<compile_context>
chip_gen: v7x
topology: tpu7x:2x2x1
jax: 0.10.0
libtpu: 0.0.40
codegen_flags: <defaults>
</compile_context>

<pallas_src>
import jax
import jax.numpy as jnp
import numpy as np
from jax.experimental import pallas as pl
from jax.experimental.pallas import tpu as pltpu

C1P = 32      # conv1 out channels 20 -> 32 (lane group)
C2P = 64      # conv2 out channels 50 -> 64
F1P = 512     # fc1 out features  500 -> 512
F2P = 128     # fc2 out features   10 -> 128
NEG = -1e30   # fc2 bias padding so padded logits vanish in log_softmax


# ------------------------------ fused kernel --------------------------------

def _fused_net_kernel(xe_ref, xo_ref, w1_ref, b1_ref, s1w_ref, w2_ref, b2_ref,
                      s2h_ref, s2w_ref, w3_ref, b3_ref, w4_ref, b4_ref, o_ref):
    f32, bf16 = jnp.float32, jnp.bfloat16
    B = xe_ref.shape[0]
    xe = xe_ref[...]                       # (B, 18, 28) even image rows (f32)
    xo = xo_ref[...]                       # (B, 18, 28) odd  image rows

    def win(x, lo):                        # 16 consecutive plane rows, merged
        return x[:, lo:lo + 16, :].reshape(B * 16, 28)

    e0, e1, e2 = win(xe, 0), win(xe, 1), win(xe, 2)
    o0, o1, o2 = win(xo, 0), win(xo, 1), win(xo, 2)
    taps_even = (e0, o0, e1, o1, e2)       # conv1 rows 2*i2 + kh, kh = 0..4
    taps_odd = (o0, e1, o1, e2, o2)        # conv1 rows 2*i2+1 + kh

    # ---- conv1 (band matmuls) fused with the H half of max_pool1 -----------
    w1 = w1_ref[...]                                        # (5, 28, 768) f32
    ce = jnp.dot(taps_even[0], w1[0], preferred_element_type=f32)
    co = jnp.dot(taps_odd[0], w1[0], preferred_element_type=f32)
    for kh in range(1, 5):
        ce = ce + jnp.dot(taps_even[kh], w1[kh], preferred_element_type=f32)
        co = co + jnp.dot(taps_odd[kh], w1[kh], preferred_element_type=f32)
    # max(relu(a+b1), relu(c+b1)) == relu(max(a,c)+b1)
    h1 = jnp.maximum(jnp.maximum(ce, co) + b1_ref[...], 0.0)   # (16B, 768)

    # ---- max_pool1, W half: lane-pair max via constant 0/1 selections ------
    h1b = h1.astype(bf16)
    p1 = jnp.maximum(
        jnp.dot(h1b, s1w_ref[0], preferred_element_type=f32),
        jnp.dot(h1b, s1w_ref[1], preferred_element_type=f32),
    ).astype(bf16)                          # (16B, 384), rows (b, i2), i2<=11 valid

    # ---- conv2: single K = 5*384 = 1920 contraction -------------------------
    p1 = p1.reshape(B, 16, 384)
    lhs2 = jnp.concatenate(
        [p1[:, kh:kh + 8, :].reshape(B * 8, 384) for kh in range(5)], axis=-1)
    y2 = jnp.dot(lhs2, w2_ref[...], preferred_element_type=f32) + b2_ref[...]
    y2 = jnp.maximum(y2, 0.0)               # (8B, 512), rows (b, io)

    # ---- max_pool2, H half (constant block selection; reorders rows to (i2,b))
    h2 = jnp.maximum(
        jnp.dot(s2h_ref[0], y2, preferred_element_type=f32),
        jnp.dot(s2h_ref[1], y2, preferred_element_type=f32))    # (4B, 512)
    # ---- max_pool2, W half ---------------------------------------------------
    h2b = h2.astype(bf16)
    p2 = jnp.maximum(
        jnp.dot(h2b, s2w_ref[0], preferred_element_type=f32),
        jnp.dot(h2b, s2w_ref[1], preferred_element_type=f32),
    ).astype(bf16)                          # (4B, 256), rows (i2, b)

    # ---- flatten: four lane-aligned row blocks -> (B, 1024) ------------------
    flat = jnp.concatenate([p2[i * B:(i + 1) * B, :] for i in range(4)], axis=-1)

    # ---- fc1 + ReLU ----------------------------------------------------------
    h3 = jnp.dot(flat, w3_ref[...], preferred_element_type=f32) + b3_ref[...]
    h3 = jnp.maximum(h3, 0.0)               # (B, 512) f32

    # ---- fc2 + log_softmax (padded logits carry -1e30 bias -> exp ~ 0) ------
    logits = jnp.dot(h3.astype(bf16), w4_ref[...],
                     preferred_element_type=f32) + b4_ref[...]   # (B, 128)
    m = jnp.max(logits, axis=-1, keepdims=True)
    s = logits - m
    lse = jnp.log(jnp.sum(jnp.exp(s), axis=-1, keepdims=True))
    o_ref[...] = s - lse


# ------------------------------- parameters ---------------------------------

def init_params(key):
    """Deterministic synthetic parameters in PyTorch layouts."""
    ks = jax.random.split(key, 8)

    def rn(k, shape, scale):
        return (scale * jax.random.normal(k, shape)).astype(jnp.float32)

    return {
        "conv1_w": rn(ks[0], (20, 1, 5, 5), 0.1),     # (cout, cin, kh, kw)
        "conv1_b": rn(ks[1], (20,), 0.1),
        "conv2_w": rn(ks[2], (50, 20, 5, 5), 0.05),
        "conv2_b": rn(ks[3], (50,), 0.05),
        "fc1_w": rn(ks[4], (500, 800), 0.03),         # (out, in), in = c*16+i*4+j
        "fc1_b": rn(ks[5], (500,), 0.03),
        "fc2_w": rn(ks[6], (10, 500), 0.05),
        "fc2_b": rn(ks[7], (10,), 0.05),
    }


def pack_params(p, block=8):
    """Pad / permute params into the lane-aligned layouts the kernel expects."""
    assert block % 8 == 0, "block size must be a multiple of 8"
    B = block
    f32 = np.float32
    w1 = np.asarray(p["conv1_w"], f32).transpose(2, 3, 0, 1)[:, :, :, 0]  # (kh,kw,co)
    w2 = np.asarray(p["conv2_w"], f32).transpose(2, 3, 1, 0)              # (kh,kw,ci,co)
    w3t = np.asarray(p["fc1_w"], f32).T                                   # (800, 500)
    w4t = np.asarray(p["fc2_w"], f32).T                                   # (500, 10)
    b1 = np.asarray(p["conv1_b"], f32)
    b2 = np.asarray(p["conv2_b"], f32)
    b3 = np.asarray(p["fc1_b"], f32)
    b4 = np.asarray(p["fc2_b"], f32)

    # conv1 band: row (kh, w'), col (j, c); value = w1[kh, w'-j, c] if valid
    w1band = np.zeros((5, 28, 24, C1P), f32)
    for kw in range(5):
        for j in range(24):
            w1band[:, j + kw, j, :20] = w1[:, kw, :]
    w1band = w1band.reshape(5, 28, 24 * C1P)
    b1big = np.tile(np.pad(b1, (0, C1P - 20)), 24).reshape(1, 24 * C1P)

    # pool1 W-pair selection: (768 -> 384) even / odd columns
    s1w = np.zeros((2, 24 * C1P, 12 * C1P), f32)
    for jp in range(12):
        for c in range(C1P):
            s1w[0, (2 * jp) * C1P + c, jp * C1P + c] = 1.0
            s1w[1, (2 * jp + 1) * C1P + c, jp * C1P + c] = 1.0

    # conv2 band: row (kh, j_in, c) -> 1920, col (j_out, d) -> 512
    w2band = np.zeros((5, 12, C1P, 8, C2P), f32)
    for kw in range(5):
        for jo in range(8):
            w2band[:, jo + kw, :20, jo, :50] = w2[:, kw, :, :]
    w2band = w2band.reshape(5 * 12 * C1P, 8 * C2P)
    b2big = np.tile(np.pad(b2, (0, C2P - 50)), 8).reshape(1, 8 * C2P)

    # pool2 H selection (+ reorder rows (b,io) -> (i2,b))
    s2h = np.zeros((2, 4 * B, 8 * B), f32)
    for i2 in range(4):
        for b in range(B):
            s2h[0, i2 * B + b, b * 8 + 2 * i2] = 1.0
            s2h[1, i2 * B + b, b * 8 + 2 * i2 + 1] = 1.0

    # pool2 W selection: (512 -> 256)
    s2w = np.zeros((2, 8 * C2P, 4 * C2P), f32)
    for jp in range(4):
        for d in range(C2P):
            s2w[0, (2 * jp) * C2P + d, jp * C2P + d] = 1.0
            s2w[1, (2 * jp + 1) * C2P + d, jp * C2P + d] = 1.0

    # fc1: kernel flatten order is (i, j, c); torch order is (c, i, j)
    w3p = np.zeros((4, 4, C2P, F1P), f32)
    w3p[:, :, :50, :500] = w3t.reshape(50, 4, 4, 500).transpose(1, 2, 0, 3)
    w3p = w3p.reshape(16 * C2P, F1P)
    b3big = np.zeros((1, F1P), f32)
    b3big[0, :500] = b3
    w4p = np.zeros((F1P, F2P), f32)
    w4p[:500, :10] = w4t
    b4big = np.full((1, F2P), NEG, f32)
    b4big[0, :10] = b4

    asf = lambda a: jnp.asarray(a, jnp.float32)
    asb = lambda a: jnp.asarray(a, jnp.bfloat16)
    return (asf(w1band), asf(b1big), asb(s1w), asb(w2band), asf(b2big),
            asf(s2h), asb(s2w), asb(w3p), asf(b3big), asb(w4p), asf(b4big))


# --------------------------------- forward ----------------------------------

def net_forward(x_nchw, packed):
    """Forward pass matching Net.forward.  x_nchw: (N, 1, 28, 28) float32."""
    (w1band, b1big, s1w, w2band, b2big, s2h, s2w, w3p, b3big, w4p, b4big) = packed
    blk = s2h.shape[1] // 4                 # images per grid step
    n = x_nchw.shape[0]
    nb = ((n + blk - 1) // blk) * blk
    x = x_nchw.reshape(n, 28, 28).astype(jnp.float32)
    if nb != n:
        x = jnp.pad(x, ((0, nb - n), (0, 0), (0, 0)))
    xp = jnp.pad(x, ((0, 0), (0, 8), (0, 0)))          # H: 28 -> 36 (zeros)
    xe, xo = xp[:, 0::2, :], xp[:, 1::2, :]            # (nb, 18, 28) parity planes

    def const_spec(a):
        nd = a.ndim
        return pl.BlockSpec(a.shape, lambda i, _nd=nd: (0,) * _nd)

    out = pl.pallas_call(
        _fused_net_kernel,
        out_shape=jax.ShapeDtypeStruct((nb, F2P), jnp.float32),
        grid=(nb // blk,),
        in_specs=[
            pl.BlockSpec((blk, 18, 28), lambda i: (i, 0, 0)),   # even rows
            pl.BlockSpec((blk, 18, 28), lambda i: (i, 0, 0)),   # odd rows
            const_spec(w1band), const_spec(b1big), const_spec(s1w),
            const_spec(w2band), const_spec(b2big), const_spec(s2h),
            const_spec(s2w), const_spec(w3p), const_spec(b3big),
            const_spec(w4p), const_spec(b4big),
        ],
        out_specs=pl.BlockSpec((blk, F2P), lambda i: (i, 0)),
        compiler_params=pltpu.CompilerParams(
            dimension_semantics=("parallel",),
            vmem_limit_bytes=40 * 1024 * 1024,
        ),
    )(xe, xo, w1band, b1big, s1w, w2band, b2big, s2h, s2w, w3p, b3big, w4p, b4big)

    return out[:n, :10]


# --------------------------- pure-JAX reference ------------------------------

def net_reference(x_nchw, p):
    dn = ("NCHW", "OIHW", "NCHW")
    y = jax.lax.conv_general_dilated(x_nchw, p["conv1_w"], (1, 1), "VALID",
                                     dimension_numbers=dn)
    y = jax.nn.relu(y + p["conv1_b"][None, :, None, None])
    y = jax.lax.reduce_window(y, -jnp.inf, jax.lax.max,
                              (1, 1, 2, 2), (1, 1, 2, 2), "VALID")
    y = jax.lax.conv_general_dilated(y, p["conv2_w"], (1, 1), "VALID",
                                     dimension_numbers=dn)
    y = jax.nn.relu(y + p["conv2_b"][None, :, None, None])
    y = jax.lax.reduce_window(y, -jnp.inf, jax.lax.max,
                              (1, 1, 2, 2), (1, 1, 2, 2), "VALID")
    y = y.reshape(y.shape[0], -1)
    y = jax.nn.relu(y @ p["fc1_w"].T + p["fc1_b"])
    y = y @ p["fc2_w"].T + p["fc2_b"]
    return jax.nn.log_softmax(y, axis=-1)


# ----------------------------------- main ------------------------------------

if __name__ == "__main__":
    key = jax.random.PRNGKey(0)
    k_x, k_p = jax.random.split(key)

    # 28x28 input is required by fc1 (4*4*50 features after two conv+pool stages).
    x = jax.random.normal(k_x, (16, 1, 28, 28), dtype=jnp.float32)
    params = init_params(k_p)
    packed = pack_params(params, block=8)       # 8 images per grid step -> 2 steps

    out = jax.block_until_ready(jax.jit(net_forward)(x, packed))

    assert out.shape == (16, 10) and out.dtype == jnp.float32
    assert bool(jnp.all(jnp.isfinite(out)))
    # log_softmax rows exponentiate-and-sum to ~1
    assert jnp.allclose(jnp.sum(jnp.exp(out), axis=1), 1.0, atol=1e-3)
    # compare against a pure-JAX f32 reference (bf16 MXU operands -> small tol)
    ref = net_reference(x, params)
    assert jnp.allclose(out, ref, atol=5e-2), float(jnp.max(jnp.abs(out - ref)))
    print("KERNEL_OK")
</pallas_src>

<mosaic_0001>
module attributes {stable_mosaic.version = 11 : i64} {
  func.func @_fused_net_kernel(%arg0: i32, %arg1: memref<8x18x28xf32, #tpu.memory_space<vmem>>, %arg2: memref<8x18x28xf32, #tpu.memory_space<vmem>>, %arg3: memref<5x28x768xf32, #tpu.memory_space<vmem>>, %arg4: memref<1x768xf32, #tpu.memory_space<vmem>>, %arg5: memref<2x768x384xbf16, #tpu.memory_space<vmem>>, %arg6: memref<1920x512xbf16, #tpu.memory_space<vmem>>, %arg7: memref<1x512xf32, #tpu.memory_space<vmem>>, %arg8: memref<2x32x64xf32, #tpu.memory_space<vmem>>, %arg9: memref<2x512x256xbf16, #tpu.memory_space<vmem>>, %arg10: memref<1024x512xbf16, #tpu.memory_space<vmem>>, %arg11: memref<1x512xf32, #tpu.memory_space<vmem>>, %arg12: memref<512x128xbf16, #tpu.memory_space<vmem>>, %arg13: memref<1x128xf32, #tpu.memory_space<vmem>>, %arg14: memref<8x128xf32, #tpu.memory_space<vmem>>) attributes {dimension_semantics = [#tpu.dimension_semantics<parallel>], iteration_bounds = array<i64: 2>, scalar_prefetch = 0 : i64, scratch_operands = 0 : i64, tpu.core_type = #tpu.core_type<tc>, window_params = [{transform_indices = @transform_0, window_bounds = array<i64: 8, 18, 28>}, {transform_indices = @transform_1, window_bounds = array<i64: 8, 18, 28>}, {pipeline_mode = #tpu.pipeline_mode<synchronous>, transform_indices = @transform_2, window_bounds = array<i64: 5, 28, 768>}, {pipeline_mode = #tpu.pipeline_mode<synchronous>, transform_indices = @transform_3, window_bounds = array<i64: 1, 768>}, {pipeline_mode = #tpu.pipeline_mode<synchronous>, transform_indices = @transform_4, window_bounds = array<i64: 2, 768, 384>}, {pipeline_mode = #tpu.pipeline_mode<synchronous>, transform_indices = @transform_5, window_bounds = array<i64: 1920, 512>}, {pipeline_mode = #tpu.pipeline_mode<synchronous>, transform_indices = @transform_6, window_bounds = array<i64: 1, 512>}, {pipeline_mode = #tpu.pipeline_mode<synchronous>, transform_indices = @transform_7, window_bounds = array<i64: 2, 32, 64>}, {pipeline_mode = #tpu.pipeline_mode<synchronous>, transform_indices = @transform_8, window_bounds = array<i64: 2, 512, 256>}, {pipeline_mode = #tpu.pipeline_mode<synchronous>, transform_indices = @transform_9, window_bounds = array<i64: 1024, 512>}, {pipeline_mode = #tpu.pipeline_mode<synchronous>, transform_indices = @transform_10, window_bounds = array<i64: 1, 512>}, {pipeline_mode = #tpu.pipeline_mode<synchronous>, transform_indices = @transform_11, window_bounds = array<i64: 512, 128>}, {pipeline_mode = #tpu.pipeline_mode<synchronous>, transform_indices = @transform_12, window_bounds = array<i64: 1, 128>}, {transform_indices = @transform_13, window_bounds = array<i64: 8, 128>}]} {
    %c0 = arith.constant 0 : index
    %c0_0 = arith.constant 0 : index
    %c0_1 = arith.constant 0 : index
    %0 = vector.load %arg1[%c0, %c0_0, %c0_1] : memref<8x18x28xf32, #tpu.memory_space<vmem>>, vector<8x18x28xf32>
    %c0_2 = arith.constant 0 : index
    %c0_3 = arith.constant 0 : index
    %c0_4 = arith.constant 0 : index
    %1 = vector.load %arg2[%c0_2, %c0_3, %c0_4] : memref<8x18x28xf32, #tpu.memory_space<vmem>>, vector<8x18x28xf32>
    %2 = vector.extract_strided_slice %0 {offsets = [0, 0, 0], sizes = [8, 16, 28], strides = [1, 1, 1]} : vector<8x18x28xf32> to vector<8x16x28xf32>
    %3 = vector.shape_cast %2 : vector<8x16x28xf32> to vector<128x28xf32>
    %4 = vector.extract_strided_slice %0 {offsets = [0, 1, 0], sizes = [8, 16, 28], strides = [1, 1, 1]} : vector<8x18x28xf32> to vector<8x16x28xf32>
    %5 = vector.shape_cast %4 : vector<8x16x28xf32> to vector<128x28xf32>
    %6 = vector.extract_strided_slice %0 {offsets = [0, 2, 0], sizes = [8, 16, 28], strides = [1, 1, 1]} : vector<8x18x28xf32> to vector<8x16x28xf32>
    %7 = vector.shape_cast %6 : vector<8x16x28xf32> to vector<128x28xf32>
    %8 = vector.extract_strided_slice %1 {offsets = [0, 0, 0], sizes = [8, 16, 28], strides = [1, 1, 1]} : vector<8x18x28xf32> to vector<8x16x28xf32>
    %9 = vector.shape_cast %8 : vector<8x16x28xf32> to vector<128x28xf32>
    %10 = vector.extract_strided_slice %1 {offsets = [0, 1, 0], sizes = [8, 16, 28], strides = [1, 1, 1]} : vector<8x18x28xf32> to vector<8x16x28xf32>
    %11 = vector.shape_cast %10 : vector<8x16x28xf32> to vector<128x28xf32>
    %12 = vector.extract_strided_slice %1 {offsets = [0, 2, 0], sizes = [8, 16, 28], strides = [1, 1, 1]} : vector<8x18x28xf32> to vector<8x16x28xf32>
    %13 = vector.shape_cast %12 : vector<8x16x28xf32> to vector<128x28xf32>
    %c0_5 = arith.constant 0 : index
    %c0_6 = arith.constant 0 : index
    %c0_7 = arith.constant 0 : index
    %14 = vector.load %arg3[%c0_5, %c0_6, %c0_7] : memref<5x28x768xf32, #tpu.memory_space<vmem>>, vector<5x28x768xf32>
    %15 = vector.extract_strided_slice %14 {offsets = [0, 0, 0], sizes = [1, 28, 768], strides = [1, 1, 1]} : vector<5x28x768xf32> to vector<1x28x768xf32>
    %16 = vector.shape_cast %15 : vector<1x28x768xf32> to vector<28x768xf32>
    %cst = arith.constant dense<0.000000e+00> : vector<128x768xf32>
    %17 = tpu.matmul %3, %16, %cst {dimension_numbers = #tpu.dot_dimension_numbers<[1], [0], [0], [1], [0, 0, 1, 1], [], []>} : vector<128x28xf32>, vector<28x768xf32>, vector<128x768xf32> -> vector<128x768xf32>
    %18 = vector.extract_strided_slice %14 {offsets = [0, 0, 0], sizes = [1, 28, 768], strides = [1, 1, 1]} : vector<5x28x768xf32> to vector<1x28x768xf32>
    %19 = vector.shape_cast %18 : vector<1x28x768xf32> to vector<28x768xf32>
    %cst_8 = arith.constant dense<0.000000e+00> : vector<128x768xf32>
    %20 = tpu.matmul %9, %19, %cst_8 {dimension_numbers = #tpu.dot_dimension_numbers<[1], [0], [0], [1], [0, 0, 1, 1], [], []>} : vector<128x28xf32>, vector<28x768xf32>, vector<128x768xf32> -> vector<128x768xf32>
    %21 = vector.extract_strided_slice %14 {offsets = [1, 0, 0], sizes = [1, 28, 768], strides = [1, 1, 1]} : vector<5x28x768xf32> to vector<1x28x768xf32>
    %22 = vector.shape_cast %21 : vector<1x28x768xf32> to vector<28x768xf32>
    %cst_9 = arith.constant dense<0.000000e+00> : vector<128x768xf32>
    %23 = tpu.matmul %9, %22, %cst_9 {dimension_numbers = #tpu.dot_dimension_numbers<[1], [0], [0], [1], [0, 0, 1, 1], [], []>} : vector<128x28xf32>, vector<28x768xf32>, vector<128x768xf32> -> vector<128x768xf32>
    %24 = arith.addf %17, %23 : vector<128x768xf32>
    %25 = vector.extract_strided_slice %14 {offsets = [1, 0, 0], sizes = [1, 28, 768], strides = [1, 1, 1]} : vector<5x28x768xf32> to vector<1x28x768xf32>
    %26 = vector.shape_cast %25 : vector<1x28x768xf32> to vector<28x768xf32>
    %cst_10 = arith.constant dense<0.000000e+00> : vector<128x768xf32>
    %27 = tpu.matmul %5, %26, %cst_10 {dimension_numbers = #tpu.dot_dimension_numbers<[1], [0], [0], [1], [0, 0, 1, 1], [], []>} : vector<128x28xf32>, vector<28x768xf32>, vector<128x768xf32> -> vector<128x768xf32>
    %28 = arith.addf %20, %27 : vector<128x768xf32>
    %29 = vector.extract_strided_slice %14 {offsets = [2, 0, 0], sizes = [1, 28, 768], strides = [1, 1, 1]} : vector<5x28x768xf32> to vector<1x28x768xf32>
    %30 = vector.shape_cast %29 : vector<1x28x768xf32> to vector<28x768xf32>
    %cst_11 = arith.constant dense<0.000000e+00> : vector<128x768xf32>
    %31 = tpu.matmul %5, %30, %cst_11 {dimension_numbers = #tpu.dot_dimension_numbers<[1], [0], [0], [1], [0, 0, 1, 1], [], []>} : vector<128x28xf32>, vector<28x768xf32>, vector<128x768xf32> -> vector<128x768xf32>
    %32 = arith.addf %24, %31 : vector<128x768xf32>
    %33 = vector.extract_strided_slice %14 {offsets = [2, 0, 0], sizes = [1, 28, 768], strides = [1, 1, 1]} : vector<5x28x768xf32> to vector<1x28x768xf32>
    %34 = vector.shape_cast %33 : vector<1x28x768xf32> to vector<28x768xf32>
    %cst_12 = arith.constant dense<0.000000e+00> : vector<128x768xf32>
    %35 = tpu.matmul %11, %34, %cst_12 {dimension_numbers = #tpu.dot_dimension_numbers<[1], [0], [0], [1], [0, 0, 1, 1], [], []>} : vector<128x28xf32>, vector<28x768xf32>, vector<128x768xf32> -> vector<128x768xf32>
    %36 = arith.addf %28, %35 : vector<128x768xf32>
    %37 = vector.extract_strided_slice %14 {offsets = [3, 0, 0], sizes = [1, 28, 768], strides = [1, 1, 1]} : vector<5x28x768xf32> to vector<1x28x768xf32>
    %38 = vector.shape_cast %37 : vector<1x28x768xf32> to vector<28x768xf32>
    %cst_13 = arith.constant dense<0.000000e+00> : vector<128x768xf32>
    %39 = tpu.matmul %11, %38, %cst_13 {dimension_numbers = #tpu.dot_dimension_numbers<[1], [0], [0], [1], [0, 0, 1, 1], [], []>} : vector<128x28xf32>, vector<28x768xf32>, vector<128x768xf32> -> vector<128x768xf32>
    %40 = arith.addf %32, %39 : vector<128x768xf32>
    %41 = vector.extract_strided_slice %14 {offsets = [3, 0, 0], sizes = [1, 28, 768], strides = [1, 1, 1]} : vector<5x28x768xf32> to vector<1x28x768xf32>
    %42 = vector.shape_cast %41 : vector<1x28x768xf32> to vector<28x768xf32>
    %cst_14 = arith.constant dense<0.000000e+00> : vector<128x768xf32>
    %43 = tpu.matmul %7, %42, %cst_14 {dimension_numbers = #tpu.dot_dimension_numbers<[1], [0], [0], [1], [0, 0, 1, 1], [], []>} : vector<128x28xf32>, vector<28x768xf32>, vector<128x768xf32> -> vector<128x768xf32>
    %44 = arith.addf %36, %43 : vector<128x768xf32>
    %45 = vector.extract_strided_slice %14 {offsets = [4, 0, 0], sizes = [1, 28, 768], strides = [1, 1, 1]} : vector<5x28x768xf32> to vector<1x28x768xf32>
    %46 = vector.shape_cast %45 : vector<1x28x768xf32> to vector<28x768xf32>
    %cst_15 = arith.constant dense<0.000000e+00> : vector<128x768xf32>
    %47 = tpu.matmul %7, %46, %cst_15 {dimension_numbers = #tpu.dot_dimension_numbers<[1], [0], [0], [1], [0, 0, 1, 1], [], []>} : vector<128x28xf32>, vector<28x768xf32>, vector<128x768xf32> -> vector<128x768xf32>
    %48 = arith.addf %40, %47 : vector<128x768xf32>
    %49 = vector.extract_strided_slice %14 {offsets = [4, 0, 0], sizes = [1, 28, 768], strides = [1, 1, 1]} : vector<5x28x768xf32> to vector<1x28x768xf32>
    %50 = vector.shape_cast %49 : vector<1x28x768xf32> to vector<28x768xf32>
    %cst_16 = arith.constant dense<0.000000e+00> : vector<128x768xf32>
    %51 = tpu.matmul %13, %50, %cst_16 {dimension_numbers = #tpu.dot_dimension_numbers<[1], [0], [0], [1], [0, 0, 1, 1], [], []>} : vector<128x28xf32>, vector<28x768xf32>, vector<128x768xf32> -> vector<128x768xf32>
    %52 = arith.addf %44, %51 : vector<128x768xf32>
    %53 = arith.maximumf %48, %52 : vector<128x768xf32>
    %c0_17 = arith.constant 0 : index
    %c0_18 = arith.constant 0 : index
    %54 = vector.load %arg4[%c0_17, %c0_18] : memref<1x768xf32, #tpu.memory_space<vmem>>, vector<1x768xf32>
    %55 = vector.broadcast %54 : vector<1x768xf32> to vector<128x768xf32>
    %56 = arith.addf %53, %55 : vector<128x768xf32>
    %cst_19 = arith.constant 0.000000e+00 : f32
    %57 = vector.broadcast %cst_19 : f32 to vector<128x768xf32>
    %58 = arith.maximumf %56, %57 : vector<128x768xf32>
    %59 = arith.truncf %58 : vector<128x768xf32> to vector<128x768xbf16>
    %c0_20 = arith.constant 0 : index
    %c0_21 = arith.constant 0 : index
    %c0_22 = arith.constant 0 : index
    %60 = vector.load %arg5[%c0_20, %c0_21, %c0_22] : memref<2x768x384xbf16, #tpu.memory_space<vmem>>, vector<1x768x384xbf16>
    %61 = vector.shape_cast %60 : vector<1x768x384xbf16> to vector<768x384xbf16>
    %cst_23 = arith.constant dense<0.000000e+00> : vector<128x384xf32>
    %62 = tpu.matmul %59, %61, %cst_23 {dimension_numbers = #tpu.dot_dimension_numbers<[1], [0], [0], [1], [0, 0, 1, 1], [], []>} : vector<128x768xbf16>, vector<768x384xbf16>, vector<128x384xf32> -> vector<128x384xf32>
    %c1 = arith.constant 1 : index
    %c0_24 = arith.constant 0 : index
    %c0_25 = arith.constant 0 : index
    %63 = vector.load %arg5[%c1, %c0_24, %c0_25] : memref<2x768x384xbf16, #tpu.memory_space<vmem>>, vector<1x768x384xbf16>
    %64 = vector.shape_cast %63 : vector<1x768x384xbf16> to vector<768x384xbf16>
    %cst_26 = arith.constant dense<0.000000e+00> : vector<128x384xf32>
    %65 = tpu.matmul %59, %64, %cst_26 {dimension_numbers = #tpu.dot_dimension_numbers<[1], [0], [0], [1], [0, 0, 1, 1], [], []>} : vector<128x768xbf16>, vector<768x384xbf16>, vector<128x384xf32> -> vector<128x384xf32>
    %66 = arith.maximumf %62, %65 : vector<128x384xf32>
    %67 = arith.truncf %66 : vector<128x384xf32> to vector<128x384xbf16>
    %68 = vector.shape_cast %67 : vector<128x384xbf16> to vector<8x16x384xbf16>
    %69 = vector.extract_strided_slice %68 {offsets = [0, 0, 0], sizes = [8, 8, 384], strides = [1, 1, 1]} : vector<8x16x384xbf16> to vector<8x8x384xbf16>
    %70 = vector.shape_cast %69 : vector<8x8x384xbf16> to vector<64x384xbf16>
    %71 = vector.extract_strided_slice %68 {offsets = [0, 1, 0], sizes = [8, 8, 384], strides = [1, 1, 1]} : vector<8x16x384xbf16> to vector<8x8x384xbf16>
    %72 = vector.shape_cast %71 : vector<8x8x384xbf16> to vector<64x384xbf16>
    %73 = vector.extract_strided_slice %68 {offsets = [0, 2, 0], sizes = [8, 8, 384], strides = [1, 1, 1]} : vector<8x16x384xbf16> to vector<8x8x384xbf16>
    %74 = vector.shape_cast %73 : vector<8x8x384xbf16> to vector<64x384xbf16>
    %75 = vector.extract_strided_slice %68 {offsets = [0, 3, 0], sizes = [8, 8, 384], strides = [1, 1, 1]} : vector<8x16x384xbf16> to vector<8x8x384xbf16>
    %76 = vector.shape_cast %75 : vector<8x8x384xbf16> to vector<64x384xbf16>
    %77 = vector.extract_strided_slice %68 {offsets = [0, 4, 0], sizes = [8, 8, 384], strides = [1, 1, 1]} : vector<8x16x384xbf16> to vector<8x8x384xbf16>
    %78 = vector.shape_cast %77 : vector<8x8x384xbf16> to vector<64x384xbf16>
    %79 = tpu.concatenate %70, %72, %74, %76, %78 in 1 : vector<64x384xbf16>, vector<64x384xbf16>, vector<64x384xbf16>, vector<64x384xbf16>, vector<64x384xbf16> -> vector<64x1920xbf16>
    %c0_27 = arith.constant 0 : index
    %c0_28 = arith.constant 0 : index
    %80 = vector.load %arg6[%c0_27, %c0_28] : memref<1920x512xbf16, #tpu.memory_space<vmem>>, vector<1920x512xbf16>
    %cst_29 = arith.constant dense<0.000000e+00> : vector<64x512xf32>
    %81 = tpu.matmul %79, %80, %cst_29 {dimension_numbers = #tpu.dot_dimension_numbers<[1], [0], [0], [1], [0, 0, 1, 1], [], []>} : vector<64x1920xbf16>, vector<1920x512xbf16>, vector<64x512xf32> -> vector<64x512xf32>
    %c0_30 = arith.constant 0 : index
    %c0_31 = arith.constant 0 : index
    %82 = vector.load %arg7[%c0_30, %c0_31] : memref<1x512xf32, #tpu.memory_space<vmem>>, vector<1x512xf32>
    %83 = vector.broadcast %82 : vector<1x512xf32> to vector<64x512xf32>
    %84 = arith.addf %81, %83 : vector<64x512xf32>
    %cst_32 = arith.constant 0.000000e+00 : f32
    %85 = vector.broadcast %cst_32 : f32 to vector<64x512xf32>
    %86 = arith.maximumf %84, %85 : vector<64x512xf32>
    %c0_33 = arith.constant 0 : index
    %c0_34 = arith.constant 0 : index
    %c0_35 = arith.constant 0 : index
    %87 = vector.load %arg8[%c0_33, %c0_34, %c0_35] : memref<2x32x64xf32, #tpu.memory_space<vmem>>, vector<1x32x64xf32>
    %88 = vector.shape_cast %87 : vector<1x32x64xf32> to vector<32x64xf32>
    %cst_36 = arith.constant dense<0.000000e+00> : vector<32x512xf32>
    %89 = tpu.matmul %88, %86, %cst_36 {dimension_numbers = #tpu.dot_dimension_numbers<[1], [0], [0], [1], [0, 0, 1, 1], [], []>} : vector<32x64xf32>, vector<64x512xf32>, vector<32x512xf32> -> vector<32x512xf32>
    %c1_37 = arith.constant 1 : index
    %c0_38 = arith.constant 0 : index
    %c0_39 = arith.constant 0 : index
    %90 = vector.load %arg8[%c1_37, %c0_38, %c0_39] : memref<2x32x64xf32, #tpu.memory_space<vmem>>, vector<1x32x64xf32>
    %91 = vector.shape_cast %90 : vector<1x32x64xf32> to vector<32x64xf32>
    %cst_40 = arith.constant dense<0.000000e+00> : vector<32x512xf32>
    %92 = tpu.matmul %91, %86, %cst_40 {dimension_numbers = #tpu.dot_dimension_numbers<[1], [0], [0], [1], [0, 0, 1, 1], [], []>} : vector<32x64xf32>, vector<64x512xf32>, vector<32x512xf32> -> vector<32x512xf32>
    %93 = arith.maximumf %89, %92 : vector<32x512xf32>
    %94 = arith.truncf %93 : vector<32x512xf32> to vector<32x512xbf16>
    %c0_41 = arith.constant 0 : index
    %c0_42 = arith.constant 0 : index
    %c0_43 = arith.constant 0 : index
    %95 = vector.load %arg9[%c0_41, %c0_42, %c0_43] : memref<2x512x256xbf16, #tpu.memory_space<vmem>>, vector<1x512x256xbf16>
    %96 = vector.shape_cast %95 : vector<1x512x256xbf16> to vector<512x256xbf16>
    %cst_44 = arith.constant dense<0.000000e+00> : vector<32x256xf32>
    %97 = tpu.matmul %94, %96, %cst_44 {dimension_numbers = #tpu.dot_dimension_numbers<[1], [0], [0], [1], [0, 0, 1, 1], [], []>} : vector<32x512xbf16>, vector<512x256xbf16>, vector<32x256xf32> -> vector<32x256xf32>
    %c1_45 = arith.constant 1 : index
    %c0_46 = arith.constant 0 : index
    %c0_47 = arith.constant 0 : index
    %98 = vector.load %arg9[%c1_45, %c0_46, %c0_47] : memref<2x512x256xbf16, #tpu.memory_space<vmem>>, vector<1x512x256xbf16>
    %99 = vector.shape_cast %98 : vector<1x512x256xbf16> to vector<512x256xbf16>
    %cst_48 = arith.constant dense<0.000000e+00> : vector<32x256xf32>
    %100 = tpu.matmul %94, %99, %cst_48 {dimension_numbers = #tpu.dot_dimension_numbers<[1], [0], [0], [1], [0, 0, 1, 1], [], []>} : vector<32x512xbf16>, vector<512x256xbf16>, vector<32x256xf32> -> vector<32x256xf32>
    %101 = arith.maximumf %97, %100 : vector<32x256xf32>
    %102 = arith.truncf %101 : vector<32x256xf32> to vector<32x256xbf16>
    %103 = vector.extract_strided_slice %102 {offsets = [0, 0], sizes = [8, 256], strides = [1, 1]} : vector<32x256xbf16> to vector<8x256xbf16>
    %104 = vector.extract_strided_slice %102 {offsets = [8, 0], sizes = [8, 256], strides = [1, 1]} : vector<32x256xbf16> to vector<8x256xbf16>
    %105 = vector.extract_strided_slice %102 {offsets = [16, 0], sizes = [8, 256], strides = [1, 1]} : vector<32x256xbf16> to vector<8x256xbf16>
    %106 = vector.extract_strided_slice %102 {offsets = [24, 0], sizes = [8, 256], strides = [1, 1]} : vector<32x256xbf16> to vector<8x256xbf16>
    %107 = tpu.concatenate %103, %104, %105, %106 in 1 : vector<8x256xbf16>, vector<8x256xbf16>, vector<8x256xbf16>, vector<8x256xbf16> -> vector<8x1024xbf16>
    %c0_49 = arith.constant 0 : index
    %c0_50 = arith.constant 0 : index
    %108 = vector.load %arg10[%c0_49, %c0_50] : memref<1024x512xbf16, #tpu.memory_space<vmem>>, vector<1024x512xbf16>
    %cst_51 = arith.constant dense<0.000000e+00> : vector<8x512xf32>
    %109 = tpu.matmul %107, %108, %cst_51 {dimension_numbers = #tpu.dot_dimension_numbers<[1], [0], [0], [1], [0, 0, 1, 1], [], []>} : vector<8x1024xbf16>, vector<1024x512xbf16>, vector<8x512xf32> -> vector<8x512xf32>
    %c0_52 = arith.constant 0 : index
    %c0_53 = arith.constant 0 : index
    %110 = vector.load %arg11[%c0_52, %c0_53] : memref<1x512xf32, #tpu.memory_space<vmem>>, vector<1x512xf32>
    %111 = vector.broadcast %110 : vector<1x512xf32> to vector<8x512xf32>
    %112 = arith.addf %109, %111 : vector<8x512xf32>
    %cst_54 = arith.constant 0.000000e+00 : f32
    %113 = vector.broadcast %cst_54 : f32 to vector<8x512xf32>
    %114 = arith.maximumf %112, %113 : vector<8x512xf32>
    %115 = arith.truncf %114 : vector<8x512xf32> to vector<8x512xbf16>
    %c0_55 = arith.constant 0 : index
    %c0_56 = arith.constant 0 : index
    %116 = vector.load %arg12[%c0_55, %c0_56] : memref<512x128xbf16, #tpu.memory_space<vmem>>, vector<512x128xbf16>
    %cst_57 = arith.constant dense<0.000000e+00> : vector<8x128xf32>
    %117 = tpu.matmul %115, %116, %cst_57 {dimension_numbers = #tpu.dot_dimension_numbers<[1], [0], [0], [1], [0, 0, 1, 1], [], []>} : vector<8x512xbf16>, vector<512x128xbf16>, vector<8x128xf32> -> vector<8x128xf32>
    %c0_58 = arith.constant 0 : index
    %c0_59 = arith.constant 0 : index
    %118 = vector.load %arg13[%c0_58, %c0_59] : memref<1x128xf32, #tpu.memory_space<vmem>>, vector<1x128xf32>
    %119 = vector.broadcast %118 : vector<1x128xf32> to vector<8x128xf32>
    %120 = arith.addf %117, %119 : vector<8x128xf32>
    %cst_60 = arith.constant dense<0xFF800000> : vector<8xf32>
    %121 = vector.multi_reduction <maximumf>, %120, %cst_60 [1] : vector<8x128xf32> to vector<8xf32>
    %122 = vector.shape_cast %121 : vector<8xf32> to vector<8x1xf32>
    %123 = vector.broadcast %122 : vector<8x1xf32> to vector<8x128xf32>
    %124 = arith.subf %120, %123 : vector<8x128xf32>
    %125 = math.exp %124 : vector<8x128xf32>
    %cst_61 = arith.constant dense<0.000000e+00> : vector<8xf32>
    %126 = vector.multi_reduction <add>, %125, %cst_61 [1] : vector<8x128xf32> to vector<8xf32>
    %127 = vector.shape_cast %126 : vector<8xf32> to vector<8x1xf32>
    %128 = math.log %127 : vector<8x1xf32>
    %129 = vector.broadcast %128 : vector<8x1xf32> to vector<8x128xf32>
    %130 = arith.subf %124, %129 : vector<8x128xf32>
    %c0_62 = arith.constant 0 : index
    %c0_63 = arith.constant 0 : index
    %131 = vector.load %arg14[%c0_62, %c0_63] : memref<8x128xf32, #tpu.memory_space<vmem>>, vector<8x128xf32>
    tpu.vector_store %arg14[%c0_62, %c0_63], %130 {strides = array<i32>} : memref<8x128xf32, #tpu.memory_space<vmem>>, vector<8x128xf32>,
    return
  }
  func.func @transform_0(%arg0: i32) -> (i32, i32, i32) {
    %c0_i32 = arith.constant 0 : i32
    %c0_i32_0 = arith.constant 0 : i32
    %c0_i32_1 = arith.constant 0 : i32
    return %arg0, %c0_i32, %c0_i32_0 : i32, i32, i32
  }
  func.func @transform_1(%arg0: i32) -> (i32, i32, i32) {
    %c0_i32 = arith.constant 0 : i32
    %c0_i32_0 = arith.constant 0 : i32
    %c0_i32_1 = arith.constant 0 : i32
    return %arg0, %c0_i32, %c0_i32_0 : i32, i32, i32
  }
  func.func @transform_2(%arg0: i32) -> (i32, i32, i32) {
    %c0_i32 = arith.constant 0 : i32
    %c0_i32_0 = arith.constant 0 : i32
    %c0_i32_1 = arith.constant 0 : i32
    %c0_i32_2 = arith.constant 0 : i32
    return %c0_i32, %c0_i32_0, %c0_i32_1 : i32, i32, i32
  }
  func.func @transform_3(%arg0: i32) -> (i32, i32) {
    %c0_i32 = arith.constant 0 : i32
    %c0_i32_0 = arith.constant 0 : i32
    %c0_i32_1 = arith.constant 0 : i32
    return %c0_i32, %c0_i32_0 : i32, i32
  }
  func.func @transform_4(%arg0: i32) -> (i32, i32, i32) {
    %c0_i32 = arith.constant 0 : i32
    %c0_i32_0 = arith.constant 0 : i32
    %c0_i32_1 = arith.constant 0 : i32
    %c0_i32_2 = arith.constant 0 : i32
    return %c0_i32, %c0_i32_0, %c0_i32_1 : i32, i32, i32
  }
  func.func @transform_5(%arg0: i32) -> (i32, i32) {
    %c0_i32 = arith.constant 0 : i32
    %c0_i32_0 = arith.constant 0 : i32
    %c0_i32_1 = arith.constant 0 : i32
    return %c0_i32, %c0_i32_0 : i32, i32
  }
  func.func @transform_6(%arg0: i32) -> (i32, i32) {
    %c0_i32 = arith.constant 0 : i32
    %c0_i32_0 = arith.constant 0 : i32
    %c0_i32_1 = arith.constant 0 : i32
    return %c0_i32, %c0_i32_0 : i32, i32
  }
  func.func @transform_7(%arg0: i32) -> (i32, i32, i32) {
    %c0_i32 = arith.constant 0 : i32
    %c0_i32_0 = arith.constant 0 : i32
    %c0_i32_1 = arith.constant 0 : i32
    %c0_i32_2 = arith.constant 0 : i32
    return %c0_i32, %c0_i32_0, %c0_i32_1 : i32, i32, i32
  }
  func.func @transform_8(%arg0: i32) -> (i32, i32, i32) {
    %c0_i32 = arith.constant 0 : i32
    %c0_i32_0 = arith.constant 0 : i32
    %c0_i32_1 = arith.constant 0 : i32
    %c0_i32_2 = arith.constant 0 : i32
    return %c0_i32, %c0_i32_0, %c0_i32_1 : i32, i32, i32
  }
  func.func @transform_9(%arg0: i32) -> (i32, i32) {
    %c0_i32 = arith.constant 0 : i32
    %c0_i32_0 = arith.constant 0 : i32
    %c0_i32_1 = arith.constant 0 : i32
    return %c0_i32, %c0_i32_0 : i32, i32
  }
  func.func @transform_10(%arg0: i32) -> (i32, i32) {
    %c0_i32 = arith.constant 0 : i32
    %c0_i32_0 = arith.constant 0 : i32
    %c0_i32_1 = arith.constant 0 : i32
    return %c0_i32, %c0_i32_0 : i32, i32
  }
  func.func @transform_11(%arg0: i32) -> (i32, i32) {
    %c0_i32 = arith.constant 0 : i32
    %c0_i32_0 = arith.constant 0 : i32
    %c0_i32_1 = arith.constant 0 : i32
    return %c0_i32, %c0_i32_0 : i32, i32
  }
  func.func @transform_12(%arg0: i32) -> (i32, i32) {
    %c0_i32 = arith.constant 0 : i32
    %c0_i32_0 = arith.constant 0 : i32
    %c0_i32_1 = arith.constant 0 : i32
    return %c0_i32, %c0_i32_0 : i32, i32
  }
  func.func @transform_13(%arg0: i32) -> (i32, i32) {
    %c0_i32 = arith.constant 0 : i32
    %c0_i32_0 = arith.constant 0 : i32
    return %arg0, %c0_i32 : i32, i32
  }
}

</mosaic_0001>

<bundles_post_ra>
// kernel: net_forward.1
= control target key start
LH: loop header
LB: loop body
LE: loop exit
PB: predicated region body
PF: predicated region fallthrough
CT: control target
= control target key end

     0   :  { %s31425_s0 = inlined_call_operand.vmem [shape: f32[16,18,28], index: 0, kind: input, shape index: {}]   ;;  %s31426_s1 = inlined_call_operand.vmem [shape: f32[16,18,28], index: 1, kind: input, shape index: {}]   ;;  %s31427_s2 = inlined_call_operand.hbm [shape: f32[5,28,768], index: 2, kind: input, shape index: {}]   ;;  %s31428_s3 = inlined_call_operand.hbm [shape: f32[1,768], index: 3, kind: input, shape index: {}]   ;;  %s31429_s4 = inlined_call_operand.vmem [shape: bf16[2,768,384], index: 4, kind: input, shape index: {}]   ;;  %s31430_s5 = inlined_call_operand.hbm [shape: bf16[1920,512], index: 5, kind: input, shape index: {}]   ;;  %s31431_s6 = inlined_call_operand.hbm [shape: f32[1,512], index: 6, kind: input, shape index: {}]   ;;  %s31432_s7 = inlined_call_operand.hbm [shape: f32[2,32,64], index: 7, kind: input, shape index: {}]   ;;  %s31433_s8 = inlined_call_operand.vmem [shape: bf16[2,512,256], index: 8, kind: input, shape index: {}]   ;;  %s31434_s9 = inlined_call_operand.hbm [shape: bf16[1024,512], index: 9, kind: input, shape index: {}]   ;;  %s31435_s10 = inlined_call_operand.hbm [shape: f32[1,512], index: 10, kind: input, shape index: {}]   ;;  %s31436_s11 = inlined_call_operand.vmem [shape: bf16[512,128], index: 11, kind: input, shape index: {}]   ;;  %s31437_s12 = inlined_call_operand.hbm [shape: f32[1,128], index: 12, kind: input, shape index: {}]   ;;  %s31438_s13 = inlined_call_operand.hbm [shape: f32[16,128], index: 13, kind: output, shape index: {}]  }
   0x1   :  { %31539 = sst [smem:[#allocation73_spill]] %s31428_s3 }
   0x2   :  { %31540 = sst [smem:[#allocation74_spill]] %s31431_s6 }
   0x3   :  { %31541 = sst [smem:[#allocation75_spill]] %s31438_s13 }
   0x4   :  { %18 = vsyncpa [#allocation3], 0 }
   0x5   :  { %19 = vsyncpa [#allocation6], 0 }
   0x6   :  { %20 = vsyncpa [#allocation9], 0 }
   0x7   :  { %21 = vsyncpa [#allocation12], 0 }
   0x8   :  { %22 = vsyncpa [#allocation15], 0 }
   0x9   :  { %23 = vsyncpa [#allocation4], 0 }
   0xa   :  { %25 = vsyncpa [#allocation4 + $0x1], 0  ;;  %s25565_s25 = smov 0   ;;  %s25567_s26 = smov 0  }
   0xb   :  { %s25569_s27 = smov 0   ;;  %s25571_s28 = smov 0  }
   0xc LB: > { %31542 = sst [smem:[#allocation23_spill]] %s25463_s25  ;;  %s25586_s29 = sadd.s32 4294967295, %s25475_s28   ;;  %s25475_s28 = sphi %s25571_s28, %s31826_s28   ;;  %s25471_s27 = sphi %s25569_s27, %s31828_s27   ;;  %s25467_s26 = sphi %s25567_s26, %s31830_s26   ;;  %s25463_s25 = sphi %s25565_s25, %s31829_s25  }
   0xd   : > { %31543 = sst [smem:[#allocation24_spill]] %s25471_s27  ;;  %s19045_s30 = sadd.s32 4294967294, %s25475_s28  }
   0xe   : > { %31544 = sst [smem:[#allocation25_spill]] %s25475_s28  ;;  %s25590_s14 = sadd.s32 1, %s25475_s28  }
   0xf   : > { %31545 = sst [smem:[#allocation26_spill]] %s25590_s14  ;;  %s321_s15 = sadd.s32 1, %s25471_s27 }
  0x10   : > { %s318_s16 = ssub.s32 %s25475_s28, %s25590_s14  ;;  %p331_p0 = scmp.ne.s32.totalorder %s25471_s27, %s25467_s26 }
  0x11   : > { %p319_p1 = scmp.eq.s32.totalorder %s318_s16, 0  ;;  %p332_p2 = scmp.eq.s32.totalorder %s25586_s29, 1 }
  0x12   : > { %p337_p3 = scmp.ne.s32.totalorder %s25467_s26, %s25463_s25  ;;  %p338_p4 = scmp.eq.s32.totalorder %s19045_s30, 1 }
  0x13   : > { %s25601_s17 = scalar_select %p319_p1, %s25471_s27, %s321_s15  }
  0x14   : > { %p25603_p5 = por %p332_p2, %p331_p0  ;;  %p25607_p6 = por %p338_p4, %p337_p3 }
  0x15   : > { %31546 = sst [smem:[#allocation27_spill]] %s25601_s17  ;;  %p19046_p7 = scmp.ge.s32.totalorder %s25475_s28, 1 }
  0x16   : > { %s31547_s18 = scalar_select %p25603_p5, 1, 0 }
  0x17   : > { %s31548_s19 = scalar_select %p25607_p6, 1, 0 }
  0x18   : > { %p345_p8 = scmp.lt.s32.totalorder %s25475_s28, 3  ;;  %p31444_p9 = scmp.eq.s32.totalorder %s25586_s29, 0 }
  0x19   : > { %31549 = sst [smem:[#allocation28_spill]] %s31548_s19  ;;  %s25477_s21 = smov [#allocation5]  }
  0x1a   : > { %p25614_p10 = pnand %p19046_p7, %p345_p8  ;;  %s371_s22 = sshll.u32 %s25477_s21, 4  ;;  %s372_s22 = int_to_ptr.vmem [resolvable:$true] %s371_s22 }
  0x1b   : > { %s25478_s23 = smov [#allocation8]   ;;  %s25479_s15 = smov [#allocation11]  }
  0x1c   : > { %s31550_s20 = scalar_select %p25614_p10, 1, 0 }
  0x1d   : > { %p23262_p11 = pneg %p25614_p10  ;;  %s398_s24 = sshll.u32 %s25478_s23, 4  ;;  %s25626_s24 = int_to_ptr.vmem [resolvable:$true] %s398_s24 }
  0x1e   : > { %s25628_s16 = sshll.u32 %s25479_s15, 4  ;;  %s31552_s3 = sld [smem:[#allocation73_spill]]  ;;  %s425_s16 = int_to_ptr.vmem [resolvable:$true] %s25628_s16 }
  0x1f   : > { %p25622_p12 = pnand %p31444_p9, %p23262_p11 }
  0x21   : > { %p25638_p0 = pneg %p25622_p12 }
  0x24   : > { %s25169_s21 = scalar_lea.hbm %s31552_s3, 96 }
  0x25   : > { %p25170_p13 = scmp.ne.s32.totalorder %s31552_s3, %s25169_s21  ;;  %p25176_p3 = scmp.lt.u32.totalorder %s25169_s21, %s31552_s3 }
  0x27   : > { %p25172_p1 = pnand %p25638_p0, %p25170_p13 }
  0x29   : > { %p25173_p2 = pneg %p25172_p1 }
  0x2b   : > { %p25178_p4 = pnand %p25176_p3, %p25173_p2 }
  0x2d   : > { %25181 = shalt.err (!%p25178_p4)
}
  0x2e   : > { %s25182_s27 = scalar_lea.vmem %s372_s22, 96  ;;  %p25190_p9 = scmp.lt.s32.totalorder %s372_s22, %s372_s22 }
  0x2f   : > { %p25183_p7 = scmp.ne.s32.totalorder %s372_s22, %s25182_s27  ;;  %p25191_p6 = scmp.lt.s32.totalorder %s25182_s27, %s25182_s27 }
  0x31   : > { %p25185_p8 = pnand %p25183_p7, %p25638_p0  ;;  %p25192_p5 = por %p25191_p6, %p25190_p9 }
  0x33   : > { %p25186_p11 = pneg %p25185_p8 }
  0x35   : > { %p25193_p10 = pnand %p25192_p5, %p25186_p11 }
  0x37   : > { %25196 = shalt.err (!%p25193_p10)
}
  0x38   : > { %23268 = dma.hbm_to_vmem [thread:$0]  (!%p25622_p12), %s31552_s3, 96, %s372_s22, [#allocation6]  }
  0x39   : > { %s31554_s6 = sld [smem:[#allocation74_spill]] }
  0x3f   : > { %s25197_s21 = scalar_lea.hbm %s31554_s6, 64 }
  0x40   : > { %p25198_p13 = scmp.ne.s32.totalorder %s31554_s6, %s25197_s21  ;;  %p25204_p5 = scmp.lt.u32.totalorder %s25197_s21, %s31554_s6 }
  0x42   : > { %p25200_p1 = pnand %p25198_p13, %p25638_p0 }
  0x44   : > { %p25201_p6 = pneg %p25200_p1 }
  0x46   : > { %p25206_p9 = pnand %p25204_p5, %p25201_p6 }
  0x48   : > { %25209 = shalt.err (!%p25206_p9)
}
  0x49   : > { %s25210_s22 = scalar_lea.vmem %s25626_s24, 64  ;;  %p25218_p4 = scmp.lt.s32.totalorder %s25626_s24, %s25626_s24 }
  0x4a   : > { %p25211_p10 = scmp.ne.s32.totalorder %s25626_s24, %s25210_s22  ;;  %p25219_p7 = scmp.lt.s32.totalorder %s25210_s22, %s25210_s22 }
  0x4c   : > { %p25213_p2 = pnand %p25211_p10, %p25638_p0  ;;  %p25220_p8 = por %p25219_p7, %p25218_p4 }
  0x4e   : > { %p25214_p3 = pneg %p25213_p2 }
  0x50   : > { %p25221_p11 = pnand %p25220_p8, %p25214_p3 }
  0x52   : > { %25224 = shalt.err (!%p25221_p11)
}
  0x53   : > { %23274 = dma.hbm_to_vmem [thread:$0]  (!%p25622_p12), %s31554_s6, 64, %s25626_s24, [#allocation9]  }
  0x54   : > { %s25225_s25 = scalar_lea.hbm %s31434_s9, 32768 }
  0x55   : > { %p25226_p13 = scmp.ne.s32.totalorder %s31434_s9, %s25225_s25  ;;  %p25232_p5 = scmp.lt.u32.totalorder %s25225_s25, %s31434_s9 }
  0x57   : > { %p25228_p1 = pnand %p25226_p13, %p25638_p0 }
  0x59   : > { %p25229_p6 = pneg %p25228_p1 }
  0x5b   : > { %p25234_p9 = pnand %p25232_p5, %p25229_p6 }
  0x5d   : > { %25237 = shalt.err (!%p25234_p9)
}
  0x5e   : > { %s25238_s22 = scalar_lea.vmem %s425_s16, 32768  ;;  %p25246_p4 = scmp.lt.s32.totalorder %s425_s16, %s425_s16 }
  0x5f   : > { %p25239_p10 = scmp.ne.s32.totalorder %s425_s16, %s25238_s22  ;;  %p25247_p7 = scmp.lt.s32.totalorder %s25238_s22, %s25238_s22 }
  0x61   : > { %p25241_p2 = pnand %p25239_p10, %p25638_p0  ;;  %p25248_p8 = por %p25247_p7, %p25246_p4 }
  0x63   : > { %p25242_p3 = pneg %p25241_p2 }
  0x65   : > { %p25249_p11 = pnand %p25248_p8, %p25242_p3 }
  0x67   : > { %25252 = shalt.err (!%p25249_p11)
}
  0x68   : > { %s31449_s24 = smov 256   ;;  %s31450_s13 = smov 16  }
  0x69   : > { %23280 = dma.hbm_to_vmem [thread:$0]  (!%p25622_p12), %s31434_s9, 32768, %s425_s16, [#allocation12], %s31449_s24, %s31449_s24, %s31450_s13  }
  0x6a   : > { %s25482_s17 = smov [#allocation2]   ;;  %s25253_s15 = scalar_lea.hbm %s31427_s2, 15360 }
  0x6b   : > { %s357_s25 = sshll.u32 %s25482_s17, 4  ;;  %p25254_p13 = scmp.ne.s32.totalorder %s31427_s2, %s25253_s15  ;;  %s358_s25 = int_to_ptr.vmem [resolvable:$true] %s357_s25 }
  0x6c   : > { %p25260_p5 = scmp.lt.u32.totalorder %s25253_s15, %s31427_s2 }
  0x6d   : > { %p25256_p1 = pnand %p25254_p13, %p25638_p0 }
  0x6f   : > { %p25257_p6 = pneg %p25256_p1 }
  0x71   : > { %p25262_p9 = pnand %p25260_p5, %p25257_p6 }
  0x73   : > { %25265 = shalt.err (!%p25262_p9)
}
  0x74   : > { %s25266_s16 = scalar_lea.vmem %s358_s25, 15360  ;;  %p25274_p4 = scmp.lt.s32.totalorder %s358_s25, %s358_s25 }
  0x75   : > { %p25267_p10 = scmp.ne.s32.totalorder %s358_s25, %s25266_s16  ;;  %p25275_p7 = scmp.lt.s32.totalorder %s25266_s16, %s25266_s16 }
  0x77   : > { %p25269_p2 = pnand %p25267_p10, %p25638_p0  ;;  %p25276_p8 = por %p25275_p7, %p25274_p4 }
  0x79   : > { %p25270_p3 = pneg %p25269_p2 }
  0x7b   : > { %p25277_p11 = pnand %p25276_p8, %p25270_p3 }
  0x7d   : > { %25280 = shalt.err (!%p25277_p11)
}
  0x7e   : > { %s25483_s28 = smov 768   ;;  %s25484_s14 = smov 48  }
  0x7f   : > { %23265 = dma.hbm_to_vmem [thread:$0]  (!%p25622_p12), %s31427_s2, 15360, %s358_s25, [#allocation3], %s25483_s28, %s25483_s28, %s25484_s14  }
  0x80   : > { %s25485_s17 = smov [#allocation7]   ;;  %s25486_s21 = smov [#allocation10]  }
  0x81   : > { %s384_s19 = sshll.u32 %s25485_s17, 4  ;;  %s408_s15 = sshll.u32 %s25486_s21, 4  ;;  %s385_s19 = int_to_ptr.vmem [resolvable:$true] %s384_s19  ;;  %s25717_s15 = int_to_ptr.vmem [resolvable:$true] %s408_s15 }
  0x82   : > { %s25281_s16 = scalar_lea.hbm %s31430_s5, 61440 }
  0x83   : > { %p25282_p13 = scmp.ne.s32.totalorder %s31430_s5, %s25281_s16  ;;  %p25288_p5 = scmp.lt.u32.totalorder %s25281_s16, %s31430_s5 }
  0x85   : > { %p25284_p1 = pnand %p25282_p13, %p25638_p0 }
  0x87   : > { %p25285_p6 = pneg %p25284_p1 }
  0x89   : > { %p25290_p9 = pnand %p25288_p5, %p25285_p6 }
  0x8b   : > { %25293 = shalt.err (!%p25290_p9)
}
  0x8c   : > { %s25294_s28 = scalar_lea.vmem %s385_s19, 61440  ;;  %p25302_p4 = scmp.lt.s32.totalorder %s385_s19, %s385_s19 }
  0x8d   : > { %p25295_p10 = scmp.ne.s32.totalorder %s385_s19, %s25294_s28  ;;  %p25303_p7 = scmp.lt.s32.totalorder %s25294_s28, %s25294_s28 }
  0x8f   : > { %p25297_p2 = pnand %p25295_p10, %p25638_p0  ;;  %p25304_p8 = por %p25303_p7, %p25302_p4 }
  0x91   : > { %p25298_p3 = pneg %p25297_p2 }
  0x93   : > { %p25305_p11 = pnand %p25304_p8, %p25298_p3 }
  0x95   : > { %25308 = shalt.err (!%p25305_p11)
}
  0x96   : > { %s31555_s24 = smov 16   ;;  %s31556_s13 = smov 256  }
  0x97   : > { %23271 = dma.hbm_to_vmem [thread:$0]  (!%p25622_p12), %s31430_s5, 61440, %s385_s19, [#allocation6], %s31556_s13, %s31556_s13, %s31555_s24  }
  0x98   : > { %s25309_s27 = scalar_lea.hbm %s31432_s7, 1024 }
  0x99   : > { %p25310_p13 = scmp.ne.s32.totalorder %s31432_s7, %s25309_s27  ;;  %p25316_p5 = scmp.lt.u32.totalorder %s25309_s27, %s31432_s7 }
  0x9b   : > { %p25312_p1 = pnand %p25310_p13, %p25638_p0 }
  0x9d   : > { %p25313_p6 = pneg %p25312_p1 }
  0x9f   : > { %p25318_p9 = pnand %p25316_p5, %p25313_p6 }
  0xa1   : > { %25321 = shalt.err (!%p25318_p9)
}
  0xa2   : > { %s25322_s19 = scalar_lea.vmem %s25717_s15, 1024  ;;  %p25330_p4 = scmp.lt.s32.totalorder %s25717_s15, %s25717_s15 }
  0xa3   : > { %p25323_p10 = scmp.ne.s32.totalorder %s25717_s15, %s25322_s19  ;;  %p25331_p7 = scmp.lt.s32.totalorder %s25322_s19, %s25322_s19 }
  0xa5   : > { %p25325_p2 = pnand %p25323_p10, %p25638_p0  ;;  %p25332_p8 = por %p25331_p7, %p25330_p4 }
  0xa7   : > { %p25326_p3 = pneg %p25325_p2 }
  0xa9   : > { %p25333_p11 = pnand %p25332_p8, %p25326_p3 }
  0xab   : > { %25336 = shalt.err (!%p25333_p11)
}
  0xac   : > { %s25487_s28 = smov 128   ;;  %s25488_s24 = smov 8  }
  0xad   : > { %23277 = dma.hbm_to_vmem [thread:$0]  (!%p25622_p12), %s31432_s7, 1024, %s25717_s15, [#allocation9], %s25487_s28, %s25487_s28, %s25488_s24  }
  0xae   : > { %s25489_s6 = smov [#allocation13]   ;;  %s25490_s21 = smov [#allocation14]  }
  0xaf   : > { %s438_s17 = sshll.u32 %s25489_s6, 4  ;;  %s452_s27 = sshll.u32 %s25490_s21, 4  ;;  %s439_s17 = int_to_ptr.vmem [resolvable:$true] %s438_s17  ;;  %s25763_s27 = int_to_ptr.vmem [resolvable:$true] %s452_s27 }
  0xb0   : > { %s25337_s3 = scalar_lea.hbm %s31435_s10, 64 }
  0xb1   : > { %p25338_p13 = scmp.ne.s32.totalorder %s31435_s10, %s25337_s3  ;;  %p25344_p5 = scmp.lt.u32.totalorder %s25337_s3, %s31435_s10 }
  0xb3   : > { %p25340_p1 = pnand %p25338_p13, %p25638_p0 }
  0xb5   : > { %p25341_p6 = pneg %p25340_p1 }
  0xb7   : > { %p25346_p9 = pnand %p25344_p5, %p25341_p6 }
  0xb9   : > { %25349 = shalt.err (!%p25346_p9)
}
  0xba   : > { %s25350_s28 = scalar_lea.vmem %s439_s17, 64  ;;  %p25358_p4 = scmp.lt.s32.totalorder %s439_s17, %s439_s17 }
  0xbb   : > { %p25351_p10 = scmp.ne.s32.totalorder %s439_s17, %s25350_s28  ;;  %p25359_p7 = scmp.lt.s32.totalorder %s25350_s28, %s25350_s28 }
  0xbd   : > { %p25353_p2 = pnand %p25351_p10, %p25638_p0  ;;  %p25360_p8 = por %p25359_p7, %p25358_p4 }
  0xbf   : > { %p25354_p3 = pneg %p25353_p2 }
  0xc1   : > { %p25361_p11 = pnand %p25360_p8, %p25354_p3 }
  0xc3   : > { %25364 = shalt.err (!%p25361_p11)
}
  0xc4   : > { %23283 = dma.hbm_to_vmem [thread:$0]  (!%p25622_p12), %s31435_s10, 64, %s439_s17, [#allocation12]  }
  0xc5   : > { %s25365_s22 = scalar_lea.hbm %s31437_s12, 16 }
  0xc6   : > { %p25366_p13 = scmp.ne.s32.totalorder %s31437_s12, %s25365_s22  ;;  %p25372_p5 = scmp.lt.u32.totalorder %s25365_s22, %s31437_s12 }
  0xc8   : > { %p25368_p1 = pnand %p25366_p13, %p25638_p0 }
  0xca   : > { %p25369_p6 = pneg %p25368_p1 }
  0xcc   : > { %p25374_p9 = pnand %p25372_p5, %p25369_p6 }
  0xce   : > { %25377 = shalt.err (!%p25374_p9)
}
  0xcf   : > { %s25378_s17 = scalar_lea.vmem %s25763_s27, 16  ;;  %s25385_s13 = scalar_lea.vmem %s25763_s27, 32 }
  0xd0   : > { %p25379_p10 = scmp.ne.s32.totalorder %s25763_s27, %s25378_s17  ;;  %p25386_p4 = scmp.lt.s32.totalorder %s25763_s27, %s25763_s27 }
  0xd1   : > { %p25387_p7 = scmp.lt.s32.totalorder %s25385_s13, %s25378_s17 }
  0xd2   : > { %p25381_p2 = pnand %p25379_p10, %p25638_p0 }
  0xd3   : > { %p25388_p8 = por %p25387_p7, %p25386_p4 }
  0xd4   : > { %p25382_p3 = pneg %p25381_p2 }
  0xd6   : > { %p25389_p11 = pnand %p25388_p8, %p25382_p3 }
  0xd8   : > { %25392 = shalt.err (!%p25389_p11)
}
  0xd9   : > { %23286 = dma.hbm_to_vmem [thread:$0]  (!%p25622_p12), %s31437_s12, 16, %s25763_s27, [#allocation15]  }
  0xda   : > { %p31557_p13 = scmp.ne.s32.totalorder %s31550_s20, 0 }
  0xdc   : > { %485 = sbr.rel (%p31557_p13) target bundleno = 4013 (0xfad), region = 72 }
  0xe3   : > { %p31558_p0 = scmp.eq.s32.totalorder %s25586_s29, 0 }
  0xe5   : > { %25438 = dma.done.wait (%p31558_p0), [#allocation3], 15360   ;;  %p31559_p1 = pmov %p31558_p0 }
  0xe6   : > { %p31560_p6 = pmov %p31558_p0 }
  0xe7   : > { %25440 = vsyncadd (%p31559_p1), [#allocation3], 4294951936 }
  0xe8   : > { %25442 = dma.done.wait (%p31560_p6), [#allocation6], 61536   ;;  %p31561_p5 = pmov %p31558_p0 }
  0xe9   : > { %p31562_p9 = pmov %p31558_p0 }
  0xea   : > { %25444 = vsyncadd (%p31561_p5), [#allocation6], 4294905760 }
  0xeb   : > { %25446 = dma.done.wait (%p31562_p9), [#allocation9], 1088   ;;  %p31563_p12 = pmov %p31558_p0 }
  0xec   : > { %p31564_p10 = pmov %p31558_p0 }
  0xed   : > { %25448 = vsyncadd (%p31563_p12), [#allocation9], 4294966208 }
  0xee   : > { %25450 = dma.done.wait (%p31564_p10), [#allocation12], 32832   ;;  %p31565_p2 = pmov %p31558_p0 }
  0xef   : > { %p31566_p3 = pmov %p31558_p0 }
  0xf0   : > { %25452 = vsyncadd (%p31565_p2), [#allocation12], 4294934464 }
  0xf1   : > { %25454 = dma.done.wait (%p31566_p3), [#allocation15], 16   ;;  %p31567_p4 = pmov %p31558_p0 }
  0xf2   : > { %s19066_s20 = sshll.u32 %s25586_s29, 3  ;;  %v31451_v0 = vmov 0.0   ;;  %vm990_vm0 = vcmask 1043456   ;;  %vm25492_vm1 = vmmov 1   ;;  %v862_v2 = vld [vmem:[#allocation2 + $0xc8] sm:$0xff]  ;;  %v868_v3 = vld [vmem:[#allocation2 + $0xf8] sm:$0xff] }
  0xf3   : > { %25456 = vsyncadd (%p31567_p4), [#allocation15], 4294967280  ;;  %1073 = vmatprep.mubr.f32.mxu0 %v31451_v0  ;;  %1234 = vmatprep.mubr.f32.mxu1 %v31451_v0  ;;  %p565_p7 = scmp.lt.s32.totalorder %s19066_s20, 15  ;;  %v864_v4 = vld [vmem:[#allocation2 + $0xd8] sm:$0xff]  ;;  %v25838_v5 = vpack.c.bf16 %v868_v3, %v862_v2  ;;  %v870_v6 = vld [vmem:[#allocation2 + $0x108] sm:$0xff]  ;;  %vm957_vm3 = vcmask 228352  }
  0xf4   : > { %vm25834_vm2 = vmpackc.low %vm990_vm0, %vm25492_vm1  ;;  %v861_v7 = vld [vmem:[#allocation2 + $0xc0] sm:$0xff]  ;;  %v867_v8 = vld [vmem:[#allocation2 + $0xf0] sm:$0xff]  ;;  %v25841_v9 = vpack.c.bf16 %v870_v6, %v864_v4  ;;  %vm651_vm4 = vcmask 1046528   ;;  %vm692_vm5 = vcmask 1045504   ;;  %vm10372_vm6 = vsmask.f32 3328 }
  0xf5   : > { %s31832_s20 = smov (!%p565_p7, %s19066_s20), 15  ;;  %v25843_v10 = vpack.c.bf16 %v867_v8, %v861_v7  ;;  %v863_v11 = vld [vmem:[#allocation2 + $0xd0] sm:$0xff]  ;;  %v869_v12 = vld [vmem:[#allocation2 + $0x100] sm:$0xff]  ;;  %v874_v13 = vld [vmem:[#allocation2 + $0x128] sm:$0xff]  ;;  %21668 = vmatprep.subr.bf16.mxu0 %v25838_v5  ;;  %vm10373_vm7 = vsmask.f32 7440 }
  0xf6   : > { %s23227_s30 = smul.u32 24, %s31832_s20  ;;  %v25846_v14 = vpack.c.bf16 %v869_v12, %v863_v11  ;;  %v880_v15 = vld [vmem:[#allocation2 + $0x158] sm:$0xf]  ;;  %v882_v17 = vld [vmem:[#allocation2 + $0x168] sm:$0xf]  ;;  %21678 = vmatprep.subr.bf16.mxu1 %v25841_v9  ;;  %v873_v20 = vld [vmem:[#allocation2 + $0x120] sm:$0xff] }
  0xf7   : > { %v876_v16 = vld [vmem:[#allocation2 + $0x138] sm:$0xff]  ;;  %21670 = vmatpush1.bf16.msra.mxu0 %v25843_v10  ;;  %v25850_v18 = vpack.c.bf16 %v880_v15, %v874_v13  ;;  %v879_v21 = vld [vmem:[#allocation2 + $0x150] sm:$0xf]  ;;  %v881_v24 = vld [vmem:[#allocation2 + $0x160] sm:$0xf]  ;;  %vm10599_vm9 = vcmask 1042432  }
  0xf8   : > { %v25852_v19 = vpack.c.bf16 %v882_v17, %v876_v16  ;;  %v875_v22 = vld [vmem:[#allocation2 + $0x130] sm:$0xff]  ;;  %21680 = vmatpush1.bf16.msra.mxu1 %v25846_v14  ;;  %v25855_v23 = vpack.c.bf16 %v879_v21, %v873_v20  ;;  %s25862_s24 = scalar_lea.vmem %s31426_s1, %s23227_s30  ;;  %v840_v26 = vld [vmem:[#allocation2 + $0x18] sm:$0xff]  ;;  %v846_v27 = vld [vmem:[#allocation2 + $0x48] sm:$0xff]  ;;  %s26056_s21 = scalar_lea.vmem %s31425_s0, %s23227_s30  ;;  %vm10600_vm10 = vcmask 1046532   ;;  %vm10666_vm12 = vsmask.f32 2304 }
  0xf9   : > { %21673 = vmatprep.subr.msk.bf16.mxu0 %vm25834_vm2, %v25850_v18  ;;  %v25870_v25 = vpack.c.bf16 %v881_v24, %v875_v22  ;;  %v839_v28 = vld [vmem:[#allocation2 + $0x10] sm:$0xff]  ;;  %v25872_v29 = vpack.c.bf16 %v846_v27, %v840_v26  ;;  %v845_v30 = vld [vmem:[#allocation2 + $0x40] sm:$0xff]  ;;  %v852_v33 = vld [vmem:[#allocation2 + $0x78] sm:$0xff]  ;;  %vm10667_vm13 = vsmask.f32 6416  ;;  %vm10829_vm14 = vcmask 1041408  }
  0xfa   : > { %21683 = vmatprep.subr.msk.bf16.mxu1 %vm25834_vm2, %v25852_v19  ;;  %v25878_v31 = vld [vmem:[%s25862_s24] sm:$0xff]  ;;  %v25883_v32 = vpack.c.bf16 %v845_v30, %v839_v28  ;;  %v858_v34 = vld [vmem:[#allocation2 + $0xa8] sm:$0xf]  ;;  %v851_v35 = vld [vmem:[#allocation2 + $0x70] sm:$0xff]  ;;  %vm10830_vm15 = vcmask 1045508   ;;  %s561_s27 = sand.u32 1, %s25467_s26  }
  0xfb   : > { %21676 = vmatpush1.bf16.msk.msra.mxu0 %vm25834_vm2, %v25855_v23  ;;  %v25888_v36 = vpack.c.bf16 %v858_v34, %v852_v33  ;;  %v857_v37 = vld [vmem:[#allocation2 + $0xa0] sm:$0xf]  ;;  %v25894_v38 = vld [vmem:[%s25862_s24 + $0x8] sm:$0xff]  ;;  %v872_v41 = vld [vmem:[#allocation2 + $0x118] sm:$0xff]  ;;  %s21192_s14 = sshll.u32 %s25586_s29, 7  ;;  %s31820_s3 = sld [smem:[#allocation75_spill]] }
  0xfc   : > { %21686 = vmatpush1.bf16.msk.msra.mxu1 %vm25834_vm2, %v25870_v25  ;;  %v25898_v39 = vpack.c.bf16 %v857_v37, %v851_v35  ;;  %v866_v40 = vld [vmem:[#allocation2 + $0xe8] sm:$0xff]  ;;  %v865_v43 = vld [vmem:[#allocation2 + $0xe0] sm:$0xff]  ;;  %v871_v44 = vld [vmem:[#allocation2 + $0x110] sm:$0xff]  ;;  %s18882_s19 = scalar_lea.sflag [#allocation4], %s561_s27  ;;  %p31821_p11 = scmp.ne.s32.totalorder %s31547_s18, 0 }
  0xfd   : > { %21708 = vmatprep.subr.bf16.mxu1 %v25872_v29  ;;  %v25903_v42 = vpack.c.bf16 %v872_v41, %v866_v40  ;;  %v878_v45 = vld [vmem:[#allocation2 + $0x148] sm:$0xff]  ;;  %v884_v46 = vld [vmem:[#allocation2 + $0x178] sm:$0xf]  ;;  %v25917_v48 = vpack.c.bf16 %v871_v44, %v865_v43  ;;  %v877_v50 = vld [vmem:[#allocation2 + $0x140] sm:$0xff]  ;;  %s25494_s29 = smov [#allocation16]  }
  0xfe   : > { %19072 = vmatmul.mubr.msk.f32.vlgmr.msra.gmra.mrb[0].mxu0 %vm957_vm3, %v25878_v31  ;;  %v25911_v47 = vld [vmem:[%s25862_s24 + $0x18] sm:$0xff]  ;;  %v25920_v49 = vpack.c.bf16 %v884_v46, %v878_v45  ;;  %v883_v51 = vld [vmem:[#allocation2 + $0x170] sm:$0xf]  ;;  %v25929_v52 = vld [vmem:[%s25862_s24 + $0x20] sm:$0xff]  ;;  %s25397_s13 = sshll.u32 %s25494_s29, 4  ;;  %s25398_s13 = int_to_ptr.vmem [resolvable:$false] %s25397_s13 }
  0xff   : > { %19090 = vmatmul.mubr.msk.f32.vlgmr.msra.gmra.mrb[0].mxu1 %vm957_vm3, %v25878_v31  ;;  %1079 = vmatprep.mubr.f32.mxu0 %v31451_v0  ;;  %v25933_v53 = vpack.c.bf16 %v883_v51, %v877_v50  ;;  %v838_v54 = vld [vmem:[#allocation2 + $0x8] sm:$0xff]  ;;  %v844_v55 = vld [vmem:[#allocation2 + $0x38] sm:$0xff]  ;;  %v25944_v56 = vld [vmem:[%s25862_s24 + $0x30] sm:$0xff]  ;;  %s25399_s15 = scalar_lea.vmem %s25398_s13, 256 }
 0x100   : > { %1240 = vmatprep.mubr.f32.mxu1 %v31451_v0  ;;  %21710 = vmatpush1.bf16.msra.mxu1 %v25883_v32  ;;  %v25946_v57 = vpack.c.bf16 %v844_v55, %v838_v54  ;;  %v25959_v58 = vld [vmem:[%s25862_s24 + $0x38] sm:$0xff]  ;;  %v25963_v59 = vld [vmem:[%s25862_s24 + $0x48] sm:$0xff]  ;;  %v25977_v60 = vld [vmem:[%s25862_s24 + $0x50] sm:$0xff] }
 0x101   : > { %21713 = vmatprep.subr.msk.bf16.mxu1 %vm25834_vm2, %v25888_v36  ;;  %21688 = vmatprep.subr.bf16.mxu0 %v25903_v42  ;;  %v25981_v61 = vld [vmem:[%s25862_s24 + $0x60] sm:$0xff]  ;;  %v25995_v62 = vld [vmem:[%s25862_s24 + $0x68] sm:$0xff]  ;;  %v25999_v63 = vld [vmem:[%s25862_s24 + $0x78] sm:$0xff]  ;;  %s31383_s25 = scalar_lea.hbm %s31820_s3, %s21192_s14 }
 0x102   : > { %19073 = vmatmul.mubr.msk.f32.gmra.mrb[2].mxu0 %vm957_vm3, %v25894_v38  ;;  %v26013_v2 = vld [vmem:[%s25862_s24 + $0x80] sm:$0xff]  ;;  %v26017_v3 = vld [vmem:[%s25862_s24 + $0x90] sm:$0xff]  ;;  %v26031_v4 = vld [vmem:[%s25862_s24 + $0x98] sm:$0xff] }
 0x103   : > { %19091 = vmatmul.mubr.msk.f32.gmra.mrb[2].mxu1 %vm957_vm3, %v25894_v38  ;;  %1085 = vmatprep.mubr.f32.mxu0 %v31451_v0  ;;  %v26049_v6 = vld [vmem:[%s25862_s24 + $0xb0] sm:$0xff]  ;;  %v837_v7 = vld [vmem:[#allocation2] sm:$0xff]  ;;  %v850_v11 = vld [vmem:[#allocation2 + $0x68] sm:$0xff] }
 0x104   : > { %1246 = vmatprep.mubr.f32.mxu1 %v31451_v0  ;;  %21716 = vmatpush1.bf16.msk.msra.mxu1 %vm25834_vm2, %v25898_v39  ;;  %v843_v8 = vld [vmem:[#allocation2 + $0x30] sm:$0xff]  ;;  %v856_v12 = vld [vmem:[#allocation2 + $0x98] sm:$0xf]  ;;  %v26062_v13 = vld [vmem:[%s26056_s21] sm:$0xff] }
 0x105   : > { %21728 = vmatprep.subr.bf16.mxu1 %v25838_v5  ;;  %21690 = vmatpush1.bf16.msra.mxu0 %v25917_v48  ;;  %v26035_v5 = vld [vmem:[%s25862_s24 + $0xa8] sm:$0xff]  ;;  %v849_v15 = vld [vmem:[#allocation2 + $0x60] sm:$0xff]  ;;  %v855_v16 = vld [vmem:[#allocation2 + $0x90] sm:$0xf]  ;;  %v26068_v17 = vpack.c.bf16 %v843_v8, %v837_v7  ;;  %v26075_v24 = vpack.c.bf16 %v856_v12, %v850_v11  ;;  %v652_v45 = vrot.slane %v26062_v13, 1 }
 0x106   : > { %19074 = vmatmul.mubr.msk.f32.gmra.mrb[4].mxu0 %vm957_vm3, %v25911_v47  ;;  %21693 = vmatprep.subr.msk.bf16.mxu0 %vm25834_vm2, %v25920_v49  ;;  %v842_v20 = vld [vmem:[#allocation2 + $0x28] sm:$0xff]  ;;  %v848_v21 = vld [vmem:[#allocation2 + $0x58] sm:$0xff]  ;;  %v26086_v26 = vpack.c.bf16 %v855_v16, %v849_v15  ;;  %v26149_v30 = vld [vmem:[%s26056_s21 + $0x50] sm:$0xff] }
 0x107   : > { %19092 = vmatmul.mubr.msk.f32.gmra.mrb[4].mxu1 %vm957_vm3, %v25911_v47  ;;  %1091 = vmatprep.mubr.f32.mxu0 %v31451_v0  ;;  %v26073_v22 = vld [vmem:[%s26056_s21 + $0x8] sm:$0xff]  ;;  %v26091_v27 = vld [vmem:[%s26056_s21 + $0x18] sm:$0xff]  ;;  %v26096_v28 = vpack.c.bf16 %v848_v21, %v842_v20  ;;  %v26185_v35 = vld [vmem:[%s26056_s21 + $0x80] sm:$0xff]  ;;  %v668_v8 = vrot.slane %v26149_v30, 1 }
 0x108   : > { %1252 = vmatprep.mubr.f32.mxu1 %v31451_v0  ;;  %v26167_v33 = vld [vmem:[%s26056_s21 + $0x68] sm:$0xff]  ;;  %v26176_v34 = vld [vmem:[%s26056_s21 + $0x78] sm:$0xff]  ;;  %v26194_v37 = vld [vmem:[%s26056_s21 + $0x90] sm:$0xff]  ;;  %v653_v44 = vrot.slane %v26073_v22, 1 }
 0x109   : > { %21696 = vmatpush1.bf16.msk.msra.mxu0 %vm25834_vm2, %v25933_v53  ;;  %v26212_v40 = vld [vmem:[%s26056_s21 + $0xa8] sm:$0xff]  ;;  %v26221_v41 = vld [vmem:[%s26056_s21 + $0xb0] sm:$0xff]  ;;  %v841_v46 = vld [vmem:[#allocation2 + $0x20] sm:$0xff]  ;;  %v673_v20 = vrot.slane %v26167_v33, 1 }
 0x10a   : > { %19075 = vmatmul.mubr.msk.f32.gmra.mrb[6].mxu0 %vm957_vm3, %v25929_v52  ;;  %21698 = vmatprep.subr.bf16.mxu0 %v25946_v57  ;;  %v581_v43 = vld [vmem:[%s26056_s21 + $0x10] sm:$0x3]  ;;  %v854_v50 = vld [vmem:[#allocation2 + $0x88] sm:$0xff]  ;;  %v860_v51 = vld [vmem:[#allocation2 + $0xb8] sm:$0xf]  ;;  %v26237_v54 = vsel %vm651_vm4, %v652_v45, %v653_v44 }
 0x10b   : > { %19093 = vmatmul.mubr.msk.f32.gmra.mrb[6].mxu1 %vm957_vm3, %v25929_v52  ;;  %1097 = vmatprep.mubr.f32.mxu0 %v31451_v0  ;;  %v853_v55 = vld [vmem:[#allocation2 + $0x80] sm:$0xff]  ;;  %v590_v7 = vld [vmem:[%s26056_s21 + $0x58] sm:$0x3]  ;;  %v593_v15 = vld [vmem:[%s26056_s21 + $0x70] sm:$0x3] }
 0x10c   : > { %1258 = vmatprep.mubr.f32.mxu1 %v31451_v0  ;;  %vm29975_vm8 = vmor %vm10372_vm6, %vm10373_vm7 }
 0x10d   : > { %vm30212_vm11 = vmor %vm10599_vm9, %vm10600_vm10 }
 0x10e   : > { %19076 = vmatmul.mubr.msk.f32.gmra.mrb[8].mxu0 %vm957_vm3, %v25944_v56  ;;  %vm30257_vm0 = vmor %vm10829_vm14, %vm10830_vm15 }
 0x10f   : > { %19094 = vmatmul.mubr.msk.f32.gmra.mrb[8].mxu1 %vm957_vm3, %v25944_v56  ;;  %1103 = vmatprep.mubr.f32.mxu0 %v31451_v0  ;;  %vm30287_vm1 = vmor %vm10666_vm12, %vm10667_vm13 }
 0x110   : > { %1264 = vmatprep.mubr.f32.mxu1 %v31451_v0 }
 0x112   : > { %19077 = vmatmul.mubr.msk.f32.gmra.mrb[10].mxu0 %vm957_vm3, %v25959_v58 }
 0x113   : > { %19095 = vmatmul.mubr.msk.f32.gmra.mrb[10].mxu1 %vm957_vm3, %v25959_v58  ;;  %1109 = vmatprep.mubr.f32.mxu0 %v31451_v0 }
 0x114   : > { %1270 = vmatprep.mubr.f32.mxu1 %v31451_v0 }
 0x116   : > { %19078 = vmatmul.mubr.msk.f32.gmra.mrb[12].mxu0 %vm957_vm3, %v25963_v59 }
 0x117   : > { %19096 = vmatmul.mubr.msk.f32.gmra.mrb[12].mxu1 %vm957_vm3, %v25963_v59  ;;  %1115 = vmatprep.mubr.f32.mxu0 %v31451_v0 }
 0x118   : > { %1276 = vmatprep.mubr.f32.mxu1 %v31451_v0 }
 0x11a   : > { %19079 = vmatmul.mubr.msk.f32.gmra.mrb[14].mxu0 %vm957_vm3, %v25977_v60 }
 0x11b   : > { %19097 = vmatmul.mubr.msk.f32.gmra.mrb[14].mxu1 %vm957_vm3, %v25977_v60  ;;  %1121 = vmatprep.mubr.f32.mxu0 %v31451_v0 }
 0x11c   : > { %1282 = vmatprep.mubr.f32.mxu1 %v31451_v0 }
 0x11e   : > { %19080 = vmatmul.mubr.msk.f32.gmra.mrb[16].mxu0 %vm957_vm3, %v25981_v61 }
 0x11f   : > { %19098 = vmatmul.mubr.msk.f32.gmra.mrb[16].mxu1 %vm957_vm3, %v25981_v61  ;;  %1127 = vmatprep.mubr.f32.mxu0 %v31451_v0 }
 0x120   : > { %1288 = vmatprep.mubr.f32.mxu1 %v31451_v0 }
 0x122   : > { %19081 = vmatmul.mubr.msk.f32.gmra.mrb[18].mxu0 %vm957_vm3, %v25995_v62 }
 0x123   : > { %19099 = vmatmul.mubr.msk.f32.gmra.mrb[18].mxu1 %vm957_vm3, %v25995_v62  ;;  %1133 = vmatprep.mubr.f32.mxu0 %v31451_v0 }
 0x124   : > { %1294 = vmatprep.mubr.f32.mxu1 %v31451_v0 }
 0x126   : > { %19082 = vmatmul.mubr.msk.f32.gmra.mrb[20].mxu0 %vm957_vm3, %v25999_v63 }
 0x127   : > { %19100 = vmatmul.mubr.msk.f32.gmra.mrb[20].mxu1 %vm957_vm3, %v25999_v63  ;;  %1139 = vmatprep.mubr.f32.mxu0 %v31451_v0 }
 0x128   : > { %1300 = vmatprep.mubr.f32.mxu1 %v31451_v0 }
 0x12a   : > { %19083 = vmatmul.mubr.msk.f32.gmra.mrb[22].mxu0 %vm957_vm3, %v26013_v2 }
 0x12b   : > { %19101 = vmatmul.mubr.msk.f32.gmra.mrb[22].mxu1 %vm957_vm3, %v26013_v2  ;;  %1145 = vmatprep.mubr.f32.mxu0 %v31451_v0 }
 0x12c   : > { %1306 = vmatprep.mubr.f32.mxu1 %v31451_v0 }
 0x12e   : > { %19084 = vmatmul.mubr.msk.f32.gmra.mrb[24].mxu0 %vm957_vm3, %v26017_v3 }
 0x12f   : > { %19102 = vmatmul.mubr.msk.f32.gmra.mrb[24].mxu1 %vm957_vm3, %v26017_v3  ;;  %1151 = vmatprep.mubr.f32.mxu0 %v31451_v0 }
 0x130   : > { %1312 = vmatprep.mubr.f32.mxu1 %v31451_v0 }
 0x132   : > { %19085 = vmatmul.mubr.msk.f32.gmra.mrb[26].mxu0 %vm957_vm3, %v26031_v4 }
 0x133   : > { %19103 = vmatmul.mubr.msk.f32.gmra.mrb[26].mxu1 %vm957_vm3, %v26031_v4  ;;  %1157 = vmatprep.mubr.f32.mxu0 %v31451_v0 }
 0x134   : > { %1318 = vmatprep.mubr.f32.mxu1 %v31451_v0 }
 0x136   : > { %19086 = vmatmul.mubr.msk.f32.gmra.mrb[28].mxu0 %vm957_vm3, %v26035_v5 }
 0x137   : > { %19104 = vmatmul.mubr.msk.f32.gmra.mrb[28].mxu1 %vm957_vm3, %v26035_v5  ;;  %1163 = vmatprep.mubr.f32.mxu0 %v31451_v0 }
 0x138   : > { %1324 = vmatprep.mubr.f32.mxu1 %v31451_v0 }
 0x13a   : > { %19087 = vmatmul.mubr.msk.f32.gmra.mrb[30].mxu0 %vm957_vm3, %v26049_v6 }
 0x13b   : > { %19105 = vmatmul.mubr.msk.f32.gmra.mrb[30].mxu1 %vm957_vm3, %v26049_v6  ;;  %1395 = vmatprep.mubr.f32.mxu0 %v31451_v0 }
 0x13c   : > { %1767 = vmatprep.mubr.f32.mxu1 %v31451_v0 }
 0x13e   : > { %19108 = vmatmul.mubr.msk.f32.vlgmr.msra.gmra.mrb[32].mxu0 %vm957_vm3, %v25878_v31  ;;  %v26158_v31 = vld [vmem:[%s26056_s21 + $0x60] sm:$0xff] }
 0x13f   : > { %19144 = vmatmul.mubr.msk.f32.vlgmr.msra.gmra.mrb[0].mxu1 %vm957_vm3, %v26062_v13  ;;  %1401 = vmatprep.mubr.f32.mxu0 %v31451_v0  ;;  %v672_v16 = vrot.slane %v26158_v31, 1 }
 0x140   : > { %1773 = vmatprep.mubr.f32.mxu1 %v31451_v0  ;;  %21730 = vmatpush1.bf16.msra.mxu1 %v25843_v10  ;;  %v26112_v10 = vld [vmem:[%s26056_s21 + $0x20] sm:$0xff] }
 0x141   : > { %21733 = vmatprep.subr.msk.bf16.mxu1 %vm25834_vm2, %v25850_v18  ;;  %21700 = vmatpush1.bf16.msra.mxu0 %v26068_v17  ;;  %v26131_v18 = vld [vmem:[%s26056_s21 + $0x38] sm:$0xff] }
 0x142   : > { %19109 = vmatmul.mubr.msk.f32.gmra.mrb[34].mxu0 %vm957_vm3, %v25894_v38  ;;  %21703 = vmatprep.subr.msk.bf16.mxu0 %vm25834_vm2, %v26075_v24  ;;  %v26203_v38 = vld [vmem:[%s26056_s21 + $0x98] sm:$0xff] }
 0x143   : > { %19145 = vmatmul.mubr.msk.f32.gmra.mrb[2].mxu1 %vm957_vm3, %v26073_v22  ;;  %1407 = vmatprep.mubr.f32.mxu0 %v31451_v0 }
 0x144   : > { %1779 = vmatprep.mubr.f32.mxu1 %v31451_v0  ;;  %21736 = vmatpush1.bf16.msk.msra.mxu1 %vm25834_vm2, %v25855_v23  ;;  %v26140_v23 = vld [vmem:[%s26056_s21 + $0x48] sm:$0xff] }
 0x145   : > { %21706 = vmatpush1.bf16.msk.msra.mxu0 %vm25834_vm2, %v26086_v26  ;;  %21738 = vmatprep.subr.bf16.mxu1 %v25841_v9  ;;  %v26122_v9 = vld [vmem:[%s26056_s21 + $0x30] sm:$0xff] }
 0x146   : > { %19110 = vmatmul.mubr.msk.f32.gmra.mrb[36].mxu0 %vm957_vm3, %v25911_v47  ;;  %21718 = vmatprep.subr.bf16.mxu0 %v26096_v28  ;;  %v847_v47 = vld [vmem:[#allocation2 + $0x50] sm:$0xff] }
 0x147   : > { %19146 = vmatmul.mubr.msk.f32.gmra.mrb[4].mxu1 %vm957_vm3, %v26091_v27  ;;  %1413 = vmatprep.mubr.f32.mxu0 %v31451_v0 }
 0x148   : > { %1785 = vmatprep.mubr.f32.mxu1 %v31451_v0 }
 0x14a   : > { %19111 = vmatmul.mubr.msk.f32.gmra.mrb[38].mxu0 %vm957_vm3, %v25929_v52  ;;  %v655_v52 = vrot.slane %v581_v43, 1  ;;  %v682_v43 = vrot.slane %v26194_v37, 1 }
 0x14b   : > { %19147 = vmatmul.mubr.msk.f32.gmra.mrb[6].mxu1 %vm957_vm3, %v26112_v10  ;;  %1419 = vmatprep.mubr.f32.mxu0 %v31451_v0 }
 0x14c   : > { %1791 = vmatprep.mubr.f32.mxu1 %v31451_v0 }
 0x14e   : > { %19112 = vmatmul.mubr.msk.f32.gmra.mrb[40].mxu0 %vm957_vm3, %v25944_v56  ;;  %v859_v56 = vld [vmem:[#allocation2 + $0xb0] sm:$0xf] }
 0x14f   : > { %19148 = vmatmul.mubr.msk.f32.gmra.mrb[8].mxu1 %vm957_vm3, %v26122_v9  ;;  %1425 = vmatprep.mubr.f32.mxu0 %v31451_v0 }
 0x150   : > { %1797 = vmatprep.mubr.f32.mxu1 %v31451_v0 }
 0x152   : > { %19113 = vmatmul.mubr.msk.f32.gmra.mrb[42].mxu0 %vm957_vm3, %v25959_v58  ;;  %v26239_v58 = vpack.c.bf16 %v847_v47, %v841_v46  ;;  %v687_v47 = vrot.slane %v26212_v40, 1 }
 0x153   : > { %19149 = vmatmul.mubr.msk.f32.gmra.mrb[10].mxu1 %vm957_vm3, %v26131_v18  ;;  %1431 = vmatprep.mubr.f32.mxu0 %v31451_v0 }
 0x154   : > { %1803 = vmatprep.mubr.f32.mxu1 %v31451_v0 }
 0x156   : > { %19114 = vmatmul.mubr.msk.f32.gmra.mrb[44].mxu0 %vm957_vm3, %v25963_v59  ;;  %v26243_v59 = vpack.c.bf16 %v860_v51, %v854_v50  ;;  %v688_v50 = vrot.slane %v26221_v41, 1 }
 0x157   : > { %19150 = vmatmul.mubr.msk.f32.gmra.mrb[12].mxu1 %vm957_vm3, %v26140_v23  ;;  %1437 = vmatprep.mubr.f32.mxu0 %v31451_v0 }
 0x158   : > { %1809 = vmatprep.mubr.f32.mxu1 %v31451_v0 }
 0x15a   : > { %19115 = vmatmul.mubr.msk.f32.gmra.mrb[46].mxu0 %vm957_vm3, %v25977_v60  ;;  %v584_v60 = vld [vmem:[%s26056_s21 + $0x28] sm:$0x3] }
 0x15b   : > { %19151 = vmatmul.mubr.msk.f32.gmra.mrb[14].mxu1 %vm957_vm3, %v26149_v30  ;;  %1443 = vmatprep.mubr.f32.mxu0 %v31451_v0 }
 0x15c   : > { %1815 = vmatprep.mubr.f32.mxu1 %v31451_v0 }
 0x15e   : > { %19116 = vmatmul.mubr.msk.f32.gmra.mrb[48].mxu0 %vm957_vm3, %v25981_v61  ;;  %v657_v61 = vrot.slane %v26091_v27, 1 }
 0x15f   : > { %19152 = vmatmul.mubr.msk.f32.gmra.mrb[16].mxu1 %vm957_vm3, %v26158_v31  ;;  %1449 = vmatprep.mubr.f32.mxu0 %v31451_v0 }
 0x160   : > { %1821 = vmatprep.mubr.f32.mxu1 %v31451_v0 }
 0x162   : > { %19117 = vmatmul.mubr.msk.f32.gmra.mrb[50].mxu0 %vm957_vm3, %v25995_v62  ;;  %v658_v62 = vrot.slane %v26112_v10, 1 }
 0x163   : > { %19153 = vmatmul.mubr.msk.f32.gmra.mrb[18].mxu1 %vm957_vm3, %v26167_v33  ;;  %1455 = vmatprep.mubr.f32.mxu0 %v31451_v0 }
 0x164   : > { %1827 = vmatprep.mubr.f32.mxu1 %v31451_v0 }
 0x166   : > { %19118 = vmatmul.mubr.msk.f32.gmra.mrb[52].mxu0 %vm957_vm3, %v25999_v63  ;;  %v26253_v63 = vsel %vm651_vm4, %v653_v44, %v655_v52  ;;  %v683_v44 = vrot.slane %v26203_v38, 1 }
 0x167   : > { %19154 = vmatmul.mubr.msk.f32.gmra.mrb[20].mxu1 %vm957_vm3, %v26176_v34  ;;  %1461 = vmatprep.mubr.f32.mxu0 %v31451_v0 }
 0x168   : > { %1833 = vmatprep.mubr.f32.mxu1 %v31451_v0 }
 0x16a   : > { %19119 = vmatmul.mubr.msk.f32.gmra.mrb[54].mxu0 %vm957_vm3, %v26013_v2  ;;  %v26260_v2 = vpack.c.bf16 %v859_v56, %v853_v55  ;;  %v25083_v55 = vld [vmem:[%s26056_s21 + $0x78] sm:$0xff]  ;;  %v25084_v56 = vld [vmem:[%s26056_s21 + $0x80] sm:$0xff] }
 0x16b   : > { %19155 = vmatmul.mubr.msk.f32.gmra.mrb[22].mxu1 %vm957_vm3, %v26185_v35  ;;  %1467 = vmatprep.mubr.f32.mxu0 %v31451_v0 }
 0x16c   : > { %1839 = vmatprep.mubr.f32.mxu1 %v31451_v0 }
 0x16e   : > { %19120 = vmatmul.mubr.msk.f32.gmra.mrb[56].mxu0 %vm957_vm3, %v26017_v3  ;;  %v662_v3 = vrot.slane %v26122_v9, 1 }
 0x16f   : > { %19156 = vmatmul.mubr.msk.f32.gmra.mrb[24].mxu1 %vm957_vm3, %v26194_v37  ;;  %1473 = vmatprep.mubr.f32.mxu0 %v31451_v0 }
 0x170   : > { %1845 = vmatprep.mubr.f32.mxu1 %v31451_v0 }
 0x172   : > { %19121 = vmatmul.mubr.msk.f32.gmra.mrb[58].mxu0 %vm957_vm3, %v26031_v4  ;;  %v663_v4 = vrot.slane %v26131_v18, 1 }
 0x173   : > { %19157 = vmatmul.mubr.msk.f32.gmra.mrb[26].mxu1 %vm957_vm3, %v26203_v38  ;;  %1479 = vmatprep.mubr.f32.mxu0 %v31451_v0 }
 0x174   : > { %1851 = vmatprep.mubr.f32.mxu1 %v31451_v0 }
 0x176   : > { %19122 = vmatmul.mubr.msk.f32.gmra.mrb[60].mxu0 %vm957_vm3, %v26035_v5 }
 0x177   : > { %19158 = vmatmul.mubr.msk.f32.gmra.mrb[28].mxu1 %vm957_vm3, %v26212_v40  ;;  %1485 = vmatprep.mubr.f32.mxu0 %v31451_v0 }
 0x178   : > { %1857 = vmatprep.mubr.f32.mxu1 %v31451_v0 }
 0x17a   : > { %19123 = vmatmul.mubr.msk.f32.gmra.mrb[62].mxu0 %vm957_vm3, %v26049_v6  ;;  %v667_v6 = vrot.slane %v26140_v23, 1 }
 0x17b   : > { %19159 = vmatmul.mubr.msk.f32.gmra.mrb[30].mxu1 %vm957_vm3, %v26221_v41  ;;  %1606 = vmatprep.mubr.f32.mxu0 %v31451_v0 }
 0x17c   : > { %2121 = vmatprep.mubr.f32.mxu1 %v31451_v0  ;;  %v26322_v12 = vsel %vm651_vm4, %v667_v6, %v668_v8  ;;  %v26538_v6 = vld [vmem:[%s25862_s24] sm:$0xff] }
 0x17e   : > { %19126 = vmatmul.mubr.msk.f32.vlgmr.msra.gmra.mrb[0].mxu0 %vm957_vm3, %v26062_v13  ;;  %v670_v13 = vrot.slane %v590_v7, 1 }
 0x17f   : > { %19180 = vmatmul.mubr.msk.f32.vlgmr.msra.gmra.mrb[32].mxu1 %vm957_vm3, %v26237_v54  ;;  %1612 = vmatprep.mubr.f32.mxu0 %v31451_v0 }
 0x180   : > { %2127 = vmatprep.mubr.f32.mxu1 %v31451_v0  ;;  %21740 = vmatpush1.bf16.msra.mxu1 %v25846_v14  ;;  %v26272_v14 = vsel %vm651_vm4, %v657_v61, %v658_v62  ;;  %v26334_v21 = vsel %vm651_vm4, %v668_v8, %v670_v13  ;;  %v25086_v61 = vld [vmem:[%s26056_s21 + $0x98] sm:$0xff]  ;;  %v26621_v13 = vld [vmem:[%s25862_s24 + $0x50] sm:$0xff] }
 0x181   : > { %21743 = vmatprep.subr.msk.bf16.mxu1 %vm25834_vm2, %v25852_v19  ;;  %21720 = vmatpush1.bf16.msra.mxu0 %v26239_v58  ;;  %v660_v19 = vrot.slane %v584_v60, 1  ;;  %v25085_v60 = vld [vmem:[%s26056_s21 + $0x90] sm:$0xff] }
 0x182   : > { %19127 = vmatmul.mubr.msk.f32.gmra.mrb[2].mxu0 %vm957_vm3, %v26073_v22  ;;  %21723 = vmatprep.subr.msk.bf16.mxu0 %vm25834_vm2, %v26243_v59  ;;  %v26343_v22 = vsel %vm651_vm4, %v672_v16, %v673_v20  ;;  %v26639_v16 = vld [vmem:[%s25862_s24 + $0x68] sm:$0xff] }
 0x183   : > { %19181 = vmatmul.mubr.msk.f32.gmra.mrb[34].mxu1 %vm957_vm3, %v26253_v63  ;;  %1618 = vmatprep.mubr.f32.mxu0 %v31451_v0 }
 0x184   : > { %2133 = vmatprep.mubr.f32.mxu1 %v31451_v0  ;;  %21746 = vmatpush1.bf16.msk.msra.mxu1 %vm25834_vm2, %v25870_v25  ;;  %v587_v25 = vld [vmem:[%s26056_s21 + $0x40] sm:$0x3] }
 0x185   : > { %21726 = vmatpush1.bf16.msk.msra.mxu0 %vm25834_vm2, %v26260_v2  ;;  %21758 = vmatprep.subr.bf16.mxu1 %v25946_v57  ;;  %v26292_v57 = vsel %vm651_vm4, %v658_v62, %v660_v19  ;;  %v665_v5 = vrot.slane %v587_v25, 1  ;;  %v25087_v62 = vld [vmem:[%s26056_s21 + $0xa8] sm:$0xff]  ;;  %v25088_v19 = vld [vmem:[%s26056_s21 + $0xb0] sm:$0xff] }
 0x186   : > { %19128 = vmatmul.mubr.msk.f32.gmra.mrb[4].mxu0 %vm957_vm3, %v26091_v27  ;;  %21748 = vmatprep.subr.bf16.mxu0 %v25903_v42  ;;  %v26301_v42 = vsel %vm651_vm4, %v662_v3, %v663_v4  ;;  %v675_v27 = vrot.slane %v593_v15, 1  ;;  %v888_v3 = vld [vmem:[#allocation2 + $0x198] sm:$0xff]  ;;  %v894_v25 = vld [vmem:[#allocation2 + $0x1c8] sm:$0xff]  ;;  %v26630_v15 = vld [vmem:[%s25862_s24 + $0x60] sm:$0xff] }
 0x187   : > { %19182 = vmatmul.mubr.msk.f32.gmra.mrb[36].mxu1 %vm957_vm3, %v26272_v14  ;;  %1624 = vmatprep.mubr.f32.mxu0 %v31451_v0  ;;  %v26313_v11 = vsel %vm651_vm4, %v663_v4, %v665_v5  ;;  %v886_v4 = vld [vmem:[#allocation2 + $0x188] sm:$0xff]  ;;  %v892_v5 = vld [vmem:[#allocation2 + $0x1b8] sm:$0xff]  ;;  %v26549_v7 = vpack.c.bf16 %v894_v25, %v888_v3  ;;  %v901_v25 = vld [vmem:[#allocation2 + $0x200] sm:$0xff] }
 0x188   : > { %2139 = vmatprep.mubr.f32.mxu1 %v31451_v0  ;;  %v26556_v8 = vpack.c.bf16 %v892_v5, %v886_v4  ;;  %v908_v3 = vld [vmem:[#allocation2 + $0x238] sm:$0xf]  ;;  %v907_v4 = vld [vmem:[#allocation2 + $0x230] sm:$0xf] }
 0x18a   : > { %19129 = vmatmul.mubr.msk.f32.gmra.mrb[6].mxu0 %vm957_vm3, %v26112_v10  ;;  %v596_v10 = vld [vmem:[%s26056_s21 + $0x88] sm:$0x3] }
 0x18b   : > { %19183 = vmatmul.mubr.msk.f32.gmra.mrb[38].mxu1 %vm957_vm3, %v26292_v57  ;;  %1630 = vmatprep.mubr.f32.mxu0 %v31451_v0 }
 0x18c   : > { %2145 = vmatprep.mubr.f32.mxu1 %v31451_v0 }
 0x18e   : > { %19130 = vmatmul.mubr.msk.f32.gmra.mrb[8].mxu0 %vm957_vm3, %v26122_v9  ;;  %v677_v9 = vrot.slane %v26176_v34, 1 }
 0x18f   : > { %19184 = vmatmul.mubr.msk.f32.gmra.mrb[40].mxu1 %vm957_vm3, %v26301_v42  ;;  %1636 = vmatprep.mubr.f32.mxu0 %v31451_v0 }
 0x190   : > { %2151 = vmatprep.mubr.f32.mxu1 %v31451_v0 }
 0x192   : > { %19131 = vmatmul.mubr.msk.f32.gmra.mrb[10].mxu0 %vm957_vm3, %v26131_v18  ;;  %v678_v18 = vrot.slane %v26185_v35, 1 }
 0x193   : > { %19185 = vmatmul.mubr.msk.f32.gmra.mrb[42].mxu1 %vm957_vm3, %v26313_v11  ;;  %1642 = vmatprep.mubr.f32.mxu0 %v31451_v0 }
 0x194   : > { %2157 = vmatprep.mubr.f32.mxu1 %v31451_v0 }
 0x196   : > { %19132 = vmatmul.mubr.msk.f32.gmra.mrb[12].mxu0 %vm957_vm3, %v26140_v23  ;;  %v26355_v23 = vsel %vm651_vm4, %v673_v20, %v675_v27  ;;  %v26648_v20 = vld [vmem:[%s25862_s24 + $0x78] sm:$0xff]  ;;  %v26657_v27 = vld [vmem:[%s25862_s24 + $0x80] sm:$0xff] }
 0x197   : > { %19186 = vmatmul.mubr.msk.f32.gmra.mrb[44].mxu1 %vm957_vm3, %v26322_v12  ;;  %1648 = vmatprep.mubr.f32.mxu0 %v31451_v0 }
 0x198   : > { %2163 = vmatprep.mubr.f32.mxu1 %v31451_v0 }
 0x19a   : > { %19133 = vmatmul.mubr.msk.f32.gmra.mrb[14].mxu0 %vm957_vm3, %v26149_v30  ;;  %v26364_v30 = vsel %vm651_vm4, %v677_v9, %v678_v18  ;;  %v26675_v9 = vld [vmem:[%s25862_s24 + $0x98] sm:$0xff] }
 0x19b   : > { %19187 = vmatmul.mubr.msk.f32.gmra.mrb[46].mxu1 %vm957_vm3, %v26334_v21  ;;  %1654 = vmatprep.mubr.f32.mxu0 %v31451_v0 }
 0x19c   : > { %2169 = vmatprep.mubr.f32.mxu1 %v31451_v0 }
 0x19e   : > { %19134 = vmatmul.mubr.msk.f32.gmra.mrb[16].mxu0 %vm957_vm3, %v26158_v31  ;;  %v680_v31 = vrot.slane %v596_v10, 1  ;;  %v26666_v10 = vld [vmem:[%s25862_s24 + $0x90] sm:$0xff] }
 0x19f   : > { %19188 = vmatmul.mubr.msk.f32.gmra.mrb[48].mxu1 %vm957_vm3, %v26343_v22  ;;  %1660 = vmatprep.mubr.f32.mxu0 %v31451_v0 }
 0x1a0   : > { %2175 = vmatprep.mubr.f32.mxu1 %v31451_v0  ;;  %v26376_v45 = vsel %vm651_vm4, %v678_v18, %v680_v31  ;;  %v26684_v18 = vld [vmem:[%s25862_s24 + $0xa8] sm:$0xff]  ;;  %v887_v31 = vld [vmem:[#allocation2 + $0x190] sm:$0xff] }
 0x1a2   : > { %19135 = vmatmul.mubr.msk.f32.gmra.mrb[18].mxu0 %vm957_vm3, %v26167_v33  ;;  %v599_v33 = vld [vmem:[%s26056_s21 + $0xa0] sm:$0x3] }
 0x1a3   : > { %19189 = vmatmul.mubr.msk.f32.gmra.mrb[50].mxu1 %vm957_vm3, %v26355_v23  ;;  %1666 = vmatprep.mubr.f32.mxu0 %v31451_v0  ;;  %v685_v46 = vrot.slane %v599_v33, 1  ;;  %v893_v33 = vld [vmem:[#allocation2 + $0x1c0] sm:$0xff] }
 0x1a4   : > { %2181 = vmatprep.mubr.f32.mxu1 %v31451_v0 }
 0x1a5   : > { %v26397_v51 = vsel %vm651_vm4, %v683_v44, %v685_v46  ;;  %v885_v46 = vld [vmem:[#allocation2 + $0x180] sm:$0xff] }
 0x1a6   : > { %19136 = vmatmul.mubr.msk.f32.gmra.mrb[20].mxu0 %vm957_vm3, %v26176_v34  ;;  %v26385_v34 = vsel %vm651_vm4, %v682_v43, %v683_v44  ;;  %v900_v43 = vld [vmem:[#allocation2 + $0x1f8] sm:$0xff]  ;;  %v906_v44 = vld [vmem:[#allocation2 + $0x228] sm:$0xf] }
 0x1a7   : > { %19190 = vmatmul.mubr.msk.f32.gmra.mrb[52].mxu1 %vm957_vm3, %v26364_v30  ;;  %1672 = vmatprep.mubr.f32.mxu0 %v31451_v0 }
 0x1a8   : > { %2187 = vmatprep.mubr.f32.mxu1 %v31451_v0 }
 0x1aa   : > { %19137 = vmatmul.mubr.msk.f32.gmra.mrb[22].mxu0 %vm957_vm3, %v26185_v35  ;;  %v602_v35 = vld [vmem:[%s26056_s21 + $0xb8] sm:$0x3] }
 0x1ab   : > { %19191 = vmatmul.mubr.msk.f32.gmra.mrb[54].mxu1 %vm957_vm3, %v26376_v45  ;;  %1678 = vmatprep.mubr.f32.mxu0 %v31451_v0  ;;  %v690_v52 = vrot.slane %v602_v35, 1  ;;  %v891_v35 = vld [vmem:[#allocation2 + $0x1b0] sm:$0xff] }
 0x1ac   : > { %2193 = vmatprep.mubr.f32.mxu1 %v31451_v0 }
 0x1ae   : > { %19138 = vmatmul.mubr.msk.f32.gmra.mrb[24].mxu0 %vm957_vm3, %v26194_v37  ;;  %v26406_v37 = vsel %vm651_vm4, %v687_v47, %v688_v50  ;;  %v898_v47 = vld [vmem:[#allocation2 + $0x1e8] sm:$0xff] }
 0x1af   : > { %19192 = vmatmul.mubr.msk.f32.gmra.mrb[56].mxu1 %vm957_vm3, %v26385_v34  ;;  %1684 = vmatprep.mubr.f32.mxu0 %v31451_v0 }
 0x1b0   : > { %2199 = vmatprep.mubr.f32.mxu1 %v31451_v0 }
 0x1b2   : > { %19139 = vmatmul.mubr.msk.f32.gmra.mrb[26].mxu0 %vm957_vm3, %v26203_v38  ;;  %v26415_v38 = vsel %vm651_vm4, %v688_v50, %v690_v52  ;;  %v904_v50 = vld [vmem:[#allocation2 + $0x218] sm:$0xf]  ;;  %v26693_v52 = vld [vmem:[%s25862_s24 + $0xb0] sm:$0xff] }
 0x1b3   : > { %19193 = vmatmul.mubr.msk.f32.gmra.mrb[58].mxu1 %vm957_vm3, %v26397_v51  ;;  %1690 = vmatprep.mubr.f32.mxu0 %v31451_v0 }
 0x1b4   : > { %2205 = vmatprep.mubr.f32.mxu1 %v31451_v0 }
 0x1b6   : > { %19140 = vmatmul.mubr.msk.f32.gmra.mrb[28].mxu0 %vm957_vm3, %v26212_v40  ;;  %v25073_v40 = vld [vmem:[%s26056_s21] sm:$0xff] }
 0x1b7   : > { %19194 = vmatmul.mubr.msk.f32.gmra.mrb[60].mxu1 %vm957_vm3, %v26406_v37  ;;  %1696 = vmatprep.mubr.f32.mxu0 %v31451_v0 }
 0x1b8   : > { %2211 = vmatprep.mubr.f32.mxu1 %v31451_v0 }
 0x1ba   : > { %19141 = vmatmul.mubr.msk.f32.gmra.mrb[30].mxu0 %vm957_vm3, %v26221_v41  ;;  %v25074_v41 = vld [vmem:[%s26056_s21 + $0x8] sm:$0xff] }
 0x1bb   : > { %19195 = vmatmul.mubr.msk.f32.gmra.mrb[62].mxu1 %vm957_vm3, %v26415_v38  ;;  %1928 = vmatprep.mubr.f32.mxu0 %v31451_v0 }
 0x1bc   : > { %2282 = vmatprep.mubr.f32.mxu1 %v31451_v0 }
 0x1be   : > { %19162 = vmatmul.mubr.msk.f32.vlgmr.msra.gmra.mrb[32].mxu0 %vm957_vm3, %v25073_v40  ;;  %v899_v40 = vld [vmem:[#allocation2 + $0x1f0] sm:$0xff] }
 0x1bf   : > { %19198 = vmatmul.mubr.msk.f32.vlgmr.msra.gmra.mrb[64].mxu1 %vm957_vm3, %v26237_v54  ;;  %1934 = vmatprep.mubr.f32.mxu0 %v31451_v0 }
 0x1c0   : > { %2288 = vmatprep.mubr.f32.mxu1 %v31451_v0  ;;  %21760 = vmatpush1.bf16.msra.mxu1 %v26068_v17  ;;  %v25079_v17 = vld [vmem:[%s26056_s21 + $0x48] sm:$0xff] }
 0x1c1   : > { %21763 = vmatprep.subr.msk.bf16.mxu1 %vm25834_vm2, %v26075_v24  ;;  %21750 = vmatpush1.bf16.msra.mxu0 %v25917_v48  ;;  %v25075_v48 = vld [vmem:[%s26056_s21 + $0x18] sm:$0xff]  ;;  %v25080_v24 = vld [vmem:[%s26056_s21 + $0x50] sm:$0xff] }
 0x1c2   : > { %19163 = vmatmul.mubr.msk.f32.gmra.mrb[34].mxu0 %vm957_vm3, %v25074_v41  ;;  %21753 = vmatprep.subr.msk.bf16.mxu0 %vm25834_vm2, %v25920_v49  ;;  %v25076_v49 = vld [vmem:[%s26056_s21 + $0x20] sm:$0xff] }
 0x1c3   : > { %19199 = vmatmul.mubr.msk.f32.gmra.mrb[66].mxu1 %vm957_vm3, %v26253_v63  ;;  %1940 = vmatprep.mubr.f32.mxu0 %v31451_v0  ;;  %v905_v41 = vld [vmem:[#allocation2 + $0x220] sm:$0xf] }
 0x1c4   : > { %2294 = vmatprep.mubr.f32.mxu1 %v31451_v0  ;;  %21766 = vmatpush1.bf16.msk.msra.mxu1 %vm25834_vm2, %v26086_v26  ;;  %v25081_v26 = vld [vmem:[%s26056_s21 + $0x60] sm:$0xff] }
 0x1c5   : > { %21756 = vmatpush1.bf16.msk.msra.mxu0 %vm25834_vm2, %v25933_v53  ;;  %21768 = vmatprep.subr.bf16.mxu1 %v25872_v29  ;;  %v25077_v29 = vld [vmem:[%s26056_s21 + $0x30] sm:$0xff]  ;;  %v25078_v53 = vld [vmem:[%s26056_s21 + $0x38] sm:$0xff] }
 0x1c6   : > { %19164 = vmatmul.mubr.msk.f32.gmra.mrb[36].mxu0 %vm957_vm3, %v25075_v48  ;;  %21778 = vmatprep.subr.bf16.mxu0 %v26096_v28  ;;  %v25082_v28 = vld [vmem:[%s26056_s21 + $0x68] sm:$0xff]  ;;  %v26699_v48 = vpack.c.bf16 %v893_v33, %v887_v31 }
 0x1c7   : > { %19200 = vmatmul.mubr.msk.f32.gmra.mrb[68].mxu1 %vm957_vm3, %v26272_v14  ;;  %1946 = vmatprep.mubr.f32.mxu0 %v31451_v0 }
 0x1c8   : > { %2300 = vmatprep.mubr.f32.mxu1 %v31451_v0 }
 0x1ca   : > { %19165 = vmatmul.mubr.msk.f32.gmra.mrb[38].mxu0 %vm957_vm3, %v25076_v49  ;;  %v897_v49 = vld [vmem:[#allocation2 + $0x1e0] sm:$0xff] }
 0x1cb   : > { %19201 = vmatmul.mubr.msk.f32.gmra.mrb[70].mxu1 %vm957_vm3, %v26292_v57  ;;  %1952 = vmatprep.mubr.f32.mxu0 %v31451_v0 }
 0x1cc   : > { %2306 = vmatprep.mubr.f32.mxu1 %v31451_v0 }
 0x1ce   : > { %19166 = vmatmul.mubr.msk.f32.gmra.mrb[40].mxu0 %vm957_vm3, %v25077_v29  ;;  %v903_v29 = vld [vmem:[#allocation2 + $0x210] sm:$0xf] }
 0x1cf   : > { %19202 = vmatmul.mubr.msk.f32.gmra.mrb[72].mxu1 %vm957_vm3, %v26301_v42  ;;  %1958 = vmatprep.mubr.f32.mxu0 %v31451_v0 }
 0x1d0   : > { %2312 = vmatprep.mubr.f32.mxu1 %v31451_v0 }
 0x1d2   : > { %19167 = vmatmul.mubr.msk.f32.gmra.mrb[42].mxu0 %vm957_vm3, %v25078_v53  ;;  %v26701_v53 = vpack.c.bf16 %v906_v44, %v900_v43  ;;  %v25108_v43 = vld [vmem:[%s25862_s24 + $0x20] sm:$0xff] }
 0x1d3   : > { %19203 = vmatmul.mubr.msk.f32.gmra.mrb[74].mxu1 %vm957_vm3, %v26313_v11  ;;  %1964 = vmatprep.mubr.f32.mxu0 %v31451_v0  ;;  %v763_v44 = vrot.slane %v25108_v43, 1  ;;  %v915_v43 = vld [vmem:[#allocation2 + $0x270] sm:$0xff] }
 0x1d4   : > { %2318 = vmatprep.mubr.f32.mxu1 %v31451_v0 }
 0x1d6   : > { %19168 = vmatmul.mubr.msk.f32.gmra.mrb[44].mxu0 %vm957_vm3, %v25079_v17  ;;  %v26703_v17 = vpack.c.bf16 %v891_v35, %v885_v46 }
 0x1d7   : > { %19204 = vmatmul.mubr.msk.f32.gmra.mrb[76].mxu1 %vm957_vm3, %v26322_v12  ;;  %1970 = vmatprep.mubr.f32.mxu0 %v31451_v0 }
 0x1d8   : > { %2324 = vmatprep.mubr.f32.mxu1 %v31451_v0 }
 0x1da   : > { %19169 = vmatmul.mubr.msk.f32.gmra.mrb[46].mxu0 %vm957_vm3, %v25080_v24  ;;  %v890_v24 = vld [vmem:[#allocation2 + $0x1a8] sm:$0xff] }
 0x1db   : > { %19205 = vmatmul.mubr.msk.f32.gmra.mrb[78].mxu1 %vm957_vm3, %v26334_v21  ;;  %1976 = vmatprep.mubr.f32.mxu0 %v31451_v0 }
 0x1dc   : > { %2330 = vmatprep.mubr.f32.mxu1 %v31451_v0 }
 0x1de   : > { %19170 = vmatmul.mubr.msk.f32.gmra.mrb[48].mxu0 %vm957_vm3, %v25081_v26  ;;  %v26707_v26 = vpack.c.bf16 %v904_v50, %v898_v47  ;;  %v25110_v47 = vld [vmem:[%s25862_s24 + $0x38] sm:$0xff] }
 0x1df   : > { %19206 = vmatmul.mubr.msk.f32.gmra.mrb[80].mxu1 %vm957_vm3, %v26343_v22  ;;  %1982 = vmatprep.mubr.f32.mxu0 %v31451_v0  ;;  %v768_v50 = vrot.slane %v25110_v47, 1  ;;  %v929_v47 = vld [vmem:[#allocation2 + $0x2e0] sm:$0xf] }
 0x1e0   : > { %2336 = vmatprep.mubr.f32.mxu1 %v31451_v0 }
 0x1e2   : > { %19171 = vmatmul.mubr.msk.f32.gmra.mrb[50].mxu0 %vm957_vm3, %v25082_v28  ;;  %v896_v28 = vld [vmem:[#allocation2 + $0x1d8] sm:$0xff] }
 0x1e3   : > { %19207 = vmatmul.mubr.msk.f32.gmra.mrb[82].mxu1 %vm957_vm3, %v26355_v23  ;;  %1988 = vmatprep.mubr.f32.mxu0 %v31451_v0 }
 0x1e4   : > { %2342 = vmatprep.mubr.f32.mxu1 %v31451_v0 }
 0x1e6   : > { %19172 = vmatmul.mubr.msk.f32.gmra.mrb[52].mxu0 %vm957_vm3, %v25083_v55  ;;  %v26714_v55 = vpack.c.bf16 %v905_v41, %v899_v40  ;;  %v25111_v40 = vld [vmem:[%s25862_s24 + $0x48] sm:$0xff] }
 0x1e7   : > { %19208 = vmatmul.mubr.msk.f32.gmra.mrb[84].mxu1 %vm957_vm3, %v26364_v30  ;;  %1994 = vmatprep.mubr.f32.mxu0 %v31451_v0  ;;  %v772_v41 = vrot.slane %v25111_v40, 1  ;;  %v927_v40 = vld [vmem:[#allocation2 + $0x2d0] sm:$0xf] }
 0x1e8   : > { %2348 = vmatprep.mubr.f32.mxu1 %v31451_v0 }
 0x1ea   : > { %19173 = vmatmul.mubr.msk.f32.gmra.mrb[54].mxu0 %vm957_vm3, %v25084_v56  ;;  %v26720_v56 = vpack.c.bf16 %v903_v29, %v897_v49 }
 0x1eb   : > { %19209 = vmatmul.mubr.msk.f32.gmra.mrb[86].mxu1 %vm957_vm3, %v26376_v45  ;;  %2000 = vmatprep.mubr.f32.mxu0 %v31451_v0 }
 0x1ec   : > { %2354 = vmatprep.mubr.f32.mxu1 %v31451_v0 }
 0x1ee   : > { %19174 = vmatmul.mubr.msk.f32.gmra.mrb[56].mxu0 %vm957_vm3, %v25085_v60  ;;  %v26727_v60 = vpack.c.bf16 %v896_v28, %v890_v24 }
 0x1ef   : > { %19210 = vmatmul.mubr.msk.f32.gmra.mrb[88].mxu1 %vm957_vm3, %v26385_v34  ;;  %2006 = vmatprep.mubr.f32.mxu0 %v31451_v0 }
 0x1f0   : > { %2360 = vmatprep.mubr.f32.mxu1 %v31451_v0 }
 0x1f2   : > { %19175 = vmatmul.mubr.msk.f32.gmra.mrb[58].mxu0 %vm957_vm3, %v25086_v61  ;;  %v889_v61 = vld [vmem:[#allocation2 + $0x1a0] sm:$0xff] }
 0x1f3   : > { %19211 = vmatmul.mubr.msk.f32.gmra.mrb[90].mxu1 %vm957_vm3, %v26397_v51  ;;  %2012 = vmatprep.mubr.f32.mxu0 %v31451_v0 }
 0x1f4   : > { %2366 = vmatprep.mubr.f32.mxu1 %v31451_v0 }
 0x1f6   : > { %19176 = vmatmul.mubr.msk.f32.gmra.mrb[60].mxu0 %vm957_vm3, %v25087_v62  ;;  %v895_v62 = vld [vmem:[#allocation2 + $0x1d0] sm:$0xff] }
 0x1f7   : > { %19212 = vmatmul.mubr.msk.f32.gmra.mrb[92].mxu1 %vm957_vm3, %v26406_v37  ;;  %2018 = vmatprep.mubr.f32.mxu0 %v31451_v0  ;;  %v26825_v5 = vpack.c.bf16 %v895_v62, %v889_v61  ;;  %v25115_v62 = vld [vmem:[%s25862_s24 + $0x78] sm:$0xff] }
 0x1f8   : > { %2372 = vmatprep.mubr.f32.mxu1 %v31451_v0 }
 0x1fa   : > { %19177 = vmatmul.mubr.msk.f32.gmra.mrb[62].mxu0 %vm957_vm3, %v25088_v19  ;;  %v902_v19 = vld [vmem:[#allocation2 + $0x208] sm:$0xff] }
 0x1fb   : > { %19213 = vmatmul.mubr.msk.f32.gmra.mrb[94].mxu1 %vm957_vm3, %v26415_v38  ;;  %2443 = vmatprep.mubr.f32.mxu0 %v31451_v0 }
 0x1fc   : > { %2604 = vmatprep.mubr.f32.mxu1 %v31451_v0 }
 0x1fe   : > { %19216 = vmatmul.mubr.msk.f32.vlgmr.msra.gmra.mrb[64].mxu0 %vm957_vm3, %v26237_v54 }
 0x1ff   : > { %19234 = vmatmul.mubr.msk.f32.vlgmr.msra.gmra.mrb[32].mxu1 %vm957_vm3, %v26538_v6  ;;  %2449 = vmatprep.mubr.f32.mxu0 %v31451_v0 }
 0x200   : > { %2610 = vmatprep.mubr.f32.mxu1 %v31451_v0  ;;  %21770 = vmatpush1.bf16.msra.mxu1 %v25883_v32  ;;  %v26559_v32 = vld [vmem:[%s25862_s24 + $0x8] sm:$0xff] }
 0x201   : > { %21773 = vmatprep.subr.msk.bf16.mxu1 %vm25834_vm2, %v25888_v36  ;;  %21780 = vmatpush1.bf16.msra.mxu0 %v26239_v58  ;;  %v26576_v36 = vld [vmem:[%s25862_s24 + $0x18] sm:$0xff]  ;;  %v26594_v58 = vld [vmem:[%s25862_s24 + $0x30] sm:$0xff] }
 0x202   : > { %19217 = vmatmul.mubr.msk.f32.gmra.mrb[66].mxu0 %vm957_vm3, %v26253_v63  ;;  %21783 = vmatprep.subr.msk.bf16.mxu0 %vm25834_vm2, %v26243_v59  ;;  %v26603_v59 = vld [vmem:[%s25862_s24 + $0x38] sm:$0xff] }
 0x203   : > { %19235 = vmatmul.mubr.msk.f32.gmra.mrb[34].mxu1 %vm957_vm3, %v26559_v32  ;;  %2455 = vmatprep.mubr.f32.mxu0 %v31451_v0 }
 0x204   : > { %2616 = vmatprep.mubr.f32.mxu1 %v31451_v0  ;;  %21776 = vmatpush1.bf16.msk.msra.mxu1 %vm25834_vm2, %v25898_v39  ;;  %v26585_v39 = vld [vmem:[%s25862_s24 + $0x20] sm:$0xff] }
 0x205   : > { %21786 = vmatpush1.bf16.msk.msra.mxu0 %vm25834_vm2, %v26260_v2  ;;  %21798 = vmatprep.subr.bf16.mxu1 %v26549_v7  ;;  %v26612_v2 = vld [vmem:[%s25862_s24 + $0x48] sm:$0xff] }
 0x206   : > { %19218 = vmatmul.mubr.msk.f32.gmra.mrb[68].mxu0 %vm957_vm3, %v26272_v14  ;;  %21788 = vmatprep.subr.bf16.mxu0 %v26556_v8 }
 0x207   : > { %19236 = vmatmul.mubr.msk.f32.gmra.mrb[36].mxu1 %vm957_vm3, %v26576_v36  ;;  %2461 = vmatprep.mubr.f32.mxu0 %v31451_v0 }
 0x208   : > { %2622 = vmatprep.mubr.f32.mxu1 %v31451_v0 }
 0x20a   : > { %19219 = vmatmul.mubr.msk.f32.gmra.mrb[70].mxu0 %vm957_vm3, %v26292_v57 }
 0x20b   : > { %19237 = vmatmul.mubr.msk.f32.gmra.mrb[38].mxu1 %vm957_vm3, %v26585_v39  ;;  %2467 = vmatprep.mubr.f32.mxu0 %v31451_v0 }
 0x20c   : > { %2628 = vmatprep.mubr.f32.mxu1 %v31451_v0 }
 0x20e   : > { %19220 = vmatmul.mubr.msk.f32.gmra.mrb[72].mxu0 %vm957_vm3, %v26301_v42 }
 0x20f   : > { %19238 = vmatmul.mubr.msk.f32.gmra.mrb[40].mxu1 %vm957_vm3, %v26594_v58  ;;  %2473 = vmatprep.mubr.f32.mxu0 %v31451_v0 }
 0x210   : > { %2634 = vmatprep.mubr.f32.mxu1 %v31451_v0 }
 0x212   : > { %19221 = vmatmul.mubr.msk.f32.gmra.mrb[74].mxu0 %vm957_vm3, %v26313_v11 }
 0x213   : > { %19239 = vmatmul.mubr.msk.f32.gmra.mrb[42].mxu1 %vm957_vm3, %v26603_v59  ;;  %2479 = vmatprep.mubr.f32.mxu0 %v31451_v0 }
 0x214   : > { %2640 = vmatprep.mubr.f32.mxu1 %v31451_v0 }
 0x216   : > { %19222 = vmatmul.mubr.msk.f32.gmra.mrb[76].mxu0 %vm957_vm3, %v26322_v12 }
 0x217   : > { %19240 = vmatmul.mubr.msk.f32.gmra.mrb[44].mxu1 %vm957_vm3, %v26612_v2  ;;  %2485 = vmatprep.mubr.f32.mxu0 %v31451_v0 }
 0x218   : > { %2646 = vmatprep.mubr.f32.mxu1 %v31451_v0 }
 0x21a   : > { %19223 = vmatmul.mubr.msk.f32.gmra.mrb[78].mxu0 %vm957_vm3, %v26334_v21 }
 0x21b   : > { %19241 = vmatmul.mubr.msk.f32.gmra.mrb[46].mxu1 %vm957_vm3, %v26621_v13  ;;  %2491 = vmatprep.mubr.f32.mxu0 %v31451_v0 }
 0x21c   : > { %2652 = vmatprep.mubr.f32.mxu1 %v31451_v0 }
 0x21e   : > { %19224 = vmatmul.mubr.msk.f32.gmra.mrb[80].mxu0 %vm957_vm3, %v26343_v22 }
 0x21f   : > { %19242 = vmatmul.mubr.msk.f32.gmra.mrb[48].mxu1 %vm957_vm3, %v26630_v15  ;;  %2497 = vmatprep.mubr.f32.mxu0 %v31451_v0 }
 0x220   : > { %2658 = vmatprep.mubr.f32.mxu1 %v31451_v0 }
 0x222   : > { %19225 = vmatmul.mubr.msk.f32.gmra.mrb[82].mxu0 %vm957_vm3, %v26355_v23 }
 0x223   : > { %19243 = vmatmul.mubr.msk.f32.gmra.mrb[50].mxu1 %vm957_vm3, %v26639_v16  ;;  %2503 = vmatprep.mubr.f32.mxu0 %v31451_v0 }
 0x224   : > { %2664 = vmatprep.mubr.f32.mxu1 %v31451_v0 }
 0x226   : > { %19226 = vmatmul.mubr.msk.f32.gmra.mrb[84].mxu0 %vm957_vm3, %v26364_v30 }
 0x227   : > { %19244 = vmatmul.mubr.msk.f32.gmra.mrb[52].mxu1 %vm957_vm3, %v26648_v20  ;;  %2509 = vmatprep.mubr.f32.mxu0 %v31451_v0 }
 0x228   : > { %2670 = vmatprep.mubr.f32.mxu1 %v31451_v0 }
 0x22a   : > { %19227 = vmatmul.mubr.msk.f32.gmra.mrb[86].mxu0 %vm957_vm3, %v26376_v45 }
 0x22b   : > { %19245 = vmatmul.mubr.msk.f32.gmra.mrb[54].mxu1 %vm957_vm3, %v26657_v27  ;;  %2515 = vmatprep.mubr.f32.mxu0 %v31451_v0 }
 0x22c   : > { %2676 = vmatprep.mubr.f32.mxu1 %v31451_v0 }
 0x22e   : > { %19228 = vmatmul.mubr.msk.f32.gmra.mrb[88].mxu0 %vm957_vm3, %v26385_v34 }
 0x22f   : > { %19246 = vmatmul.mubr.msk.f32.gmra.mrb[56].mxu1 %vm957_vm3, %v26666_v10  ;;  %2521 = vmatprep.mubr.f32.mxu0 %v31451_v0 }
 0x230   : > { %2682 = vmatprep.mubr.f32.mxu1 %v31451_v0 }
 0x232   : > { %19229 = vmatmul.mubr.msk.f32.gmra.mrb[90].mxu0 %vm957_vm3, %v26397_v51 }
 0x233   : > { %19247 = vmatmul.mubr.msk.f32.gmra.mrb[58].mxu1 %vm957_vm3, %v26675_v9  ;;  %2527 = vmatprep.mubr.f32.mxu0 %v31451_v0 }
 0x234   : > { %2688 = vmatprep.mubr.f32.mxu1 %v31451_v0 }
 0x236   : > { %19230 = vmatmul.mubr.msk.f32.gmra.mrb[92].mxu0 %vm957_vm3, %v26406_v37 }
 0x237   : > { %19248 = vmatmul.mubr.msk.f32.gmra.mrb[60].mxu1 %vm957_vm3, %v26684_v18  ;;  %2533 = vmatprep.mubr.f32.mxu0 %v31451_v0 }
 0x238   : > { %2694 = vmatprep.mubr.f32.mxu1 %v31451_v0 }
 0x23a   : > { %19231 = vmatmul.mubr.msk.f32.gmra.mrb[94].mxu0 %vm957_vm3, %v26415_v38 }
 0x23b   : > { %19249 = vmatmul.mubr.msk.f32.gmra.mrb[62].mxu1 %vm957_vm3, %v26693_v52  ;;  %2926 = vmatprep.mubr.f32.mxu0 %v31451_v0 }
 0x23c   : > { %2765 = vmatprep.mubr.f32.mxu1 %v31451_v0 }
 0x23e   : > { %19270 = vmatmul.mubr.msk.f32.vlgmr.msra.gmra.mrb[64].mxu0 %vm957_vm3, %v26538_v6 }
 0x23f   : > { %19252 = vmatmul.mubr.msk.f32.vlgmr.msra.gmra.mrb[64].mxu1 %vm957_vm3, %v26538_v6  ;;  %2932 = vmatprep.mubr.f32.mxu0 %v31451_v0  ;;  %v26829_v6 = vpack.c.bf16 %v908_v3, %v902_v19  ;;  %v782_v19 = vrot.slane %v25115_v62, 1  ;;  %v25116_v3 = vld [vmem:[%s25862_s24 + $0x80] sm:$0xff] }
 0x240   : > { %2771 = vmatprep.mubr.f32.mxu1 %v31451_v0  ;;  %21800 = vmatpush1.bf16.msra.mxu1 %v26699_v48  ;;  %v925_v62 = vld [vmem:[#allocation2 + $0x2c0] sm:$0xff] }
 0x241   : > { %21803 = vmatprep.subr.msk.bf16.mxu1 %vm25834_vm2, %v26701_v53  ;;  %21790 = vmatpush1.bf16.msra.mxu0 %v26703_v17 }
 0x242   : > { %19271 = vmatmul.mubr.msk.f32.gmra.mrb[66].mxu0 %vm957_vm3, %v26559_v32  ;;  %21793 = vmatprep.subr.msk.bf16.mxu0 %vm25834_vm2, %v26707_v26 }
 0x243   : > { %19253 = vmatmul.mubr.msk.f32.gmra.mrb[66].mxu1 %vm957_vm3, %v26559_v32  ;;  %2938 = vmatprep.mubr.f32.mxu0 %v31451_v0 }
 0x244   : > { %2777 = vmatprep.mubr.f32.mxu1 %v31451_v0  ;;  %21806 = vmatpush1.bf16.msk.msra.mxu1 %vm25834_vm2, %v26714_v55 }
 0x245   : > { %21796 = vmatpush1.bf16.msk.msra.mxu0 %vm25834_vm2, %v26720_v56  ;;  %21818 = vmatprep.subr.bf16.mxu1 %v26556_v8  ;;  %v26840_v8 = vpack.c.bf16 %v907_v4, %v901_v25  ;;  %v783_v25 = vrot.slane %v25116_v3, 1  ;;  %v620_v4 = vld [vmem:[%s25862_s24 + $0x88] sm:$0x3] }
 0x246   : > { %19272 = vmatmul.mubr.msk.f32.gmra.mrb[68].mxu0 %vm957_vm3, %v26576_v36  ;;  %21808 = vmatprep.subr.bf16.mxu0 %v26727_v60 }
 0x247   : > { %19254 = vmatmul.mubr.msk.f32.gmra.mrb[68].mxu1 %vm957_vm3, %v26576_v36  ;;  %2944 = vmatprep.mubr.f32.mxu0 %v31451_v0  ;;  %v25106_v36 = vld [vmem:[%s25862_s24 + $0x8] sm:$0xff] }
 0x248   : > { %2783 = vmatprep.mubr.f32.mxu1 %v31451_v0 }
 0x24a   : > { %19273 = vmatmul.mubr.msk.f32.gmra.mrb[70].mxu0 %vm957_vm3, %v26585_v39 }
 0x24b   : > { %19255 = vmatmul.mubr.msk.f32.gmra.mrb[70].mxu1 %vm957_vm3, %v26585_v39  ;;  %2950 = vmatprep.mubr.f32.mxu0 %v31451_v0  ;;  %v758_v39 = vrot.slane %v25106_v36, 1  ;;  %v623_v36 = vld [vmem:[%s25862_s24 + $0xa0] sm:$0x3] }
 0x24c   : > { %2789 = vmatprep.mubr.f32.mxu1 %v31451_v0 }
 0x24e   : > { %19274 = vmatmul.mubr.msk.f32.gmra.mrb[72].mxu0 %vm957_vm3, %v26594_v58 }
 0x24f   : > { %19256 = vmatmul.mubr.msk.f32.gmra.mrb[72].mxu1 %vm957_vm3, %v26594_v58  ;;  %2956 = vmatprep.mubr.f32.mxu0 %v31451_v0  ;;  %v605_v58 = vld [vmem:[%s25862_s24 + $0x10] sm:$0x3] }
 0x250   : > { %2795 = vmatprep.mubr.f32.mxu1 %v31451_v0 }
 0x252   : > { %19275 = vmatmul.mubr.msk.f32.gmra.mrb[74].mxu0 %vm957_vm3, %v26603_v59 }
 0x253   : > { %19257 = vmatmul.mubr.msk.f32.gmra.mrb[74].mxu1 %vm957_vm3, %v26603_v59  ;;  %2962 = vmatprep.mubr.f32.mxu0 %v31451_v0  ;;  %v608_v59 = vld [vmem:[%s25862_s24 + $0x28] sm:$0x3] }
 0x254   : > { %2801 = vmatprep.mubr.f32.mxu1 %v31451_v0  ;;  %v765_v46 = vrot.slane %v608_v59, 1 }
 0x256   : > { %19276 = vmatmul.mubr.msk.f32.gmra.mrb[76].mxu0 %vm957_vm3, %v26612_v2 }
 0x257   : > { %19258 = vmatmul.mubr.msk.f32.gmra.mrb[76].mxu1 %vm957_vm3, %v26612_v2  ;;  %2968 = vmatprep.mubr.f32.mxu0 %v31451_v0 }
 0x258   : > { %2807 = vmatprep.mubr.f32.mxu1 %v31451_v0 }
 0x25a   : > { %19277 = vmatmul.mubr.msk.f32.gmra.mrb[78].mxu0 %vm957_vm3, %v26621_v13 }
 0x25b   : > { %19259 = vmatmul.mubr.msk.f32.gmra.mrb[78].mxu1 %vm957_vm3, %v26621_v13  ;;  %2974 = vmatprep.mubr.f32.mxu0 %v31451_v0  ;;  %v760_v13 = vrot.slane %v605_v58, 1  ;;  %v25119_v58 = vld [vmem:[%s25862_s24 + $0xa8] sm:$0xff] }
 0x25c   : > { %2813 = vmatprep.mubr.f32.mxu1 %v31451_v0  ;;  %v792_v59 = vrot.slane %v25119_v58, 1  ;;  %v940_v58 = vld [vmem:[#allocation2 + $0x338] sm:$0xff] }
 0x25d   : > { %v26962_v33 = vsel %vm651_vm4, %v758_v39, %v760_v13  ;;  %v25120_v13 = vld [vmem:[%s25862_s24 + $0xb0] sm:$0xff] }
 0x25e   : > { %19278 = vmatmul.mubr.msk.f32.gmra.mrb[80].mxu0 %vm957_vm3, %v26630_v15 }
 0x25f   : > { %19260 = vmatmul.mubr.msk.f32.gmra.mrb[80].mxu1 %vm957_vm3, %v26630_v15  ;;  %2980 = vmatprep.mubr.f32.mxu0 %v31451_v0  ;;  %v611_v15 = vld [vmem:[%s25862_s24 + $0x40] sm:$0x3] }
 0x260   : > { %2819 = vmatprep.mubr.f32.mxu1 %v31451_v0 }
 0x262   : > { %19279 = vmatmul.mubr.msk.f32.gmra.mrb[82].mxu0 %vm957_vm3, %v26639_v16 }
 0x263   : > { %19261 = vmatmul.mubr.msk.f32.gmra.mrb[82].mxu1 %vm957_vm3, %v26639_v16  ;;  %2986 = vmatprep.mubr.f32.mxu0 %v31451_v0  ;;  %v912_v16 = vld [vmem:[#allocation2 + $0x258] sm:$0xff] }
 0x264   : > { %2825 = vmatprep.mubr.f32.mxu1 %v31451_v0 }
 0x266   : > { %19280 = vmatmul.mubr.msk.f32.gmra.mrb[84].mxu0 %vm957_vm3, %v26648_v20 }
 0x267   : > { %19262 = vmatmul.mubr.msk.f32.gmra.mrb[84].mxu1 %vm957_vm3, %v26648_v20  ;;  %2992 = vmatprep.mubr.f32.mxu0 %v31451_v0  ;;  %v918_v20 = vld [vmem:[#allocation2 + $0x288] sm:$0xff] }
 0x268   : > { %2831 = vmatprep.mubr.f32.mxu1 %v31451_v0  ;;  %v26973_v49 = vpack.c.bf16 %v918_v20, %v912_v16  ;;  %v626_v16 = vld [vmem:[%s25862_s24 + $0xb8] sm:$0x3] }
 0x269   : > { %v795_v20 = vrot.slane %v626_v16, 1 }
 0x26a   : > { %19281 = vmatmul.mubr.msk.f32.gmra.mrb[86].mxu0 %vm957_vm3, %v26657_v27 }
 0x26b   : > { %19263 = vmatmul.mubr.msk.f32.gmra.mrb[86].mxu1 %vm957_vm3, %v26657_v27  ;;  %2998 = vmatprep.mubr.f32.mxu0 %v31451_v0  ;;  %v26952_v27 = vld [vmem:[%s25862_s24 + $0x58] sm:$0x3] }
 0x26c   : > { %2837 = vmatprep.mubr.f32.mxu1 %v31451_v0 }
 0x26e   : > { %19282 = vmatmul.mubr.msk.f32.gmra.mrb[88].mxu0 %vm957_vm3, %v26666_v10 }
 0x26f   : > { %19264 = vmatmul.mubr.msk.f32.gmra.mrb[88].mxu1 %vm957_vm3, %v26666_v10  ;;  %3004 = vmatprep.mubr.f32.mxu0 %v31451_v0  ;;  %v910_v10 = vld [vmem:[#allocation2 + $0x248] sm:$0xff] }
 0x270   : > { %2843 = vmatprep.mubr.f32.mxu1 %v31451_v0 }
 0x272   : > { %19283 = vmatmul.mubr.msk.f32.gmra.mrb[90].mxu0 %vm957_vm3, %v26675_v9 }
 0x273   : > { %19265 = vmatmul.mubr.msk.f32.gmra.mrb[90].mxu1 %vm957_vm3, %v26675_v9  ;;  %3010 = vmatprep.mubr.f32.mxu0 %v31451_v0  ;;  %v916_v9 = vld [vmem:[#allocation2 + $0x278] sm:$0xff] }
 0x274   : > { %2849 = vmatprep.mubr.f32.mxu1 %v31451_v0  ;;  %v26982_v24 = vpack.c.bf16 %v916_v9, %v910_v10  ;;  %v917_v10 = vld [vmem:[#allocation2 + $0x280] sm:$0xff]  ;;  %v924_v9 = vld [vmem:[#allocation2 + $0x2b8] sm:$0xff] }
 0x276   : > { %19284 = vmatmul.mubr.msk.f32.gmra.mrb[92].mxu0 %vm957_vm3, %v26684_v18 }
 0x277   : > { %19266 = vmatmul.mubr.msk.f32.gmra.mrb[92].mxu1 %vm957_vm3, %v26684_v18  ;;  %3016 = vmatprep.mubr.f32.mxu0 %v31451_v0  ;;  %v25107_v18 = vld [vmem:[%s25862_s24 + $0x18] sm:$0xff] }
 0x278   : > { %2855 = vmatprep.mubr.f32.mxu1 %v31451_v0  ;;  %v762_v31 = vrot.slane %v25107_v18, 1  ;;  %v930_v18 = vld [vmem:[#allocation2 + $0x2e8] sm:$0xf] }
 0x27a   : > { %19285 = vmatmul.mubr.msk.f32.gmra.mrb[94].mxu0 %vm957_vm3, %v26693_v52 }
 0x27b   : > { %19267 = vmatmul.mubr.msk.f32.gmra.mrb[94].mxu1 %vm957_vm3, %v26693_v52  ;;  %3105 = vmatprep.mubr.f32.mxu0 %v31451_v0  ;;  %v770_v52 = vrot.slane %v611_v15, 1  ;;  %v793_v15 = vrot.slane %v25120_v13, 1 }
 0x27c   : > { %3266 = vmatprep.mubr.f32.mxu1 %v31451_v0 }
 0x27e   : > { %19288 = vmatmul.mubr.msk.f32.vlgmr.msra.gmra.mrb[0].mxu0 %vm957_vm3, %v26237_v54 }
 0x27f   : > { %19306 = vmatmul.mubr.msk.f32.vlgmr.msra.gmra.mrb[0].mxu1 %vm957_vm3, %v26237_v54  ;;  %3111 = vmatprep.mubr.f32.mxu0 %v31451_v0 }
 0x280   : > { %3272 = vmatprep.mubr.f32.mxu1 %v31451_v0  ;;  %21820 = vmatpush1.bf16.msra.mxu1 %v26703_v17  ;;  %v775_v17 = vrot.slane %v26952_v27, 1  ;;  %v911_v27 = vld [vmem:[#allocation2 + $0x250] sm:$0xff] }
 0x281   : > { %21823 = vmatprep.subr.msk.bf16.mxu1 %vm25834_vm2, %v26707_v26  ;;  %21810 = vmatpush1.bf16.msra.mxu0 %v26825_v5  ;;  %v25113_v26 = vld [vmem:[%s25862_s24 + $0x60] sm:$0xff] }
 0x282   : > { %19289 = vmatmul.mubr.msk.f32.gmra.mrb[2].mxu0 %vm957_vm3, %v26253_v63  ;;  %21813 = vmatprep.subr.msk.bf16.mxu0 %vm25834_vm2, %v26829_v6  ;;  %v777_v28 = vrot.slane %v25113_v26, 1 }
 0x283   : > { %19307 = vmatmul.mubr.msk.f32.gmra.mrb[2].mxu1 %vm957_vm3, %v26253_v63  ;;  %3117 = vmatprep.mubr.f32.mxu0 %v31451_v0 }
 0x284   : > { %3278 = vmatprep.mubr.f32.mxu1 %v31451_v0  ;;  %21826 = vmatpush1.bf16.msk.msra.mxu1 %vm25834_vm2, %v26720_v56 }
 0x285   : > { %21816 = vmatpush1.bf16.msk.msra.mxu0 %vm25834_vm2, %v26840_v8  ;;  %21828 = vmatprep.subr.bf16.mxu1 %v26549_v7  ;;  %v25105_v7 = vld [vmem:[%s25862_s24] sm:$0xff] }
 0x286   : > { %19290 = vmatmul.mubr.msk.f32.gmra.mrb[4].mxu0 %vm957_vm3, %v26272_v14  ;;  %21838 = vmatprep.subr.bf16.mxu0 %v26727_v60  ;;  %v757_v32 = vrot.slane %v25105_v7, 1  ;;  %v617_v60 = vld [vmem:[%s25862_s24 + $0x70] sm:$0x3]  ;;  %v25118_v7 = vld [vmem:[%s25862_s24 + $0x98] sm:$0xff] }
 0x287   : > { %19308 = vmatmul.mubr.msk.f32.gmra.mrb[4].mxu1 %vm957_vm3, %v26272_v14  ;;  %3123 = vmatprep.mubr.f32.mxu0 %v31451_v0  ;;  %v780_v61 = vrot.slane %v617_v60, 1 }
 0x288   : > { %3284 = vmatprep.mubr.f32.mxu1 %v31451_v0  ;;  %v26948_v2 = vsel %vm651_vm4, %v757_v32, %v758_v39  ;;  %v788_v32 = vrot.slane %v25118_v7, 1  ;;  %v790_v39 = vrot.slane %v623_v36, 1  ;;  %v942_v36 = vld [vmem:[#allocation2 + $0x348] sm:$0xff] }
 0x28a   : > { %19291 = vmatmul.mubr.msk.f32.gmra.mrb[6].mxu0 %vm957_vm3, %v26292_v57 }
 0x28b   : > { %19309 = vmatmul.mubr.msk.f32.gmra.mrb[6].mxu1 %vm957_vm3, %v26292_v57  ;;  %3129 = vmatprep.mubr.f32.mxu0 %v31451_v0 }
 0x28c   : > { %3290 = vmatprep.mubr.f32.mxu1 %v31451_v0 }
 0x28e   : > { %19292 = vmatmul.mubr.msk.f32.gmra.mrb[8].mxu0 %vm957_vm3, %v26301_v42 }
 0x28f   : > { %19310 = vmatmul.mubr.msk.f32.gmra.mrb[8].mxu1 %vm957_vm3, %v26301_v42  ;;  %3135 = vmatprep.mubr.f32.mxu0 %v31451_v0 }
 0x290   : > { %3296 = vmatprep.mubr.f32.mxu1 %v31451_v0 }
 0x292   : > { %19293 = vmatmul.mubr.msk.f32.gmra.mrb[10].mxu0 %vm957_vm3, %v26313_v11 }
 0x293   : > { %19311 = vmatmul.mubr.msk.f32.gmra.mrb[10].mxu1 %vm957_vm3, %v26313_v11  ;;  %3141 = vmatprep.mubr.f32.mxu0 %v31451_v0 }
 0x294   : > { %3302 = vmatprep.mubr.f32.mxu1 %v31451_v0 }
 0x296   : > { %19294 = vmatmul.mubr.msk.f32.gmra.mrb[12].mxu0 %vm957_vm3, %v26322_v12 }
 0x297   : > { %19312 = vmatmul.mubr.msk.f32.gmra.mrb[12].mxu1 %vm957_vm3, %v26322_v12  ;;  %3147 = vmatprep.mubr.f32.mxu0 %v31451_v0 }
 0x298   : > { %3308 = vmatprep.mubr.f32.mxu1 %v31451_v0 }
 0x29a   : > { %19295 = vmatmul.mubr.msk.f32.gmra.mrb[14].mxu0 %vm957_vm3, %v26334_v21 }
 0x29b   : > { %19313 = vmatmul.mubr.msk.f32.gmra.mrb[14].mxu1 %vm957_vm3, %v26334_v21  ;;  %3153 = vmatprep.mubr.f32.mxu0 %v31451_v0 }
 0x29c   : > { %3314 = vmatprep.mubr.f32.mxu1 %v31451_v0 }
 0x29e   : > { %19296 = vmatmul.mubr.msk.f32.gmra.mrb[16].mxu0 %vm957_vm3, %v26343_v22 }
 0x29f   : > { %19314 = vmatmul.mubr.msk.f32.gmra.mrb[16].mxu1 %vm957_vm3, %v26343_v22  ;;  %3159 = vmatprep.mubr.f32.mxu0 %v31451_v0 }
 0x2a0   : > { %3320 = vmatprep.mubr.f32.mxu1 %v31451_v0 }
 0x2a2   : > { %19297 = vmatmul.mubr.msk.f32.gmra.mrb[18].mxu0 %vm957_vm3, %v26355_v23 }
 0x2a3   : > { %19315 = vmatmul.mubr.msk.f32.gmra.mrb[18].mxu1 %vm957_vm3, %v26355_v23  ;;  %3165 = vmatprep.mubr.f32.mxu0 %v31451_v0 }
 0x2a4   : > { %3326 = vmatprep.mubr.f32.mxu1 %v31451_v0 }
 0x2a6   : > { %19298 = vmatmul.mubr.msk.f32.gmra.mrb[20].mxu0 %vm957_vm3, %v26364_v30 }
 0x2a7   : > { %19316 = vmatmul.mubr.msk.f32.gmra.mrb[20].mxu1 %vm957_vm3, %v26364_v30  ;;  %3171 = vmatprep.mubr.f32.mxu0 %v31451_v0 }
 0x2a8   : > { %3332 = vmatprep.mubr.f32.mxu1 %v31451_v0 }
 0x2aa   : > { %19299 = vmatmul.mubr.msk.f32.gmra.mrb[22].mxu0 %vm957_vm3, %v26376_v45 }
 0x2ab   : > { %19317 = vmatmul.mubr.msk.f32.gmra.mrb[22].mxu1 %vm957_vm3, %v26376_v45  ;;  %3177 = vmatprep.mubr.f32.mxu0 %v31451_v0 }
 0x2ac   : > { %3338 = vmatprep.mubr.f32.mxu1 %v31451_v0 }
 0x2ae   : > { %19300 = vmatmul.mubr.msk.f32.gmra.mrb[24].mxu0 %vm957_vm3, %v26385_v34 }
 0x2af   : > { %19318 = vmatmul.mubr.msk.f32.gmra.mrb[24].mxu1 %vm957_vm3, %v26385_v34  ;;  %3183 = vmatprep.mubr.f32.mxu0 %v31451_v0 }
 0x2b0   : > { %3344 = vmatprep.mubr.f32.mxu1 %v31451_v0 }
 0x2b2   : > { %19301 = vmatmul.mubr.msk.f32.gmra.mrb[26].mxu0 %vm957_vm3, %v26397_v51 }
 0x2b3   : > { %19319 = vmatmul.mubr.msk.f32.gmra.mrb[26].mxu1 %vm957_vm3, %v26397_v51  ;;  %3189 = vmatprep.mubr.f32.mxu0 %v31451_v0 }
 0x2b4   : > { %3350 = vmatprep.mubr.f32.mxu1 %v31451_v0 }
 0x2b6   : > { %19302 = vmatmul.mubr.msk.f32.gmra.mrb[28].mxu0 %vm957_vm3, %v26406_v37 }
 0x2b7   : > { %19320 = vmatmul.mubr.msk.f32.gmra.mrb[28].mxu1 %vm957_vm3, %v26406_v37  ;;  %3195 = vmatprep.mubr.f32.mxu0 %v31451_v0 }
 0x2b8   : > { %3356 = vmatprep.mubr.f32.mxu1 %v31451_v0 }
 0x2ba   : > { %19303 = vmatmul.mubr.msk.f32.gmra.mrb[30].mxu0 %vm957_vm3, %v26415_v38 }
 0x2bb   : > { %19321 = vmatmul.mubr.msk.f32.gmra.mrb[30].mxu1 %vm957_vm3, %v26415_v38  ;;  %3427 = vmatprep.mubr.f32.mxu0 %v31451_v0 }
 0x2bc   : > { %3716 = vmatprep.mubr.f32.mxu1 %v31451_v0 }
 0x2be   : > { %19324 = vmatmul.mubr.msk.f32.vlgmr.msra.gmra.mrb[32].mxu0 %vm957_vm3, %v26237_v54  ;;  %v25109_v54 = vld [vmem:[%s25862_s24 + $0x30] sm:$0xff] }
 0x2bf   : > { %19342 = vmatmul.mubr.msk.f32.vlgmr.msra.gmra.mrb[32].mxu1 %vm957_vm3, %v26948_v2  ;;  %3433 = vmatprep.mubr.f32.mxu0 %v31451_v0  ;;  %v767_v35 = vrot.slane %v25109_v54, 1  ;;  %v27136_v54 = vpack.c.bf16 %v930_v18, %v924_v9  ;;  %v25126_v9 = vld [vmem:[%s26056_s21 + $0x28] sm:$0x3]  ;;  %v25127_v18 = vld [vmem:[%s26056_s21 + $0x30] sm:$0xff] }
 0x2c0   : > { %3722 = vmatprep.mubr.f32.mxu1 %v31451_v0  ;;  %21830 = vmatpush1.bf16.msra.mxu1 %v26699_v48  ;;  %v25112_v48 = vld [vmem:[%s25862_s24 + $0x50] sm:$0xff] }
 0x2c1   : > { %21833 = vmatprep.subr.msk.bf16.mxu1 %vm25834_vm2, %v26701_v53  ;;  %21840 = vmatpush1.bf16.msra.mxu0 %v26825_v5  ;;  %v773_v29 = vrot.slane %v25112_v48, 1  ;;  %v26989_v53 = vsel %vm651_vm4, %v762_v31, %v763_v44  ;;  %v785_v5 = vrot.slane %v620_v4, 1  ;;  %v909_v31 = vld [vmem:[#allocation2 + $0x240] sm:$0xff]  ;;  %v920_v48 = vld [vmem:[#allocation2 + $0x298] sm:$0xff] }
 0x2c2   : > { %19325 = vmatmul.mubr.msk.f32.gmra.mrb[34].mxu0 %vm957_vm3, %v26253_v63  ;;  %21843 = vmatprep.subr.msk.bf16.mxu0 %vm25834_vm2, %v26829_v6  ;;  %v27006_v63 = vsel %vm651_vm4, %v763_v44, %v765_v46  ;;  %v25117_v6 = vld [vmem:[%s25862_s24 + $0x90] sm:$0xff]  ;;  %v928_v44 = vld [vmem:[#allocation2 + $0x2d8] sm:$0xf]  ;;  %v27134_v46 = vpack.c.bf16 %v917_v10, %v911_v27  ;;  %v25122_v4 = vld [vmem:[%s26056_s21] sm:$0xff] }
 0x2c3   : > { %19343 = vmatmul.mubr.msk.f32.gmra.mrb[34].mxu1 %vm957_vm3, %v26962_v33  ;;  %3439 = vmatprep.mubr.f32.mxu0 %v31451_v0 }
 0x2c4   : > { %3728 = vmatprep.mubr.f32.mxu1 %v31451_v0  ;;  %21836 = vmatpush1.bf16.msk.msra.mxu1 %vm25834_vm2, %v26714_v55  ;;  %v25114_v55 = vld [vmem:[%s25862_s24 + $0x68] sm:$0xff] }
 0x2c5   : > { %21846 = vmatpush1.bf16.msk.msra.mxu0 %vm25834_vm2, %v26840_v8  ;;  %21858 = vmatprep.subr.bf16.mxu1 %v26973_v49  ;;  %v778_v56 = vrot.slane %v25114_v55, 1  ;;  %v787_v8 = vrot.slane %v25117_v6, 1  ;;  %v926_v55 = vld [vmem:[#allocation2 + $0x2c8] sm:$0xff] }
 0x2c6   : > { %19326 = vmatmul.mubr.msk.f32.gmra.mrb[36].mxu0 %vm957_vm3, %v26272_v14  ;;  %21848 = vmatprep.subr.bf16.mxu0 %v26982_v24  ;;  %v27015_v14 = vsel %vm651_vm4, %v767_v35, %v768_v50  ;;  %v923_v35 = vld [vmem:[#allocation2 + $0x2b0] sm:$0xff] }
 0x2c7   : > { %19344 = vmatmul.mubr.msk.f32.gmra.mrb[36].mxu1 %vm957_vm3, %v26989_v53  ;;  %3445 = vmatprep.mubr.f32.mxu0 %v31451_v0 }
 0x2c8   : > { %3734 = vmatprep.mubr.f32.mxu1 %v31451_v0 }
 0x2ca   : > { %19327 = vmatmul.mubr.msk.f32.gmra.mrb[38].mxu0 %vm957_vm3, %v26292_v57  ;;  %v27024_v57 = vsel %vm651_vm4, %v768_v50, %v770_v52  ;;  %v27138_v50 = vpack.c.bf16 %v915_v43, %v909_v31  ;;  %v921_v52 = vld [vmem:[#allocation2 + $0x2a0] sm:$0xff]  ;;  %v703_v31 = vrot.slane %v25127_v18, 2  ;;  %v25128_v43 = vld [vmem:[%s26056_s21 + $0x38] sm:$0xff] }
 0x2cb   : > { %19345 = vmatmul.mubr.msk.f32.gmra.mrb[38].mxu1 %vm957_vm3, %v27006_v63  ;;  %3451 = vmatprep.mubr.f32.mxu0 %v31451_v0  ;;  %v952_v18 = vld [vmem:[#allocation2 + $0x398] sm:$0xf] }
 0x2cc   : > { %3740 = vmatprep.mubr.f32.mxu1 %v31451_v0 }
 0x2ce   : > { %19328 = vmatmul.mubr.msk.f32.gmra.mrb[40].mxu0 %vm957_vm3, %v26301_v42  ;;  %v27033_v42 = vsel %vm651_vm4, %v772_v41, %v773_v29  ;;  %v914_v41 = vld [vmem:[#allocation2 + $0x268] sm:$0xff] }
 0x2cf   : > { %19346 = vmatmul.mubr.msk.f32.gmra.mrb[40].mxu1 %vm957_vm3, %v27015_v14  ;;  %3457 = vmatprep.mubr.f32.mxu0 %v31451_v0  ;;  %v27162_v26 = vpack.c.bf16 %v920_v48, %v914_v41  ;;  %v25134_v48 = vld [vmem:[%s26056_s21 + $0x68] sm:$0xff] }
 0x2d0   : > { %3746 = vmatprep.mubr.f32.mxu1 %v31451_v0 }
 0x2d2   : > { %19329 = vmatmul.mubr.msk.f32.gmra.mrb[42].mxu0 %vm957_vm3, %v26313_v11  ;;  %v27042_v11 = vsel %vm651_vm4, %v773_v29, %v775_v17  ;;  %v27149_v29 = vpack.c.bf16 %v929_v47, %v923_v35  ;;  %v27155_v17 = vpack.c.bf16 %v927_v40, %v921_v52  ;;  %v25131_v47 = vld [vmem:[%s26056_s21 + $0x50] sm:$0xff]  ;;  %v25132_v52 = vld [vmem:[%s26056_s21 + $0x58] sm:$0x3] }
 0x2d3   : > { %19347 = vmatmul.mubr.msk.f32.gmra.mrb[42].mxu1 %vm957_vm3, %v27024_v57  ;;  %3463 = vmatprep.mubr.f32.mxu0 %v31451_v0  ;;  %v711_v40 = vrot.slane %v25132_v52, 2 }
 0x2d4   : > { %3752 = vmatprep.mubr.f32.mxu1 %v31451_v0 }
 0x2d6   : > { %19330 = vmatmul.mubr.msk.f32.gmra.mrb[44].mxu0 %vm957_vm3, %v26322_v12  ;;  %v27054_v12 = vsel %vm651_vm4, %v777_v28, %v778_v56  ;;  %v919_v28 = vld [vmem:[#allocation2 + $0x290] sm:$0xff] }
 0x2d7   : > { %19348 = vmatmul.mubr.msk.f32.gmra.mrb[44].mxu1 %vm957_vm3, %v27033_v42  ;;  %3469 = vmatprep.mubr.f32.mxu0 %v31451_v0 }
 0x2d8   : > { %3758 = vmatprep.mubr.f32.mxu1 %v31451_v0 }
 0x2da   : > { %19331 = vmatmul.mubr.msk.f32.gmra.mrb[46].mxu0 %vm957_vm3, %v26334_v21  ;;  %v27063_v21 = vsel %vm651_vm4, %v778_v56, %v780_v61  ;;  %v932_v56 = vld [vmem:[#allocation2 + $0x2f8] sm:$0xf] }
 0x2db   : > { %19349 = vmatmul.mubr.msk.f32.gmra.mrb[46].mxu1 %vm957_vm3, %v27042_v11  ;;  %3475 = vmatprep.mubr.f32.mxu0 %v31451_v0  ;;  %v27264_v61 = vpack.c.bf16 %v932_v56, %v926_v55  ;;  %v25137_v55 = vld [vmem:[%s26056_s21 + $0x80] sm:$0xff] }
 0x2dc   : > { %3764 = vmatprep.mubr.f32.mxu1 %v31451_v0  ;;  %v719_v56 = vrot.slane %v25137_v55, 2 }
 0x2de   : > { %19332 = vmatmul.mubr.msk.f32.gmra.mrb[48].mxu0 %vm957_vm3, %v26343_v22  ;;  %v27075_v22 = vsel %vm651_vm4, %v782_v19, %v783_v25  ;;  %v931_v19 = vld [vmem:[#allocation2 + $0x2f0] sm:$0xf] }
 0x2df   : > { %19350 = vmatmul.mubr.msk.f32.gmra.mrb[48].mxu1 %vm957_vm3, %v27054_v12  ;;  %3481 = vmatprep.mubr.f32.mxu0 %v31451_v0  ;;  %v27275_v3 = vpack.c.bf16 %v931_v19, %v925_v62 }
 0x2e0   : > { %3770 = vmatprep.mubr.f32.mxu1 %v31451_v0 }
 0x2e2   : > { %19333 = vmatmul.mubr.msk.f32.gmra.mrb[50].mxu0 %vm957_vm3, %v26355_v23  ;;  %v27084_v23 = vsel %vm651_vm4, %v783_v25, %v785_v5  ;;  %v693_v5 = vrot.slane %v25122_v4, 2  ;;  %v25141_v4 = vld [vmem:[%s26056_s21 + $0xa0] sm:$0x3] }
 0x2e3   : > { %19351 = vmatmul.mubr.msk.f32.gmra.mrb[50].mxu1 %vm957_vm3, %v27063_v21  ;;  %3487 = vmatprep.mubr.f32.mxu0 %v31451_v0 }
 0x2e4   : > { %3776 = vmatprep.mubr.f32.mxu1 %v31451_v0 }
 0x2e6   : > { %19334 = vmatmul.mubr.msk.f32.gmra.mrb[52].mxu0 %vm957_vm3, %v26364_v30  ;;  %v27096_v30 = vsel %vm651_vm4, %v787_v8, %v788_v32  ;;  %v25123_v8 = vld [vmem:[%s26056_s21 + $0x10] sm:$0x3] }
 0x2e7   : > { %19352 = vmatmul.mubr.msk.f32.gmra.mrb[52].mxu1 %vm957_vm3, %v27075_v22  ;;  %3493 = vmatprep.mubr.f32.mxu0 %v31451_v0  ;;  %v696_v7 = vrot.slane %v25123_v8, 2 }
 0x2e8   : > { %3782 = vmatprep.mubr.f32.mxu1 %v31451_v0 }
 0x2ea   : > { %19335 = vmatmul.mubr.msk.f32.gmra.mrb[54].mxu0 %vm957_vm3, %v26376_v45  ;;  %v27105_v45 = vsel %vm651_vm4, %v788_v32, %v790_v39  ;;  %v936_v32 = vld [vmem:[#allocation2 + $0x318] sm:$0xff]  ;;  %v934_v39 = vld [vmem:[#allocation2 + $0x308] sm:$0xff] }
 0x2eb   : > { %19353 = vmatmul.mubr.msk.f32.gmra.mrb[54].mxu1 %vm957_vm3, %v27084_v23  ;;  %3499 = vmatprep.mubr.f32.mxu0 %v31451_v0  ;;  %v27407_v27 = vpack.c.bf16 %v940_v58, %v934_v39  ;;  %v25144_v39 = vld [vmem:[%s26056_s21 + $0xb8] sm:$0x3] }
 0x2ec   : > { %3788 = vmatprep.mubr.f32.mxu1 %v31451_v0  ;;  %v731_v58 = vrot.slane %v25144_v39, 2  ;;  %v25151_v39 = vld [vmem:[%s25862_s24 + $0x30] sm:$0xff] }
 0x2ee   : > { %19336 = vmatmul.mubr.msk.f32.gmra.mrb[56].mxu0 %vm957_vm3, %v26385_v34  ;;  %v27117_v34 = vsel %vm651_vm4, %v792_v59, %v793_v15  ;;  %v25124_v59 = vld [vmem:[%s26056_s21 + $0x18] sm:$0xff] }
 0x2ef   : > { %19354 = vmatmul.mubr.msk.f32.gmra.mrb[56].mxu1 %vm957_vm3, %v27096_v30  ;;  %3505 = vmatprep.mubr.f32.mxu0 %v31451_v0  ;;  %v698_v13 = vrot.slane %v25124_v59, 2  ;;  %v935_v59 = vld [vmem:[#allocation2 + $0x310] sm:$0xff] }
 0x2f0   : > { %3794 = vmatprep.mubr.f32.mxu1 %v31451_v0 }
 0x2f2   : > { %19337 = vmatmul.mubr.msk.f32.gmra.mrb[58].mxu0 %vm957_vm3, %v26397_v51  ;;  %v27126_v51 = vsel %vm651_vm4, %v793_v15, %v795_v20  ;;  %v25125_v15 = vld [vmem:[%s26056_s21 + $0x20] sm:$0xff] }
 0x2f3   : > { %19355 = vmatmul.mubr.msk.f32.gmra.mrb[58].mxu1 %vm957_vm3, %v27105_v45  ;;  %3511 = vmatprep.mubr.f32.mxu0 %v31451_v0  ;;  %v699_v16 = vrot.slane %v25125_v15, 2  ;;  %v948_v15 = vld [vmem:[#allocation2 + $0x378] sm:$0xff] }
 0x2f4   : > { %3800 = vmatprep.mubr.f32.mxu1 %v31451_v0 }
 0x2f5   : > { %v27414_v10 = vsel %vm692_vm5, %v698_v13, %v699_v16  ;;  %v941_v13 = vld [vmem:[#allocation2 + $0x340] sm:$0xff] }
 0x2f6   : > { %19338 = vmatmul.mubr.msk.f32.gmra.mrb[60].mxu0 %vm957_vm3, %v26406_v37  ;;  %v922_v37 = vld [vmem:[#allocation2 + $0x2a8] sm:$0xff] }
 0x2f7   : > { %19356 = vmatmul.mubr.msk.f32.gmra.mrb[60].mxu1 %vm957_vm3, %v27117_v34  ;;  %3517 = vmatprep.mubr.f32.mxu0 %v31451_v0 }
 0x2f8   : > { %3806 = vmatprep.mubr.f32.mxu1 %v31451_v0 }
 0x2fa   : > { %19339 = vmatmul.mubr.msk.f32.gmra.mrb[62].mxu0 %vm957_vm3, %v26415_v38  ;;  %v27142_v38 = vpack.c.bf16 %v928_v44, %v922_v37  ;;  %v704_v37 = vrot.slane %v25128_v43, 2 }
 0x2fb   : > { %19357 = vmatmul.mubr.msk.f32.gmra.mrb[62].mxu1 %vm957_vm3, %v27126_v51  ;;  %4038 = vmatprep.mubr.f32.mxu0 %v31451_v0 }
 0x2fc   : > { %3877 = vmatprep.mubr.f32.mxu1 %v31451_v0 }
 0x2fe   : > { %19378 = vmatmul.mubr.msk.f32.vlgmr.msra.gmra.mrb[64].mxu0 %vm957_vm3, %v26948_v2 }
 0x2ff   : > { %19360 = vmatmul.mubr.msk.f32.vlgmr.msra.gmra.mrb[64].mxu1 %vm957_vm3, %v26948_v2  ;;  %4044 = vmatprep.mubr.f32.mxu0 %v31451_v0 }
 0x300   : > { %3883 = vmatprep.mubr.f32.mxu1 %v31451_v0  ;;  %21860 = vmatpush1.bf16.msra.mxu1 %v27134_v46 }
 0x301   : > { %21863 = vmatprep.subr.msk.bf16.mxu1 %vm25834_vm2, %v27136_v54  ;;  %21850 = vmatpush1.bf16.msra.mxu0 %v27138_v50 }
 0x302   : > { %19379 = vmatmul.mubr.msk.f32.gmra.mrb[66].mxu0 %vm957_vm3, %v26962_v33  ;;  %21853 = vmatprep.subr.msk.bf16.mxu0 %vm25834_vm2, %v27142_v38 }
 0x303   : > { %19361 = vmatmul.mubr.msk.f32.gmra.mrb[66].mxu1 %vm957_vm3, %v26962_v33  ;;  %4050 = vmatprep.mubr.f32.mxu0 %v31451_v0 }
 0x304   : > { %3889 = vmatprep.mubr.f32.mxu1 %v31451_v0  ;;  %21866 = vmatpush1.bf16.msk.msra.mxu1 %vm25834_vm2, %v27149_v29 }
 0x305   : > { %21856 = vmatpush1.bf16.msk.msra.mxu0 %vm25834_vm2, %v27155_v17  ;;  %21878 = vmatprep.subr.bf16.mxu1 %v26982_v24  ;;  %v913_v24 = vld [vmem:[#allocation2 + $0x260] sm:$0xff] }
 0x306   : > { %19380 = vmatmul.mubr.msk.f32.gmra.mrb[68].mxu0 %vm957_vm3, %v26989_v53  ;;  %21868 = vmatprep.subr.bf16.mxu0 %v27162_v26  ;;  %v27260_v60 = vpack.c.bf16 %v919_v28, %v913_v24 }
 0x307   : > { %19362 = vmatmul.mubr.msk.f32.gmra.mrb[68].mxu1 %vm957_vm3, %v26989_v53  ;;  %4056 = vmatprep.mubr.f32.mxu0 %v31451_v0 }
 0x308   : > { %3895 = vmatprep.mubr.f32.mxu1 %v31451_v0 }
 0x30a   : > { %19381 = vmatmul.mubr.msk.f32.gmra.mrb[70].mxu0 %vm957_vm3, %v27006_v63 }
 0x30b   : > { %19363 = vmatmul.mubr.msk.f32.gmra.mrb[70].mxu1 %vm957_vm3, %v27006_v63  ;;  %4062 = vmatprep.mubr.f32.mxu0 %v31451_v0 }
 0x30c   : > { %3901 = vmatprep.mubr.f32.mxu1 %v31451_v0 }
 0x30e   : > { %19382 = vmatmul.mubr.msk.f32.gmra.mrb[72].mxu0 %vm957_vm3, %v27015_v14 }
 0x30f   : > { %19364 = vmatmul.mubr.msk.f32.gmra.mrb[72].mxu1 %vm957_vm3, %v27015_v14  ;;  %4068 = vmatprep.mubr.f32.mxu0 %v31451_v0 }
 0x310   : > { %3907 = vmatprep.mubr.f32.mxu1 %v31451_v0 }
 0x312   : > { %19383 = vmatmul.mubr.msk.f32.gmra.mrb[74].mxu0 %vm957_vm3, %v27024_v57 }
 0x313   : > { %19365 = vmatmul.mubr.msk.f32.gmra.mrb[74].mxu1 %vm957_vm3, %v27024_v57  ;;  %4074 = vmatprep.mubr.f32.mxu0 %v31451_v0 }
 0x314   : > { %3913 = vmatprep.mubr.f32.mxu1 %v31451_v0 }
 0x316   : > { %19384 = vmatmul.mubr.msk.f32.gmra.mrb[76].mxu0 %vm957_vm3, %v27033_v42 }
 0x317   : > { %19366 = vmatmul.mubr.msk.f32.gmra.mrb[76].mxu1 %vm957_vm3, %v27033_v42  ;;  %4080 = vmatprep.mubr.f32.mxu0 %v31451_v0 }
 0x318   : > { %3919 = vmatprep.mubr.f32.mxu1 %v31451_v0 }
 0x31a   : > { %19385 = vmatmul.mubr.msk.f32.gmra.mrb[78].mxu0 %vm957_vm3, %v27042_v11 }
 0x31b   : > { %19367 = vmatmul.mubr.msk.f32.gmra.mrb[78].mxu1 %vm957_vm3, %v27042_v11  ;;  %4086 = vmatprep.mubr.f32.mxu0 %v31451_v0 }
 0x31c   : > { %3925 = vmatprep.mubr.f32.mxu1 %v31451_v0 }
 0x31e   : > { %19386 = vmatmul.mubr.msk.f32.gmra.mrb[80].mxu0 %vm957_vm3, %v27054_v12 }
 0x31f   : > { %19368 = vmatmul.mubr.msk.f32.gmra.mrb[80].mxu1 %vm957_vm3, %v27054_v12  ;;  %4092 = vmatprep.mubr.f32.mxu0 %v31451_v0 }
 0x320   : > { %3931 = vmatprep.mubr.f32.mxu1 %v31451_v0 }
 0x322   : > { %19387 = vmatmul.mubr.msk.f32.gmra.mrb[82].mxu0 %vm957_vm3, %v27063_v21 }
 0x323   : > { %19369 = vmatmul.mubr.msk.f32.gmra.mrb[82].mxu1 %vm957_vm3, %v27063_v21  ;;  %4098 = vmatprep.mubr.f32.mxu0 %v31451_v0 }
 0x324   : > { %3937 = vmatprep.mubr.f32.mxu1 %v31451_v0 }
 0x326   : > { %19388 = vmatmul.mubr.msk.f32.gmra.mrb[84].mxu0 %vm957_vm3, %v27075_v22 }
 0x327   : > { %19370 = vmatmul.mubr.msk.f32.gmra.mrb[84].mxu1 %vm957_vm3, %v27075_v22  ;;  %4104 = vmatprep.mubr.f32.mxu0 %v31451_v0 }
 0x328   : > { %3943 = vmatprep.mubr.f32.mxu1 %v31451_v0 }
 0x32a   : > { %19389 = vmatmul.mubr.msk.f32.gmra.mrb[86].mxu0 %vm957_vm3, %v27084_v23 }
 0x32b   : > { %19371 = vmatmul.mubr.msk.f32.gmra.mrb[86].mxu1 %vm957_vm3, %v27084_v23  ;;  %4110 = vmatprep.mubr.f32.mxu0 %v31451_v0 }
 0x32c   : > { %3949 = vmatprep.mubr.f32.mxu1 %v31451_v0 }
 0x32e   : > { %19390 = vmatmul.mubr.msk.f32.gmra.mrb[88].mxu0 %vm957_vm3, %v27096_v30 }
 0x32f   : > { %19372 = vmatmul.mubr.msk.f32.gmra.mrb[88].mxu1 %vm957_vm3, %v27096_v30  ;;  %4116 = vmatprep.mubr.f32.mxu0 %v31451_v0 }
 0x330   : > { %3955 = vmatprep.mubr.f32.mxu1 %v31451_v0 }
 0x332   : > { %19391 = vmatmul.mubr.msk.f32.gmra.mrb[90].mxu0 %vm957_vm3, %v27105_v45 }
 0x333   : > { %19373 = vmatmul.mubr.msk.f32.gmra.mrb[90].mxu1 %vm957_vm3, %v27105_v45  ;;  %4122 = vmatprep.mubr.f32.mxu0 %v31451_v0 }
 0x334   : > { %3961 = vmatprep.mubr.f32.mxu1 %v31451_v0 }
 0x336   : > { %19392 = vmatmul.mubr.msk.f32.gmra.mrb[92].mxu0 %vm957_vm3, %v27117_v34 }
 0x337   : > { %19374 = vmatmul.mubr.msk.f32.gmra.mrb[92].mxu1 %vm957_vm3, %v27117_v34  ;;  %4128 = vmatprep.mubr.f32.mxu0 %v31451_v0 }
 0x338   : > { %3967 = vmatprep.mubr.f32.mxu1 %v31451_v0 }
 0x33a   : > { %19393 = vmatmul.mubr.msk.f32.gmra.mrb[94].mxu0 %vm957_vm3, %v27126_v51 }
 0x33b   : > { %19375 = vmatmul.mubr.msk.f32.gmra.mrb[94].mxu1 %vm957_vm3, %v27126_v51  ;;  %4313 = vmatprep.mubr.f32.mxu0 %v31451_v0 }
 0x33c   : > { %4474 = vmatprep.mubr.f32.mxu1 %v31451_v0 }
 0x33e   : > { %19396 = vmatmul.mubr.msk.f32.vlgmr.msra.gmra.mrb[0].mxu0 %vm957_vm3, %v26948_v2 }
 0x33f   : > { %19414 = vmatmul.mubr.msk.f32.vlgmr.msra.gmra.mrb[0].mxu1 %vm957_vm3, %v26948_v2  ;;  %4319 = vmatprep.mubr.f32.mxu0 %v31451_v0 }
 0x340   : > { %4480 = vmatprep.mubr.f32.mxu1 %v31451_v0  ;;  %21880 = vmatpush1.bf16.msra.mxu1 %v27138_v50  ;;  %v709_v50 = vrot.slane %v25131_v47, 2  ;;  %v938_v47 = vld [vmem:[#allocation2 + $0x328] sm:$0xff] }
 0x341   : > { %21883 = vmatprep.subr.msk.bf16.mxu1 %vm25834_vm2, %v27142_v38  ;;  %21870 = vmatpush1.bf16.msra.mxu0 %v27260_v60 }
 0x342   : > { %19397 = vmatmul.mubr.msk.f32.gmra.mrb[2].mxu0 %vm957_vm3, %v26962_v33  ;;  %21873 = vmatprep.subr.msk.bf16.mxu0 %vm25834_vm2, %v27264_v61 }
 0x343   : > { %19415 = vmatmul.mubr.msk.f32.gmra.mrb[2].mxu1 %vm957_vm3, %v26962_v33  ;;  %4325 = vmatprep.mubr.f32.mxu0 %v31451_v0 }
 0x344   : > { %4486 = vmatprep.mubr.f32.mxu1 %v31451_v0  ;;  %21886 = vmatpush1.bf16.msk.msra.mxu1 %vm25834_vm2, %v27155_v17  ;;  %v27476_v17 = vsel %vm692_vm5, %v709_v50, %v711_v40 }
 0x345   : > { %21876 = vmatpush1.bf16.msk.msra.mxu0 %vm25834_vm2, %v27275_v3  ;;  %21888 = vmatprep.subr.bf16.mxu1 %v26973_v49  ;;  %v25121_v49 = vld [vmem:[%s26056_s21 + $0x8] sm:$0xff] }
 0x346   : > { %19398 = vmatmul.mubr.msk.f32.gmra.mrb[4].mxu0 %vm957_vm3, %v26989_v53  ;;  %21898 = vmatprep.subr.bf16.mxu0 %v27162_v26  ;;  %v694_v25 = vrot.slane %v25121_v49, 2  ;;  %v25135_v26 = vld [vmem:[%s26056_s21 + $0x70] sm:$0x3] }
 0x347   : > { %19416 = vmatmul.mubr.msk.f32.gmra.mrb[4].mxu1 %vm957_vm3, %v26989_v53  ;;  %4331 = vmatprep.mubr.f32.mxu0 %v31451_v0  ;;  %v716_v24 = vrot.slane %v25135_v26, 2 }
 0x348   : > { %4492 = vmatprep.mubr.f32.mxu1 %v31451_v0  ;;  %v27381_v6 = vsel %vm692_vm5, %v693_v5, %v694_v25  ;;  %v27393_v20 = vsel %vm692_vm5, %v694_v25, %v696_v7  ;;  %v726_v5 = vrot.slane %v25141_v4, 2  ;;  %v25143_v7 = vld [vmem:[%s26056_s21 + $0xb0] sm:$0xff]  ;;  %v25148_v4 = vld [vmem:[%s25862_s24 + $0x18] sm:$0xff] }
 0x34a   : > { %19399 = vmatmul.mubr.msk.f32.gmra.mrb[6].mxu0 %vm957_vm3, %v27006_v63 }
 0x34b   : > { %19417 = vmatmul.mubr.msk.f32.gmra.mrb[6].mxu1 %vm957_vm3, %v27006_v63  ;;  %4337 = vmatprep.mubr.f32.mxu0 %v31451_v0 }
 0x34c   : > { %4498 = vmatprep.mubr.f32.mxu1 %v31451_v0 }
 0x34e   : > { %19400 = vmatmul.mubr.msk.f32.gmra.mrb[8].mxu0 %vm957_vm3, %v27015_v14 }
 0x34f   : > { %19418 = vmatmul.mubr.msk.f32.gmra.mrb[8].mxu1 %vm957_vm3, %v27015_v14  ;;  %4343 = vmatprep.mubr.f32.mxu0 %v31451_v0 }
 0x350   : > { %4504 = vmatprep.mubr.f32.mxu1 %v31451_v0 }
 0x352   : > { %19401 = vmatmul.mubr.msk.f32.gmra.mrb[10].mxu0 %vm957_vm3, %v27024_v57 }
 0x353   : > { %19419 = vmatmul.mubr.msk.f32.gmra.mrb[10].mxu1 %vm957_vm3, %v27024_v57  ;;  %4349 = vmatprep.mubr.f32.mxu0 %v31451_v0 }
 0x354   : > { %4510 = vmatprep.mubr.f32.mxu1 %v31451_v0 }
 0x356   : > { %19402 = vmatmul.mubr.msk.f32.gmra.mrb[12].mxu0 %vm957_vm3, %v27033_v42 }
 0x357   : > { %19420 = vmatmul.mubr.msk.f32.gmra.mrb[12].mxu1 %vm957_vm3, %v27033_v42  ;;  %4355 = vmatprep.mubr.f32.mxu0 %v31451_v0 }
 0x358   : > { %4516 = vmatprep.mubr.f32.mxu1 %v31451_v0 }
 0x35a   : > { %19403 = vmatmul.mubr.msk.f32.gmra.mrb[14].mxu0 %vm957_vm3, %v27042_v11 }
 0x35b   : > { %19421 = vmatmul.mubr.msk.f32.gmra.mrb[14].mxu1 %vm957_vm3, %v27042_v11  ;;  %4361 = vmatprep.mubr.f32.mxu0 %v31451_v0 }
 0x35c   : > { %4522 = vmatprep.mubr.f32.mxu1 %v31451_v0 }
 0x35e   : > { %19404 = vmatmul.mubr.msk.f32.gmra.mrb[16].mxu0 %vm957_vm3, %v27054_v12 }
 0x35f   : > { %19422 = vmatmul.mubr.msk.f32.gmra.mrb[16].mxu1 %vm957_vm3, %v27054_v12  ;;  %4367 = vmatprep.mubr.f32.mxu0 %v31451_v0 }
 0x360   : > { %4528 = vmatprep.mubr.f32.mxu1 %v31451_v0 }
 0x362   : > { %19405 = vmatmul.mubr.msk.f32.gmra.mrb[18].mxu0 %vm957_vm3, %v27063_v21 }
 0x363   : > { %19423 = vmatmul.mubr.msk.f32.gmra.mrb[18].mxu1 %vm957_vm3, %v27063_v21  ;;  %4373 = vmatprep.mubr.f32.mxu0 %v31451_v0 }
 0x364   : > { %4534 = vmatprep.mubr.f32.mxu1 %v31451_v0 }
 0x366   : > { %19406 = vmatmul.mubr.msk.f32.gmra.mrb[20].mxu0 %vm957_vm3, %v27075_v22 }
 0x367   : > { %19424 = vmatmul.mubr.msk.f32.gmra.mrb[20].mxu1 %vm957_vm3, %v27075_v22  ;;  %4379 = vmatprep.mubr.f32.mxu0 %v31451_v0 }
 0x368   : > { %4540 = vmatprep.mubr.f32.mxu1 %v31451_v0 }
 0x36a   : > { %19407 = vmatmul.mubr.msk.f32.gmra.mrb[22].mxu0 %vm957_vm3, %v27084_v23 }
 0x36b   : > { %19425 = vmatmul.mubr.msk.f32.gmra.mrb[22].mxu1 %vm957_vm3, %v27084_v23  ;;  %4385 = vmatprep.mubr.f32.mxu0 %v31451_v0 }
 0x36c   : > { %4546 = vmatprep.mubr.f32.mxu1 %v31451_v0 }
 0x36e   : > { %19408 = vmatmul.mubr.msk.f32.gmra.mrb[24].mxu0 %vm957_vm3, %v27096_v30 }
 0x36f   : > { %19426 = vmatmul.mubr.msk.f32.gmra.mrb[24].mxu1 %vm957_vm3, %v27096_v30  ;;  %4391 = vmatprep.mubr.f32.mxu0 %v31451_v0 }
 0x370   : > { %4552 = vmatprep.mubr.f32.mxu1 %v31451_v0 }
 0x372   : > { %19409 = vmatmul.mubr.msk.f32.gmra.mrb[26].mxu0 %vm957_vm3, %v27105_v45 }
 0x373   : > { %19427 = vmatmul.mubr.msk.f32.gmra.mrb[26].mxu1 %vm957_vm3, %v27105_v45  ;;  %4397 = vmatprep.mubr.f32.mxu0 %v31451_v0 }
 0x374   : > { %4558 = vmatprep.mubr.f32.mxu1 %v31451_v0 }
 0x376   : > { %19410 = vmatmul.mubr.msk.f32.gmra.mrb[28].mxu0 %vm957_vm3, %v27117_v34 }
 0x377   : > { %19428 = vmatmul.mubr.msk.f32.gmra.mrb[28].mxu1 %vm957_vm3, %v27117_v34  ;;  %4403 = vmatprep.mubr.f32.mxu0 %v31451_v0 }
 0x378   : > { %4564 = vmatprep.mubr.f32.mxu1 %v31451_v0 }
 0x37a   : > { %19411 = vmatmul.mubr.msk.f32.gmra.mrb[30].mxu0 %vm957_vm3, %v27126_v51 }
 0x37b   : > { %19429 = vmatmul.mubr.msk.f32.gmra.mrb[30].mxu1 %vm957_vm3, %v27126_v51  ;;  %4635 = vmatprep.mubr.f32.mxu0 %v31451_v0 }
 0x37c   : > { %4924 = vmatprep.mubr.f32.mxu1 %v31451_v0 }
 0x37e   : > { %19432 = vmatmul.mubr.msk.f32.vlgmr.msra.gmra.mrb[32].mxu0 %vm957_vm3, %v26948_v2  ;;  %v27400_v2 = vpack.c.bf16 %v942_v36, %v936_v32  ;;  %v729_v32 = vrot.slane %v25143_v7, 2  ;;  %v25150_v7 = vld [vmem:[%s25862_s24 + $0x28] sm:$0x3] }
 0x37f   : > { %19450 = vmatmul.mubr.msk.f32.vlgmr.msra.gmra.mrb[32].mxu1 %vm957_vm3, %v27381_v6  ;;  %4641 = vmatprep.mubr.f32.mxu0 %v31451_v0 }
 0x380   : > { %4930 = vmatprep.mubr.f32.mxu1 %v31451_v0  ;;  %21890 = vmatpush1.bf16.msra.mxu1 %v27134_v46  ;;  %v25129_v46 = vld [vmem:[%s26056_s21 + $0x40] sm:$0x3] }
 0x381   : > { %21893 = vmatprep.subr.msk.bf16.mxu1 %vm25834_vm2, %v27136_v54  ;;  %21900 = vmatpush1.bf16.msra.mxu0 %v27260_v60  ;;  %v706_v54 = vrot.slane %v25129_v46, 2  ;;  %v953_v46 = vld [vmem:[#allocation2 + $0x3a0] sm:$0xf] }
 0x382   : > { %19433 = vmatmul.mubr.msk.f32.gmra.mrb[34].mxu0 %vm957_vm3, %v26962_v33  ;;  %21903 = vmatprep.subr.msk.bf16.mxu0 %vm25834_vm2, %v27264_v61  ;;  %v701_v33 = vrot.slane %v25126_v9, 2  ;;  %v25138_v61 = vld [vmem:[%s26056_s21 + $0x88] sm:$0x3]  ;;  %v933_v9 = vld [vmem:[#allocation2 + $0x300] sm:$0xff] }
 0x383   : > { %19451 = vmatmul.mubr.msk.f32.gmra.mrb[34].mxu1 %vm957_vm3, %v27393_v20  ;;  %4647 = vmatprep.mubr.f32.mxu0 %v31451_v0  ;;  %v27455_v38 = vsel %vm692_vm5, %v704_v37, %v706_v54  ;;  %v721_v62 = vrot.slane %v25138_v61, 2  ;;  %v25146_v61 = vld [vmem:[%s25862_s24 + $0x8] sm:$0xff] }
 0x384   : > { %4936 = vmatprep.mubr.f32.mxu1 %v31451_v0  ;;  %21896 = vmatpush1.bf16.msk.msra.mxu1 %vm25834_vm2, %v27149_v29  ;;  %v27434_v44 = vsel %vm692_vm5, %v699_v16, %v701_v33  ;;  %v714_v29 = vrot.slane %v25134_v48, 2  ;;  %v954_v16 = vld [vmem:[#allocation2 + $0x3a8] sm:$0xf]  ;;  %v939_v33 = vld [vmem:[#allocation2 + $0x330] sm:$0xff] }
 0x385   : > { %21906 = vmatpush1.bf16.msk.msra.mxu0 %vm25834_vm2, %v27275_v3  ;;  %21918 = vmatprep.subr.bf16.mxu1 %v27400_v2  ;;  %v25140_v3 = vld [vmem:[%s26056_s21 + $0x98] sm:$0xff]  ;;  %v27518_v25 = vsel %vm692_vm5, %v719_v56, %v721_v62  ;;  %v27568_v43 = vpack.c.bf16 %v954_v16, %v948_v15  ;;  %v27570_v54 = vpack.c.bf16 %v939_v33, %v933_v9  ;;  %v950_v48 = vld [vmem:[#allocation2 + $0x388] sm:$0xff]  ;;  %v798_v62 = vrot.slane %v25146_v61, 2  ;;  %v25155_v33 = vld [vmem:[%s25862_s24 + $0x50] sm:$0xff] }
 0x386   : > { %19434 = vmatmul.mubr.msk.f32.gmra.mrb[36].mxu0 %vm957_vm3, %v26989_v53  ;;  %21908 = vmatprep.subr.bf16.mxu0 %v27407_v27  ;;  %v27443_v53 = vsel %vm692_vm5, %v703_v31, %v704_v37  ;;  %v27497_v60 = vsel %vm692_vm5, %v714_v29, %v716_v24  ;;  %v724_v49 = vrot.slane %v25140_v3, 2  ;;  %v27566_v31 = vpack.c.bf16 %v941_v13, %v935_v59  ;;  %v947_v37 = vld [vmem:[#allocation2 + $0x370] sm:$0xff]  ;;  %v25152_v59 = vld [vmem:[%s25862_s24 + $0x38] sm:$0xff]  ;;  %v25153_v13 = vld [vmem:[%s25862_s24 + $0x40] sm:$0x3] }
 0x387   : > { %19452 = vmatmul.mubr.msk.f32.gmra.mrb[36].mxu1 %vm957_vm3, %v27414_v10  ;;  %4653 = vmatprep.mubr.f32.mxu0 %v31451_v0  ;;  %v27581_v52 = vpack.c.bf16 %v953_v46, %v947_v37  ;;  %v808_v1 = vrot.slane %v25152_v59, 2  ;;  %v810_v15 = vrot.slane %v25153_v13, 2  ;;  %v25154_v16 = vld [vmem:[%s25862_s24 + $0x48] sm:$0xff]  ;;  %v25168_v61 = vld [vmem:[%s25862_s24 + $0xb8] sm:$0x3] }
 0x388   : > { %4942 = vmatprep.mubr.f32.mxu1 %v31451_v0  ;;  %v27539_v36 = vsel %vm692_vm5, %v724_v49, %v726_v5  ;;  %v802_v5 = vrot.slane %v25148_v4, 2  ;;  %v812_v9 = vrot.slane %v25154_v16, 2  ;;  %v25158_v46 = vld [vmem:[%s25862_s24 + $0x68] sm:$0xff] }
 0x389   : > { %v23385_v4 = vld [vmem:[%s31429_s4 + $0x8] ss:$12 sps:$4 sm:$0xff]   ;;  %v23369_v59 = vld [vmem:[%s31429_s4 + $0x60] ss:$12 sps:$4 sm:$0xff]  }
 0x38a   : > { %19435 = vmatmul.mubr.msk.f32.gmra.mrb[38].mxu0 %vm957_vm3, %v27006_v63  ;;  %v25130_v63 = vld [vmem:[%s26056_s21 + $0x48] sm:$0xff] }
 0x38b   : > { %19453 = vmatmul.mubr.msk.f32.gmra.mrb[38].mxu1 %vm957_vm3, %v27434_v44  ;;  %4659 = vmatprep.mubr.f32.mxu0 %v31451_v0  ;;  %v708_v35 = vrot.slane %v25130_v63, 2  ;;  %v945_v63 = vld [vmem:[#allocation2 + $0x360] sm:$0xff]  ;;  %v23404_v13 = vld [vmem:[%s31429_s4 + $0x128] ss:$12 sps:$4 sm:$0xff]  }
 0x38c   : > { %4948 = vmatprep.mubr.f32.mxu1 %v31451_v0  ;;  %v23405_v16 = vld [vmem:[%s31429_s4 + $0x68] ss:$12 sps:$4 sm:$0xff]  }
 0x38e   : > { %19436 = vmatmul.mubr.msk.f32.gmra.mrb[40].mxu0 %vm957_vm3, %v27015_v14  ;;  %v27464_v14 = vsel %vm692_vm5, %v708_v35, %v709_v50  ;;  %v951_v35 = vld [vmem:[#allocation2 + $0x390] sm:$0xf]  ;;  %v944_v50 = vld [vmem:[#allocation2 + $0x358] sm:$0xff] }
 0x38f   : > { %19454 = vmatmul.mubr.msk.f32.gmra.mrb[40].mxu1 %vm957_vm3, %v27443_v53  ;;  %4665 = vmatprep.mubr.f32.mxu0 %v31451_v0  ;;  %v27587_v40 = vpack.c.bf16 %v951_v35, %v945_v63 }
 0x390   : > { %4954 = vmatprep.mubr.f32.mxu1 %v31451_v0 }
 0x392   : > { %19437 = vmatmul.mubr.msk.f32.gmra.mrb[42].mxu0 %vm957_vm3, %v27024_v57  ;;  %v25133_v57 = vld [vmem:[%s26056_s21 + $0x60] sm:$0xff] }
 0x393   : > { %19455 = vmatmul.mubr.msk.f32.gmra.mrb[42].mxu1 %vm957_vm3, %v27455_v38  ;;  %4671 = vmatprep.mubr.f32.mxu0 %v31451_v0  ;;  %v713_v41 = vrot.slane %v25133_v57, 2  ;;  %v27594_v57 = vpack.c.bf16 %v944_v50, %v938_v47  ;;  %v25160_v47 = vld [vmem:[%s25862_s24 + $0x78] sm:$0xff] }
 0x394   : > { %4960 = vmatprep.mubr.f32.mxu1 %v31451_v0  ;;  %v822_v50 = vrot.slane %v25160_v47, 2  ;;  %v23403_v47 = vld [vmem:[%s31429_s4 + $0x124] ss:$12 sps:$4 sm:$0xff]  }
 0x396   : > { %19438 = vmatmul.mubr.msk.f32.gmra.mrb[44].mxu0 %vm957_vm3, %v27033_v42  ;;  %v27485_v42 = vsel %vm692_vm5, %v713_v41, %v714_v29  ;;  %v943_v41 = vld [vmem:[#allocation2 + $0x350] sm:$0xff]  ;;  %v956_v29 = vld [vmem:[#allocation2 + $0x3b8] sm:$0xf] }
 0x397   : > { %19456 = vmatmul.mubr.msk.f32.gmra.mrb[44].mxu1 %vm957_vm3, %v27464_v14  ;;  %4677 = vmatprep.mubr.f32.mxu0 %v31451_v0  ;;  %v27696_v24 = vpack.c.bf16 %v956_v29, %v950_v48  ;;  %v25164_v29 = vld [vmem:[%s25862_s24 + $0x98] sm:$0xff] }
 0x398   : > { %4966 = vmatprep.mubr.f32.mxu1 %v31451_v0 }
 0x39a   : > { %19439 = vmatmul.mubr.msk.f32.gmra.mrb[46].mxu0 %vm957_vm3, %v27042_v11  ;;  %v25136_v11 = vld [vmem:[%s26056_s21 + $0x78] sm:$0xff] }
 0x39b   : > { %19457 = vmatmul.mubr.msk.f32.gmra.mrb[46].mxu1 %vm957_vm3, %v27476_v17  ;;  %4683 = vmatprep.mubr.f32.mxu0 %v31451_v0  ;;  %v718_v28 = vrot.slane %v25136_v11, 2  ;;  %v949_v11 = vld [vmem:[#allocation2 + $0x380] sm:$0xff] }
 0x39c   : > { %4972 = vmatprep.mubr.f32.mxu1 %v31451_v0 }
 0x39e   : > { %19440 = vmatmul.mubr.msk.f32.gmra.mrb[48].mxu0 %vm957_vm3, %v27054_v12  ;;  %v27506_v12 = vsel %vm692_vm5, %v718_v28, %v719_v56  ;;  %v955_v28 = vld [vmem:[#allocation2 + $0x3b0] sm:$0xf] }
 0x39f   : > { %19458 = vmatmul.mubr.msk.f32.gmra.mrb[48].mxu1 %vm957_vm3, %v27485_v42  ;;  %4689 = vmatprep.mubr.f32.mxu0 %v31451_v0  ;;  %v27707_v55 = vpack.c.bf16 %v955_v28, %v949_v11  ;;  %v25166_v28 = vld [vmem:[%s25862_s24 + $0xa8] sm:$0xff] }
 0x3a0   : > { %4978 = vmatprep.mubr.f32.mxu1 %v31451_v0 }
 0x3a2   : > { %19441 = vmatmul.mubr.msk.f32.gmra.mrb[50].mxu0 %vm957_vm3, %v27063_v21  ;;  %v25139_v21 = vld [vmem:[%s26056_s21 + $0x90] sm:$0xff] }
 0x3a3   : > { %19459 = vmatmul.mubr.msk.f32.gmra.mrb[50].mxu1 %vm957_vm3, %v27497_v60  ;;  %4695 = vmatprep.mubr.f32.mxu0 %v31451_v0  ;;  %v723_v19 = vrot.slane %v25139_v21, 2 }
 0x3a4   : > { %4984 = vmatprep.mubr.f32.mxu1 %v31451_v0 }
 0x3a6   : > { %19442 = vmatmul.mubr.msk.f32.gmra.mrb[52].mxu0 %vm957_vm3, %v27075_v22  ;;  %v27527_v22 = vsel %vm692_vm5, %v723_v19, %v724_v49  ;;  %v25147_v19 = vld [vmem:[%s25862_s24 + $0x10] sm:$0x3] }
 0x3a7   : > { %19460 = vmatmul.mubr.msk.f32.gmra.mrb[52].mxu1 %vm957_vm3, %v27506_v12  ;;  %4701 = vmatprep.mubr.f32.mxu0 %v31451_v0  ;;  %v800_v3 = vrot.slane %v25147_v19, 2  ;;  %v23362_v19 = vld [vmem:[%s31429_s4 + $0x1c] ss:$12 sps:$4 sm:$0xff]  }
 0x3a8   : > { %4990 = vmatprep.mubr.f32.mxu1 %v31451_v0 }
 0x3a9   : > { %v27823_v49 = vsel %vm692_vm5, %v798_v62, %v800_v3  ;;  %v23360_v3 = vld [vmem:[%s31429_s4 + $0x18] ss:$12 sps:$4 sm:$0xff]  }
 0x3aa   : > { %19443 = vmatmul.mubr.msk.f32.gmra.mrb[54].mxu0 %vm957_vm3, %v27084_v23  ;;  %v25142_v23 = vld [vmem:[%s26056_s21 + $0xa8] sm:$0xff] }
 0x3ab   : > { %19461 = vmatmul.mubr.msk.f32.gmra.mrb[54].mxu1 %vm957_vm3, %v27518_v25  ;;  %4707 = vmatprep.mubr.f32.mxu0 %v31451_v0  ;;  %v728_v8 = vrot.slane %v25142_v23, 2  ;;  %v25149_v23 = vld [vmem:[%s25862_s24 + $0x20] sm:$0xff] }
 0x3ac   : > { %4996 = vmatprep.mubr.f32.mxu1 %v31451_v0 }
 0x3ae   : > { %19444 = vmatmul.mubr.msk.f32.gmra.mrb[56].mxu0 %vm957_vm3, %v27096_v30  ;;  %v27548_v30 = vsel %vm692_vm5, %v728_v8, %v729_v32  ;;  %v803_v8 = vrot.slane %v25149_v23, 2  ;;  %v23363_v23 = vld [vmem:[%s31429_s4 + $0x30] ss:$12 sps:$4 sm:$0xff]  }
 0x3af   : > { %19462 = vmatmul.mubr.msk.f32.gmra.mrb[56].mxu1 %vm957_vm3, %v27527_v22  ;;  %4713 = vmatprep.mubr.f32.mxu0 %v31451_v0 }
 0x3b0   : > { %5002 = vmatprep.mubr.f32.mxu1 %v31451_v0 }
 0x3b2   : > { %19445 = vmatmul.mubr.msk.f32.gmra.mrb[58].mxu0 %vm957_vm3, %v27105_v45  ;;  %v27558_v45 = vsel %vm692_vm5, %v729_v32, %v731_v58  ;;  %v805_v32 = vrot.slane %v25150_v7, 2  ;;  %v807_v58 = vrot.slane %v25151_v39, 2  ;;  %v23394_v7 = vld [vmem:[%s31429_s4 + $0xf8] ss:$12 sps:$4 sm:$0xff]  }
 0x3b3   : > { %19463 = vmatmul.mubr.msk.f32.gmra.mrb[58].mxu1 %vm957_vm3, %v27539_v36  ;;  %4719 = vmatprep.mubr.f32.mxu0 %v31451_v0  ;;  %v23395_v39 = vld [vmem:[%s31429_s4 + $0x38] ss:$12 sps:$4 sm:$0xff]  }
 0x3b4   : > { %5008 = vmatprep.mubr.f32.mxu1 %v31451_v0 }
 0x3b6   : > { %19446 = vmatmul.mubr.msk.f32.gmra.mrb[60].mxu0 %vm957_vm3, %v27117_v34  ;;  %v946_v34 = vld [vmem:[#allocation2 + $0x368] sm:$0xff] }
 0x3b7   : > { %19464 = vmatmul.mubr.msk.f32.gmra.mrb[60].mxu1 %vm957_vm3, %v27548_v30  ;;  %4725 = vmatprep.mubr.f32.mxu0 %v31451_v0 }
 0x3b8   : > { %5014 = vmatprep.mubr.f32.mxu1 %v31451_v0 }
 0x3ba   : > { %19447 = vmatmul.mubr.msk.f32.gmra.mrb[62].mxu0 %vm957_vm3, %v27126_v51  ;;  %v27574_v51 = vpack.c.bf16 %v952_v18, %v946_v34  ;;  %v813_v34 = vrot.slane %v25155_v33, 2  ;;  %v25156_v18 = vld [vmem:[%s25862_s24 + $0x58] sm:$0x3]  ;;  %v23375_v33 = vld [vmem:[%s31429_s4 + $0x90] ss:$12 sps:$4 sm:$0xff]  }
 0x3bb   : > { %19465 = vmatmul.mubr.msk.f32.gmra.mrb[62].mxu1 %vm957_vm3, %v27558_v45  ;;  %5246 = vmatprep.mubr.f32.mxu0 %v31451_v0 }
 0x3bc   : > { %5085 = vmatprep.mubr.f32.mxu1 %v31451_v0 }
 0x3be   : > { %19486 = vmatmul.mubr.msk.f32.vlgmr.msra.gmra.mrb[64].mxu0 %vm957_vm3, %v27381_v6 }
 0x3bf   : > { %19468 = vmatmul.mubr.msk.f32.vlgmr.msra.gmra.mrb[64].mxu1 %vm957_vm3, %v27381_v6  ;;  %5252 = vmatprep.mubr.f32.mxu0 %v31451_v0 }
 0x3c0   : > { %5091 = vmatprep.mubr.f32.mxu1 %v31451_v0  ;;  %21920 = vmatpush1.bf16.msra.mxu1 %v27566_v31 }
 0x3c1   : > { %21923 = vmatprep.subr.msk.bf16.mxu1 %vm25834_vm2, %v27568_v43  ;;  %21910 = vmatpush1.bf16.msra.mxu0 %v27570_v54 }
 0x3c2   : > { %19487 = vmatmul.mubr.msk.f32.gmra.mrb[66].mxu0 %vm957_vm3, %v27393_v20  ;;  %21913 = vmatprep.subr.msk.bf16.mxu0 %vm25834_vm2, %v27574_v51 }
 0x3c3   : > { %19469 = vmatmul.mubr.msk.f32.gmra.mrb[66].mxu1 %vm957_vm3, %v27393_v20  ;;  %5258 = vmatprep.mubr.f32.mxu0 %v31451_v0 }
 0x3c4   : > { %5097 = vmatprep.mubr.f32.mxu1 %v31451_v0  ;;  %21926 = vmatpush1.bf16.msk.msra.mxu1 %vm25834_vm2, %v27581_v52 }
 0x3c5   : > { %21916 = vmatpush1.bf16.msk.msra.mxu0 %vm25834_vm2, %v27587_v40  ;;  %21938 = vmatprep.subr.bf16.mxu1 %v27407_v27  ;;  %v937_v27 = vld [vmem:[#allocation2 + $0x320] sm:$0xff] }
 0x3c6   : > { %19488 = vmatmul.mubr.msk.f32.gmra.mrb[68].mxu0 %vm957_vm3, %v27414_v10  ;;  %21928 = vmatprep.subr.bf16.mxu0 %v27594_v57  ;;  %v27692_v26 = vpack.c.bf16 %v943_v41, %v937_v27  ;;  %v25163_v41 = vld [vmem:[%s25862_s24 + $0x90] sm:$0xff] }
 0x3c7   : > { %19470 = vmatmul.mubr.msk.f32.gmra.mrb[68].mxu1 %vm957_vm3, %v27414_v10  ;;  %5264 = vmatprep.mubr.f32.mxu0 %v31451_v0  ;;  %v827_v48 = vrot.slane %v25163_v41, 2  ;;  %v23423_v41 = vld [vmem:[%s31429_s4 + $0x184] ss:$12 sps:$4 sm:$0xff]  }
 0x3c8   : > { %5103 = vmatprep.mubr.f32.mxu1 %v31451_v0 }
 0x3ca   : > { %19489 = vmatmul.mubr.msk.f32.gmra.mrb[70].mxu0 %vm957_vm3, %v27434_v44 }
 0x3cb   : > { %19471 = vmatmul.mubr.msk.f32.gmra.mrb[70].mxu1 %vm957_vm3, %v27434_v44  ;;  %5270 = vmatprep.mubr.f32.mxu0 %v31451_v0 }
 0x3cc   : > { %5109 = vmatprep.mubr.f32.mxu1 %v31451_v0 }
 0x3ce   : > { %19490 = vmatmul.mubr.msk.f32.gmra.mrb[72].mxu0 %vm957_vm3, %v27443_v53 }
 0x3cf   : > { %19472 = vmatmul.mubr.msk.f32.gmra.mrb[72].mxu1 %vm957_vm3, %v27443_v53  ;;  %5276 = vmatprep.mubr.f32.mxu0 %v31451_v0 }
 0x3d0   : > { %5115 = vmatprep.mubr.f32.mxu1 %v31451_v0 }
 0x3d2   : > { %19491 = vmatmul.mubr.msk.f32.gmra.mrb[74].mxu0 %vm957_vm3, %v27455_v38 }
 0x3d3   : > { %19473 = vmatmul.mubr.msk.f32.gmra.mrb[74].mxu1 %vm957_vm3, %v27455_v38  ;;  %5282 = vmatprep.mubr.f32.mxu0 %v31451_v0 }
 0x3d4   : > { %5121 = vmatprep.mubr.f32.mxu1 %v31451_v0 }
 0x3d6   : > { %19492 = vmatmul.mubr.msk.f32.gmra.mrb[76].mxu0 %vm957_vm3, %v27464_v14 }
 0x3d7   : > { %19474 = vmatmul.mubr.msk.f32.gmra.mrb[76].mxu1 %vm957_vm3, %v27464_v14  ;;  %5288 = vmatprep.mubr.f32.mxu0 %v31451_v0 }
 0x3d8   : > { %5127 = vmatprep.mubr.f32.mxu1 %v31451_v0 }
 0x3da   : > { %19493 = vmatmul.mubr.msk.f32.gmra.mrb[78].mxu0 %vm957_vm3, %v27476_v17 }
 0x3db   : > { %19475 = vmatmul.mubr.msk.f32.gmra.mrb[78].mxu1 %vm957_vm3, %v27476_v17  ;;  %5294 = vmatprep.mubr.f32.mxu0 %v31451_v0 }
 0x3dc   : > { %5133 = vmatprep.mubr.f32.mxu1 %v31451_v0 }
 0x3de   : > { %19494 = vmatmul.mubr.msk.f32.gmra.mrb[80].mxu0 %vm957_vm3, %v27485_v42 }
 0x3df   : > { %19476 = vmatmul.mubr.msk.f32.gmra.mrb[80].mxu1 %vm957_vm3, %v27485_v42  ;;  %5300 = vmatprep.mubr.f32.mxu0 %v31451_v0 }
 0x3e0   : > { %5139 = vmatprep.mubr.f32.mxu1 %v31451_v0 }
 0x3e2   : > { %19495 = vmatmul.mubr.msk.f32.gmra.mrb[82].mxu0 %vm957_vm3, %v27497_v60 }
 0x3e3   : > { %19477 = vmatmul.mubr.msk.f32.gmra.mrb[82].mxu1 %vm957_vm3, %v27497_v60  ;;  %5306 = vmatprep.mubr.f32.mxu0 %v31451_v0 }
 0x3e4   : > { %5145 = vmatprep.mubr.f32.mxu1 %v31451_v0 }
 0x3e6   : > { %19496 = vmatmul.mubr.msk.f32.gmra.mrb[84].mxu0 %vm957_vm3, %v27506_v12 }
 0x3e7   : > { %19478 = vmatmul.mubr.msk.f32.gmra.mrb[84].mxu1 %vm957_vm3, %v27506_v12  ;;  %5312 = vmatprep.mubr.f32.mxu0 %v31451_v0 }
 0x3e8   : > { %5151 = vmatprep.mubr.f32.mxu1 %v31451_v0 }
 0x3ea   : > { %19497 = vmatmul.mubr.msk.f32.gmra.mrb[86].mxu0 %vm957_vm3, %v27518_v25 }
 0x3eb   : > { %19479 = vmatmul.mubr.msk.f32.gmra.mrb[86].mxu1 %vm957_vm3, %v27518_v25  ;;  %5318 = vmatprep.mubr.f32.mxu0 %v31451_v0 }
 0x3ec   : > { %5157 = vmatprep.mubr.f32.mxu1 %v31451_v0 }
 0x3ee   : > { %19498 = vmatmul.mubr.msk.f32.gmra.mrb[88].mxu0 %vm957_vm3, %v27527_v22 }
 0x3ef   : > { %19480 = vmatmul.mubr.msk.f32.gmra.mrb[88].mxu1 %vm957_vm3, %v27527_v22  ;;  %5324 = vmatprep.mubr.f32.mxu0 %v31451_v0 }
 0x3f0   : > { %5163 = vmatprep.mubr.f32.mxu1 %v31451_v0 }
 0x3f2   : > { %19499 = vmatmul.mubr.msk.f32.gmra.mrb[90].mxu0 %vm957_vm3, %v27539_v36 }
 0x3f3   : > { %19481 = vmatmul.mubr.msk.f32.gmra.mrb[90].mxu1 %vm957_vm3, %v27539_v36  ;;  %5330 = vmatprep.mubr.f32.mxu0 %v31451_v0 }
 0x3f4   : > { %5169 = vmatprep.mubr.f32.mxu1 %v31451_v0 }
 0x3f6   : > { %19500 = vmatmul.mubr.msk.f32.gmra.mrb[92].mxu0 %vm957_vm3, %v27548_v30 }
 0x3f7   : > { %19482 = vmatmul.mubr.msk.f32.gmra.mrb[92].mxu1 %vm957_vm3, %v27548_v30  ;;  %5336 = vmatprep.mubr.f32.mxu0 %v31451_v0 }
 0x3f8   : > { %5175 = vmatprep.mubr.f32.mxu1 %v31451_v0 }
 0x3fa   : > { %19501 = vmatmul.mubr.msk.f32.gmra.mrb[94].mxu0 %vm957_vm3, %v27558_v45 }
 0x3fb   : > { %19483 = vmatmul.mubr.msk.f32.gmra.mrb[94].mxu1 %vm957_vm3, %v27558_v45  ;;  %5521 = vmatprep.mubr.f32.mxu0 %v31451_v0 }
 0x3fc   : > { %5682 = vmatprep.mubr.f32.mxu1 %v31451_v0 }
 0x3fe   : > { %19504 = vmatmul.mubr.msk.f32.vlgmr.msra.gmra.mrb[0].mxu0 %vm957_vm3, %v27381_v6 }
 0x3ff   : > { %19522 = vmatmul.mubr.msk.f32.vlgmr.msra.gmra.mrb[0].mxu1 %vm957_vm3, %v27381_v6  ;;  %5527 = vmatprep.mubr.f32.mxu0 %v31451_v0 }
 0x400   : > { %5688 = vmatprep.mubr.f32.mxu1 %v31451_v0  ;;  %21940 = vmatpush1.bf16.msra.mxu1 %v27570_v54  ;;  %v818_v54 = vrot.slane %v25158_v46, 2  ;;  %v23381_v46 = vld [vmem:[%s31429_s4 + $0xc0] ss:$12 sps:$4 sm:$0xff]  }
 0x401   : > { %21943 = vmatprep.subr.msk.bf16.mxu1 %vm25834_vm2, %v27574_v51  ;;  %21930 = vmatpush1.bf16.msra.mxu0 %v27692_v26  ;;  %v25159_v51 = vld [vmem:[%s25862_s24 + $0x70] sm:$0x3] }
 0x402   : > { %19505 = vmatmul.mubr.msk.f32.gmra.mrb[2].mxu0 %vm957_vm3, %v27393_v20  ;;  %21933 = vmatprep.subr.msk.bf16.mxu0 %vm25834_vm2, %v27696_v24  ;;  %v820_v63 = vrot.slane %v25159_v51, 2  ;;  %v23386_v51 = vld [vmem:[%s31429_s4 + $0xd8] ss:$12 sps:$4 sm:$0xff]  }
 0x403   : > { %19523 = vmatmul.mubr.msk.f32.gmra.mrb[2].mxu1 %vm957_vm3, %v27393_v20  ;;  %5533 = vmatprep.mubr.f32.mxu0 %v31451_v0 }
 0x404   : > { %5694 = vmatprep.mubr.f32.mxu1 %v31451_v0  ;;  %21946 = vmatpush1.bf16.msk.msra.mxu1 %vm25834_vm2, %v27587_v40  ;;  %v27924_v35 = vsel %vm692_vm5, %v818_v54, %v820_v63  ;;  %v23393_v63 = vld [vmem:[%s31429_s4 + $0xf4] ss:$12 sps:$4 sm:$0xff]  }
 0x405   : > { %21936 = vmatpush1.bf16.msk.msra.mxu0 %vm25834_vm2, %v27707_v55  ;;  %21948 = vmatprep.subr.bf16.mxu1 %v27400_v2  ;;  %v25145_v2 = vld [vmem:[%s25862_s24] sm:$0xff] }
 0x406   : > { %19506 = vmatmul.mubr.msk.f32.gmra.mrb[4].mxu0 %vm957_vm3, %v27414_v10  ;;  %21958 = vmatprep.subr.bf16.mxu0 %v27594_v57  ;;  %v797_v56 = vrot.slane %v25145_v2, 2  ;;  %v25162_v57 = vld [vmem:[%s25862_s24 + $0x88] sm:$0x3]  ;;  %v25167_v2 = vld [vmem:[%s25862_s24 + $0xb0] sm:$0xff] }
 0x407   : > { %19524 = vmatmul.mubr.msk.f32.gmra.mrb[4].mxu1 %vm957_vm3, %v27414_v10  ;;  %5539 = vmatprep.mubr.f32.mxu0 %v31451_v0  ;;  %v825_v27 = vrot.slane %v25162_v57, 2  ;;  %v23411_v57 = vld [vmem:[%s31429_s4 + $0x150] ss:$12 sps:$4 sm:$0xff]  }
 0x408   : > { %5700 = vmatprep.mubr.f32.mxu1 %v31451_v0  ;;  %v27813_v21 = vsel %vm692_vm5, %v797_v56, %v798_v62  ;;  %v833_v56 = vrot.slane %v25167_v2, 2  ;;  %v835_v62 = vrot.slane %v25168_v61, 2 }
 0x40a   : > { %19507 = vmatmul.mubr.msk.f32.gmra.mrb[6].mxu0 %vm957_vm3, %v27434_v44 }
 0x40b   : > { %19525 = vmatmul.mubr.msk.f32.gmra.mrb[6].mxu1 %vm957_vm3, %v27434_v44  ;;  %5545 = vmatprep.mubr.f32.mxu0 %v31451_v0 }
 0x40c   : > { %5706 = vmatprep.mubr.f32.mxu1 %v31451_v0 }
 0x40e   : > { %19508 = vmatmul.mubr.msk.f32.gmra.mrb[8].mxu0 %vm957_vm3, %v27443_v53 }
 0x40f   : > { %19526 = vmatmul.mubr.msk.f32.gmra.mrb[8].mxu1 %vm957_vm3, %v27443_v53  ;;  %5551 = vmatprep.mubr.f32.mxu0 %v31451_v0 }
 0x410   : > { %5712 = vmatprep.mubr.f32.mxu1 %v31451_v0 }
 0x412   : > { %19509 = vmatmul.mubr.msk.f32.gmra.mrb[10].mxu0 %vm957_vm3, %v27455_v38 }
 0x413   : > { %19527 = vmatmul.mubr.msk.f32.gmra.mrb[10].mxu1 %vm957_vm3, %v27455_v38  ;;  %5557 = vmatprep.mubr.f32.mxu0 %v31451_v0 }
 0x414   : > { %5718 = vmatprep.mubr.f32.mxu1 %v31451_v0 }
 0x416   : > { %19510 = vmatmul.mubr.msk.f32.gmra.mrb[12].mxu0 %vm957_vm3, %v27464_v14 }
 0x417   : > { %19528 = vmatmul.mubr.msk.f32.gmra.mrb[12].mxu1 %vm957_vm3, %v27464_v14  ;;  %5563 = vmatprep.mubr.f32.mxu0 %v31451_v0 }
 0x418   : > { %5724 = vmatprep.mubr.f32.mxu1 %v31451_v0 }
 0x41a   : > { %19511 = vmatmul.mubr.msk.f32.gmra.mrb[14].mxu0 %vm957_vm3, %v27476_v17 }
 0x41b   : > { %19529 = vmatmul.mubr.msk.f32.gmra.mrb[14].mxu1 %vm957_vm3, %v27476_v17  ;;  %5569 = vmatprep.mubr.f32.mxu0 %v31451_v0 }
 0x41c   : > { %5730 = vmatprep.mubr.f32.mxu1 %v31451_v0 }
 0x41e   : > { %19512 = vmatmul.mubr.msk.f32.gmra.mrb[16].mxu0 %vm957_vm3, %v27485_v42 }
 0x41f   : > { %19530 = vmatmul.mubr.msk.f32.gmra.mrb[16].mxu1 %vm957_vm3, %v27485_v42  ;;  %5575 = vmatprep.mubr.f32.mxu0 %v31451_v0 }
 0x420   : > { %5736 = vmatprep.mubr.f32.mxu1 %v31451_v0 }
 0x422   : > { %19513 = vmatmul.mubr.msk.f32.gmra.mrb[18].mxu0 %vm957_vm3, %v27497_v60 }
 0x423   : > { %19531 = vmatmul.mubr.msk.f32.gmra.mrb[18].mxu1 %vm957_vm3, %v27497_v60  ;;  %5581 = vmatprep.mubr.f32.mxu0 %v31451_v0 }
 0x424   : > { %5742 = vmatprep.mubr.f32.mxu1 %v31451_v0 }
 0x426   : > { %19514 = vmatmul.mubr.msk.f32.gmra.mrb[20].mxu0 %vm957_vm3, %v27506_v12 }
 0x427   : > { %19532 = vmatmul.mubr.msk.f32.gmra.mrb[20].mxu1 %vm957_vm3, %v27506_v12  ;;  %5587 = vmatprep.mubr.f32.mxu0 %v31451_v0 }
 0x428   : > { %5748 = vmatprep.mubr.f32.mxu1 %v31451_v0 }
 0x42a   : > { %19515 = vmatmul.mubr.msk.f32.gmra.mrb[22].mxu0 %vm957_vm3, %v27518_v25 }
 0x42b   : > { %19533 = vmatmul.mubr.msk.f32.gmra.mrb[22].mxu1 %vm957_vm3, %v27518_v25  ;;  %5593 = vmatprep.mubr.f32.mxu0 %v31451_v0 }
 0x42c   : > { %5754 = vmatprep.mubr.f32.mxu1 %v31451_v0 }
 0x42e   : > { %19516 = vmatmul.mubr.msk.f32.gmra.mrb[24].mxu0 %vm957_vm3, %v27527_v22 }
 0x42f   : > { %19534 = vmatmul.mubr.msk.f32.gmra.mrb[24].mxu1 %vm957_vm3, %v27527_v22  ;;  %5599 = vmatprep.mubr.f32.mxu0 %v31451_v0 }
 0x430   : > { %5760 = vmatprep.mubr.f32.mxu1 %v31451_v0 }
 0x432   : > { %19517 = vmatmul.mubr.msk.f32.gmra.mrb[26].mxu0 %vm957_vm3, %v27539_v36 }
 0x433   : > { %19535 = vmatmul.mubr.msk.f32.gmra.mrb[26].mxu1 %vm957_vm3, %v27539_v36  ;;  %5605 = vmatprep.mubr.f32.mxu0 %v31451_v0 }
 0x434   : > { %5766 = vmatprep.mubr.f32.mxu1 %v31451_v0 }
 0x436   : > { %19518 = vmatmul.mubr.msk.f32.gmra.mrb[28].mxu0 %vm957_vm3, %v27548_v30 }
 0x437   : > { %19536 = vmatmul.mubr.msk.f32.gmra.mrb[28].mxu1 %vm957_vm3, %v27548_v30  ;;  %5611 = vmatprep.mubr.f32.mxu0 %v31451_v0 }
 0x438   : > { %5772 = vmatprep.mubr.f32.mxu1 %v31451_v0 }
 0x43a   : > { %19519 = vmatmul.mubr.msk.f32.gmra.mrb[30].mxu0 %vm957_vm3, %v27558_v45 }
 0x43b   : > { %19537 = vmatmul.mubr.msk.f32.gmra.mrb[30].mxu1 %vm957_vm3, %v27558_v45  ;;  %5843 = vmatprep.mubr.f32.mxu0 %v31451_v0 }
 0x43c   : > { %6132 = vmatprep.mubr.f32.mxu1 %v31451_v0 }
 0x43e   : > { %19540 = vmatmul.mubr.msk.f32.vlgmr.msra.gmra.mrb[32].mxu0 %vm957_vm3, %v27381_v6  ;;  %v27842_v6 = vsel %vm692_vm5, %v802_v5, %v803_v8  ;;  %v23389_v5 = vld [vmem:[%s31429_s4 + $0xe0] ss:$12 sps:$4 sm:$0xff]  }
 0x43f   : > { %19558 = vmatmul.mubr.msk.f32.vlgmr.msra.gmra.mrb[32].mxu1 %vm957_vm3, %v27813_v21  ;;  %5849 = vmatprep.mubr.f32.mxu0 %v31451_v0 }
 0x440   : > { %6138 = vmatprep.mubr.f32.mxu1 %v31451_v0  ;;  %21950 = vmatpush1.bf16.msra.mxu1 %v27566_v31  ;;  %v815_v31 = vrot.slane %v25156_v18, 2  ;;  %v23414_v18 = vld [vmem:[%s31429_s4 + $0x158] ss:$12 sps:$4 sm:$0xff]  }
 0x441   : > { %21953 = vmatprep.subr.msk.bf16.mxu1 %vm25834_vm2, %v27568_v43  ;;  %21960 = vmatpush1.bf16.msra.mxu0 %v27692_v26  ;;  %v25157_v43 = vld [vmem:[%s25862_s24 + $0x60] sm:$0xff]  ;;  %v828_v26 = vrot.slane %v25164_v29, 2  ;;  %v6745_v29 = vlaneseq }
 0x442   : > { %19541 = vmatmul.mubr.msk.f32.gmra.mrb[34].mxu0 %vm957_vm3, %v27393_v20  ;;  %21963 = vmatprep.subr.msk.bf16.mxu0 %vm25834_vm2, %v27696_v24  ;;  %v27858_v20 = vsel %vm692_vm5, %v803_v8, %v805_v32  ;;  %v817_v37 = vrot.slane %v25157_v43, 2  ;;  %v25165_v24 = vld [vmem:[%s25862_s24 + $0xa0] sm:$0x3]  ;;  %v23366_v32 = vld [vmem:[%s31429_s4 + $0x48] ss:$12 sps:$4 sm:$0xff]  }
 0x443   : > { %19559 = vmatmul.mubr.msk.f32.gmra.mrb[34].mxu1 %vm957_vm3, %v27823_v49  ;;  %5855 = vmatprep.mubr.f32.mxu0 %v31451_v0  ;;  %v830_v11 = vrot.slane %v25165_v24, 2  ;;  %v23390_v8 = vld [vmem:[%s31429_s4 + $0x20] ss:$12 sps:$4 sm:$0xff]   ;;  %v23415_v43 = vld [vmem:[%s31429_s4 + $0x98] ss:$12 sps:$4 sm:$0xff]  }
 0x444   : > { %6144 = vmatprep.mubr.f32.mxu1 %v31451_v0  ;;  %21956 = vmatpush1.bf16.msk.msra.mxu1 %vm25834_vm2, %v27581_v52  ;;  %v25161_v52 = vld [vmem:[%s25862_s24 + $0x80] sm:$0xff]  ;;  %s19065_s24 = sshll.u32 %s561_s27, 3 }
 0x445   : > { %21966 = vmatpush1.bf16.msk.msra.mxu0 %vm25834_vm2, %v27707_v55  ;;  %v832_v55 = vrot.slane %v25166_v28, 2  ;;  %v28245_v28 = vld [vmem:[#allocation5] sm:$0x3f]  ;;  %vm15218_vm2 = vcmask 523264   ;;  %s563_s6 = scalar_lea.vmem [#allocation16], %s19065_s24 }
 0x446   : > { %19542 = vmatmul.mubr.msk.f32.gmra.mrb[36].mxu0 %vm957_vm3, %v27414_v10  ;;  %v27869_v10 = vsel %vm692_vm5, %v807_v58, %v808_v1  ;;  %v23399_v58 = vld [vmem:[%s31429_s4 + $0x110] ss:$12 sps:$4 sm:$0xff]   ;;  %s18895_s21 = sshll.u32 %s563_s6, 4  ;;  %s31385_s21 = int_to_ptr.vmem [resolvable:$true] %s18895_s21 }
 0x447   : > { %19560 = vmatmul.mubr.msk.f32.gmra.mrb[36].mxu1 %vm957_vm3, %v27842_v6  ;;  %5861 = vmatprep.mubr.f32.mxu0 %v31451_v0  ;;  %s25393_s17 = scalar_lea.vmem %s31385_s21, 128  ;;  %p25400_p1 = scmp.lt.s32.totalorder %s31385_s21, %s25398_s13 }
 0x448   : > { %6150 = vmatprep.mubr.f32.mxu1 %v31451_v0  ;;  %p25394_p8 = scmp.ne.s32.totalorder %s31385_s21, %s25393_s17  ;;  %p25401_p6 = scmp.lt.s32.totalorder %s25399_s15, %s25393_s17 }
 0x44a   : > { %19543 = vmatmul.mubr.msk.f32.gmra.mrb[38].mxu0 %vm957_vm3, %v27434_v44  ;;  %v27879_v44 = vsel %vm692_vm5, %v808_v1, %v810_v15  ;;  %v23400_v1 = vld [vmem:[%s31429_s4 + $0x50] ss:$12 sps:$4 sm:$0xff]   ;;  %v23372_v15 = vld [vmem:[%s31429_s4 + $0x78] ss:$12 sps:$4 sm:$0xff]   ;;  %p25395_p13 = pnand %p25394_p8, %p31821_p11  ;;  %p25402_p5 = por %p25401_p6, %p25400_p1 }
 0x44b   : > { %19561 = vmatmul.mubr.msk.f32.gmra.mrb[38].mxu1 %vm957_vm3, %v27858_v20  ;;  %5867 = vmatprep.mubr.f32.mxu0 %v31451_v0 }
 0x44c   : > { %6156 = vmatprep.mubr.f32.mxu1 %v31451_v0  ;;  %p25396_p0 = pneg %p25395_p13 }
 0x44e   : > { %19544 = vmatmul.mubr.msk.f32.gmra.mrb[40].mxu0 %vm957_vm3, %v27443_v53  ;;  %v27890_v53 = vsel %vm692_vm5, %v812_v9, %v813_v34  ;;  %v23409_v9 = vld [vmem:[%s31429_s4 + $0x140] ss:$12 sps:$4 sm:$0xff]   ;;  %p25403_p9 = pnand %p25402_p5, %p25396_p0 }
 0x44f   : > { %19562 = vmatmul.mubr.msk.f32.gmra.mrb[40].mxu1 %vm957_vm3, %v27869_v10  ;;  %5873 = vmatprep.mubr.f32.mxu0 %v31451_v0 }
 0x450   : > { %6162 = vmatprep.mubr.f32.mxu1 %v31451_v0 }
 0x452   : > { %19545 = vmatmul.mubr.msk.f32.gmra.mrb[42].mxu0 %vm957_vm3, %v27455_v38  ;;  %v27900_v38 = vsel %vm692_vm5, %v813_v34, %v815_v31  ;;  %v23410_v34 = vld [vmem:[%s31429_s4 + $0x80] ss:$12 sps:$4 sm:$0xff]   ;;  %v23378_v31 = vld [vmem:[%s31429_s4 + $0xa8] ss:$12 sps:$4 sm:$0xff]  }
 0x453   : > { %19563 = vmatmul.mubr.msk.f32.gmra.mrb[42].mxu1 %vm957_vm3, %v27879_v44  ;;  %5879 = vmatprep.mubr.f32.mxu0 %v31451_v0 }
 0x454   : > { %6168 = vmatprep.mubr.f32.mxu1 %v31451_v0 }
 0x456   : > { %19546 = vmatmul.mubr.msk.f32.gmra.mrb[44].mxu0 %vm957_vm3, %v27464_v14  ;;  %v27911_v14 = vsel %vm692_vm5, %v817_v37, %v818_v54  ;;  %v23419_v37 = vld [vmem:[%s31429_s4 + $0x170] ss:$12 sps:$4 sm:$0xff]  }
 0x457   : > { %19564 = vmatmul.mubr.msk.f32.gmra.mrb[44].mxu1 %vm957_vm3, %v27890_v53  ;;  %5885 = vmatprep.mubr.f32.mxu0 %v31451_v0  ;;  %v23420_v54 = vld [vmem:[%s31429_s4 + $0xb0] ss:$12 sps:$4 sm:$0xff]  }
 0x458   : > { %6174 = vmatprep.mubr.f32.mxu1 %v31451_v0 }
 0x45a   : > { %19547 = vmatmul.mubr.msk.f32.gmra.mrb[46].mxu0 %vm957_vm3, %v27476_v17  ;;  %v23359_v17 = vld [vmem:[%s31429_s4 + $0x4] ss:$12 sps:$4 sm:$0xff]  }
 0x45b   : > { %19565 = vmatmul.mubr.msk.f32.gmra.mrb[46].mxu1 %vm957_vm3, %v27900_v38  ;;  %5891 = vmatprep.mubr.f32.mxu0 %v31451_v0 }
 0x45c   : > { %6180 = vmatprep.mubr.f32.mxu1 %v31451_v0  ;;  %7975 = vmatprep.subr.bf16.mxu0 %v23359_v17  ;;  %v23398_v17 = vld [vmem:[%s31429_s4 + $0x10c] ss:$12 sps:$4 sm:$0xff]  }
 0x45e   : > { %19548 = vmatmul.mubr.msk.f32.gmra.mrb[48].mxu0 %vm957_vm3, %v27485_v42  ;;  %v823_v42 = vrot.slane %v25161_v52, 2  ;;  %v23408_v52 = vld [vmem:[%s31429_s4 + $0x13c] ss:$12 sps:$4 sm:$0xff]  }
 0x45f   : > { %19566 = vmatmul.mubr.msk.f32.gmra.mrb[48].mxu1 %vm957_vm3, %v27911_v14  ;;  %5897 = vmatprep.mubr.f32.mxu0 %v31451_v0 }
 0x460   : > { %6186 = vmatprep.mubr.f32.mxu1 %v31451_v0  ;;  %v27935_v40 = vsel %vm692_vm5, %v822_v50, %v823_v42  ;;  %v23401_v50 = vld [vmem:[%s31429_s4 + $0x120] ss:$12 sps:$4 sm:$0xff]  }
 0x462   : > { %19549 = vmatmul.mubr.msk.f32.gmra.mrb[50].mxu0 %vm957_vm3, %v27497_v60  ;;  %v27945_v60 = vsel %vm692_vm5, %v823_v42, %v825_v27  ;;  %v23406_v42 = vld [vmem:[%s31429_s4 + $0x138] ss:$12 sps:$4 sm:$0xff]  }
 0x463   : > { %19567 = vmatmul.mubr.msk.f32.gmra.mrb[50].mxu1 %vm957_vm3, %v27924_v35  ;;  %5903 = vmatprep.mubr.f32.mxu0 %v31451_v0  ;;  %v23418_v27 = vld [vmem:[%s31429_s4 + $0x16c] ss:$12 sps:$4 sm:$0xff]  }
 0x464   : > { %6192 = vmatprep.mubr.f32.mxu1 %v31451_v0 }
 0x466   : > { %19550 = vmatmul.mubr.msk.f32.gmra.mrb[52].mxu0 %vm957_vm3, %v27506_v12  ;;  %v27956_v12 = vsel %vm692_vm5, %v827_v48, %v828_v26  ;;  %v23448_v48 = vld [vmem:[%s31429_s4 + $0x248] ss:$12 sps:$4 sm:$0xff]  }
 0x467   : > { %19568 = vmatmul.mubr.msk.f32.gmra.mrb[52].mxu1 %vm957_vm3, %v27935_v40  ;;  %5909 = vmatprep.mubr.f32.mxu0 %v31451_v0 }
 0x468   : > { %6198 = vmatprep.mubr.f32.mxu1 %v31451_v0 }
 0x46a   : > { %19551 = vmatmul.mubr.msk.f32.gmra.mrb[54].mxu0 %vm957_vm3, %v27518_v25  ;;  %v27966_v25 = vsel %vm692_vm5, %v828_v26, %v830_v11  ;;  %v28236_v26 = vshrl.u32 %v6745_v29, 7 }
 0x46b   : > { %19569 = vmatmul.mubr.msk.f32.gmra.mrb[54].mxu1 %vm957_vm3, %v27945_v60  ;;  %5915 = vmatprep.mubr.f32.mxu0 %v31451_v0 }
 0x46c   : > { %6204 = vmatprep.mubr.f32.mxu1 %v31451_v0  ;;  %v6763_v24 = vsub.s32 4, %v28236_v26 }
 0x46e   : > { %19552 = vmatmul.mubr.msk.f32.gmra.mrb[56].mxu0 %vm957_vm3, %v27527_v22  ;;  %v27977_v22 = vsel %vm692_vm5, %v832_v55, %v833_v56  ;;  %v6767_v55 = vsub.s32 5, %v28236_v26 }
 0x46f   : > { %19570 = vmatmul.mubr.msk.f32.gmra.mrb[56].mxu1 %vm957_vm3, %v27956_v12  ;;  %5921 = vmatprep.mubr.f32.mxu0 %v31451_v0 }
 0x470   : > { %6210 = vmatprep.mubr.f32.mxu1 %v31451_v0 }
 0x472   : > { %19553 = vmatmul.mubr.msk.f32.gmra.mrb[58].mxu0 %vm957_vm3, %v27539_v36  ;;  %v27987_v36 = vsel %vm692_vm5, %v833_v56, %v835_v62  ;;  %v28251_v56 = vrot.slane %v28245_v28, %v6763_v24 }
 0x473   : > { %19571 = vmatmul.mubr.msk.f32.gmra.mrb[58].mxu1 %vm957_vm3, %v27966_v25  ;;  %5927 = vmatprep.mubr.f32.mxu0 %v31451_v0 }
 0x474   : > { %6216 = vmatprep.mubr.f32.mxu1 %v31451_v0 }
 0x476   : > { %19554 = vmatmul.mubr.msk.f32.gmra.mrb[60].mxu0 %vm957_vm3, %v27548_v30  ;;  %v23357_v30 = vld [vmem:[%s31429_s4] ss:$12 sps:$4 sm:$0xff]  }
 0x477   : > { %19572 = vmatmul.mubr.msk.f32.gmra.mrb[60].mxu1 %vm957_vm3, %v27977_v22  ;;  %5933 = vmatprep.mubr.f32.mxu0 %v31451_v0 }
 0x478   : > { %6222 = vmatprep.mubr.f32.mxu1 %v31451_v0 }
 0x47a   : > { %19555 = vmatmul.mubr.msk.f32.gmra.mrb[62].mxu0 %vm957_vm3, %v27558_v45  ;;  %v23384_v45 = vld [vmem:[%s31429_s4 + $0xc8] ss:$12 sps:$4 sm:$0xff]  }
 0x47b   : > { %19573 = vmatmul.mubr.msk.f32.gmra.mrb[62].mxu1 %vm957_vm3, %v27987_v36  ;;  %6454 = vmatprep.mubr.f32.mxu0 %v31451_v0 }
 0x47c   : > { %6293 = vmatprep.mubr.f32.mxu1 %v31451_v0  ;;  %21239 = vmatprep.subr.bf16.mxu1 %v23384_v45 }
 0x47e   : > { %19594 = vmatmul.mubr.msk.f32.vlgmr.msra.gmra.mrb[64].mxu0 %vm957_vm3, %v27813_v21 }
 0x47f   : > { %19576 = vmatmul.mubr.msk.f32.vlgmr.msra.gmra.mrb[64].mxu1 %vm957_vm3, %v27813_v21  ;;  %6460 = vmatprep.mubr.f32.mxu0 %v31451_v0  ;;  %v23365_v21 = vld [vmem:[%s31429_s4 + $0x34] ss:$12 sps:$4 sm:$0xff]  }
 0x480   : > { %6299 = vmatprep.mubr.f32.mxu1 %v31451_v0  ;;  %7976 = vmatpush1.bf16.msra.mxu0 %v23357_v30 }
 0x481   : > { %7977 = vmatprep.subr.bf16.mxu0 %v23362_v19  ;;  %21240 = vmatpush3.bf16.msra.mxu1 %v23385_v4 }
 0x482   : > { %19595 = vmatmul.mubr.msk.f32.gmra.mrb[66].mxu0 %vm957_vm3, %v27823_v49  ;;  %21241 = vmatprep.subr.bf16.mxu1 %v23389_v5 }
 0x483   : > { %19577 = vmatmul.mubr.msk.f32.gmra.mrb[66].mxu1 %vm957_vm3, %v27823_v49  ;;  %6466 = vmatprep.mubr.f32.mxu0 %v31451_v0  ;;  %v23368_v49 = vld [vmem:[%s31429_s4 + $0x4c] ss:$12 sps:$4 sm:$0xff]  }
 0x484   : > { %6305 = vmatprep.mubr.f32.mxu1 %v31451_v0  ;;  %7978 = vmatpush1.bf16.msra.mxu0 %v23360_v3 }
 0x485   : > { %7979 = vmatprep.subr.bf16.mxu0 %v23365_v21  ;;  %21242 = vmatpush3.bf16.msra.mxu1 %v23390_v8 }
 0x486   : > { %19596 = vmatmul.mubr.msk.f32.gmra.mrb[68].mxu0 %vm957_vm3, %v27842_v6  ;;  %21243 = vmatprep.subr.bf16.mxu1 %v23394_v7 }
 0x487   : > { %19578 = vmatmul.mubr.msk.f32.gmra.mrb[68].mxu1 %vm957_vm3, %v27842_v6  ;;  %6472 = vmatprep.mubr.f32.mxu0 %v31451_v0  ;;  %v23371_v6 = vld [vmem:[%s31429_s4 + $0x64] ss:$12 sps:$4 sm:$0xff]  }
 0x488   : > { %6311 = vmatprep.mubr.f32.mxu1 %v31451_v0  ;;  %7980 = vmatpush1.bf16.msra.mxu0 %v23363_v23 }
 0x489   : > { %7981 = vmatprep.subr.bf16.mxu0 %v23368_v49  ;;  %21244 = vmatpush3.bf16.msra.mxu1 %v23395_v39 }
 0x48a   : > { %19597 = vmatmul.mubr.msk.f32.gmra.mrb[70].mxu0 %vm957_vm3, %v27858_v20  ;;  %21245 = vmatprep.subr.bf16.mxu1 %v23399_v58 }
 0x48b   : > { %19579 = vmatmul.mubr.msk.f32.gmra.mrb[70].mxu1 %vm957_vm3, %v27858_v20  ;;  %6478 = vmatprep.mubr.f32.mxu0 %v31451_v0  ;;  %v23374_v20 = vld [vmem:[%s31429_s4 + $0x7c] ss:$12 sps:$4 sm:$0xff]  }
 0x48c   : > { %6317 = vmatprep.mubr.f32.mxu1 %v31451_v0  ;;  %7982 = vmatpush1.bf16.msra.mxu0 %v23366_v32 }
 0x48d   : > { %7983 = vmatprep.subr.bf16.mxu0 %v23371_v6  ;;  %21246 = vmatpush3.bf16.msra.mxu1 %v23400_v1 }
 0x48e   : > { %19598 = vmatmul.mubr.msk.f32.gmra.mrb[72].mxu0 %vm957_vm3, %v27869_v10  ;;  %21247 = vmatprep.subr.bf16.mxu1 %v23404_v13 }
 0x48f   : > { %19580 = vmatmul.mubr.msk.f32.gmra.mrb[72].mxu1 %vm957_vm3, %v27869_v10  ;;  %6484 = vmatprep.mubr.f32.mxu0 %v31451_v0  ;;  %v23377_v10 = vld [vmem:[%s31429_s4 + $0x94] ss:$12 sps:$4 sm:$0xff]  }
 0x490   : > { %6323 = vmatprep.mubr.f32.mxu1 %v31451_v0  ;;  %7984 = vmatpush1.bf16.msra.mxu0 %v23369_v59 }
 0x491   : > { %7985 = vmatprep.subr.bf16.mxu0 %v23374_v20  ;;  %21248 = vmatpush3.bf16.msra.mxu1 %v23405_v16 }
 0x492   : > { %19599 = vmatmul.mubr.msk.f32.gmra.mrb[74].mxu0 %vm957_vm3, %v27879_v44  ;;  %21249 = vmatprep.subr.bf16.mxu1 %v23409_v9 }
 0x493   : > { %19581 = vmatmul.mubr.msk.f32.gmra.mrb[74].mxu1 %vm957_vm3, %v27879_v44  ;;  %6490 = vmatprep.mubr.f32.mxu0 %v31451_v0  ;;  %v23380_v44 = vld [vmem:[%s31429_s4 + $0xac] ss:$12 sps:$4 sm:$0xff]  }
 0x494   : > { %6329 = vmatprep.mubr.f32.mxu1 %v31451_v0  ;;  %7986 = vmatpush1.bf16.msra.mxu0 %v23372_v15 }
 0x495   : > { %7987 = vmatprep.subr.bf16.mxu0 %v23377_v10  ;;  %21250 = vmatpush3.bf16.msra.mxu1 %v23410_v34 }
 0x496   : > { %19600 = vmatmul.mubr.msk.f32.gmra.mrb[76].mxu0 %vm957_vm3, %v27890_v53  ;;  %21251 = vmatprep.subr.bf16.mxu1 %v23414_v18 }
 0x497   : > { %19582 = vmatmul.mubr.msk.f32.gmra.mrb[76].mxu1 %vm957_vm3, %v27890_v53  ;;  %6496 = vmatprep.mubr.f32.mxu0 %v31451_v0  ;;  %v23383_v53 = vld [vmem:[%s31429_s4 + $0xc4] ss:$12 sps:$4 sm:$0xff]  }
 0x498   : > { %6335 = vmatprep.mubr.f32.mxu1 %v31451_v0  ;;  %7988 = vmatpush1.bf16.msra.mxu0 %v23375_v33 }
 0x499   : > { %7989 = vmatprep.subr.bf16.mxu0 %v23380_v44  ;;  %21252 = vmatpush3.bf16.msra.mxu1 %v23415_v43 }
 0x49a   : > { %19601 = vmatmul.mubr.msk.f32.gmra.mrb[78].mxu0 %vm957_vm3, %v27900_v38  ;;  %21253 = vmatprep.subr.bf16.mxu1 %v23419_v37 }
 0x49b   : > { %19583 = vmatmul.mubr.msk.f32.gmra.mrb[78].mxu1 %vm957_vm3, %v27900_v38  ;;  %6502 = vmatprep.mubr.f32.mxu0 %v31451_v0  ;;  %v23388_v38 = vld [vmem:[%s31429_s4 + $0xdc] ss:$12 sps:$4 sm:$0xff]  }
 0x49c   : > { %6341 = vmatprep.mubr.f32.mxu1 %v31451_v0  ;;  %7990 = vmatpush1.bf16.msra.mxu0 %v23378_v31 }
 0x49d   : > { %7991 = vmatprep.subr.bf16.mxu0 %v23383_v53  ;;  %21254 = vmatpush3.bf16.msra.mxu1 %v23420_v54 }
 0x49e   : > { %19602 = vmatmul.mubr.msk.f32.gmra.mrb[80].mxu0 %vm957_vm3, %v27911_v14  ;;  %21303 = vmatprep.subr.bf16.mxu1 %v23448_v48 }
 0x49f   : > { %19584 = vmatmul.mubr.msk.f32.gmra.mrb[80].mxu1 %vm957_vm3, %v27911_v14  ;;  %6508 = vmatprep.mubr.f32.mxu0 %v31451_v0  ;;  %v23391_v14 = vld [vmem:[%s31429_s4 + $0xf0] ss:$12 sps:$4 sm:$0xff]  }
 0x4a0   : > { %6347 = vmatprep.mubr.f32.mxu1 %v31451_v0  ;;  %7992 = vmatpush1.bf16.msra.mxu0 %v23381_v46 }
 0x4a1   : > { %7993 = vmatprep.subr.bf16.mxu0 %v23388_v38 }
 0x4a2   : > { %19603 = vmatmul.mubr.msk.f32.gmra.mrb[82].mxu0 %vm957_vm3, %v27924_v35 }
 0x4a3   : > { %19585 = vmatmul.mubr.msk.f32.gmra.mrb[82].mxu1 %vm957_vm3, %v27924_v35  ;;  %6514 = vmatprep.mubr.f32.mxu0 %v31451_v0  ;;  %v23396_v35 = vld [vmem:[%s31429_s4 + $0x108] ss:$12 sps:$4 sm:$0xff]  }
 0x4a4   : > { %6353 = vmatprep.mubr.f32.mxu1 %v31451_v0  ;;  %7994 = vmatpush1.bf16.msra.mxu0 %v23386_v51 }
 0x4a5   : > { %7995 = vmatprep.subr.bf16.mxu0 %v23393_v63 }
 0x4a6   : > { %19604 = vmatmul.mubr.msk.f32.gmra.mrb[84].mxu0 %vm957_vm3, %v27935_v40 }
 0x4a7   : > { %19586 = vmatmul.mubr.msk.f32.gmra.mrb[84].mxu1 %vm957_vm3, %v27935_v40  ;;  %6520 = vmatprep.mubr.f32.mxu0 %v31451_v0  ;;  %v23413_v40 = vld [vmem:[%s31429_s4 + $0x154] ss:$12 sps:$4 sm:$0xff]  }
 0x4a8   : > { %6359 = vmatprep.mubr.f32.mxu1 %v31451_v0  ;;  %7996 = vmatpush1.bf16.msra.mxu0 %v23391_v14 }
 0x4a9   : > { %7997 = vmatprep.subr.bf16.mxu0 %v23398_v17 }
 0x4aa   : > { %19605 = vmatmul.mubr.msk.f32.gmra.mrb[86].mxu0 %vm957_vm3, %v27945_v60 }
 0x4ab   : > { %19587 = vmatmul.mubr.msk.f32.gmra.mrb[86].mxu1 %vm957_vm3, %v27945_v60  ;;  %6526 = vmatprep.mubr.f32.mxu0 %v31451_v0  ;;  %v23416_v60 = vld [vmem:[%s31429_s4 + $0x168] ss:$12 sps:$4 sm:$0xff]  }
 0x4ac   : > { %6365 = vmatprep.mubr.f32.mxu1 %v31451_v0  ;;  %7998 = vmatpush1.bf16.msra.mxu0 %v23396_v35 }
 0x4ad   : > { %7999 = vmatprep.subr.bf16.mxu0 %v23403_v47 }
 0x4ae   : > { %19606 = vmatmul.mubr.msk.f32.gmra.mrb[88].mxu0 %vm957_vm3, %v27956_v12 }
 0x4af   : > { %19588 = vmatmul.mubr.msk.f32.gmra.mrb[88].mxu1 %vm957_vm3, %v27956_v12  ;;  %6532 = vmatprep.mubr.f32.mxu0 %v31451_v0 }
 0x4b0   : > { %6371 = vmatprep.mubr.f32.mxu1 %v31451_v0  ;;  %8000 = vmatpush1.bf16.msra.mxu0 %v23401_v50 }
 0x4b1   : > { %8001 = vmatprep.subr.bf16.mxu0 %v23408_v52 }
 0x4b2   : > { %19607 = vmatmul.mubr.msk.f32.gmra.mrb[90].mxu0 %vm957_vm3, %v27966_v25 }
 0x4b3   : > { %19589 = vmatmul.mubr.msk.f32.gmra.mrb[90].mxu1 %vm957_vm3, %v27966_v25  ;;  %6538 = vmatprep.mubr.f32.mxu0 %v31451_v0 }
 0x4b4   : > { %6377 = vmatprep.mubr.f32.mxu1 %v31451_v0  ;;  %8002 = vmatpush1.bf16.msra.mxu0 %v23406_v42 }
 0x4b5   : > { %8003 = vmatprep.subr.bf16.mxu0 %v23413_v40 }
 0x4b6   : > { %19608 = vmatmul.mubr.msk.f32.gmra.mrb[92].mxu0 %vm957_vm3, %v27977_v22 }
 0x4b7   : > { %19590 = vmatmul.mubr.msk.f32.gmra.mrb[92].mxu1 %vm957_vm3, %v27977_v22  ;;  %6544 = vmatprep.mubr.f32.mxu0 %v31451_v0  ;;  %v28254_v22 = vrot.slane %v28245_v28, %v6767_v55 }
 0x4b8   : > { %6383 = vmatprep.mubr.f32.mxu1 %v31451_v0  ;;  %8004 = vmatpush1.bf16.msra.mxu0 %v23411_v57 }
 0x4b9   : > { %8005 = vmatprep.subr.bf16.mxu0 %v23418_v27 }
 0x4ba   : > { %19609 = vmatmul.mubr.msk.f32.gmra.mrb[94].mxu0 %vm957_vm3, %v27987_v36 }
 0x4bb   : > { %19591 = vmatmul.mubr.msk.f32.gmra.mrb[94].mxu1 %vm957_vm3, %v27987_v36 }
 0x4bc   : > { %8006 = vmatpush1.bf16.msra.mxu0 %v23416_v60 }
 0x4bd   : > { %8088 = vmatprep.subr.bf16.mxu0 %v23423_v41 }
 0x4d1   : > { %v28238_v12 = vpop.f32.mrb[0].mxu0 }
 0x4d2   : > { %v28241_v11 = vpop.f32.mrb[0].mxu1  ;;  %v28243_v25 = vpop.f32.mrb[1].mxu0 }
 0x4d3   : > { %v28248_v2 = vpop.f32.mrb[1].mxu1 }
 0x4d5   : > { %v28256_v61 = vpop.f32.mrb[2].mxu0 }
 0x4d6   : > { %v28258_v62 = vpop.f32.mrb[2].mxu1  ;;  %v28260_v36 = vpop.f32.mrb[3].mxu0 }
 0x4d7   : > { %v28262_v30 = vpop.f32.mrb[3].mxu1 }
 0x4d9   : > { %v28264_v19 = vpop.f32.mrb[4].mxu0 }
 0x4da   : > { %v28266_v45 = vpop.f32.mrb[4].mxu1  ;;  %v28268_v3 = vpop.f32.mrb[5].mxu0 }
 0x4db   : > { %v28270_v4 = vpop.f32.mrb[5].mxu1 }
 0x4dd   : > { %v28272_v21 = vpop.f32.mrb[6].mxu0 }
 0x4de   : > { %v28274_v5 = vpop.f32.mrb[6].mxu1  ;;  %v28276_v23 = vpop.f32.mrb[7].mxu0 }
 0x4df   : > { %31570 = vst [vmem:[#allocation29_spill] sm:$0xff] %v28274_v5  ;;  %v28278_v8 = vpop.f32.mrb[7].mxu1 }
 0x4e0   : > { %31571 = vst [vmem:[#allocation30_spill] sm:$0xff] %v28278_v8 }
 0x4e1   : > { %v28280_v49 = vpop.f32.mrb[8].mxu0 }
 0x4e2   : > { %v28282_v7 = vpop.f32.mrb[8].mxu1  ;;  %v28284_v32 = vpop.f32.mrb[9].mxu0 }
 0x4e3   : > { %31572 = vst [vmem:[#allocation31_spill] sm:$0xff] %v28282_v7  ;;  %v28286_v39 = vpop.f32.mrb[9].mxu1 }
 0x4e4   : > { %31573 = vst [vmem:[#allocation32_spill] sm:$0xff] %v28286_v39 }
 0x4e5   : > { %v28288_v6 = vpop.f32.mrb[10].mxu0 }
 0x4e6   : > { %v28290_v58 = vpop.f32.mrb[10].mxu1  ;;  %v28292_v59 = vpop.f32.mrb[11].mxu0 }
 0x4e7   : > { %31574 = vst [vmem:[#allocation33_spill] sm:$0xff] %v28290_v58  ;;  %v28294_v1 = vpop.f32.mrb[11].mxu1 }
 0x4e8   : > { %31575 = vst [vmem:[#allocation34_spill] sm:$0xff] %v28294_v1 }
 0x4e9   : > { %v28296_v20 = vpop.f32.mrb[12].mxu0 }
 0x4ea   : > { %v28298_v13 = vpop.f32.mrb[12].mxu1  ;;  %v28300_v15 = vpop.f32.mrb[13].mxu0 }
 0x4eb   : > { %31576 = vst [vmem:[#allocation35_spill] sm:$0xff] %v28298_v13  ;;  %v28302_v16 = vpop.f32.mrb[13].mxu1 }
 0x4ec   : > { %31577 = vst [vmem:[#allocation36_spill] sm:$0xff] %v28302_v16 }
 0x4ed   : > { %v28304_v10 = vpop.f32.mrb[14].mxu0 }
 0x4ee   : > { %v28306_v9 = vpop.f32.mrb[14].mxu1  ;;  %v28308_v33 = vpop.f32.mrb[15].mxu0 }
 0x4ef   : > { %31578 = vst [vmem:[#allocation37_spill] sm:$0xff] %v28306_v9  ;;  %v28310_v34 = vpop.f32.mrb[15].mxu1 }
 0x4f0   : > { %31579 = vst [vmem:[#allocation38_spill] sm:$0xff] %v28310_v34 }
 0x4f1   : > { %v28312_v44 = vpop.f32.mrb[16].mxu0 }
 0x4f2   : > { %v28314_v18 = vpop.f32.mrb[16].mxu1  ;;  %v28316_v31 = vpop.f32.mrb[17].mxu0 }
 0x4f3   : > { %31580 = vst [vmem:[#allocation39_spill] sm:$0xff] %v28314_v18  ;;  %v28318_v43 = vpop.f32.mrb[17].mxu1 }
 0x4f4   : > { %31581 = vst [vmem:[#allocation40_spill] sm:$0xff] %v28318_v43 }
 0x4f5   : > { %v28320_v53 = vpop.f32.mrb[18].mxu0 }
 0x4f6   : > { %v28322_v37 = vpop.f32.mrb[18].mxu1  ;;  %v28324_v46 = vpop.f32.mrb[19].mxu0 }
 0x4f7   : > { %31582 = vst [vmem:[#allocation41_spill] sm:$0xff] %v28322_v37  ;;  %v28326_v54 = vpop.f32.mrb[19].mxu1 }
 0x4f8   : > { %31583 = vst [vmem:[#allocation42_spill] sm:$0xff] %v28326_v54 }
 0x4f9   : > { %v28328_v38 = vpop.f32.mrb[20].mxu0 }
 0x4fa   : > { %v28330_v51 = vpop.f32.mrb[20].mxu1  ;;  %v28332_v63 = vpop.f32.mrb[21].mxu0 }
 0x4fb   : > { %31584 = vst [vmem:[#allocation43_spill] sm:$0xff] %v28330_v51  ;;  %v28334_v14 = vpop.f32.mrb[21].mxu1 }
 0x4fc   : > { %31585 = vst [vmem:[#allocation44_spill] sm:$0xff] %v28334_v14 }
 0x4fd   : > { %v28336_v17 = vpop.f32.mrb[22].mxu0 }
 0x4fe   : > { %v28338_v35 = vpop.f32.mrb[22].mxu1  ;;  %v28340_v47 = vpop.f32.mrb[23].mxu0 }
 0x4ff   : > { %31586 = vst [vmem:[#allocation45_spill] sm:$0xff] %v28338_v35  ;;  %v28342_v50 = vpop.f32.mrb[23].mxu1 }
 0x500   : > { %31587 = vst [vmem:[#allocation46_spill] sm:$0xff] %v28342_v50 }
 0x501   : > { %v28344_v52 = vpop.f32.mrb[24].mxu0 }
 0x502   : > { %v28346_v42 = vpop.f32.mrb[24].mxu1  ;;  %v28348_v40 = vpop.f32.mrb[25].mxu0 }
 0x503   : > { %31588 = vst [vmem:[#allocation47_spill] sm:$0xff] %v28346_v42  ;;  %v28350_v57 = vpop.f32.mrb[25].mxu1 }
 0x504   : > { %31589 = vst [vmem:[#allocation48_spill] sm:$0xff] %v28350_v57 }
 0x505   : > { %v28352_v27 = vpop.f32.mrb[26].mxu0 }
 0x506   : > { %v28354_v60 = vpop.f32.mrb[26].mxu1  ;;  %v28356_v41 = vpop.f32.mrb[27].mxu0 }
 0x507   : > { %31590 = vst [vmem:[#allocation49_spill] sm:$0xff] %v28354_v60  ;;  %v28358_v48 = vpop.f32.mrb[27].mxu1  ;;  %v28377_v60 = vsub.s32 0, %v28236_v26 }
 0x508   : > { %31591 = vst [vmem:[#allocation50_spill] sm:$0xff] %v28358_v48  ;;  %v28380_v48 = vsub.s32 1, %v28236_v26 }
 0x509   : > { %v28360_v29 = vpop.f32.mrb[28].mxu0  ;;  %31596 = vst [vmem:[#allocation55_spill] sm:$0xff] %v28377_v60 }
 0x50a   : > { %v28362_v24 = vpop.f32.mrb[28].mxu1  ;;  %v28364_v55 = vpop.f32.mrb[29].mxu0  ;;  %31597 = vst [vmem:[#allocation56_spill] sm:$0xff] %v28380_v48  ;;  %v28394_v37 = vrot.slane %v28245_v28, %v28380_v48 }
 0x50b   : > { %31592 = vst [vmem:[#allocation51_spill] sm:$0xff] %v28362_v24  ;;  %v28366_v0 = vpop.f32.mrb[29].mxu1 }
 0x50c   : > { %31593 = vst [vmem:[#allocation52_spill] sm:$0xff] %v28366_v0 }
 0x50d   : > { %v28368_v42 = vpop.f32.mrb[30].mxu0 }
 0x50e   : > { %v28370_v50 = vpop.f32.mrb[30].mxu1  ;;  %v28372_v57 = vpop.f32.mrb[31].mxu0 }
 0x50f   : > { %31594 = vst [vmem:[#allocation53_spill] sm:$0xff] %v28370_v50  ;;  %v28374_v35 = vpop.f32.mrb[31].mxu1  ;;  %v28389_v50 = vrot.slane %v28245_v28, %v28377_v60 }
 0x510   : > { %31595 = vst [vmem:[#allocation54_spill] sm:$0xff] %v28374_v35 }
 0x511   : > { %v28382_v14 = vpop.f32.mrb[32].mxu0 }
 0x512   : > { %v6134_v24 = vpop.f32.mrb[32].mxu1  ;;  %v28384_v51 = vpop.f32.mrb[33].mxu0 }
 0x513   : > { %v6136_v0 = vpop.f32.mrb[33].mxu1  ;;  %v6647_v54 = vmax.f32 %v28238_v12, %v6134_v24 }
 0x514   : > { %v6648_v35 = vmax.f32 %v28243_v25, %v6136_v0 }
 0x515   : > { %v28396_v43 = vpop.f32.mrb[34].mxu0  ;;  %v6775_v12 = vadd.f32 %v28389_v50, %v6647_v54 }
 0x516   : > { %v6140_v18 = vpop.f32.mrb[34].mxu1  ;;  %v28398_v34 = vpop.f32.mrb[35].mxu0  ;;  %v6776_v60 = vadd.f32 %v28394_v37, %v6648_v35 }
 0x517   : > { %v6142_v9 = vpop.f32.mrb[35].mxu1  ;;  %v6653_v16 = vmax.f32 %v28256_v61, %v6140_v18  ;;  %v6871_v39 = vmax.f32 %v6775_v12, 0.0  ;;  %v23421_v12 = vld [vmem:[%s31429_s4 + $0x180] ss:$12 sps:$4 sm:$0xff]  }
 0x518   : > { %v6654_v24 = vmax.f32 %v28260_v36, %v6142_v9  ;;  %v6872_v18 = vmax.f32 %v6776_v60, 0.0 }
 0x519   : > { %v28404_v13 = vpop.f32.mrb[36].mxu0  ;;  %v6781_v0 = vadd.f32 %v28389_v50, %v6653_v16 }
 0x51a   : > { %v6146_v25 = vpop.f32.mrb[36].mxu1  ;;  %v28407_v48 = vpop.f32.mrb[37].mxu0  ;;  %v6782_v1 = vadd.f32 %v28394_v37, %v6654_v24 }
 0x51b   : > { %v6148_v58 = vpop.f32.mrb[37].mxu1  ;;  %v6877_v7 = vmax.f32 %v6781_v0, 0.0  ;;  %v6659_v61 = vmax.f32 %v28264_v19, %v6146_v25  ;;  %v23449_v19 = vld [vmem:[%s31429_s4 + $0x188] ss:$12 sps:$4 sm:$0xff]  }
 0x51c   : > { %v6878_v54 = vmax.f32 %v6782_v1, 0.0  ;;  %v6660_v36 = vmax.f32 %v28268_v3, %v6148_v58  ;;  %v23426_v3 = vld [vmem:[%s31429_s4 + $0x19c] ss:$12 sps:$4 sm:$0xff]   ;;  %v23453_v58 = vld [vmem:[%s31429_s4 + $0x260] ss:$12 sps:$4 sm:$0xff]  }
 0x51d   : > { %v28412_v9 = vpop.f32.mrb[38].mxu0  ;;  %v28414_v35 = vpack.c.bf16 %v6877_v7, %v6871_v39  ;;  %v6787_v39 = vadd.f32 %v28389_v50, %v6659_v61 }
 0x51e   : > { %v6152_v8 = vpop.f32.mrb[38].mxu1  ;;  %v28416_v16 = vpop.f32.mrb[39].mxu0  ;;  %v28418_v5 = vpack.c.bf16 %v6878_v54, %v6872_v18  ;;  %v6788_v24 = vadd.f32 %v28394_v37, %v6660_v36  ;;  %v23429_v18 = vld [vmem:[%s31429_s4 + $0x1b4] ss:$12 sps:$4 sm:$0xff]  }
 0x51f   : > { %31598 = vst [vmem:[#allocation57_spill] sm:$0xff] %v28414_v35  ;;  %31599 = vst [vmem:[#allocation58_spill] sm:$0xff] %v28416_v16  ;;  %v6154_v1 = vpop.f32.mrb[39].mxu1  ;;  %v6665_v7 = vmax.f32 %v28272_v21, %v6152_v8  ;;  %v23424_v21 = vld [vmem:[%s31429_s4 + $0x198] ss:$12 sps:$4 sm:$0xff]  }
 0x520   : > { %31600 = vst [vmem:[#allocation59_spill] sm:$0xff] %v28418_v5  ;;  %8007 = vmatprep.mubr.bf16.mxu0 %v28418_v5  ;;  %8346 = vmatprep.mubr.bf16.mxu1 %v28418_v5  ;;  %v6666_v60 = vmax.f32 %v28276_v23, %v6154_v1  ;;  %v23454_v54 = vld [vmem:[%s31429_s4 + $0x1a0] ss:$12 sps:$4 sm:$0xff]   ;;  %v6883_v1 = vmax.f32 %v6787_v39, 0.0 }
 0x521   : > { %8008 = vmatmul.mubr.bf16.vlgmr.msra.gmra.mrb[96].mxu0 %v28414_v35  ;;  %8347 = vmatmul.mubr.bf16.vlgmr.msra.gmra.mrb[96].mxu1 %v28414_v35  ;;  %v28440_v0 = vpop.f32.mrb[40].mxu0  ;;  %v6793_v8 = vadd.f32 %v28389_v50, %v6665_v7 }
 0x522   : > { %31601 = vst [vmem:[#allocation60_spill] sm:$0xff] %v28440_v0  ;;  %v6158_v25 = vpop.f32.mrb[40].mxu1  ;;  %8089 = vmatpush1.bf16.msra.mxu0 %v23421_v12  ;;  %v28446_v61 = vpop.f32.mrb[41].mxu0  ;;  %v6794_v23 = vadd.f32 %v28394_v37, %v6666_v60  ;;  %21304 = vmatpush3.bf16.msra.mxu1 %v23449_v19  ;;  %v23458_v12 = vld [vmem:[%s31429_s4 + $0x278] ss:$12 sps:$4 sm:$0xff]   ;;  %v6884_v60 = vmax.f32 %v6788_v24, 0.0 }
 0x523   : > { %31602 = vst [vmem:[#allocation61_spill] sm:$0xff] %v28446_v61  ;;  %v6160_v36 = vpop.f32.mrb[41].mxu1  ;;  %8090 = vmatprep.subr.bf16.mxu0 %v23426_v3  ;;  %v6889_v35 = vmax.f32 %v6793_v8, 0.0  ;;  %v6671_v7 = vmax.f32 %v28280_v49, %v6158_v25  ;;  %21305 = vmatprep.subr.bf16.mxu1 %v23453_v58  ;;  %v23427_v49 = vld [vmem:[%s31429_s4 + $0x1b0] ss:$12 sps:$4 sm:$0xff]  }
 0x524   : > { %v6890_v5 = vmax.f32 %v6794_v23, 0.0  ;;  %v6672_v61 = vmax.f32 %v28284_v32, %v6160_v36  ;;  %v23459_v58 = vld [vmem:[%s31429_s4 + $0x1b8] ss:$12 sps:$4 sm:$0xff]   ;;  %v23464_v36 = vld [vmem:[%s31429_s4 + $0x1d0] ss:$12 sps:$4 sm:$0xff]  }
 0x525   : > { %v28460_v19 = vpop.f32.mrb[42].mxu0  ;;  %v28462_v0 = vpack.c.bf16 %v6889_v35, %v6883_v1  ;;  %v23432_v35 = vld [vmem:[%s31429_s4 + $0x1cc] ss:$12 sps:$4 sm:$0xff]  }
 0x526   : > { %v6164_v16 = vpop.f32.mrb[42].mxu1  ;;  %8091 = vmatpush1.bf16.msra.mxu0 %v23424_v21  ;;  %v28464_v3 = vpop.f32.mrb[43].mxu0  ;;  %v28466_v39 = vpack.c.bf16 %v6890_v5, %v6884_v60  ;;  %21306 = vmatpush3.bf16.msra.mxu1 %v23454_v54  ;;  %v6799_v5 = vadd.f32 %v28389_v50, %v6671_v7  ;;  %v23463_v21 = vld [vmem:[%s31429_s4 + $0x290] ss:$12 sps:$4 sm:$0xff]   ;;  %v6800_v25 = vadd.f32 %v28394_v37, %v6672_v61 }
 0x527   : > { %31603 = vst [vmem:[#allocation62_spill] sm:$0xff] %v28462_v0  ;;  %v6166_v32 = vpop.f32.mrb[43].mxu1  ;;  %8092 = vmatprep.subr.bf16.mxu0 %v23429_v18  ;;  %v6677_v24 = vmax.f32 %v28288_v6, %v6164_v16  ;;  %21307 = vmatprep.subr.bf16.mxu1 %v23458_v12  ;;  %v23430_v16 = vld [vmem:[%s31429_s4 + $0x1c8] ss:$12 sps:$4 sm:$0xff]   ;;  %v23435_v61 = vld [vmem:[%s31429_s4 + $0x1e4] ss:$12 sps:$4 sm:$0xff]  }
 0x528   : > { %31604 = vst [vmem:[#allocation63_spill] sm:$0xff] %v28466_v39  ;;  %8017 = vmatprep.mubr.bf16.mxu0 %v28466_v39  ;;  %8354 = vmatprep.mubr.bf16.mxu1 %v28466_v39  ;;  %v6678_v8 = vmax.f32 %v28292_v59, %v6166_v32  ;;  %v6895_v7 = vmax.f32 %v6799_v5, 0.0  ;;  %v6896_v32 = vmax.f32 %v6800_v25, 0.0  ;;  %v23438_v25 = vld [vmem:[%s31429_s4 + $0x1fc] ss:$12 sps:$4 sm:$0xff]  }
 0x529   : > { %8018 = vmatmul.mubr.bf16.gmra.mrb[100].mxu0 %v28462_v0  ;;  %8355 = vmatmul.mubr.bf16.gmra.mrb[100].mxu1 %v28462_v0  ;;  %v28488_v6 = vpop.f32.mrb[44].mxu0  ;;  %v6805_v23 = vadd.f32 %v28389_v50, %v6677_v24 }
 0x52a   : > { %v6170_v18 = vpop.f32.mrb[44].mxu1  ;;  %8093 = vmatpush1.bf16.msra.mxu0 %v23427_v49  ;;  %v28494_v54 = vpop.f32.mrb[45].mxu0  ;;  %v6806_v59 = vadd.f32 %v28394_v37, %v6678_v8  ;;  %21308 = vmatpush3.bf16.msra.mxu1 %v23459_v58  ;;  %v23468_v49 = vld [vmem:[%s31429_s4 + $0x2a8] ss:$12 sps:$4 sm:$0xff]  }
 0x52b   : > { %v6172_v1 = vpop.f32.mrb[45].mxu1  ;;  %8094 = vmatprep.subr.bf16.mxu0 %v23432_v35  ;;  %v6901_v12 = vmax.f32 %v6805_v23, 0.0  ;;  %v6683_v60 = vmax.f32 %v28296_v20, %v6170_v18  ;;  %21309 = vmatprep.subr.bf16.mxu1 %v23463_v21  ;;  %v23433_v20 = vld [vmem:[%s31429_s4 + $0x1e0] ss:$12 sps:$4 sm:$0xff]   ;;  %v23469_v21 = vld [vmem:[%s31429_s4 + $0x1e8] ss:$12 sps:$4 sm:$0xff]  }
 0x52c   : > { %v6902_v24 = vmax.f32 %v6806_v59, 0.0  ;;  %v6684_v8 = vmax.f32 %v28300_v15, %v6172_v1  ;;  %v23473_v18 = vld [vmem:[%s31429_s4 + $0x2c0] ss:$12 sps:$4 sm:$0xff]  }
 0x52d   : > { %v28508_v58 = vpop.f32.mrb[46].mxu0  ;;  %v28510_v0 = vpack.c.bf16 %v6901_v12, %v6895_v7  ;;  %v6811_v23 = vadd.f32 %v28389_v50, %v6683_v60  ;;  %v23441_v12 = vld [vmem:[%s31429_s4 + $0x214] ss:$12 sps:$4 sm:$0xff]  }
 0x52e   : > { %v6176_v39 = vpop.f32.mrb[46].mxu1  ;;  %8095 = vmatpush1.bf16.msra.mxu0 %v23430_v16  ;;  %v28512_v35 = vpop.f32.mrb[47].mxu0  ;;  %v28514_v5 = vpack.c.bf16 %v6902_v24, %v6896_v32  ;;  %21310 = vmatpush3.bf16.msra.mxu1 %v23464_v36  ;;  %v23474_v60 = vld [vmem:[%s31429_s4 + $0x200] ss:$12 sps:$4 sm:$0xff]  }
 0x52f   : > { %31605 = vst [vmem:[#allocation64_spill] sm:$0xff] %v28510_v0  ;;  %v6178_v15 = vpop.f32.mrb[47].mxu1  ;;  %8096 = vmatprep.subr.bf16.mxu0 %v23435_v61  ;;  %v6689_v16 = vmax.f32 %v28304_v10, %v6176_v39  ;;  %21311 = vmatprep.subr.bf16.mxu1 %v23468_v49  ;;  %v6812_v61 = vadd.f32 %v28394_v37, %v6684_v8  ;;  %v23436_v39 = vld [vmem:[%s31429_s4 + $0x1f8] ss:$12 sps:$4 sm:$0xff]   ;;  %v6907_v24 = vmax.f32 %v6811_v23, 0.0 }
 0x530   : > { %31606 = vst [vmem:[#allocation65_spill] sm:$0xff] %v28514_v5  ;;  %8027 = vmatprep.mubr.bf16.mxu0 %v28514_v5  ;;  %8362 = vmatprep.mubr.bf16.mxu1 %v28514_v5  ;;  %v6690_v59 = vmax.f32 %v28308_v33, %v6178_v15  ;;  %v23439_v23 = vld [vmem:[%s31429_s4 + $0x210] ss:$12 sps:$4 sm:$0xff]  }
 0x531   : > { %8028 = vmatmul.mubr.bf16.gmra.mrb[104].mxu0 %v28510_v0  ;;  %8363 = vmatmul.mubr.bf16.gmra.mrb[104].mxu1 %v28510_v0  ;;  %v28536_v10 = vpop.f32.mrb[48].mxu0  ;;  %v6817_v36 = vadd.f32 %v28389_v50, %v6689_v16  ;;  %v6908_v16 = vmax.f32 %v6812_v61, 0.0 }
 0x532   : > { %v6182_v1 = vpop.f32.mrb[48].mxu1  ;;  %8097 = vmatpush1.bf16.msra.mxu0 %v23433_v20  ;;  %v28542_v7 = vpop.f32.mrb[49].mxu0  ;;  %v6818_v33 = vadd.f32 %v28394_v37, %v6690_v59  ;;  %21312 = vmatpush3.bf16.msra.mxu1 %v23469_v21  ;;  %v23478_v20 = vld [vmem:[%s31429_s4 + $0x2d8] ss:$12 sps:$4 sm:$0xff]  }
 0x533   : > { %v6695_v49 = vmax.f32 %v28312_v44, %v6182_v1  ;;  %v6184_v32 = vpop.f32.mrb[49].mxu1  ;;  %8098 = vmatprep.subr.bf16.mxu0 %v23438_v25  ;;  %v6913_v8 = vmax.f32 %v6817_v36, 0.0  ;;  %21313 = vmatprep.subr.bf16.mxu1 %v23473_v18  ;;  %v23483_v1 = vld [vmem:[%s31429_s4 + $0x2f0] ss:$12 sps:$4 sm:$0xff]  }
 0x534   : > { %v6696_v15 = vmax.f32 %v28316_v31, %v6184_v32  ;;  %v6914_v59 = vmax.f32 %v6818_v33, 0.0  ;;  %v23479_v31 = vld [vmem:[%s31429_s4 + $0x218] ss:$12 sps:$4 sm:$0xff]  }
 0x535   : > { %v28556_v21 = vpop.f32.mrb[50].mxu0  ;;  %v28558_v0 = vpack.c.bf16 %v6913_v8, %v6907_v24  ;;  %v6823_v18 = vadd.f32 %v28389_v50, %v6695_v49  ;;  %v23447_v24 = vld [vmem:[%s31429_s4 + $0x244] ss:$12 sps:$4 sm:$0xff]  }
 0x536   : > { %v6188_v5 = vpop.f32.mrb[50].mxu1  ;;  %8099 = vmatpush1.bf16.msra.mxu0 %v23436_v39  ;;  %v28560_v44 = vpop.f32.mrb[51].mxu0  ;;  %v28562_v25 = vpack.c.bf16 %v6914_v59, %v6908_v16  ;;  %21314 = vmatpush3.bf16.msra.mxu1 %v23474_v60  ;;  %v23444_v39 = vld [vmem:[%s31429_s4 + $0x22c] ss:$12 sps:$4 sm:$0xff]   ;;  %v6824_v33 = vadd.f32 %v28394_v37, %v6696_v15  ;;  %v23484_v8 = vld [vmem:[%s31429_s4 + $0x230] ss:$12 sps:$4 sm:$0xff]  }
 0x537   : > { %31607 = vst [vmem:[#allocation66_spill] sm:$0xff] %v28558_v0  ;;  %v6701_v61 = vmax.f32 %v28320_v53, %v6188_v5  ;;  %v6190_v36 = vpop.f32.mrb[51].mxu1  ;;  %8100 = vmatprep.subr.bf16.mxu0 %v23441_v12  ;;  %21315 = vmatprep.subr.bf16.mxu1 %v23478_v20  ;;  %v23442_v12 = vld [vmem:[%s31429_s4 + $0x228] ss:$12 sps:$4 sm:$0xff]   ;;  %v6919_v20 = vmax.f32 %v6823_v18, 0.0 }
 0x538   : > { %31608 = vst [vmem:[#allocation67_spill] sm:$0xff] %v28562_v25  ;;  %v6702_v60 = vmax.f32 %v28324_v46, %v6190_v36  ;;  %8037 = vmatprep.mubr.bf16.mxu0 %v28562_v25  ;;  %8370 = vmatprep.mubr.bf16.mxu1 %v28562_v25 }
 0x539   : > { %v6829_v53 = vadd.f32 %v28389_v50, %v6701_v61  ;;  %8038 = vmatmul.mubr.bf16.gmra.mrb[108].mxu0 %v28558_v0  ;;  %8371 = vmatmul.mubr.bf16.gmra.mrb[108].mxu1 %v28558_v0  ;;  %v28585_v5 = vpop.f32.mrb[52].mxu0  ;;  %v6920_v61 = vmax.f32 %v6824_v33, 0.0 }
 0x53a   : > { %v6830_v49 = vadd.f32 %v28394_v37, %v6702_v60  ;;  %v6194_v32 = vpop.f32.mrb[52].mxu1  ;;  %8101 = vmatpush1.bf16.msra.mxu0 %v23439_v23  ;;  %v28591_v46 = vpop.f32.mrb[53].mxu0  ;;  %21316 = vmatpush3.bf16.msra.mxu1 %v23479_v31  ;;  %v23512_v23 = vld [vmem:[%s31429_s4 + $0x3c8] ss:$12 sps:$4 sm:$0xff]  }
 0x53b   : > { %v6925_v15 = vmax.f32 %v6829_v53, 0.0  ;;  %v6707_v16 = vmax.f32 %v28328_v38, %v6194_v32  ;;  %v6196_v59 = vpop.f32.mrb[53].mxu1  ;;  %8102 = vmatprep.subr.bf16.mxu0 %v23444_v39  ;;  %21317 = vmatprep.subr.bf16.mxu1 %v23483_v1  ;;  %v23445_v39 = vld [vmem:[%s31429_s4 + $0x240] ss:$12 sps:$4 sm:$0xff]   ;;  %v23452_v53 = vld [vmem:[%s31429_s4 + $0x25c] ss:$12 sps:$4 sm:$0xff]  }
 0x53c   : > { %v6926_v36 = vmax.f32 %v6830_v49, 0.0  ;;  %v6708_v60 = vmax.f32 %v28332_v63, %v6196_v59 }
 0x53d   : > { %v28604_v31 = vpop.f32.mrb[54].mxu0  ;;  %v28606_v0 = vpack.c.bf16 %v6925_v15, %v6919_v20  ;;  %v6835_v1 = vadd.f32 %v28389_v50, %v6707_v16 }
 0x53e   : > { %v6200_v25 = vpop.f32.mrb[54].mxu1  ;;  %8103 = vmatpush1.bf16.msra.mxu0 %v23442_v12  ;;  %v28608_v18 = vpop.f32.mrb[55].mxu0  ;;  %v28610_v38 = vpack.c.bf16 %v6926_v36, %v6920_v61  ;;  %21318 = vmatpush3.bf16.msra.mxu1 %v23484_v8  ;;  %v6836_v12 = vadd.f32 %v28394_v37, %v6708_v60 }
 0x53f   : > { %v6713_v33 = vmax.f32 %v28336_v17, %v6200_v25  ;;  %v6202_v63 = vpop.f32.mrb[55].mxu1  ;;  %8104 = vmatprep.subr.bf16.mxu0 %v23447_v24  ;;  %21367 = vmatprep.subr.bf16.mxu1 %v23512_v23  ;;  %v6931_v20 = vmax.f32 %v6835_v1, 0.0  ;;  %v23457_v23 = vld [vmem:[%s31429_s4 + $0x274] ss:$12 sps:$4 sm:$0xff]  }
 0x540   : > { %v6714_v49 = vmax.f32 %v28340_v47, %v6202_v63  ;;  %8047 = vmatprep.mubr.bf16.mxu0 %v28610_v38  ;;  %8378 = vmatprep.mubr.bf16.mxu1 %v28610_v38  ;;  %v23450_v47 = vld [vmem:[%s31429_s4 + $0x258] ss:$12 sps:$4 sm:$0xff]   ;;  %v6932_v61 = vmax.f32 %v6836_v12, 0.0 }
 0x541   : > { %v6841_v32 = vadd.f32 %v28389_v50, %v6713_v33  ;;  %8048 = vmatmul.mubr.bf16.gmra.mrb[112].mxu0 %v28606_v0  ;;  %8379 = vmatmul.mubr.bf16.gmra.mrb[112].mxu1 %v28606_v0  ;;  %v28627_v17 = vpop.f32.mrb[56].mxu0 }
 0x542   : > { %v6842_v25 = vadd.f32 %v28394_v37, %v6714_v49  ;;  %v6206_v24 = vpop.f32.mrb[56].mxu1  ;;  %8105 = vmatpush1.bf16.msra.mxu0 %v23445_v39  ;;  %v28630_v8 = vpop.f32.mrb[57].mxu0 }
 0x543   : > { %v6937_v15 = vmax.f32 %v6841_v32, 0.0  ;;  %v6719_v16 = vmax.f32 %v28344_v52, %v6206_v24  ;;  %v6208_v59 = vpop.f32.mrb[57].mxu1  ;;  %8106 = vmatprep.subr.bf16.mxu0 %v23452_v53  ;;  %v23455_v52 = vld [vmem:[%s31429_s4 + $0x270] ss:$12 sps:$4 sm:$0xff]  }
 0x544   : > { %v6938_v36 = vmax.f32 %v6842_v25, 0.0  ;;  %v6720_v60 = vmax.f32 %v28348_v40, %v6208_v59  ;;  %v23462_v40 = vld [vmem:[%s31429_s4 + $0x28c] ss:$12 sps:$4 sm:$0xff]  }
 0x545   : > { %v28640_v39 = vpop.f32.mrb[58].mxu0  ;;  %v28642_v33 = vpack.c.bf16 %v6937_v15, %v6931_v20  ;;  %v6847_v53 = vadd.f32 %v28389_v50, %v6719_v16 }
 0x546   : > { %v6212_v63 = vpop.f32.mrb[58].mxu1  ;;  %8107 = vmatpush1.bf16.msra.mxu0 %v23450_v47  ;;  %v28644_v1 = vpop.f32.mrb[59].mxu0  ;;  %v28646_v49 = vpack.c.bf16 %v6938_v36, %v6932_v61  ;;  %v6848_v25 = vadd.f32 %v28394_v37, %v6720_v60  ;;  %v23467_v60 = vld [vmem:[%s31429_s4 + $0x2a4] ss:$12 sps:$4 sm:$0xff]  }
 0x547   : > { %31609 = vst [vmem:[#allocation68_spill] sm:$0xff] %v28642_v33  ;;  %v6725_v12 = vmax.f32 %v28352_v27, %v6212_v63  ;;  %v6214_v32 = vpop.f32.mrb[59].mxu1  ;;  %8108 = vmatprep.subr.bf16.mxu0 %v23457_v23  ;;  %v6943_v59 = vmax.f32 %v6847_v53, 0.0 }
 0x548   : > { %v6726_v24 = vmax.f32 %v28356_v41, %v6214_v32  ;;  %8057 = vmatprep.mubr.bf16.mxu0 %v28646_v49  ;;  %8386 = vmatprep.mubr.bf16.mxu1 %v28646_v49  ;;  %v23460_v41 = vld [vmem:[%s31429_s4 + $0x288] ss:$12 sps:$4 sm:$0xff]   ;;  %v6944_v63 = vmax.f32 %v6848_v25, 0.0  ;;  %v23465_v25 = vld [vmem:[%s31429_s4 + $0x2a0] ss:$12 sps:$4 sm:$0xff]  }
 0x549   : > { %v6853_v47 = vadd.f32 %v28389_v50, %v6725_v12  ;;  %8058 = vmatmul.mubr.bf16.gmra.mrb[116].mxu0 %v28642_v33  ;;  %8387 = vmatmul.mubr.bf16.gmra.mrb[116].mxu1 %v28642_v33  ;;  %v28663_v27 = vpop.f32.mrb[60].mxu0  ;;  %v28681_v33 = vsub.s32 2, %v28236_v26 }
 0x54a   : > { %v6854_v20 = vadd.f32 %v28394_v37, %v6726_v24  ;;  %v6218_v15 = vpop.f32.mrb[60].mxu1  ;;  %8109 = vmatpush1.bf16.msra.mxu0 %v23455_v52  ;;  %v28666_v16 = vpop.f32.mrb[61].mxu0 }
 0x54b   : > { %v6949_v23 = vmax.f32 %v6853_v47, 0.0  ;;  %v6731_v61 = vmax.f32 %v28360_v29, %v6218_v15  ;;  %v6220_v36 = vpop.f32.mrb[61].mxu1  ;;  %8110 = vmatprep.subr.bf16.mxu0 %v23462_v40  ;;  %31610 = vst [vmem:[#allocation69_spill] sm:$0xff] %v28681_v33  ;;  %v28691_v47 = vsub.s32 3, %v28236_v26 }
 0x54c   : > { %v6950_v12 = vmax.f32 %v6854_v20, 0.0  ;;  %v6732_v52 = vmax.f32 %v28364_v55, %v6220_v36 }
 0x54d   : > { %v28676_v32 = vpop.f32.mrb[62].mxu0  ;;  %v28678_v24 = vpack.c.bf16 %v6949_v23, %v6943_v59  ;;  %31611 = vst [vmem:[#allocation70_spill] sm:$0xff] %v28691_v47  ;;  %v6859_v55 = vadd.f32 %v28389_v50, %v6731_v61 }
 0x54e   : > { %v6224_v53 = vpop.f32.mrb[62].mxu1  ;;  %8111 = vmatpush1.bf16.msra.mxu0 %v23460_v41  ;;  %v28683_v29 = vpop.f32.mrb[63].mxu0  ;;  %v28685_v40 = vpack.c.bf16 %v6950_v12, %v6944_v63  ;;  %v23472_v41 = vld [vmem:[%s31429_s4 + $0x2bc] ss:$12 sps:$4 sm:$0xff]   ;;  %v6860_v59 = vadd.f32 %v28394_v37, %v6732_v52  ;;  %v28713_v63 = vrot.slane %v28245_v28, %v28691_v47  ;;  %v23470_v12 = vld [vmem:[%s31429_s4 + $0x2b8] ss:$12 sps:$4 sm:$0xff]  }
 0x54f   : > { %v6737_v20 = vmax.f32 %v28368_v42, %v6224_v53  ;;  %v6226_v15 = vpop.f32.mrb[63].mxu1  ;;  %8112 = vmatprep.subr.bf16.mxu0 %v23467_v60  ;;  %v28707_v42 = vrot.slane %v28245_v28, %v28681_v33  ;;  %v6955_v52 = vmax.f32 %v6859_v55, 0.0 }
 0x550   : > { %v6738_v23 = vmax.f32 %v28372_v57, %v6226_v15  ;;  %8067 = vmatprep.mubr.bf16.mxu0 %v28685_v40  ;;  %8394 = vmatprep.mubr.bf16.mxu1 %v28685_v40 }
 0x551   : > { %v6865_v26 = vadd.f32 %v28389_v50, %v6737_v20  ;;  %8068 = vmatmul.mubr.bf16.gmra.mrb[120].mxu0 %v28678_v24  ;;  %8395 = vmatmul.mubr.bf16.gmra.mrb[120].mxu1 %v28678_v24  ;;  %v6456_v61 = vpop.f32.mrb[64].mxu0 }
 0x552   : > { %v6866_v36 = vadd.f32 %v28394_v37, %v6738_v23  ;;  %v6295_v60 = vpop.f32.mrb[64].mxu1  ;;  %v6651_v57 = vmax.f32 %v28382_v14, %v6456_v61  ;;  %8113 = vmatpush1.bf16.msra.mxu0 %v23465_v25  ;;  %v6458_v50 = vpop.f32.mrb[65].mxu0  ;;  %v23477_v14 = vld [vmem:[%s31429_s4 + $0x2d4] ss:$12 sps:$4 sm:$0xff]   ;;  %v6956_v25 = vmax.f32 %v6860_v59, 0.0 }
 0x553   : > { %v6961_v53 = vmax.f32 %v6865_v26, 0.0  ;;  %v6649_v20 = vmax.f32 %v28241_v11, %v6295_v60  ;;  %v6297_v15 = vpop.f32.mrb[65].mxu1  ;;  %v6652_v37 = vmax.f32 %v28384_v51, %v6458_v50  ;;  %8114 = vmatprep.subr.bf16.mxu0 %v23472_v41 }
 0x554   : > { %v6962_v28 = vmax.f32 %v6866_v36, 0.0  ;;  %v6779_v23 = vadd.f32 %v28251_v56, %v6651_v57  ;;  %v6650_v61 = vmax.f32 %v28248_v2, %v6297_v15  ;;  %v23475_v2 = vld [vmem:[%s31429_s4 + $0x2d0] ss:$12 sps:$4 sm:$0xff]  }
 0x555   : > { %v6777_v47 = vadd.f32 %v28707_v42, %v6649_v20  ;;  %v6780_v55 = vadd.f32 %v28254_v22, %v6652_v37  ;;  %v6462_v26 = vpop.f32.mrb[66].mxu0  ;;  %v28727_v11 = vpack.c.bf16 %v6961_v53, %v6955_v52  ;;  %v23482_v52 = vld [vmem:[%s31429_s4 + $0x2ec] ss:$12 sps:$4 sm:$0xff]  }
 0x556   : > { %v6778_v51 = vadd.f32 %v28713_v63, %v6650_v61  ;;  %v6301_v41 = vpop.f32.mrb[66].mxu1  ;;  %v6657_v60 = vmax.f32 %v28396_v43, %v6462_v26  ;;  %8115 = vmatpush1.bf16.msra.mxu0 %v23470_v12  ;;  %v6464_v50 = vpop.f32.mrb[67].mxu0  ;;  %v28731_v59 = vpack.c.bf16 %v6962_v28, %v6956_v25  ;;  %v6875_v53 = vmax.f32 %v6779_v23, 0.0 }
 0x557   : > { %v6655_v36 = vmax.f32 %v28258_v62, %v6301_v41  ;;  %v6303_v57 = vpop.f32.mrb[67].mxu1  ;;  %v6658_v20 = vmax.f32 %v28398_v34, %v6464_v50  ;;  %8116 = vmatprep.subr.bf16.mxu0 %v23477_v14  ;;  %v6873_v15 = vmax.f32 %v6777_v47, 0.0  ;;  %v6876_v37 = vmax.f32 %v6780_v55, 0.0  ;;  %v23480_v47 = vld [vmem:[%s31429_s4 + $0x2e8] ss:$12 sps:$4 sm:$0xff]  }
 0x558   : > { %v6785_v43 = vadd.f32 %v28251_v56, %v6657_v60  ;;  %v6656_v12 = vmax.f32 %v28262_v30, %v6303_v57  ;;  %8077 = vmatprep.mubr.bf16.mxu0 %v28731_v59  ;;  %8402 = vmatprep.mubr.bf16.mxu1 %v28731_v59  ;;  %v6874_v25 = vmax.f32 %v6778_v51, 0.0  ;;  %v23487_v51 = vld [vmem:[%s31429_s4 + $0x304] ss:$12 sps:$4 sm:$0xff]  }
 0x559   : > { %v6783_v62 = vadd.f32 %v28707_v42, %v6655_v36  ;;  %v6786_v34 = vadd.f32 %v28254_v22, %v6658_v20  ;;  %8078 = vmatmul.mubr.bf16.gmra.mrb[124].mxu0 %v28727_v11  ;;  %8403 = vmatmul.mubr.bf16.gmra.mrb[124].mxu1 %v28727_v11  ;;  %v6468_v14 = vpop.f32.mrb[68].mxu0 }
 0x55a   : > { %v6881_v28 = vmax.f32 %v6785_v43, 0.0  ;;  %v6784_v23 = vadd.f32 %v28713_v63, %v6656_v12  ;;  %v6307_v30 = vpop.f32.mrb[68].mxu1  ;;  %v6663_v61 = vmax.f32 %v28404_v13, %v6468_v14  ;;  %8117 = vmatpush1.bf16.msra.mxu0 %v23475_v2  ;;  %v6470_v26 = vpop.f32.mrb[69].mxu0 }
 0x55b   : > { %v6879_v55 = vmax.f32 %v6783_v62, 0.0  ;;  %v6882_v41 = vmax.f32 %v6786_v34, 0.0  ;;  %v6661_v60 = vmax.f32 %v28266_v45, %v6307_v30  ;;  %v6309_v50 = vpop.f32.mrb[69].mxu1  ;;  %v6664_v36 = vmax.f32 %v28407_v48, %v6470_v26  ;;  %8118 = vmatprep.subr.bf16.mxu0 %v23482_v52 }
 0x55c   : > { %v28759_v57 = vpack.c.bf16 %v6881_v28, %v6875_v53  ;;  %v6880_v13 = vmax.f32 %v6784_v23, 0.0  ;;  %v6791_v2 = vadd.f32 %v28251_v56, %v6663_v61  ;;  %v6662_v20 = vmax.f32 %v28270_v4, %v6309_v50  ;;  %v23485_v4 = vld [vmem:[%s31429_s4 + $0x300] ss:$12 sps:$4 sm:$0xff]   ;;  %v23488_v50 = vld [vmem:[%s31429_s4 + $0x318] ss:$12 sps:$4 sm:$0xff]  }
 0x55d   : > { %v28763_v43 = vpack.c.bf16 %v6879_v55, %v6873_v15  ;;  %v28765_v12 = vpack.c.bf16 %v6882_v41, %v6876_v37  ;;  %v6789_v45 = vadd.f32 %v28707_v42, %v6661_v60  ;;  %v6792_v48 = vadd.f32 %v28254_v22, %v6664_v36  ;;  %v6474_v52 = vpop.f32.mrb[70].mxu0  ;;  %v23513_v15 = vld [vmem:[%s31429_s4 + $0x308] ss:$12 sps:$4 sm:$0xff]   ;;  %v31614_v37 = vld [vmem:[#allocation29_spill] sm:$0xff] }
 0x55e   : > { %v6790_v62 = vadd.f32 %v28713_v63, %v6662_v20  ;;  %v6313_v34 = vpop.f32.mrb[70].mxu1  ;;  %v6669_v53 = vmax.f32 %v28412_v9, %v6474_v52  ;;  %8119 = vmatpush1.bf16.msra.mxu0 %v23480_v47  ;;  %v6476_v14 = vpop.f32.mrb[71].mxu0  ;;  %v28771_v28 = vpack.c.bf16 %v6880_v13, %v6874_v25  ;;  %v31615_v61 = vld [vmem:[#allocation58_spill] sm:$0xff]  ;;  %v6887_v47 = vmax.f32 %v6791_v2, 0.0  ;;  %v23493_v52 = vld [vmem:[%s31429_s4 + $0x334] ss:$12 sps:$4 sm:$0xff]  }
 0x55f   : > { %31612 = vst [vmem:[#allocation71_spill] sm:$0xff] %v28763_v43  ;;  %v6667_v23 = vmax.f32 %v31614_v37, %v6313_v34  ;;  %v6315_v30 = vpop.f32.mrb[71].mxu1  ;;  %v6670_v26 = vmax.f32 %v31615_v61, %v6476_v14  ;;  %8201 = vmatprep.subr.bf16.mxu0 %v23487_v51  ;;  %v23490_v9 = vld [vmem:[%s31429_s4 + $0x31c] ss:$12 sps:$4 sm:$0xff]   ;;  %v23517_v25 = vld [vmem:[%s31429_s4 + $0x3e0] ss:$12 sps:$4 sm:$0xff]  }
 0x560   : > { %31613 = vst [vmem:[#allocation72_spill] sm:$0xff] %v28771_v28  ;;  %v6797_v55 = vadd.f32 %v28251_v56, %v6669_v53  ;;  %v31616_v41 = vld [vmem:[#allocation30_spill] sm:$0xff]  ;;  %8120 = vmatprep.mubr.bf16.mxu0 %v28771_v28  ;;  %8443 = vmatprep.mubr.bf16.mxu1 %v28771_v28  ;;  %v6885_v36 = vmax.f32 %v6789_v45, 0.0  ;;  %v6888_v51 = vmax.f32 %v6792_v48, 0.0  ;;  %v6886_v34 = vmax.f32 %v6790_v62, 0.0  ;;  %v31617_v45 = vld [vmem:[#allocation60_spill] sm:$0xff] }
 0x561   : > { %v6668_v60 = vmax.f32 %v31616_v41, %v6315_v30  ;;  %v6795_v13 = vadd.f32 %v28707_v42, %v6667_v23  ;;  %v6798_v20 = vadd.f32 %v28254_v22, %v6670_v26  ;;  %8121 = vmatmul.mubr.bf16.vlgmr.msra.gmra.mrb[96].mxu0 %v28763_v43  ;;  %8444 = vmatmul.mubr.bf16.vlgmr.msra.gmra.mrb[128].mxu1 %v28763_v43  ;;  %v6480_v2 = vpop.f32.mrb[72].mxu0  ;;  %v23518_v30 = vld [vmem:[%s31429_s4 + $0x320] ss:$12 sps:$4 sm:$0xff]   ;;  %v31618_v41 = vld [vmem:[#allocation31_spill] sm:$0xff] }
 0x562   : > { %v6893_v53 = vmax.f32 %v6797_v55, 0.0  ;;  %v6319_v37 = vpop.f32.mrb[72].mxu1  ;;  %v6675_v48 = vmax.f32 %v31617_v45, %v6480_v2  ;;  %8202 = vmatpush1.bf16.msra.mxu0 %v23485_v4  ;;  %v6482_v23 = vpop.f32.mrb[73].mxu0  ;;  %21368 = vmatpush3.bf16.msra.mxu1 %v23513_v15  ;;  %v31619_v28 = vld [vmem:[#allocation61_spill] sm:$0xff]  ;;  %v31620_v2 = vld [vmem:[#allocation32_spill] sm:$0xff] }
 0x563   : > { %v6796_v14 = vadd.f32 %v28713_v63, %v6668_v60  ;;  %v6891_v61 = vmax.f32 %v6795_v13, 0.0  ;;  %v6894_v26 = vmax.f32 %v6798_v20, 0.0  ;;  %v6673_v33 = vmax.f32 %v31618_v41, %v6319_v37  ;;  %v6321_v43 = vpop.f32.mrb[73].mxu1  ;;  %8203 = vmatprep.subr.bf16.mxu0 %v23490_v9  ;;  %21369 = vmatprep.subr.bf16.mxu1 %v23517_v25  ;;  %v23522_v55 = vld [vmem:[%s31429_s4 + $0x3f8] ss:$12 sps:$4 sm:$0xff]  }
 0x564   : > { %v6676_v62 = vmax.f32 %v31619_v28, %v6482_v23  ;;  %v28811_v4 = vpack.c.bf16 %v6893_v53, %v6887_v47  ;;  %v6803_v60 = vadd.f32 %v28251_v56, %v6675_v48  ;;  %v6674_v45 = vmax.f32 %v31620_v2, %v6321_v43  ;;  %v23491_v43 = vld [vmem:[%s31429_s4 + $0x330] ss:$12 sps:$4 sm:$0xff]  }
 0x565   : > { %v6892_v15 = vmax.f32 %v6796_v14, 0.0  ;;  %v28815_v13 = vpack.c.bf16 %v6894_v26, %v6888_v51  ;;  %v6486_v37 = vpop.f32.mrb[74].mxu0  ;;  %v28818_v41 = vpack.c.bf16 %v6891_v61, %v6885_v36  ;;  %v6801_v28 = vadd.f32 %v28707_v42, %v6673_v33  ;;  %v23523_v36 = vld [vmem:[%s31429_s4 + $0x338] ss:$12 sps:$4 sm:$0xff]   ;;  %v31622_v61 = vld [vmem:[#allocation34_spill] sm:$0xff] }
 0x566   : > { %v6804_v20 = vadd.f32 %v28254_v22, %v6676_v62  ;;  %v6325_v9 = vpop.f32.mrb[74].mxu1  ;;  %v6681_v25 = vmax.f32 %v28460_v19, %v6486_v37  ;;  %8204 = vmatpush1.bf16.msra.mxu0 %v23488_v50  ;;  %v6488_v47 = vpop.f32.mrb[75].mxu0  ;;  %v6802_v51 = vadd.f32 %v28713_v63, %v6674_v45  ;;  %21370 = vmatpush3.bf16.msra.mxu1 %v23518_v30  ;;  %v31621_v14 = vld [vmem:[#allocation33_spill] sm:$0xff]  ;;  %v23496_v50 = vld [vmem:[%s31429_s4 + $0x34c] ss:$12 sps:$4 sm:$0xff]   ;;  %v6899_v23 = vmax.f32 %v6803_v60, 0.0 }
 0x567   : > { %v28822_v53 = vpack.c.bf16 %v6892_v15, %v6886_v34  ;;  %v6679_v33 = vmax.f32 %v31621_v14, %v6325_v9  ;;  %v6327_v48 = vpop.f32.mrb[75].mxu1  ;;  %v6682_v19 = vmax.f32 %v28464_v3, %v6488_v47  ;;  %8205 = vmatprep.subr.bf16.mxu0 %v23493_v52  ;;  %21371 = vmatprep.subr.bf16.mxu1 %v23522_v55  ;;  %v23527_v34 = vld [vmem:[%s31429_s4 + $0x410] ss:$12 sps:$4 sm:$0xff]   ;;  %v23494_v3 = vld [vmem:[%s31429_s4 + $0x348] ss:$12 sps:$4 sm:$0xff]   ;;  %v6897_v60 = vmax.f32 %v6801_v28, 0.0 }
 0x568   : > { %v6809_v30 = vadd.f32 %v28251_v56, %v6681_v25  ;;  %v6680_v26 = vmax.f32 %v31622_v61, %v6327_v48  ;;  %v6900_v52 = vmax.f32 %v6804_v20, 0.0  ;;  %v23499_v2 = vld [vmem:[%s31429_s4 + $0x364] ss:$12 sps:$4 sm:$0xff]   ;;  %v6898_v47 = vmax.f32 %v6802_v51, 0.0 }
 0x569   : > { %8130 = vmatprep.mubr.bf16.mxu0 %v28822_v53  ;;  %8451 = vmatprep.mubr.bf16.mxu1 %v28822_v53  ;;  %v6810_v62 = vadd.f32 %v28254_v22, %v6682_v19  ;;  %v6492_v55 = vpop.f32.mrb[76].mxu0  ;;  %v6807_v15 = vadd.f32 %v28707_v42, %v6679_v33  ;;  %v23528_v14 = vld [vmem:[%s31429_s4 + $0x350] ss:$12 sps:$4 sm:$0xff]  }
 0x56a   : > { %8131 = vmatmul.mubr.bf16.gmra.mrb[100].mxu0 %v28818_v41  ;;  %8452 = vmatmul.mubr.bf16.gmra.mrb[132].mxu1 %v28818_v41  ;;  %v6905_v45 = vmax.f32 %v6809_v30, 0.0  ;;  %v6331_v37 = vpop.f32.mrb[76].mxu1  ;;  %v6687_v9 = vmax.f32 %v28488_v6, %v6492_v55  ;;  %v6494_v20 = vpop.f32.mrb[77].mxu0  ;;  %v6808_v25 = vadd.f32 %v28713_v63, %v6680_v26  ;;  %v31623_v28 = vld [vmem:[#allocation35_spill] sm:$0xff] }
 0x56b   : > { %8206 = vmatpush1.bf16.msra.mxu0 %v23491_v43  ;;  %21372 = vmatpush3.bf16.msra.mxu1 %v23523_v36  ;;  %v6906_v33 = vmax.f32 %v6810_v62, 0.0  ;;  %v6685_v48 = vmax.f32 %v31623_v28, %v6331_v37  ;;  %v6333_v19 = vpop.f32.mrb[77].mxu1  ;;  %v6688_v61 = vmax.f32 %v28494_v54, %v6494_v20  ;;  %v6903_v30 = vmax.f32 %v6807_v15, 0.0  ;;  %v23532_v6 = vld [vmem:[%s31429_s4 + $0x428] ss:$12 sps:$4 sm:$0xff]   ;;  %v31624_v36 = vld [vmem:[#allocation36_spill] sm:$0xff] }
 0x56c   : > { %8207 = vmatprep.subr.bf16.mxu0 %v23496_v50  ;;  %21373 = vmatprep.subr.bf16.mxu1 %v23527_v34  ;;  %v28863_v43 = vpack.c.bf16 %v6905_v45, %v6899_v23  ;;  %v6815_v51 = vadd.f32 %v28251_v56, %v6687_v9  ;;  %v6686_v26 = vmax.f32 %v31624_v36, %v6333_v19  ;;  %v6904_v55 = vmax.f32 %v6808_v25, 0.0  ;;  %v23533_v25 = vld [vmem:[%s31429_s4 + $0x368] ss:$12 sps:$4 sm:$0xff]  }
 0x56d   : > { %v28867_v62 = vpack.c.bf16 %v6906_v33, %v6900_v52  ;;  %v6813_v37 = vadd.f32 %v28707_v42, %v6685_v48  ;;  %v6816_v54 = vadd.f32 %v28254_v22, %v6688_v61  ;;  %v6498_v50 = vpop.f32.mrb[78].mxu0  ;;  %v28871_v15 = vpack.c.bf16 %v6903_v30, %v6897_v60  ;;  %v23497_v52 = vld [vmem:[%s31429_s4 + $0x360] ss:$12 sps:$4 sm:$0xff]  }
 0x56e   : > { %v6814_v34 = vadd.f32 %v28713_v63, %v6686_v26  ;;  %v6337_v20 = vpop.f32.mrb[78].mxu1  ;;  %v6693_v23 = vmax.f32 %v28508_v58, %v6498_v50  ;;  %v6500_v45 = vpop.f32.mrb[79].mxu0  ;;  %v28875_v9 = vpack.c.bf16 %v6904_v55, %v6898_v47  ;;  %v31625_v60 = vld [vmem:[#allocation37_spill] sm:$0xff]  ;;  %v23502_v58 = vld [vmem:[%s31429_s4 + $0x37c] ss:$12 sps:$4 sm:$0xff]   ;;  %v6911_v47 = vmax.f32 %v6815_v51, 0.0 }
 0x56f   : > { %8208 = vmatpush1.bf16.msra.mxu0 %v23494_v3  ;;  %21374 = vmatpush3.bf16.msra.mxu1 %v23528_v14  ;;  %v6691_v33 = vmax.f32 %v31625_v60, %v6337_v20  ;;  %v6339_v28 = vpop.f32.mrb[79].mxu1  ;;  %v6694_v48 = vmax.f32 %v28512_v35, %v6500_v45  ;;  %v23537_v3 = vld [vmem:[%s31429_s4 + $0x440] ss:$12 sps:$4 sm:$0xff]   ;;  %v23500_v35 = vld [vmem:[%s31429_s4 + $0x378] ss:$12 sps:$4 sm:$0xff]   ;;  %v6912_v30 = vmax.f32 %v6816_v54, 0.0 }
 0x570   : > { %8209 = vmatprep.subr.bf16.mxu0 %v23499_v2  ;;  %21375 = vmatprep.subr.bf16.mxu1 %v23532_v6  ;;  %v6821_v14 = vadd.f32 %v28251_v56, %v6693_v23  ;;  %v31626_v19 = vld [vmem:[#allocation38_spill] sm:$0xff]  ;;  %v6909_v2 = vmax.f32 %v6813_v37, 0.0  ;;  %v23505_v26 = vld [vmem:[%s31429_s4 + $0x394] ss:$12 sps:$4 sm:$0xff]   ;;  %v6910_v55 = vmax.f32 %v6814_v34, 0.0 }
 0x571   : > { %v6692_v61 = vmax.f32 %v31626_v19, %v6339_v28  ;;  %8140 = vmatprep.mubr.bf16.mxu0 %v28875_v9  ;;  %8459 = vmatprep.mubr.bf16.mxu1 %v28875_v9  ;;  %v6819_v6 = vadd.f32 %v28707_v42, %v6691_v33  ;;  %v6822_v36 = vadd.f32 %v28254_v22, %v6694_v48  ;;  %v6504_v51 = vpop.f32.mrb[80].mxu0  ;;  %v23538_v45 = vld [vmem:[%s31429_s4 + $0x380] ss:$12 sps:$4 sm:$0xff]   ;;  %v31627_v28 = vld [vmem:[#allocation39_spill] sm:$0xff] }
 0x572   : > { %8141 = vmatmul.mubr.bf16.gmra.mrb[104].mxu0 %v28871_v15  ;;  %8460 = vmatmul.mubr.bf16.gmra.mrb[136].mxu1 %v28871_v15  ;;  %v6917_v50 = vmax.f32 %v6821_v14, 0.0  ;;  %v6343_v23 = vpop.f32.mrb[80].mxu1  ;;  %v6699_v37 = vmax.f32 %v28536_v10, %v6504_v51  ;;  %v6506_v54 = vpop.f32.mrb[81].mxu0  ;;  %v23542_v10 = vld [vmem:[%s31429_s4 + $0x458] ss:$12 sps:$4 sm:$0xff]  }
 0x573   : > { %v6820_v20 = vadd.f32 %v28713_v63, %v6692_v61  ;;  %8210 = vmatpush1.bf16.msra.mxu0 %v23497_v52  ;;  %21376 = vmatpush3.bf16.msra.mxu1 %v23533_v25  ;;  %v6915_v60 = vmax.f32 %v6819_v6, 0.0  ;;  %v6918_v33 = vmax.f32 %v6822_v36, 0.0  ;;  %v6697_v48 = vmax.f32 %v31627_v28, %v6343_v23  ;;  %v6345_v19 = vpop.f32.mrb[81].mxu1  ;;  %v31628_v61 = vld [vmem:[#allocation40_spill] sm:$0xff] }
 0x574   : > { %v6700_v34 = vmax.f32 %v28542_v7, %v6506_v54  ;;  %8211 = vmatprep.subr.bf16.mxu0 %v23502_v58  ;;  %21377 = vmatprep.subr.bf16.mxu1 %v23537_v3  ;;  %v28915_v52 = vpack.c.bf16 %v6917_v50, %v6911_v47  ;;  %v6827_v14 = vadd.f32 %v28251_v56, %v6699_v37  ;;  %v23543_v37 = vld [vmem:[%s31429_s4 + $0x398] ss:$12 sps:$4 sm:$0xff]  }
 0x575   : > { %v6916_v25 = vmax.f32 %v6820_v20, 0.0  ;;  %v6698_v51 = vmax.f32 %v31628_v61, %v6345_v19  ;;  %v28919_v6 = vpack.c.bf16 %v6918_v33, %v6912_v30  ;;  %v6825_v36 = vadd.f32 %v28707_v42, %v6697_v48  ;;  %v6510_v7 = vpop.f32.mrb[82].mxu0  ;;  %v23503_v30 = vld [vmem:[%s31429_s4 + $0x390] ss:$12 sps:$4 sm:$0xff]   ;;  %v31630_v48 = vld [vmem:[#allocation42_spill] sm:$0xff] }
 0x576   : > { %v6828_v23 = vadd.f32 %v28254_v22, %v6700_v34  ;;  %v28923_v58 = vpack.c.bf16 %v6915_v60, %v6909_v2  ;;  %v6349_v54 = vpop.f32.mrb[82].mxu1  ;;  %v6705_v47 = vmax.f32 %v28556_v21, %v6510_v7  ;;  %v6512_v50 = vpop.f32.mrb[83].mxu0  ;;  %v31629_v2 = vld [vmem:[#allocation41_spill] sm:$0xff]  ;;  %v23508_v21 = vld [vmem:[%s31429_s4 + $0x3ac] ss:$12 sps:$4 sm:$0xff]  }
 0x577   : > { %v6826_v3 = vadd.f32 %v28713_v63, %v6698_v51  ;;  %8212 = vmatpush1.bf16.msra.mxu0 %v23500_v35  ;;  %v28927_v20 = vpack.c.bf16 %v6916_v25, %v6910_v55  ;;  %21378 = vmatpush3.bf16.msra.mxu1 %v23538_v45  ;;  %v6703_v60 = vmax.f32 %v31629_v2, %v6349_v54  ;;  %v6351_v33 = vpop.f32.mrb[83].mxu1  ;;  %v23547_v35 = vld [vmem:[%s31429_s4 + $0x470] ss:$12 sps:$4 sm:$0xff]   ;;  %v6923_v55 = vmax.f32 %v6827_v14, 0.0 }
 0x578   : > { %v6706_v28 = vmax.f32 %v28560_v44, %v6512_v50  ;;  %8213 = vmatprep.subr.bf16.mxu0 %v23505_v26  ;;  %21379 = vmatprep.subr.bf16.mxu1 %v23542_v10  ;;  %v6833_v45 = vadd.f32 %v28251_v56, %v6705_v47  ;;  %v6704_v19 = vmax.f32 %v31630_v48, %v6351_v33  ;;  %v23506_v44 = vld [vmem:[%s31429_s4 + $0x3a8] ss:$12 sps:$4 sm:$0xff]   ;;  %v6921_v26 = vmax.f32 %v6825_v36, 0.0  ;;  %v23511_v61 = vld [vmem:[%s31429_s4 + $0x3c4] ss:$12 sps:$4 sm:$0xff]  }
 0x579   : > { %8150 = vmatprep.mubr.bf16.mxu0 %v28927_v20  ;;  %8467 = vmatprep.mubr.bf16.mxu1 %v28927_v20  ;;  %v6924_v34 = vmax.f32 %v6828_v23, 0.0  ;;  %v6831_v10 = vadd.f32 %v28707_v42, %v6703_v60  ;;  %v6516_v14 = vpop.f32.mrb[84].mxu0  ;;  %v6922_v51 = vmax.f32 %v6826_v3, 0.0  ;;  %v23548_v50 = vld [vmem:[%s31429_s4 + $0x3b0] ss:$12 sps:$4 sm:$0xff]  }
 0x57a   : > { %v6834_v25 = vadd.f32 %v28254_v22, %v6706_v28  ;;  %8151 = vmatmul.mubr.bf16.gmra.mrb[108].mxu0 %v28923_v58  ;;  %8468 = vmatmul.mubr.bf16.gmra.mrb[140].mxu1 %v28923_v58  ;;  %v6929_v7 = vmax.f32 %v6833_v45, 0.0  ;;  %v6832_v54 = vadd.f32 %v28713_v63, %v6704_v19  ;;  %v6355_v47 = vpop.f32.mrb[84].mxu1  ;;  %v6711_v36 = vmax.f32 %v28585_v5, %v6516_v14  ;;  %v6518_v23 = vpop.f32.mrb[85].mxu0  ;;  %v31631_v33 = vld [vmem:[#allocation43_spill] sm:$0xff]  ;;  %v31632_v19 = vld [vmem:[#allocation44_spill] sm:$0xff] }
 0x57b   : > { %8214 = vmatpush1.bf16.msra.mxu0 %v23503_v30  ;;  %21380 = vmatpush3.bf16.msra.mxu1 %v23543_v37  ;;  %v6927_v2 = vmax.f32 %v6831_v10, 0.0  ;;  %v6709_v28 = vmax.f32 %v31631_v33, %v6355_v47  ;;  %v6357_v48 = vpop.f32.mrb[85].mxu1  ;;  %v6712_v3 = vmax.f32 %v28591_v46, %v6518_v23  ;;  %v23576_v5 = vld [vmem:[%s31429_s4 + $0x548] ss:$12 sps:$4 sm:$0xff]  }
 0x57c   : > { %v6930_v60 = vmax.f32 %v6834_v25, 0.0  ;;  %8215 = vmatprep.subr.bf16.mxu0 %v23508_v21  ;;  %21381 = vmatprep.subr.bf16.mxu1 %v23547_v35  ;;  %v28967_v30 = vpack.c.bf16 %v6929_v7, %v6923_v55  ;;  %v6928_v37 = vmax.f32 %v6832_v54, 0.0  ;;  %v6839_v45 = vadd.f32 %v28251_v56, %v6711_v36 }
 0x57d   : > { %v6710_v14 = vmax.f32 %v31632_v19, %v6357_v48  ;;  %v28971_v10 = vpack.c.bf16 %v6927_v2, %v6921_v26  ;;  %v6837_v47 = vadd.f32 %v28707_v42, %v6709_v28  ;;  %v6840_v46 = vadd.f32 %v28254_v22, %v6712_v3  ;;  %v6522_v21 = vpop.f32.mrb[86].mxu0  ;;  %v23509_v26 = vld [vmem:[%s31429_s4 + $0x3c0] ss:$12 sps:$4 sm:$0xff]  }
 0x57e   : > { %v28973_v25 = vpack.c.bf16 %v6930_v60, %v6924_v34  ;;  %v28977_v35 = vpack.c.bf16 %v6928_v37, %v6922_v51  ;;  %v6361_v55 = vpop.f32.mrb[86].mxu1  ;;  %v6717_v7 = vmax.f32 %v28604_v31, %v6522_v21  ;;  %v6524_v54 = vpop.f32.mrb[87].mxu0  ;;  %v31633_v34 = vld [vmem:[#allocation45_spill] sm:$0xff]  ;;  %v23516_v51 = vld [vmem:[%s31429_s4 + $0x3dc] ss:$12 sps:$4 sm:$0xff]   ;;  %v6935_v33 = vmax.f32 %v6839_v45, 0.0 }
 0x57f   : > { %v6838_v23 = vadd.f32 %v28713_v63, %v6710_v14  ;;  %8216 = vmatpush1.bf16.msra.mxu0 %v23506_v44  ;;  %21382 = vmatpush3.bf16.msra.mxu1 %v23548_v50  ;;  %v6715_v36 = vmax.f32 %v31633_v34, %v6361_v55  ;;  %v6363_v2 = vpop.f32.mrb[87].mxu1  ;;  %v6718_v60 = vmax.f32 %v28608_v18, %v6524_v54  ;;  %v31634_v44 = vld [vmem:[#allocation46_spill] sm:$0xff]  ;;  %v6933_v50 = vmax.f32 %v6837_v47, 0.0  ;;  %v23514_v47 = vld [vmem:[%s31429_s4 + $0x3d8] ss:$12 sps:$4 sm:$0xff]  }
 0x580   : > { %8217 = vmatprep.subr.bf16.mxu0 %v23511_v61  ;;  %21431 = vmatprep.subr.bf16.mxu1 %v23576_v5  ;;  %v6845_v31 = vadd.f32 %v28251_v56, %v6717_v7  ;;  %v6716_v28 = vmax.f32 %v31634_v44, %v6363_v2  ;;  %v6936_v48 = vmax.f32 %v6840_v46, 0.0  ;;  %v31635_v7 = vld [vmem:[#allocation47_spill] sm:$0xff] }
 0x581   : > { %8160 = vmatprep.mubr.bf16.mxu0 %v28977_v35  ;;  %8475 = vmatprep.mubr.bf16.mxu1 %v28977_v35  ;;  %v6843_v3 = vadd.f32 %v28707_v42, %v6715_v36  ;;  %v6846_v18 = vadd.f32 %v28254_v22, %v6718_v60  ;;  %v6528_v61 = vpop.f32.mrb[88].mxu0  ;;  %v6934_v5 = vmax.f32 %v6838_v23, 0.0  ;;  %v23521_v23 = vld [vmem:[%s31429_s4 + $0x3f4] ss:$12 sps:$4 sm:$0xff]   ;;  %v31636_v60 = vld [vmem:[#allocation48_spill] sm:$0xff] }
 0x582   : > { %8161 = vmatmul.mubr.bf16.gmra.mrb[112].mxu0 %v28971_v10  ;;  %8476 = vmatmul.mubr.bf16.gmra.mrb[144].mxu1 %v28971_v10  ;;  %v6941_v37 = vmax.f32 %v6845_v31, 0.0  ;;  %v6844_v45 = vadd.f32 %v28713_v63, %v6716_v28  ;;  %v6367_v19 = vpop.f32.mrb[88].mxu1  ;;  %v6723_v14 = vmax.f32 %v28627_v17, %v6528_v61  ;;  %v6530_v21 = vpop.f32.mrb[89].mxu0 }
 0x583   : > { %8218 = vmatpush1.bf16.msra.mxu0 %v23509_v26  ;;  %v6939_v46 = vmax.f32 %v6843_v3, 0.0  ;;  %v6942_v55 = vmax.f32 %v6846_v18, 0.0  ;;  %v6721_v54 = vmax.f32 %v31635_v7, %v6367_v19  ;;  %v6369_v34 = vpop.f32.mrb[89].mxu1  ;;  %v6724_v36 = vmax.f32 %v28630_v8, %v6530_v21 }
 0x584   : > { %8219 = vmatprep.subr.bf16.mxu0 %v23516_v51  ;;  %v29007_v2 = vpack.c.bf16 %v6941_v37, %v6935_v33  ;;  %v6940_v17 = vmax.f32 %v6844_v45, 0.0  ;;  %v6851_v26 = vadd.f32 %v28251_v56, %v6723_v14  ;;  %v6722_v31 = vmax.f32 %v31636_v60, %v6369_v34 }
 0x585   : > { %v29011_v44 = vpack.c.bf16 %v6939_v46, %v6933_v50  ;;  %v29013_v28 = vpack.c.bf16 %v6942_v55, %v6936_v48  ;;  %v6849_v3 = vadd.f32 %v28707_v42, %v6721_v54  ;;  %v6852_v8 = vadd.f32 %v28254_v22, %v6724_v36  ;;  %v6534_v51 = vpop.f32.mrb[90].mxu0  ;;  %v23519_v50 = vld [vmem:[%s31429_s4 + $0x3f0] ss:$12 sps:$4 sm:$0xff]   ;;  %v31637_v48 = vld [vmem:[#allocation49_spill] sm:$0xff] }
 0x586   : > { %v29017_v18 = vpack.c.bf16 %v6940_v17, %v6934_v5  ;;  %v6850_v61 = vadd.f32 %v28713_v63, %v6722_v31  ;;  %v6373_v33 = vpop.f32.mrb[90].mxu1  ;;  %v6729_v37 = vmax.f32 %v28640_v39, %v6534_v51  ;;  %v6536_v45 = vpop.f32.mrb[91].mxu0  ;;  %v23526_v5 = vld [vmem:[%s31429_s4 + $0x40c] ss:$12 sps:$4 sm:$0xff]   ;;  %v6947_v46 = vmax.f32 %v6851_v26, 0.0 }
 0x587   : > { %8220 = vmatpush1.bf16.msra.mxu0 %v23514_v47  ;;  %v6727_v19 = vmax.f32 %v31637_v48, %v6373_v33  ;;  %v6375_v14 = vpop.f32.mrb[91].mxu1  ;;  %v6730_v21 = vmax.f32 %v28644_v1, %v6536_v45  ;;  %v31638_v39 = vld [vmem:[#allocation50_spill] sm:$0xff]  ;;  %v6945_v7 = vmax.f32 %v6849_v3, 0.0  ;;  %v6948_v54 = vmax.f32 %v6852_v8, 0.0 }
 0x588   : > { %8221 = vmatprep.subr.bf16.mxu0 %v23521_v23  ;;  %v6857_v55 = vadd.f32 %v28251_v56, %v6729_v37  ;;  %v6728_v47 = vmax.f32 %v31638_v39, %v6375_v14  ;;  %8170 = vmatprep.mubr.bf16.mxu0 %v29017_v18  ;;  %v6946_v23 = vmax.f32 %v6850_v61, 0.0  ;;  %v23524_v3 = vld [vmem:[%s31429_s4 + $0x408] ss:$12 sps:$4 sm:$0xff]   ;;  %v23531_v61 = vld [vmem:[%s31429_s4 + $0x424] ss:$12 sps:$4 sm:$0xff]  }
 0x589   : > { %8483 = vmatprep.mubr.bf16.mxu1 %v29017_v18  ;;  %v6855_v34 = vadd.f32 %v28707_v42, %v6727_v19  ;;  %v6858_v1 = vadd.f32 %v28254_v22, %v6730_v21  ;;  %v6540_v36 = vpop.f32.mrb[92].mxu0  ;;  %v31639_v37 = vld [vmem:[#allocation51_spill] sm:$0xff]  ;;  %v31640_v21 = vld [vmem:[#allocation52_spill] sm:$0xff] }
 0x58a   : > { %8171 = vmatmul.mubr.bf16.gmra.mrb[116].mxu0 %v29011_v44  ;;  %8484 = vmatmul.mubr.bf16.gmra.mrb[148].mxu1 %v29011_v44  ;;  %v6953_v17 = vmax.f32 %v6857_v55, 0.0  ;;  %v6856_v26 = vadd.f32 %v28713_v63, %v6728_v47  ;;  %v6379_v60 = vpop.f32.mrb[92].mxu1  ;;  %v6735_v31 = vmax.f32 %v28663_v27, %v6540_v36  ;;  %v6542_v51 = vpop.f32.mrb[93].mxu0 }
 0x58b   : > { %8222 = vmatpush1.bf16.msra.mxu0 %v23519_v50  ;;  %v6951_v8 = vmax.f32 %v6855_v34, 0.0  ;;  %v6954_v33 = vmax.f32 %v6858_v1, 0.0  ;;  %v6733_v45 = vmax.f32 %v31639_v37, %v6379_v60  ;;  %v6381_v48 = vpop.f32.mrb[93].mxu1  ;;  %v6736_v19 = vmax.f32 %v28666_v16, %v6542_v51 }
 0x58c   : > { %8223 = vmatprep.subr.bf16.mxu0 %v23526_v5  ;;  %v29047_v14 = vpack.c.bf16 %v6953_v17, %v6947_v46  ;;  %v6952_v27 = vmax.f32 %v6856_v26, 0.0  ;;  %v6863_v50 = vadd.f32 %v28251_v56, %v6735_v31  ;;  %v6734_v55 = vmax.f32 %v31640_v21, %v6381_v48 }
 0x58d   : > { %v29051_v39 = vpack.c.bf16 %v6951_v8, %v6945_v7  ;;  %v29053_v47 = vpack.c.bf16 %v6954_v33, %v6948_v54  ;;  %v6861_v34 = vadd.f32 %v28707_v42, %v6733_v45  ;;  %v6864_v16 = vadd.f32 %v28254_v22, %v6736_v19  ;;  %v6546_v5 = vpop.f32.mrb[94].mxu0  ;;  %v23529_v7 = vld [vmem:[%s31429_s4 + $0x420] ss:$12 sps:$4 sm:$0xff]  }
 0x58e   : > { %v29057_v1 = vpack.c.bf16 %v6952_v27, %v6946_v23  ;;  %v6862_v36 = vadd.f32 %v28713_v63, %v6734_v55  ;;  %v6385_v46 = vpop.f32.mrb[94].mxu1  ;;  %v6741_v17 = vmax.f32 %v28676_v32, %v6546_v5  ;;  %v6548_v26 = vpop.f32.mrb[95].mxu0  ;;  %v31641_v54 = vld [vmem:[#allocation53_spill] sm:$0xff]  ;;  %v23536_v23 = vld [vmem:[%s31429_s4 + $0x43c] ss:$12 sps:$4 sm:$0xff]  }
 0x58f   : > { %8224 = vmatpush1.bf16.msra.mxu0 %v23524_v3  ;;  %v6739_v60 = vmax.f32 %v31641_v54, %v6385_v46  ;;  %v6387_v31 = vpop.f32.mrb[95].mxu1  ;;  %v6742_v51 = vmax.f32 %v28683_v29, %v6548_v26  ;;  %v31642_v33 = vld [vmem:[#allocation54_spill] sm:$0xff]  ;;  %v6959_v29 = vmax.f32 %v6863_v50, 0.0  ;;  %v6957_v19 = vmax.f32 %v6861_v34, 0.0  ;;  %v23539_v34 = vld [vmem:[%s31429_s4 + $0x450] ss:$12 sps:$4 sm:$0xff]  }
 0x590   : > { %8225 = vmatprep.subr.bf16.mxu0 %v23531_v61  ;;  %v6869_v8 = vadd.f32 %v28251_v56, %v6741_v17  ;;  %v6740_v32 = vmax.f32 %v31642_v33, %v6387_v31  ;;  %8180 = vmatprep.mubr.bf16.mxu0 %v29057_v1  ;;  %v23534_v56 = vld [vmem:[%s31429_s4 + $0x438] ss:$12 sps:$4 sm:$0xff]   ;;  %v6960_v61 = vmax.f32 %v6864_v16, 0.0  ;;  %v23549_v26 = vld [vmem:[%s31429_s4 + $0x480] ss:$12 sps:$4 sm:$0xff]  }
 0x591   : > { %8491 = vmatprep.mubr.bf16.mxu1 %v29057_v1  ;;  %v6867_v3 = vadd.f32 %v28707_v42, %v6739_v60  ;;  %v6870_v37 = vadd.f32 %v28254_v22, %v6742_v51  ;;  %v23541_v22 = vld [vmem:[%s31429_s4 + $0x454] ss:$12 sps:$4 sm:$0xff]   ;;  %v6958_v42 = vmax.f32 %v6862_v36, 0.0  ;;  %v23546_v16 = vld [vmem:[%s31429_s4 + $0x46c] ss:$12 sps:$4 sm:$0xff]  }
 0x592   : > { %8181 = vmatmul.mubr.bf16.gmra.mrb[120].mxu0 %v29051_v39  ;;  %8492 = vmatmul.mubr.bf16.gmra.mrb[152].mxu1 %v29051_v39  ;;  %v6965_v45 = vmax.f32 %v6869_v8, 0.0  ;;  %v6868_v48 = vadd.f32 %v28713_v63, %v6740_v32  ;;  %v23544_v36 = vld [vmem:[%s31429_s4 + $0x468] ss:$12 sps:$4 sm:$0xff]   ;;  %v23551_v17 = vld [vmem:[%s31429_s4 + $0x484] ss:$12 sps:$4 sm:$0xff]  }
 0x593   : > { %8226 = vmatpush1.bf16.msra.mxu0 %v23529_v7  ;;  %v6963_v27 = vmax.f32 %v6867_v3, 0.0  ;;  %v6966_v21 = vmax.f32 %v6870_v37, 0.0  ;;  %v23577_v7 = vld [vmem:[%s31429_s4 + $0x488] ss:$12 sps:$4 sm:$0xff]   ;;  %v23581_v60 = vld [vmem:[%s31429_s4 + $0x560] ss:$12 sps:$4 sm:$0xff]  }
 0x594   : > { %8227 = vmatprep.subr.bf16.mxu0 %v23536_v23  ;;  %v29084_v55 = vpack.c.bf16 %v6965_v45, %v6959_v29  ;;  %v6964_v50 = vmax.f32 %v6868_v48, 0.0  ;;  %v23554_v54 = vld [vmem:[%s31429_s4 + $0x49c] ss:$12 sps:$4 sm:$0xff]   ;;  %v23552_v31 = vld [vmem:[%s31429_s4 + $0x498] ss:$12 sps:$4 sm:$0xff]  }
 0x595   : > { %v29086_v5 = vpack.c.bf16 %v6963_v27, %v6957_v19  ;;  %v29088_v63 = vpack.c.bf16 %v6966_v21, %v6960_v61  ;;  %v23582_v51 = vld [vmem:[%s31429_s4 + $0x4a0] ss:$12 sps:$4 sm:$0xff]   ;;  %v23586_v8 = vld [vmem:[%s31429_s4 + $0x578] ss:$12 sps:$4 sm:$0xff]   ;;  %v23555_v33 = vld [vmem:[%s31429_s4 + $0x4b0] ss:$12 sps:$4 sm:$0xff]  }
 0x596   : > { %v29090_v46 = vpack.c.bf16 %v6964_v50, %v6958_v42  ;;  %v23557_v23 = vld [vmem:[%s31429_s4 + $0x4b4] ss:$12 sps:$4 sm:$0xff]   ;;  %v23587_v32 = vld [vmem:[%s31429_s4 + $0x4b8] ss:$12 sps:$4 sm:$0xff]   ;;  %v23591_v37 = vld [vmem:[%s31429_s4 + $0x590] ss:$12 sps:$4 sm:$0xff]  }
 0x597   : > { %8228 = vmatpush1.bf16.msra.mxu0 %v23534_v56  ;;  %v23560_v3 = vld [vmem:[%s31429_s4 + $0x4cc] ss:$12 sps:$4 sm:$0xff]   ;;  %v23558_v29 = vld [vmem:[%s31429_s4 + $0x4c8] ss:$12 sps:$4 sm:$0xff]   ;;  %v23592_v45 = vld [vmem:[%s31429_s4 + $0x4d0] ss:$12 sps:$4 sm:$0xff]  }
 0x598   : > { %8229 = vmatprep.subr.bf16.mxu0 %v23541_v22  ;;  %8190 = vmatprep.mubr.bf16.mxu0 %v29090_v46  ;;  %v23563_v48 = vld [vmem:[%s31429_s4 + $0x4e4] ss:$12 sps:$4 sm:$0xff]   ;;  %v23596_v56 = vld [vmem:[%s31429_s4 + $0x5a8] ss:$12 sps:$4 sm:$0xff]   ;;  %v23561_v19 = vld [vmem:[%s31429_s4 + $0x4e0] ss:$12 sps:$4 sm:$0xff]  }
 0x599   : > { %8499 = vmatprep.mubr.bf16.mxu1 %v29090_v46  ;;  %v23597_v61 = vld [vmem:[%s31429_s4 + $0x4e8] ss:$12 sps:$4 sm:$0xff]   ;;  %v23601_v21 = vld [vmem:[%s31429_s4 + $0x5c0] ss:$12 sps:$4 sm:$0xff]   ;;  %v23564_v22 = vld [vmem:[%s31429_s4 + $0x4f8] ss:$12 sps:$4 sm:$0xff]  }
 0x59a   : > { %8191 = vmatmul.mubr.bf16.gmra.mrb[124].mxu0 %v29086_v5  ;;  %8500 = vmatmul.mubr.bf16.gmra.mrb[156].mxu1 %v29086_v5  ;;  %v23566_v27 = vld [vmem:[%s31429_s4 + $0x4fc] ss:$12 sps:$4 sm:$0xff]   ;;  %v23602_v42 = vld [vmem:[%s31429_s4 + $0x500] ss:$12 sps:$4 sm:$0xff]  }
 0x59b   : > { %8230 = vmatpush1.bf16.msra.mxu0 %v23539_v34  ;;  %8233 = vmatprep.mubr.bf16.mxu0 %v28765_v12  ;;  %v23569_v50 = vld [vmem:[%s31429_s4 + $0x514] ss:$12 sps:$4 sm:$0xff]   ;;  %v23606_v34 = vld [vmem:[%s31429_s4 + $0x5d8] ss:$12 sps:$4 sm:$0xff]  }
 0x59c   : > { %8540 = vmatprep.mubr.bf16.mxu1 %v28765_v12  ;;  %8231 = vmatprep.subr.bf16.mxu0 %v23546_v16  ;;  %v23567_v16 = vld [vmem:[%s31429_s4 + $0x510] ss:$12 sps:$4 sm:$0xff]  }
 0x59f   : > { %8232 = vmatpush1.bf16.msra.mxu0 %v23544_v36  ;;  %v23607_v36 = vld [vmem:[%s31429_s4 + $0x518] ss:$12 sps:$4 sm:$0xff]  }
 0x5a0   : > { %9566 = vmatprep.subr.bf16.mxu0 %v23551_v17  ;;  %v23572_v17 = vld [vmem:[%s31429_s4 + $0x52c] ss:$12 sps:$4 sm:$0xff]  }
 0x5a2   : > { %8234 = vmatmul.mubr.bf16.vlgmr.msra.gmra.mrb[96].mxu0 %v28759_v57  ;;  %8541 = vmatmul.mubr.bf16.vlgmr.msra.gmra.mrb[160].mxu1 %v28759_v57 }
 0x5a3   : > { %8243 = vmatprep.mubr.bf16.mxu0 %v28815_v13  ;;  %8548 = vmatprep.mubr.bf16.mxu1 %v28815_v13 }
 0x5a4   : > { %9567 = vmatpush1.bf16.msra.mxu0 %v23549_v26  ;;  %21432 = vmatpush3.bf16.msra.mxu1 %v23577_v7  ;;  %v23611_v26 = vld [vmem:[%s31429_s4 + $0x5f0] ss:$12 sps:$4 sm:$0xff]   ;;  %v23570_v7 = vld [vmem:[%s31429_s4 + $0x528] ss:$12 sps:$4 sm:$0xff]  }
 0x5a5   : > { %9568 = vmatprep.subr.bf16.mxu0 %v23554_v54  ;;  %21433 = vmatprep.subr.bf16.mxu1 %v23581_v60  ;;  %v23612_v54 = vld [vmem:[%s31429_s4 + $0x530] ss:$12 sps:$4 sm:$0xff]  }
 0x5a6   : > { %v23575_v60 = vld [vmem:[%s31429_s4 + $0x544] ss:$12 sps:$4 sm:$0xff]  }
 0x5a8   : > { %9569 = vmatpush1.bf16.msra.mxu0 %v23552_v31  ;;  %21434 = vmatpush3.bf16.msra.mxu1 %v23582_v51  ;;  %v23640_v31 = vld [vmem:[%s31429_s4 + $0x6c8] ss:$12 sps:$4 sm:$0xff]   ;;  %v23573_v51 = vld [vmem:[%s31429_s4 + $0x540] ss:$12 sps:$4 sm:$0xff]  }
 0x5a9   : > { %9570 = vmatprep.subr.bf16.mxu0 %v23557_v23  ;;  %21435 = vmatprep.subr.bf16.mxu1 %v23586_v8  ;;  %v23580_v23 = vld [vmem:[%s31429_s4 + $0x55c] ss:$12 sps:$4 sm:$0xff]   ;;  %v23578_v8 = vld [vmem:[%s31429_s4 + $0x558] ss:$12 sps:$4 sm:$0xff]  }
 0x5aa   : > { %8244 = vmatmul.mubr.bf16.gmra.mrb[100].mxu0 %v28811_v4  ;;  %8549 = vmatmul.mubr.bf16.gmra.mrb[164].mxu1 %v28811_v4 }
 0x5ab   : > { %8253 = vmatprep.mubr.bf16.mxu0 %v28867_v62  ;;  %8556 = vmatprep.mubr.bf16.mxu1 %v28867_v62 }
 0x5ac   : > { %9571 = vmatpush1.bf16.msra.mxu0 %v23555_v33  ;;  %21436 = vmatpush3.bf16.msra.mxu1 %v23587_v32  ;;  %v23585_v33 = vld [vmem:[%s31429_s4 + $0x574] ss:$12 sps:$4 sm:$0xff]   ;;  %v23583_v32 = vld [vmem:[%s31429_s4 + $0x570] ss:$12 sps:$4 sm:$0xff]  }
 0x5ad   : > { %9572 = vmatprep.subr.bf16.mxu0 %v23560_v3  ;;  %21437 = vmatprep.subr.bf16.mxu1 %v23591_v37  ;;  %v23590_v3 = vld [vmem:[%s31429_s4 + $0x58c] ss:$12 sps:$4 sm:$0xff]   ;;  %v23588_v37 = vld [vmem:[%s31429_s4 + $0x588] ss:$12 sps:$4 sm:$0xff]  }
 0x5b0   : > { %9573 = vmatpush1.bf16.msra.mxu0 %v23558_v29  ;;  %21438 = vmatpush3.bf16.msra.mxu1 %v23592_v45  ;;  %v23595_v29 = vld [vmem:[%s31429_s4 + $0x5a4] ss:$12 sps:$4 sm:$0xff]   ;;  %v23593_v45 = vld [vmem:[%s31429_s4 + $0x5a0] ss:$12 sps:$4 sm:$0xff]  }
 0x5b1   : > { %9574 = vmatprep.subr.bf16.mxu0 %v23563_v48  ;;  %21439 = vmatprep.subr.bf16.mxu1 %v23596_v56  ;;  %v23600_v48 = vld [vmem:[%s31429_s4 + $0x5bc] ss:$12 sps:$4 sm:$0xff]   ;;  %v23598_v56 = vld [vmem:[%s31429_s4 + $0x5b8] ss:$12 sps:$4 sm:$0xff]  }
 0x5b2   : > { %8254 = vmatmul.mubr.bf16.gmra.mrb[104].mxu0 %v28863_v43  ;;  %8557 = vmatmul.mubr.bf16.gmra.mrb[168].mxu1 %v28863_v43 }
 0x5b3   : > { %8263 = vmatprep.mubr.bf16.mxu0 %v28919_v6  ;;  %8564 = vmatprep.mubr.bf16.mxu1 %v28919_v6 }
 0x5b4   : > { %9575 = vmatpush1.bf16.msra.mxu0 %v23561_v19  ;;  %21440 = vmatpush3.bf16.msra.mxu1 %v23597_v61  ;;  %v23605_v19 = vld [vmem:[%s31429_s4 + $0x5d4] ss:$12 sps:$4 sm:$0xff]   ;;  %v23603_v61 = vld [vmem:[%s31429_s4 + $0x5d0] ss:$12 sps:$4 sm:$0xff]  }
 0x5b5   : > { %9576 = vmatprep.subr.bf16.mxu0 %v23566_v27  ;;  %21441 = vmatprep.subr.bf16.mxu1 %v23601_v21  ;;  %v23610_v27 = vld [vmem:[%s31429_s4 + $0x5ec] ss:$12 sps:$4 sm:$0xff]   ;;  %v31643_v21 = vld [vmem:[#allocation59_spill] sm:$0xff] }
 0x5b8   : > { %9577 = vmatpush1.bf16.msra.mxu0 %v23564_v22  ;;  %21442 = vmatpush3.bf16.msra.mxu1 %v23602_v42  ;;  %v23608_v22 = vld [vmem:[%s31429_s4 + $0x5e8] ss:$12 sps:$4 sm:$0xff]   ;;  %v23615_v42 = vld [vmem:[%s31429_s4 + $0x604] ss:$12 sps:$4 sm:$0xff]  }
 0x5b9   : > { %9578 = vmatprep.subr.bf16.mxu0 %v23569_v50  ;;  %21443 = vmatprep.subr.bf16.mxu1 %v23606_v34  ;;  %v23613_v50 = vld [vmem:[%s31429_s4 + $0x600] ss:$12 sps:$4 sm:$0xff]   ;;  %v23618_v34 = vld [vmem:[%s31429_s4 + $0x61c] ss:$12 sps:$4 sm:$0xff]  }
 0x5ba   : > { %8264 = vmatmul.mubr.bf16.gmra.mrb[108].mxu0 %v28915_v52  ;;  %8565 = vmatmul.mubr.bf16.gmra.mrb[172].mxu1 %v28915_v52 }
 0x5bb   : > { %8273 = vmatprep.mubr.bf16.mxu0 %v28973_v25  ;;  %8572 = vmatprep.mubr.bf16.mxu1 %v28973_v25 }
 0x5bc   : > { %9579 = vmatpush1.bf16.msra.mxu0 %v23567_v16  ;;  %21444 = vmatpush3.bf16.msra.mxu1 %v23607_v36  ;;  %v23641_v16 = vld [vmem:[%s31429_s4 + $0x608] ss:$12 sps:$4 sm:$0xff]   ;;  %v31644_v36 = vld [vmem:[#allocation57_spill] sm:$0xff] }
 0x5bd   : > { %9580 = vmatprep.subr.bf16.mxu0 %v23572_v17  ;;  %21445 = vmatprep.subr.bf16.mxu1 %v23611_v26  ;;  %v23645_v17 = vld [vmem:[%s31429_s4 + $0x6e0] ss:$12 sps:$4 sm:$0xff]   ;;  %v31645_v26 = vld [vmem:[#allocation63_spill] sm:$0xff] }
 0x5c0   : > { %9581 = vmatpush1.bf16.msra.mxu0 %v23570_v7  ;;  %21446 = vmatpush3.bf16.msra.mxu1 %v23612_v54  ;;  %v23616_v7 = vld [vmem:[%s31429_s4 + $0x618] ss:$12 sps:$4 sm:$0xff]   ;;  %v23621_v54 = vld [vmem:[%s31429_s4 + $0x634] ss:$12 sps:$4 sm:$0xff]  }
 0x5c1   : > { %9582 = vmatprep.subr.bf16.mxu0 %v23575_v60  ;;  %21495 = vmatprep.subr.bf16.mxu1 %v23640_v31  ;;  %v23646_v60 = vld [vmem:[%s31429_s4 + $0x620] ss:$12 sps:$4 sm:$0xff]   ;;  %v23650_v31 = vld [vmem:[%s31429_s4 + $0x6f8] ss:$12 sps:$4 sm:$0xff]  }
 0x5c2   : > { %8274 = vmatmul.mubr.bf16.gmra.mrb[112].mxu0 %v28967_v30  ;;  %8573 = vmatmul.mubr.bf16.gmra.mrb[176].mxu1 %v28967_v30 }
 0x5c3   : > { %8283 = vmatprep.mubr.bf16.mxu0 %v29013_v28  ;;  %8580 = vmatprep.mubr.bf16.mxu1 %v29013_v28 }
 0x5c4   : > { %9583 = vmatpush1.bf16.msra.mxu0 %v23573_v51  ;;  %v23619_v51 = vld [vmem:[%s31429_s4 + $0x630] ss:$12 sps:$4 sm:$0xff]  }
 0x5c5   : > { %9584 = vmatprep.subr.bf16.mxu0 %v23580_v23  ;;  %v23624_v23 = vld [vmem:[%s31429_s4 + $0x64c] ss:$12 sps:$4 sm:$0xff]  }
 0x5c8   : > { %9585 = vmatpush1.bf16.msra.mxu0 %v23578_v8  ;;  %v23651_v8 = vld [vmem:[%s31429_s4 + $0x638] ss:$12 sps:$4 sm:$0xff]  }
 0x5c9   : > { %9586 = vmatprep.subr.bf16.mxu0 %v23585_v33  ;;  %v31646_v33 = vld [vmem:[#allocation62_spill] sm:$0xff] }
 0x5ca   : > { %8284 = vmatmul.mubr.bf16.gmra.mrb[116].mxu0 %v29007_v2  ;;  %8581 = vmatmul.mubr.bf16.gmra.mrb[180].mxu1 %v29007_v2 }
 0x5cb   : > { %8293 = vmatprep.mubr.bf16.mxu0 %v29053_v47  ;;  %8588 = vmatprep.mubr.bf16.mxu1 %v29053_v47 }
 0x5cc   : > { %9587 = vmatpush1.bf16.msra.mxu0 %v23583_v32  ;;  %v23655_v32 = vld [vmem:[%s31429_s4 + $0x710] ss:$12 sps:$4 sm:$0xff]  }
 0x5cd   : > { %9588 = vmatprep.subr.bf16.mxu0 %v23590_v3  ;;  %v31647_v3 = vld [vmem:[#allocation65_spill] sm:$0xff] }
 0x5d0   : > { %9589 = vmatpush1.bf16.msra.mxu0 %v23588_v37  ;;  %v23622_v37 = vld [vmem:[%s31429_s4 + $0x648] ss:$12 sps:$4 sm:$0xff]  }
 0x5d1   : > { %9590 = vmatprep.subr.bf16.mxu0 %v23595_v29  ;;  %v23627_v29 = vld [vmem:[%s31429_s4 + $0x664] ss:$12 sps:$4 sm:$0xff]  }
 0x5d2   : > { %8294 = vmatmul.mubr.bf16.gmra.mrb[120].mxu0 %v29047_v14  ;;  %8589 = vmatmul.mubr.bf16.gmra.mrb[184].mxu1 %v29047_v14 }
 0x5d3   : > { %8303 = vmatprep.mubr.bf16.mxu0 %v29088_v63  ;;  %8596 = vmatprep.mubr.bf16.mxu1 %v29088_v63 }
 0x5d4   : > { %9591 = vmatpush1.bf16.msra.mxu0 %v23593_v45  ;;  %v23656_v45 = vld [vmem:[%s31429_s4 + $0x650] ss:$12 sps:$4 sm:$0xff]  }
 0x5d5   : > { %9592 = vmatprep.subr.bf16.mxu0 %v23600_v48  ;;  %v23660_v48 = vld [vmem:[%s31429_s4 + $0x728] ss:$12 sps:$4 sm:$0xff]  }
 0x5d8   : > { %9593 = vmatpush1.bf16.msra.mxu0 %v23598_v56  ;;  %v23625_v56 = vld [vmem:[%s31429_s4 + $0x660] ss:$12 sps:$4 sm:$0xff]  }
 0x5d9   : > { %9594 = vmatprep.subr.bf16.mxu0 %v23605_v19  ;;  %v23630_v19 = vld [vmem:[%s31429_s4 + $0x67c] ss:$12 sps:$4 sm:$0xff]  }
 0x5da   : > { %8304 = vmatmul.mubr.bf16.gmra.mrb[124].mxu0 %v29084_v55  ;;  %8597 = vmatmul.mubr.bf16.gmra.mrb[188].mxu1 %v29084_v55 }
 0x5db   : > { %9598 = vmatprep.mubr.bf16.mxu0 %v31643_v21  ;;  %9937 = vmatprep.mubr.bf16.mxu1 %v31643_v21  ;;  %v23665_v21 = vld [vmem:[%s31429_s4 + $0x740] ss:$12 sps:$4 sm:$0xff]  }
 0x5dc   : > { %9595 = vmatpush1.bf16.msra.mxu0 %v23603_v61  ;;  %v23661_v61 = vld [vmem:[%s31429_s4 + $0x668] ss:$12 sps:$4 sm:$0xff]  }
 0x5dd   : > { %9596 = vmatprep.subr.bf16.mxu0 %v23610_v27  ;;  %v31648_v27 = vld [vmem:[#allocation64_spill] sm:$0xff] }
 0x5e0   : > { %9597 = vmatpush1.bf16.msra.mxu0 %v23608_v22  ;;  %v31649_v22 = vld [vmem:[#allocation67_spill] sm:$0xff] }
 0x5e1   : > { %9679 = vmatprep.subr.bf16.mxu0 %v23615_v42  ;;  %v23628_v42 = vld [vmem:[%s31429_s4 + $0x678] ss:$12 sps:$4 sm:$0xff]  }
 0x5e2   : > { %9938 = vmatmul.mubr.bf16.vlgmr.msra.gmra.mrb[192].mxu1 %v31644_v36 }
 0x5e3   : > { %9599 = vmatmul.mubr.bf16.vlgmr.msra.gmra.mrb[128].mxu0 %v31644_v36  ;;  %9945 = vmatprep.mubr.bf16.mxu1 %v31645_v26 }
 0x5e4   : > { %9608 = vmatprep.mubr.bf16.mxu0 %v31645_v26  ;;  %9680 = vmatpush1.bf16.msra.mxu0 %v23613_v50 }
 0x5e5   : > { %9681 = vmatprep.subr.bf16.mxu0 %v23618_v34  ;;  %21496 = vmatpush3.bf16.msra.mxu1 %v23641_v16  ;;  %v23633_v34 = vld [vmem:[%s31429_s4 + $0x694] ss:$12 sps:$4 sm:$0xff]  }
 0x5e6   : > { %21497 = vmatprep.subr.bf16.mxu1 %v23645_v17  ;;  %v23666_v16 = vld [vmem:[%s31429_s4 + $0x680] ss:$12 sps:$4 sm:$0xff]   ;;  %v23670_v17 = vld [vmem:[%s31429_s4 + $0x758] ss:$12 sps:$4 sm:$0xff]  }
 0x5e8   : > { %9682 = vmatpush1.bf16.msra.mxu0 %v23616_v7 }
 0x5e9   : > { %9683 = vmatprep.subr.bf16.mxu0 %v23621_v54  ;;  %21498 = vmatpush3.bf16.msra.mxu1 %v23646_v60  ;;  %v23631_v60 = vld [vmem:[%s31429_s4 + $0x690] ss:$12 sps:$4 sm:$0xff]  }
 0x5ea   : > { %9946 = vmatmul.mubr.bf16.gmra.mrb[196].mxu1 %v31646_v33  ;;  %21499 = vmatprep.subr.bf16.mxu1 %v23650_v31 }
 0x5eb   : > { %9609 = vmatmul.mubr.bf16.gmra.mrb[132].mxu0 %v31646_v33  ;;  %9953 = vmatprep.mubr.bf16.mxu1 %v31647_v3  ;;  %v23675_v33 = vld [vmem:[%s31429_s4 + $0x770] ss:$12 sps:$4 sm:$0xff]  }
 0x5ec   : > { %9618 = vmatprep.mubr.bf16.mxu0 %v31647_v3  ;;  %9684 = vmatpush1.bf16.msra.mxu0 %v23619_v51  ;;  %v23636_v51 = vld [vmem:[%s31429_s4 + $0x6ac] ss:$12 sps:$4 sm:$0xff]  }
 0x5ed   : > { %9685 = vmatprep.subr.bf16.mxu0 %v23624_v23  ;;  %21500 = vmatpush3.bf16.msra.mxu1 %v23651_v8  ;;  %v23671_v23 = vld [vmem:[%s31429_s4 + $0x698] ss:$12 sps:$4 sm:$0xff]   ;;  %v31650_v8 = vld [vmem:[#allocation66_spill] sm:$0xff] }
 0x5ee   : > { %21501 = vmatprep.subr.bf16.mxu1 %v23655_v32  ;;  %v23634_v32 = vld [vmem:[%s31429_s4 + $0x6a8] ss:$12 sps:$4 sm:$0xff]  }
 0x5f0   : > { %9686 = vmatpush1.bf16.msra.mxu0 %v23622_v37  ;;  %v23639_v37 = vld [vmem:[%s31429_s4 + $0x6c4] ss:$12 sps:$4 sm:$0xff]  }
 0x5f1   : > { %9687 = vmatprep.subr.bf16.mxu0 %v23627_v29  ;;  %21502 = vmatpush3.bf16.msra.mxu1 %v23656_v45  ;;  %v23676_v29 = vld [vmem:[%s31429_s4 + $0x6b0] ss:$12 sps:$4 sm:$0xff]  }
 0x5f2   : > { %9954 = vmatmul.mubr.bf16.gmra.mrb[200].mxu1 %v31648_v27  ;;  %21503 = vmatprep.subr.bf16.mxu1 %v23660_v48 }
 0x5f3   : > { %9619 = vmatmul.mubr.bf16.gmra.mrb[136].mxu0 %v31648_v27  ;;  %9961 = vmatprep.mubr.bf16.mxu1 %v31649_v22 }
 0x5f4   : > { %9628 = vmatprep.mubr.bf16.mxu0 %v31649_v22  ;;  %9688 = vmatpush1.bf16.msra.mxu0 %v23625_v56  ;;  %v21255_v50 = vpop.f32.mrb[96].mxu1  ;;  %v23642_v22 = vld [vmem:[%s31429_s4 + $0x6d8] ss:$12 sps:$4 sm:$0xff]  }
 0x5f5   : > { %9689 = vmatprep.subr.bf16.mxu0 %v23630_v19  ;;  %21504 = vmatpush3.bf16.msra.mxu1 %v23661_v61  ;;  %v21256_v36 = vpop.f32.mrb[97].mxu1  ;;  %v23637_v61 = vld [vmem:[%s31429_s4 + $0x6c0] ss:$12 sps:$4 sm:$0xff]  }
 0x5f6   : > { %21505 = vmatprep.subr.bf16.mxu1 %v23665_v21  ;;  %v29370_v26 = vadd.f32 %v21256_v36, %v21255_v50  ;;  %v21258_v7 = vpop.f32.mrb[98].mxu1  ;;  %v23644_v21 = vld [vmem:[%s31429_s4 + $0x6dc] ss:$12 sps:$4 sm:$0xff]   ;;  %v23649_v50 = vld [vmem:[%s31429_s4 + $0x6f4] ss:$12 sps:$4 sm:$0xff]  }
 0x5f7   : > { %v21259_v54 = vpop.f32.mrb[99].mxu1 }
 0x5f8   : > { %9690 = vmatpush1.bf16.msra.mxu0 %v23628_v42  ;;  %v29375_v31 = vadd.f32 %v21259_v54, %v21258_v7  ;;  %v23654_v7 = vld [vmem:[%s31429_s4 + $0x70c] ss:$12 sps:$4 sm:$0xff]  }
 0x5f9   : > { %9691 = vmatprep.subr.bf16.mxu0 %v23633_v34  ;;  %21506 = vmatpush3.bf16.msra.mxu1 %v23666_v16  ;;  %v31651_v54 = vld [vmem:[#allocation68_spill] sm:$0xff] }
 0x5fa   : > { %9962 = vmatmul.mubr.bf16.gmra.mrb[204].mxu1 %v31650_v8  ;;  %21507 = vmatprep.subr.bf16.mxu1 %v23670_v17 }
 0x5fb   : > { %9629 = vmatmul.mubr.bf16.gmra.mrb[140].mxu0 %v31650_v8  ;;  %9969 = vmatprep.mubr.bf16.mxu1 %v28610_v38 }
 0x5fc   : > { %9638 = vmatprep.mubr.bf16.mxu0 %v28610_v38  ;;  %9692 = vmatpush1.bf16.msra.mxu0 %v23631_v60  ;;  %v21261_v3 = vpop.f32.mrb[100].mxu1  ;;  %v23704_v38 = vld [vmem:[%s31429_s4 + $0x848] ss:$12 sps:$4 sm:$0xff]  }
 0x5fd   : > { %9693 = vmatprep.subr.bf16.mxu0 %v23636_v51  ;;  %21508 = vmatpush3.bf16.msra.mxu1 %v23671_v23  ;;  %v21262_v45 = vpop.f32.mrb[101].mxu1  ;;  %v23652_v60 = vld [vmem:[%s31429_s4 + $0x708] ss:$12 sps:$4 sm:$0xff]   ;;  %v23659_v23 = vld [vmem:[%s31429_s4 + $0x724] ss:$12 sps:$4 sm:$0xff]  }
 0x5fe   : > { %21509 = vmatprep.subr.bf16.mxu1 %v23675_v33  ;;  %v29402_v48 = vadd.f32 %v21262_v45, %v21261_v3  ;;  %v21264_v56 = vpop.f32.mrb[102].mxu1  ;;  %v23662_v45 = vld [vmem:[%s31429_s4 + $0x738] ss:$12 sps:$4 sm:$0xff]  }
 0x5ff   : > { %v21265_v19 = vpop.f32.mrb[103].mxu1 }
 0x600   : > { %9694 = vmatpush1.bf16.msra.mxu0 %v23634_v32  ;;  %v29407_v27 = vadd.f32 %v21265_v19, %v21264_v56  ;;  %v23669_v56 = vld [vmem:[%s31429_s4 + $0x754] ss:$12 sps:$4 sm:$0xff]  }
 0x601   : > { %9695 = vmatprep.subr.bf16.mxu0 %v23639_v37  ;;  %21510 = vmatpush3.bf16.msra.mxu1 %v23676_v29  ;;  %v23664_v29 = vld [vmem:[%s31429_s4 + $0x73c] ss:$12 sps:$4 sm:$0xff]  }
 0x602   : > { %9970 = vmatmul.mubr.bf16.gmra.mrb[208].mxu1 %v28606_v0  ;;  %21559 = vmatprep.subr.bf16.mxu1 %v23704_v38 }
 0x603   : > { %9639 = vmatmul.mubr.bf16.gmra.mrb[144].mxu0 %v28606_v0  ;;  %9977 = vmatprep.mubr.bf16.mxu1 %v28646_v49 }
 0x604   : > { %9648 = vmatprep.mubr.bf16.mxu0 %v28646_v49  ;;  %9696 = vmatpush1.bf16.msra.mxu0 %v23637_v61  ;;  %v21267_v42 = vpop.f32.mrb[104].mxu1  ;;  %v23647_v49 = vld [vmem:[%s31429_s4 + $0x6f0] ss:$12 sps:$4 sm:$0xff]  }
 0x605   : > { %9697 = vmatprep.subr.bf16.mxu0 %v23644_v21  ;;  %v21268_v34 = vpop.f32.mrb[105].mxu1 }
 0x606   : > { %v29422_v16 = vadd.f32 %v21268_v34, %v21267_v42  ;;  %v21270_v36 = vpop.f32.mrb[106].mxu1  ;;  %v23674_v42 = vld [vmem:[%s31429_s4 + $0x76c] ss:$12 sps:$4 sm:$0xff]   ;;  %v23672_v34 = vld [vmem:[%s31429_s4 + $0x768] ss:$12 sps:$4 sm:$0xff]  }
 0x607   : > { %v21271_v0 = vpop.f32.mrb[107].mxu1 }
 0x608   : > { %9698 = vmatpush1.bf16.msra.mxu0 %v23642_v22  ;;  %v29427_v17 = vadd.f32 %v21271_v0, %v21270_v36  ;;  %v23679_v0 = vld [vmem:[%s31429_s4 + $0x784] ss:$12 sps:$4 sm:$0xff]  }
 0x609   : > { %9699 = vmatprep.subr.bf16.mxu0 %v23649_v50  ;;  %v31652_v50 = vld [vmem:[#allocation72_spill] sm:$0xff] }
 0x60a   : > { %9978 = vmatmul.mubr.bf16.gmra.mrb[212].mxu1 %v31651_v54 }
 0x60b   : > { %9649 = vmatmul.mubr.bf16.gmra.mrb[148].mxu0 %v31651_v54  ;;  %9985 = vmatprep.mubr.bf16.mxu1 %v28685_v40 }
 0x60c   : > { %9658 = vmatprep.mubr.bf16.mxu0 %v28685_v40  ;;  %9700 = vmatpush1.bf16.msra.mxu0 %v23647_v49  ;;  %v21273_v51 = vpop.f32.mrb[108].mxu1  ;;  %v23657_v40 = vld [vmem:[%s31429_s4 + $0x720] ss:$12 sps:$4 sm:$0xff]  }
 0x60d   : > { %9701 = vmatprep.subr.bf16.mxu0 %v23654_v7  ;;  %v21274_v8 = vpop.f32.mrb[109].mxu1 }
 0x60e   : > { %v29442_v33 = vadd.f32 %v21274_v8, %v21273_v51  ;;  %v21276_v32 = vpop.f32.mrb[110].mxu1  ;;  %v23705_v8 = vld [vmem:[%s31429_s4 + $0x788] ss:$12 sps:$4 sm:$0xff]  }
 0x60f   : > { %v21277_v3 = vpop.f32.mrb[111].mxu1 }
 0x610   : > { %9702 = vmatpush1.bf16.msra.mxu0 %v23652_v60  ;;  %v29447_v37 = vadd.f32 %v21277_v3, %v21276_v32  ;;  %v23677_v60 = vld [vmem:[%s31429_s4 + $0x780] ss:$12 sps:$4 sm:$0xff]   ;;  %v31653_v32 = vld [vmem:[#allocation71_spill] sm:$0xff] }
 0x611   : > { %9703 = vmatprep.subr.bf16.mxu0 %v23659_v23  ;;  %v23682_v23 = vld [vmem:[%s31429_s4 + $0x79c] ss:$12 sps:$4 sm:$0xff]   ;;  %v23709_v3 = vld [vmem:[%s31429_s4 + $0x860] ss:$12 sps:$4 sm:$0xff]  }
 0x612   : > { %9986 = vmatmul.mubr.bf16.gmra.mrb[216].mxu1 %v28678_v24 }
 0x613   : > { %9659 = vmatmul.mubr.bf16.gmra.mrb[152].mxu0 %v28678_v24  ;;  %9993 = vmatprep.mubr.bf16.mxu1 %v28731_v59 }
 0x614   : > { %9668 = vmatprep.mubr.bf16.mxu0 %v28731_v59  ;;  %9704 = vmatpush1.bf16.msra.mxu0 %v23657_v40  ;;  %v21279_v38 = vpop.f32.mrb[112].mxu1  ;;  %v23667_v59 = vld [vmem:[%s31429_s4 + $0x750] ss:$12 sps:$4 sm:$0xff]   ;;  %v23680_v40 = vld [vmem:[%s31429_s4 + $0x798] ss:$12 sps:$4 sm:$0xff]  }
 0x615   : > { %9705 = vmatprep.subr.bf16.mxu0 %v23664_v29  ;;  %v21280_v19 = vpop.f32.mrb[113].mxu1 }
 0x616   : > { %v29462_v61 = vadd.f32 %v21280_v19, %v21279_v38  ;;  %v21282_v21 = vpop.f32.mrb[114].mxu1  ;;  %v23710_v38 = vld [vmem:[%s31429_s4 + $0x7a0] ss:$12 sps:$4 sm:$0xff]  }
 0x617   : > { %v21283_v24 = vpop.f32.mrb[115].mxu1 }
 0x618   : > { %9706 = vmatpush1.bf16.msra.mxu0 %v23662_v45  ;;  %v29467_v22 = vadd.f32 %v21283_v24, %v21282_v21  ;;  %v23685_v45 = vld [vmem:[%s31429_s4 + $0x7b4] ss:$12 sps:$4 sm:$0xff]  }
 0x619   : > { %9707 = vmatprep.subr.bf16.mxu0 %v23669_v56 }
 0x61a   : > { %9994 = vmatmul.mubr.bf16.gmra.mrb[220].mxu1 %v28727_v11 }
 0x61b   : > { %9669 = vmatmul.mubr.bf16.gmra.mrb[156].mxu0 %v28727_v11  ;;  %10034 = vmatprep.mubr.bf16.mxu1 %v31652_v50 }
 0x61c   : > { %9708 = vmatpush1.bf16.msra.mxu0 %v23667_v59  ;;  %9711 = vmatprep.mubr.bf16.mxu0 %v31652_v50  ;;  %v21285_v36 = vpop.f32.mrb[116].mxu1  ;;  %v23683_v59 = vld [vmem:[%s31429_s4 + $0x7b0] ss:$12 sps:$4 sm:$0xff]   ;;  %v23688_v50 = vld [vmem:[%s31429_s4 + $0x7cc] ss:$12 sps:$4 sm:$0xff]  }
 0x61d   : > { %9709 = vmatprep.subr.bf16.mxu0 %v23674_v42  ;;  %v21286_v49 = vpop.f32.mrb[117].mxu1 }
 0x61e   : > { %v29482_v7 = vadd.f32 %v21286_v49, %v21285_v36  ;;  %v21288_v54 = vpop.f32.mrb[118].mxu1  ;;  %v23719_v36 = vld [vmem:[%s31429_s4 + $0x890] ss:$12 sps:$4 sm:$0xff]  }
 0x61f   : > { %v21289_v11 = vpop.f32.mrb[119].mxu1 }
 0x620   : > { %9710 = vmatpush1.bf16.msra.mxu0 %v23672_v34  ;;  %v29487_v51 = vadd.f32 %v21289_v11, %v21288_v54  ;;  %v23715_v34 = vld [vmem:[%s31429_s4 + $0x7b8] ss:$12 sps:$4 sm:$0xff]  }
 0x621   : > { %9792 = vmatprep.subr.bf16.mxu0 %v23679_v0  ;;  %v23686_v0 = vld [vmem:[%s31429_s4 + $0x7c8] ss:$12 sps:$4 sm:$0xff]   ;;  %v23691_v54 = vld [vmem:[%s31429_s4 + $0x7e4] ss:$12 sps:$4 sm:$0xff]  }
 0x622   : > { %10035 = vmatmul.mubr.bf16.vlgmr.msra.gmra.mrb[224].mxu1 %v31653_v32 }
 0x623   : > { %9712 = vmatmul.mubr.bf16.vlgmr.msra.gmra.mrb[128].mxu0 %v31653_v32  ;;  %10042 = vmatprep.mubr.bf16.mxu1 %v28822_v53  ;;  %v23689_v32 = vld [vmem:[%s31429_s4 + $0x7e0] ss:$12 sps:$4 sm:$0xff]  }
 0x624   : > { %9721 = vmatprep.mubr.bf16.mxu0 %v28822_v53  ;;  %9793 = vmatpush1.bf16.msra.mxu0 %v23677_v60  ;;  %v21291_v29 = vpop.f32.mrb[120].mxu1  ;;  %v23714_v53 = vld [vmem:[%s31429_s4 + $0x878] ss:$12 sps:$4 sm:$0xff]  }
 0x625   : > { %9794 = vmatprep.subr.bf16.mxu0 %v23682_v23  ;;  %21560 = vmatpush3.bf16.msra.mxu1 %v23705_v8  ;;  %v21292_v56 = vpop.f32.mrb[121].mxu1 }
 0x626   : > { %21561 = vmatprep.subr.bf16.mxu1 %v23709_v3  ;;  %v29514_v19 = vadd.f32 %v21292_v56, %v21291_v29  ;;  %v21294_v21 = vpop.f32.mrb[122].mxu1  ;;  %v23725_v29 = vld [vmem:[%s31429_s4 + $0x7e8] ss:$12 sps:$4 sm:$0xff]  }
 0x627   : > { %v21295_v24 = vpop.f32.mrb[123].mxu1 }
 0x628   : > { %9795 = vmatpush1.bf16.msra.mxu0 %v23680_v40  ;;  %v29519_v42 = vadd.f32 %v21295_v24, %v21294_v21  ;;  %v23694_v40 = vld [vmem:[%s31429_s4 + $0x7fc] ss:$12 sps:$4 sm:$0xff]  }
 0x629   : > { %9796 = vmatprep.subr.bf16.mxu0 %v23685_v45  ;;  %21562 = vmatpush3.bf16.msra.mxu1 %v23710_v38  ;;  %v23729_v45 = vld [vmem:[%s31429_s4 + $0x8c0] ss:$12 sps:$4 sm:$0xff]   ;;  %v23692_v38 = vld [vmem:[%s31429_s4 + $0x7f8] ss:$12 sps:$4 sm:$0xff]  }
 0x62a   : > { %10043 = vmatmul.mubr.bf16.gmra.mrb[228].mxu1 %v28818_v41  ;;  %21563 = vmatprep.subr.bf16.mxu1 %v23714_v53  ;;  %v23697_v53 = vld [vmem:[%s31429_s4 + $0x814] ss:$12 sps:$4 sm:$0xff]  }
 0x62b   : > { %9722 = vmatmul.mubr.bf16.gmra.mrb[132].mxu0 %v28818_v41  ;;  %10050 = vmatprep.mubr.bf16.mxu1 %v28875_v9  ;;  %v23720_v41 = vld [vmem:[%s31429_s4 + $0x7d0] ss:$12 sps:$4 sm:$0xff]  }
 0x62c   : > { %9731 = vmatprep.mubr.bf16.mxu0 %v28875_v9  ;;  %9797 = vmatpush1.bf16.msra.mxu0 %v23683_v59  ;;  %v21297_v49 = vpop.f32.mrb[124].mxu1  ;;  %v23724_v9 = vld [vmem:[%s31429_s4 + $0x8a8] ss:$12 sps:$4 sm:$0xff]  }
 0x62d   : > { %9798 = vmatprep.subr.bf16.mxu0 %v23688_v50  ;;  %21564 = vmatpush3.bf16.msra.mxu1 %v23715_v34  ;;  %v21298_v11 = vpop.f32.mrb[125].mxu1  ;;  %v23695_v34 = vld [vmem:[%s31429_s4 + $0x810] ss:$12 sps:$4 sm:$0xff]  }
 0x62e   : > { %21565 = vmatprep.subr.bf16.mxu1 %v23719_v36  ;;  %v29546_v60 = vadd.f32 %v21298_v11, %v21297_v49  ;;  %v21300_v23 = vpop.f32.mrb[126].mxu1  ;;  %v23700_v49 = vld [vmem:[%s31429_s4 + $0x82c] ss:$12 sps:$4 sm:$0xff]   ;;  %v23698_v11 = vld [vmem:[%s31429_s4 + $0x828] ss:$12 sps:$4 sm:$0xff]  }
 0x62f   : > { %v21301_v8 = vpop.f32.mrb[127].mxu1 }
 0x630   : > { %9799 = vmatpush1.bf16.msra.mxu0 %v23686_v0  ;;  %v29551_v3 = vadd.f32 %v21301_v8, %v21300_v23  ;;  %v23703_v23 = vld [vmem:[%s31429_s4 + $0x844] ss:$12 sps:$4 sm:$0xff]  }
 0x631   : > { %9800 = vmatprep.subr.bf16.mxu0 %v23691_v54  ;;  %21566 = vmatpush3.bf16.msra.mxu1 %v23720_v41  ;;  %v23735_v54 = vld [vmem:[%s31429_s4 + $0x818] ss:$12 sps:$4 sm:$0xff]   ;;  %v23739_v41 = vld [vmem:[%s31429_s4 + $0x8f0] ss:$12 sps:$4 sm:$0xff]  }
 0x632   : > { %10051 = vmatmul.mubr.bf16.gmra.mrb[232].mxu1 %v28871_v15  ;;  %21567 = vmatprep.subr.bf16.mxu1 %v23724_v9 }
 0x633   : > { %9732 = vmatmul.mubr.bf16.gmra.mrb[136].mxu0 %v28871_v15  ;;  %10058 = vmatprep.mubr.bf16.mxu1 %v28927_v20  ;;  %v23730_v15 = vld [vmem:[%s31429_s4 + $0x800] ss:$12 sps:$4 sm:$0xff]  }
 0x634   : > { %9741 = vmatprep.mubr.bf16.mxu0 %v28927_v20  ;;  %9801 = vmatpush1.bf16.msra.mxu0 %v23689_v32  ;;  %v21319_v56 = vpop.f32.mrb[128].mxu1  ;;  %v23734_v20 = vld [vmem:[%s31429_s4 + $0x8d8] ss:$12 sps:$4 sm:$0xff]  }
 0x635   : > { %9802 = vmatprep.subr.bf16.mxu0 %v23694_v40  ;;  %21568 = vmatpush3.bf16.msra.mxu1 %v23725_v29  ;;  %v21320_v21 = vpop.f32.mrb[129].mxu1  ;;  %v23701_v40 = vld [vmem:[%s31429_s4 + $0x840] ss:$12 sps:$4 sm:$0xff]  }
 0x636   : > { %21569 = vmatprep.subr.bf16.mxu1 %v23729_v45  ;;  %v21321_v24 = vadd.f32 %v21320_v21, %v21319_v56  ;;  %v21322_v59 = vpop.f32.mrb[130].mxu1 }
 0x637   : > { %v21323_v50 = vpop.f32.mrb[131].mxu1 }
 0x638   : > { %9803 = vmatpush1.bf16.msra.mxu0 %v23692_v38  ;;  %v29582_v36 = vadd.f32 %v21321_v24, %v29370_v26  ;;  %v21324_v0 = vadd.f32 %v21323_v50, %v21322_v59  ;;  %v23708_v38 = vld [vmem:[%s31429_s4 + $0x85c] ss:$12 sps:$4 sm:$0xff]   ;;  %v23718_v50 = vld [vmem:[%s31429_s4 + $0x88c] ss:$12 sps:$4 sm:$0xff]  }
 0x639   : > { %9804 = vmatprep.subr.bf16.mxu0 %v23697_v53  ;;  %21570 = vmatpush3.bf16.msra.mxu1 %v23730_v15  ;;  %v23713_v15 = vld [vmem:[%s31429_s4 + $0x874] ss:$12 sps:$4 sm:$0xff]  }
 0x63a   : > { %10059 = vmatmul.mubr.bf16.gmra.mrb[236].mxu1 %v28923_v58  ;;  %21571 = vmatprep.subr.bf16.mxu1 %v23734_v20  ;;  %v29595_v26 = vadd.f32 %v21324_v0, %v29375_v31 }
 0x63b   : > { %9742 = vmatmul.mubr.bf16.gmra.mrb[140].mxu0 %v28923_v58  ;;  %10066 = vmatprep.mubr.bf16.mxu1 %v28977_v35  ;;  %v23740_v58 = vld [vmem:[%s31429_s4 + $0x830] ss:$12 sps:$4 sm:$0xff]  }
 0x63c   : > { %9751 = vmatprep.mubr.bf16.mxu0 %v28977_v35  ;;  %9805 = vmatpush1.bf16.msra.mxu0 %v23695_v34 }
 0x63d   : > { %v21325_v9 = vpop.f32.mrb[132].mxu1  ;;  %9806 = vmatprep.subr.bf16.mxu0 %v23700_v49  ;;  %21572 = vmatpush3.bf16.msra.mxu1 %v23735_v54  ;;  %v23723_v49 = vld [vmem:[%s31429_s4 + $0x8a4] ss:$12 sps:$4 sm:$0xff]  }
 0x63e   : > { %v21326_v31 = vpop.f32.mrb[133].mxu1  ;;  %21573 = vmatprep.subr.bf16.mxu1 %v23739_v41 }
 0x63f   : > { %v21327_v8 = vadd.f32 %v21326_v31, %v21325_v9  ;;  %v21328_v35 = vpop.f32.mrb[134].mxu1 }
 0x640   : > { %9807 = vmatpush1.bf16.msra.mxu0 %v23698_v11  ;;  %v21329_v32 = vpop.f32.mrb[135].mxu1 }
 0x641   : > { %v29613_v29 = vadd.f32 %v21327_v8, %v29402_v48  ;;  %v21330_v45 = vadd.f32 %v21329_v32, %v21328_v35  ;;  %9808 = vmatprep.subr.bf16.mxu0 %v23703_v23  ;;  %21574 = vmatpush3.bf16.msra.mxu1 %v23740_v58  ;;  %v23706_v48 = vld [vmem:[%s31429_s4 + $0x858] ss:$12 sps:$4 sm:$0xff]   ;;  %v23728_v23 = vld [vmem:[%s31429_s4 + $0x8bc] ss:$12 sps:$4 sm:$0xff]   ;;  %v23733_v8 = vld [vmem:[%s31429_s4 + $0x8d4] ss:$12 sps:$4 sm:$0xff]  }
 0x642   : > { %10067 = vmatmul.mubr.bf16.gmra.mrb[240].mxu1 %v28971_v10 }
 0x643   : > { %v29620_v56 = vadd.f32 %v21330_v45, %v29407_v27  ;;  %9752 = vmatmul.mubr.bf16.gmra.mrb[144].mxu0 %v28971_v10  ;;  %10074 = vmatprep.mubr.bf16.mxu1 %v29017_v18 }
 0x644   : > { %9761 = vmatprep.mubr.bf16.mxu0 %v29017_v18  ;;  %9809 = vmatpush1.bf16.msra.mxu0 %v23701_v40  ;;  %v23711_v18 = vld [vmem:[%s31429_s4 + $0x870] ss:$12 sps:$4 sm:$0xff]  }
 0x645   : > { %v21331_v53 = vpop.f32.mrb[136].mxu1  ;;  %9810 = vmatprep.subr.bf16.mxu0 %v23708_v38  ;;  %v23738_v38 = vld [vmem:[%s31429_s4 + $0x8ec] ss:$12 sps:$4 sm:$0xff]  }
 0x646   : > { %v21332_v21 = vpop.f32.mrb[137].mxu1 }
 0x647   : > { %v21333_v27 = vadd.f32 %v21332_v21, %v21331_v53  ;;  %v21334_v20 = vpop.f32.mrb[138].mxu1 }
 0x648   : > { %9811 = vmatpush1.bf16.msra.mxu0 %v23706_v48  ;;  %v21335_v10 = vpop.f32.mrb[139].mxu1 }
 0x649   : > { %v29635_v24 = vadd.f32 %v21333_v27, %v29422_v16  ;;  %v21336_v59 = vadd.f32 %v21335_v10, %v21334_v20  ;;  %9812 = vmatprep.subr.bf16.mxu0 %v23713_v15  ;;  %v23716_v16 = vld [vmem:[%s31429_s4 + $0x888] ss:$12 sps:$4 sm:$0xff]  }
 0x64a   : > { %10075 = vmatmul.mubr.bf16.gmra.mrb[244].mxu1 %v29011_v44 }
 0x64b   : > { %v29642_v34 = vadd.f32 %v21336_v59, %v29427_v17  ;;  %9762 = vmatmul.mubr.bf16.gmra.mrb[148].mxu0 %v29011_v44  ;;  %10082 = vmatprep.mubr.bf16.mxu1 %v29057_v1 }
 0x64c   : > { %9771 = vmatprep.mubr.bf16.mxu0 %v29057_v1  ;;  %9813 = vmatpush1.bf16.msra.mxu0 %v23711_v18  ;;  %v23721_v1 = vld [vmem:[%s31429_s4 + $0x8a0] ss:$12 sps:$4 sm:$0xff]  }
 0x64d   : > { %v21337_v0 = vpop.f32.mrb[140].mxu1  ;;  %9814 = vmatprep.subr.bf16.mxu0 %v23718_v50 }
 0x64e   : > { %v21338_v54 = vpop.f32.mrb[141].mxu1 }
 0x64f   : > { %v21339_v17 = vadd.f32 %v21338_v54, %v21337_v0  ;;  %v21340_v41 = vpop.f32.mrb[142].mxu1 }
 0x650   : > { %9815 = vmatpush1.bf16.msra.mxu0 %v23716_v16  ;;  %v21341_v44 = vpop.f32.mrb[143].mxu1 }
 0x651   : > { %v29657_v11 = vadd.f32 %v21339_v17, %v29442_v33  ;;  %v21342_v9 = vadd.f32 %v21341_v44, %v21340_v41  ;;  %9816 = vmatprep.subr.bf16.mxu0 %v23723_v49  ;;  %v23726_v33 = vld [vmem:[%s31429_s4 + $0x8b8] ss:$12 sps:$4 sm:$0xff]  }
 0x652   : > { %10083 = vmatmul.mubr.bf16.gmra.mrb[248].mxu1 %v29051_v39 }
 0x653   : > { %v29664_v58 = vadd.f32 %v21342_v9, %v29447_v37  ;;  %9772 = vmatmul.mubr.bf16.gmra.mrb[152].mxu0 %v29051_v39  ;;  %10090 = vmatprep.mubr.bf16.mxu1 %v29090_v46 }
 0x654   : > { %9781 = vmatprep.mubr.bf16.mxu0 %v29090_v46  ;;  %9817 = vmatpush1.bf16.msra.mxu0 %v23721_v1  ;;  %v23731_v46 = vld [vmem:[%s31429_s4 + $0x8d0] ss:$12 sps:$4 sm:$0xff]  }
 0x655   : > { %v21343_v31 = vpop.f32.mrb[144].mxu1  ;;  %9818 = vmatprep.subr.bf16.mxu0 %v23728_v23 }
 0x656   : > { %v21344_v35 = vpop.f32.mrb[145].mxu1 }
 0x657   : > { %v21345_v37 = vadd.f32 %v21344_v35, %v21343_v31  ;;  %v21346_v32 = vpop.f32.mrb[146].mxu1 }
 0x658   : > { %9819 = vmatpush1.bf16.msra.mxu0 %v23726_v33  ;;  %v21347_v39 = vpop.f32.mrb[147].mxu1 }
 0x659   : > { %v29679_v40 = vadd.f32 %v21345_v37, %v29462_v61  ;;  %v21348_v45 = vadd.f32 %v21347_v39, %v21346_v32  ;;  %9820 = vmatprep.subr.bf16.mxu0 %v23733_v8  ;;  %v23736_v61 = vld [vmem:[%s31429_s4 + $0x8e8] ss:$12 sps:$4 sm:$0xff]  }
 0x65a   : > { %10091 = vmatmul.mubr.bf16.gmra.mrb[252].mxu1 %v29086_v5 }
 0x65b   : > { %v29686_v48 = vadd.f32 %v21348_v45, %v29467_v22  ;;  %9782 = vmatmul.mubr.bf16.gmra.mrb[156].mxu0 %v29086_v5  ;;  %10131 = vmatprep.mubr.bf16.mxu1 %v28765_v12 }
 0x65c   : > { %9821 = vmatpush1.bf16.msra.mxu0 %v23731_v46  ;;  %9824 = vmatprep.mubr.bf16.mxu0 %v28765_v12 }
 0x65d   : > { %v21349_v53 = vpop.f32.mrb[148].mxu1  ;;  %9822 = vmatprep.subr.bf16.mxu0 %v23738_v38 }
 0x65e   : > { %v21350_v15 = vpop.f32.mrb[149].mxu1 }
 0x65f   : > { %v21351_v21 = vadd.f32 %v21350_v15, %v21349_v53  ;;  %v21352_v27 = vpop.f32.mrb[150].mxu1  ;;  %v23741_v15 = vld [vmem:[#allocation7] ss:$16 sps:$4 sm:$0xff]  }
 0x660   : > { %9823 = vmatpush1.bf16.msra.mxu0 %v23736_v61  ;;  %v21353_v20 = vpop.f32.mrb[151].mxu1  ;;  %v23746_v61 = vld [vmem:[#allocation7 + $0xc] ss:$16 sps:$4 sm:$0xff]  }
 0x661   : > { %v29695_v22 = vadd.f32 %v21351_v21, %v29482_v7  ;;  %v21354_v5 = vadd.f32 %v21353_v20, %v21352_v27  ;;  %v23744_v21 = vld [vmem:[#allocation7 + $0x8] ss:$16 sps:$4 sm:$0xff]   ;;  %14598 = vmatprep.subr.bf16.mxu1 %v23746_v61  ;;  %v23770_v61 = vld [vmem:[#allocation7 + $0x8c] ss:$16 sps:$4 sm:$0xff]  }
 0x662   : > { %10132 = vmatmul.mubr.bf16.vlgmr.msra.gmra.mrb[0].mxu1 %v28759_v57 }
 0x663   : > { %v29699_v10 = vadd.f32 %v21354_v5, %v29487_v51  ;;  %9825 = vmatmul.mubr.bf16.vlgmr.msra.gmra.mrb[128].mxu0 %v28759_v57  ;;  %10139 = vmatprep.mubr.bf16.mxu1 %v28815_v13 }
 0x664   : > { %9834 = vmatprep.mubr.bf16.mxu0 %v28815_v13  ;;  %14599 = vmatpush1.bf16.msra.mxu1 %v23744_v21  ;;  %v23765_v21 = vld [vmem:[#allocation7 + $0x80] ss:$16 sps:$4 sm:$0xff]  }
 0x665   : > { %v21355_v12 = vpop.f32.mrb[152].mxu1 }
 0x666   : > { %v21356_v18 = vpop.f32.mrb[153].mxu1 }
 0x667   : > { %v21357_v59 = vadd.f32 %v21356_v18, %v21355_v12  ;;  %v21358_v50 = vpop.f32.mrb[154].mxu1  ;;  %v23752_v12 = vld [vmem:[#allocation7 + $0x2c] ss:$16 sps:$4 sm:$0xff]  }
 0x668   : > { %v21359_v16 = vpop.f32.mrb[155].mxu1  ;;  %14600 = vmatprep.subr.bf16.mxu1 %v23752_v12 }
 0x669   : > { %v29705_v7 = vadd.f32 %v21357_v59, %v29514_v19  ;;  %v21360_v0 = vadd.f32 %v21359_v16, %v21358_v50  ;;  %v23747_v50 = vld [vmem:[#allocation7 + $0x20] ss:$16 sps:$4 sm:$0xff]  }
 0x66a   : > { %10140 = vmatmul.mubr.bf16.gmra.mrb[4].mxu1 %v28811_v4 }
 0x66b   : > { %v29709_v51 = vadd.f32 %v21360_v0, %v29519_v42  ;;  %9835 = vmatmul.mubr.bf16.gmra.mrb[132].mxu0 %v28811_v4  ;;  %10147 = vmatprep.mubr.bf16.mxu1 %v28867_v62  ;;  %v23750_v0 = vld [vmem:[#allocation7 + $0x28] ss:$16 sps:$4 sm:$0xff]  }
 0x66c   : > { %9844 = vmatprep.mubr.bf16.mxu0 %v28867_v62  ;;  %14601 = vmatpush1.bf16.msra.mxu1 %v23750_v0 }
 0x66d   : > { %v21361_v57 = vpop.f32.mrb[156].mxu1 }
 0x66e   : > { %v21362_v13 = vpop.f32.mrb[157].mxu1 }
 0x66f   : > { %v21363_v49 = vadd.f32 %v21362_v13, %v21361_v57  ;;  %v21364_v54 = vpop.f32.mrb[158].mxu1 }
 0x670   : > { %v21365_v17 = vpop.f32.mrb[159].mxu1 }
 0x671   : > { %v29715_v19 = vadd.f32 %v21363_v49, %v29546_v60  ;;  %v21366_v41 = vadd.f32 %v21365_v17, %v21364_v54  ;;  %v23755_v49 = vld [vmem:[#allocation7 + $0x44] ss:$16 sps:$4 sm:$0xff]   ;;  %v23758_v54 = vld [vmem:[#allocation7 + $0x4c] ss:$16 sps:$4 sm:$0xff]  }
 0x672   : > { %10148 = vmatmul.mubr.bf16.gmra.mrb[8].mxu1 %v28863_v43  ;;  %14602 = vmatprep.subr.bf16.mxu1 %v23758_v54 }
 0x673   : > { %v29719_v42 = vadd.f32 %v21366_v41, %v29551_v3  ;;  %9845 = vmatmul.mubr.bf16.gmra.mrb[136].mxu0 %v28863_v43  ;;  %10155 = vmatprep.mubr.bf16.mxu1 %v28919_v6  ;;  %v23753_v41 = vld [vmem:[#allocation7 + $0x40] ss:$16 sps:$4 sm:$0xff]  }
 0x674   : > { %9854 = vmatprep.mubr.bf16.mxu0 %v28919_v6 }
 0x675   : > { %v29724_v4 = vpop.f32.mrb[96].mxu0  ;;  %v21383_v62 = vpop.f32.mrb[160].mxu1 }
 0x676   : > { %v29726_v44 = vpop.f32.mrb[97].mxu0  ;;  %v21384_v1 = vpop.f32.mrb[161].mxu1 }
 0x677   : > { %v21385_v60 = vadd.f32 %v21384_v1, %v21383_v62  ;;  %v29728_v9 = vpop.f32.mrb[98].mxu0  ;;  %v21386_v23 = vpop.f32.mrb[162].mxu1  ;;  %v23756_v62 = vld [vmem:[#allocation7 + $0x48] ss:$16 sps:$4 sm:$0xff]  }
 0x678   : > { %v29730_v33 = vpop.f32.mrb[99].mxu0  ;;  %v21387_v3 = vpop.f32.mrb[163].mxu1  ;;  %14603 = vmatpush1.bf16.msra.mxu1 %v23756_v62  ;;  %v23782_v62 = vld [vmem:[#allocation7 + $0xcc] ss:$16 sps:$4 sm:$0xff]  }
 0x679   : > { %v29733_v31 = vadd.f32 %v21385_v60, %v29582_v36  ;;  %v21388_v43 = vadd.f32 %v21387_v3, %v21386_v23  ;;  %v23764_v3 = vld [vmem:[#allocation7 + $0x6c] ss:$16 sps:$4 sm:$0xff]  }
 0x67a   : > { %10156 = vmatmul.mubr.bf16.gmra.mrb[12].mxu1 %v28915_v52  ;;  %14604 = vmatprep.subr.bf16.mxu1 %v23764_v3 }
 0x67b   : > { %v29737_v6 = vadd.f32 %v21388_v43, %v29595_v26  ;;  %9855 = vmatmul.mubr.bf16.gmra.mrb[140].mxu0 %v28915_v52  ;;  %10163 = vmatprep.mubr.bf16.mxu1 %v28973_v25 }
 0x67c   : > { %9864 = vmatprep.mubr.bf16.mxu0 %v28973_v25  ;;  %v23743_v25 = vld [vmem:[#allocation7 + $0x4] ss:$16 sps:$4 sm:$0xff]  }
 0x67d   : > { %v29742_v8 = vpop.f32.mrb[100].mxu0  ;;  %v21389_v35 = vpop.f32.mrb[164].mxu1  ;;  %14014 = vmatprep.subr.bf16.mxu0 %v23743_v25  ;;  %v23767_v25 = vld [vmem:[#allocation7 + $0x84] ss:$16 sps:$4 sm:$0xff]  }
 0x67e   : > { %v29744_v37 = vpop.f32.mrb[101].mxu0  ;;  %v21390_v32 = vpop.f32.mrb[165].mxu1  ;;  %14015 = vmatpush1.bf16.msra.mxu0 %v23741_v15 }
 0x67f   : > { %v21391_v36 = vadd.f32 %v21390_v32, %v21389_v35  ;;  %v29746_v39 = vpop.f32.mrb[102].mxu0  ;;  %v21392_v46 = vpop.f32.mrb[166].mxu1  ;;  %v23759_v32 = vld [vmem:[#allocation7 + $0x60] ss:$16 sps:$4 sm:$0xff]  }
 0x680   : > { %v29748_v45 = vpop.f32.mrb[103].mxu0  ;;  %v21393_v26 = vpop.f32.mrb[167].mxu1 }
 0x681   : > { %v29751_v38 = vadd.f32 %v21391_v36, %v29613_v29  ;;  %v21394_v52 = vadd.f32 %v21393_v26, %v21392_v46  ;;  %v23762_v46 = vld [vmem:[#allocation7 + $0x68] ss:$16 sps:$4 sm:$0xff]  }
 0x682   : > { %10164 = vmatmul.mubr.bf16.gmra.mrb[16].mxu1 %v28967_v30 }
 0x683   : > { %v29755_v53 = vadd.f32 %v21394_v52, %v29620_v56  ;;  %9865 = vmatmul.mubr.bf16.gmra.mrb[144].mxu0 %v28967_v30  ;;  %10171 = vmatprep.mubr.bf16.mxu1 %v29013_v28  ;;  %v23749_v56 = vld [vmem:[#allocation7 + $0x24] ss:$16 sps:$4 sm:$0xff]  }
 0x684   : > { %9874 = vmatprep.mubr.bf16.mxu0 %v29013_v28  ;;  %14016 = vmatprep.subr.bf16.mxu0 %v23749_v56 }
 0x685   : > { %v29760_v27 = vpop.f32.mrb[104].mxu0  ;;  %v21395_v29 = vpop.f32.mrb[168].mxu1  ;;  %14017 = vmatpush1.bf16.msra.mxu0 %v23747_v50  ;;  %14605 = vmatpush1.bf16.msra.mxu1 %v23762_v46 }
 0x686   : > { %v29762_v20 = vpop.f32.mrb[105].mxu0  ;;  %v21396_v5 = vpop.f32.mrb[169].mxu1  ;;  %14018 = vmatprep.subr.bf16.mxu0 %v23755_v49  ;;  %14606 = vmatprep.subr.bf16.mxu1 %v23770_v61 }
 0x687   : > { %v21397_v18 = vadd.f32 %v21396_v5, %v21395_v29  ;;  %v29764_v30 = vpop.f32.mrb[106].mxu0  ;;  %v21398_v59 = vpop.f32.mrb[170].mxu1 }
 0x688   : > { %v29766_v16 = vpop.f32.mrb[107].mxu0  ;;  %v21399_v28 = vpop.f32.mrb[171].mxu1 }
 0x689   : > { %v29769_v57 = vadd.f32 %v21397_v18, %v29635_v24  ;;  %v21400_v13 = vadd.f32 %v21399_v28, %v21398_v59  ;;  %14019 = vmatpush1.bf16.msra.mxu0 %v23753_v41  ;;  %v23776_v18 = vld [vmem:[#allocation7 + $0xac] ss:$16 sps:$4 sm:$0xff]   ;;  %v23771_v28 = vld [vmem:[#allocation7 + $0xa0] ss:$16 sps:$4 sm:$0xff]   ;;  %v23779_v41 = vld [vmem:[#allocation7 + $0xc4] ss:$16 sps:$4 sm:$0xff]  }
 0x68a   : > { %10172 = vmatmul.mubr.bf16.gmra.mrb[20].mxu1 %v29007_v2 }
 0x68b   : > { %v29773_v17 = vadd.f32 %v21400_v13, %v29642_v34  ;;  %9875 = vmatmul.mubr.bf16.gmra.mrb[148].mxu0 %v29007_v2  ;;  %10179 = vmatprep.mubr.bf16.mxu1 %v29053_v47  ;;  %v23761_v34 = vld [vmem:[#allocation7 + $0x64] ss:$16 sps:$4 sm:$0xff]   ;;  %v23774_v13 = vld [vmem:[#allocation7 + $0xa8] ss:$16 sps:$4 sm:$0xff]  }
 0x68c   : > { %9884 = vmatprep.mubr.bf16.mxu0 %v29053_v47  ;;  %14020 = vmatprep.subr.bf16.mxu0 %v23761_v34  ;;  %v23780_v34 = vld [vmem:[#allocation7 + $0xc8] ss:$16 sps:$4 sm:$0xff]  }
 0x68d   : > { %v29778_v24 = vpop.f32.mrb[108].mxu0  ;;  %v21401_v1 = vpop.f32.mrb[172].mxu1  ;;  %14021 = vmatpush1.bf16.msra.mxu0 %v23759_v32  ;;  %v23785_v32 = vld [vmem:[#allocation7 + $0xe4] ss:$16 sps:$4 sm:$0xff]  }
 0x68e   : > { %v29780_v60 = vpop.f32.mrb[109].mxu0  ;;  %v21402_v23 = vpop.f32.mrb[173].mxu1  ;;  %14022 = vmatprep.subr.bf16.mxu0 %v23767_v25  ;;  %v23783_v25 = vld [vmem:[#allocation7 + $0xe0] ss:$16 sps:$4 sm:$0xff]  }
 0x68f   : > { %v21403_v43 = vadd.f32 %v21402_v23, %v21401_v1  ;;  %v29782_v2 = vpop.f32.mrb[110].mxu0  ;;  %v21404_v35 = vpop.f32.mrb[174].mxu1  ;;  %v23777_v23 = vld [vmem:[#allocation7 + $0xc0] ss:$16 sps:$4 sm:$0xff]  }
 0x690   : > { %v29784_v36 = vpop.f32.mrb[111].mxu0  ;;  %v21405_v47 = vpop.f32.mrb[175].mxu1 }
 0x691   : > { %v29787_v26 = vadd.f32 %v21403_v43, %v29657_v11  ;;  %v21406_v52 = vadd.f32 %v21405_v47, %v21404_v35  ;;  %v23768_v11 = vld [vmem:[#allocation7 + $0x88] ss:$16 sps:$4 sm:$0xff]   ;;  %14023 = vmatpush1.bf16.msra.mxu0 %v23765_v21  ;;  %v23788_v47 = vld [vmem:[#allocation7 + $0xec] ss:$16 sps:$4 sm:$0xff]  }
 0x692   : > { %10180 = vmatmul.mubr.bf16.gmra.mrb[24].mxu1 %v29047_v14  ;;  %v23786_v21 = vld [vmem:[#allocation7 + $0xe8] ss:$16 sps:$4 sm:$0xff]  }
 0x693   : > { %v29791_v15 = vadd.f32 %v21406_v52, %v29664_v58  ;;  %9885 = vmatmul.mubr.bf16.gmra.mrb[152].mxu0 %v29047_v14  ;;  %10187 = vmatprep.mubr.bf16.mxu1 %v29088_v63  ;;  %v23773_v58 = vld [vmem:[#allocation7 + $0xa4] ss:$16 sps:$4 sm:$0xff]  }
 0x694   : > { %9894 = vmatprep.mubr.bf16.mxu0 %v29088_v63  ;;  %14607 = vmatpush1.bf16.msra.mxu1 %v23768_v11 }
 0x695   : > { %v29796_v29 = vpop.f32.mrb[112].mxu0  ;;  %v21407_v5 = vpop.f32.mrb[176].mxu1  ;;  %14024 = vmatprep.subr.bf16.mxu0 %v23773_v58  ;;  %14608 = vmatprep.subr.bf16.mxu1 %v23776_v18  ;;  %v23794_v58 = vld [vmem:[#allocation7 + $0x10c] ss:$16 sps:$4 sm:$0xff]  }
 0x696   : > { %v29798_v56 = vpop.f32.mrb[113].mxu0  ;;  %v21408_v12 = vpop.f32.mrb[177].mxu1  ;;  %14025 = vmatpush1.bf16.msra.mxu0 %v23771_v28 }
 0x697   : > { %v21409_v59 = vadd.f32 %v21408_v12, %v21407_v5  ;;  %v29800_v14 = vpop.f32.mrb[114].mxu0  ;;  %v21410_v50 = vpop.f32.mrb[178].mxu1  ;;  %14026 = vmatprep.subr.bf16.mxu0 %v23779_v41  ;;  %v23791_v12 = vld [vmem:[#allocation7 + $0x104] ss:$16 sps:$4 sm:$0xff]   ;;  %v23800_v41 = vld [vmem:[#allocation7 + $0x12c] ss:$16 sps:$4 sm:$0xff]  }
 0x698   : > { %v29802_v0 = vpop.f32.mrb[115].mxu0  ;;  %v21411_v63 = vpop.f32.mrb[179].mxu1  ;;  %14609 = vmatpush1.bf16.msra.mxu1 %v23774_v13 }
 0x699   : > { %v29805_v49 = vadd.f32 %v21409_v59, %v29679_v40  ;;  %v21412_v54 = vadd.f32 %v21411_v63, %v21410_v50  ;;  %14610 = vmatprep.subr.bf16.mxu1 %v23782_v62  ;;  %v23789_v59 = vld [vmem:[#allocation7 + $0x100] ss:$16 sps:$4 sm:$0xff]   ;;  %v23792_v50 = vld [vmem:[#allocation7 + $0x108] ss:$16 sps:$4 sm:$0xff]  }
 0x69a   : > { %10188 = vmatmul.mubr.bf16.gmra.mrb[28].mxu1 %v29084_v55  ;;  %14027 = vmatpush1.bf16.msra.mxu0 %v23777_v23 }
 0x69b   : > { %v29809_v1 = vadd.f32 %v21412_v54, %v29686_v48  ;;  %9895 = vmatmul.mubr.bf16.gmra.mrb[156].mxu0 %v29084_v55  ;;  %14028 = vmatprep.subr.bf16.mxu0 %v23785_v32  ;;  %v23797_v54 = vld [vmem:[#allocation7 + $0x124] ss:$16 sps:$4 sm:$0xff]   ;;  %v23798_v32 = vld [vmem:[#allocation7 + $0x128] ss:$16 sps:$4 sm:$0xff]  }
 0x69c   : > { %14611 = vmatpush1.bf16.msra.mxu1 %v23780_v34 }
 0x69d   : > { %31654 = vst [vmem:[#allocation29_spill] sm:$0xff] %v29809_v1  ;;  %v29812_v3 = vpop.f32.mrb[116].mxu0  ;;  %v21413_v40 = vpop.f32.mrb[180].mxu1  ;;  %14612 = vmatprep.subr.bf16.mxu1 %v23788_v47 }
 0x69e   : > { %31655 = vst [vmem:[#allocation58_spill] sm:$0xff] %v29812_v3  ;;  %v29814_v43 = vpop.f32.mrb[117].mxu0  ;;  %v21414_v35 = vpop.f32.mrb[181].mxu1  ;;  %14029 = vmatpush1.bf16.msra.mxu0 %v23783_v25  ;;  %v23806_v25 = vld [vmem:[#allocation7 + $0x14c] ss:$16 sps:$4 sm:$0xff]  }
 0x69f   : > { %31656 = vst [vmem:[#allocation30_spill] sm:$0xff] %v29814_v43  ;;  %v21415_v46 = vadd.f32 %v21414_v35, %v21413_v40  ;;  %v29816_v52 = vpop.f32.mrb[118].mxu0  ;;  %v21416_v48 = vpop.f32.mrb[182].mxu1  ;;  %14030 = vmatprep.subr.bf16.mxu0 %v23791_v12 }
 0x6a0   : > { %31657 = vst [vmem:[#allocation60_spill] sm:$0xff] %v29816_v52  ;;  %v29818_v55 = vpop.f32.mrb[119].mxu0  ;;  %v21417_v61 = vpop.f32.mrb[183].mxu1  ;;  %14613 = vmatpush1.bf16.msra.mxu1 %v23786_v21  ;;  %v23801_v21 = vld [vmem:[#allocation7 + $0x140] ss:$16 sps:$4 sm:$0xff]  }
 0x6a1   : > { %31658 = vst [vmem:[#allocation31_spill] sm:$0xff] %v29818_v55  ;;  %v29821_v11 = vadd.f32 %v21415_v46, %v29695_v22  ;;  %v21418_v5 = vadd.f32 %v21417_v61, %v21416_v48  ;;  %14614 = vmatprep.subr.bf16.mxu1 %v23794_v58  ;;  %v23803_v48 = vld [vmem:[#allocation7 + $0x144] ss:$16 sps:$4 sm:$0xff]  }
 0x6a2   : > { %14031 = vmatpush1.bf16.msra.mxu0 %v23789_v59 }
 0x6a3   : > { %31659 = vst [vmem:[#allocation61_spill] sm:$0xff] %v29821_v11  ;;  %v29824_v18 = vadd.f32 %v21418_v5, %v29699_v10  ;;  %v23795_v10 = vld [vmem:[#allocation7 + $0x120] ss:$16 sps:$4 sm:$0xff]   ;;  %14032 = vmatprep.subr.bf16.mxu0 %v23797_v54  ;;  %v23804_v5 = vld [vmem:[#allocation7 + $0x148] ss:$16 sps:$4 sm:$0xff]  }
 0x6a4   : > { %14615 = vmatpush1.bf16.msra.mxu1 %v23792_v50  ;;  %v23809_v50 = vld [vmem:[#allocation7 + $0x164] ss:$16 sps:$4 sm:$0xff]  }
 0x6a5   : > { %31660 = vst [vmem:[#allocation32_spill] sm:$0xff] %v29824_v18  ;;  %v29826_v28 = vpop.f32.mrb[120].mxu0  ;;  %v21419_v63 = vpop.f32.mrb[184].mxu1  ;;  %14616 = vmatprep.subr.bf16.mxu1 %v23800_v41 }
 0x6a6   : > { %31661 = vst [vmem:[#allocation33_spill] sm:$0xff] %v29826_v28  ;;  %v29828_v13 = vpop.f32.mrb[121].mxu0  ;;  %v21420_v22 = vpop.f32.mrb[185].mxu1  ;;  %14033 = vmatpush1.bf16.msra.mxu0 %v23795_v10  ;;  %v23810_v10 = vld [vmem:[#allocation7 + $0x168] ss:$16 sps:$4 sm:$0xff]  }
 0x6a7   : > { %31662 = vst [vmem:[#allocation34_spill] sm:$0xff] %v29828_v13  ;;  %v21421_v62 = vadd.f32 %v21420_v22, %v21419_v63  ;;  %v29830_v23 = vpop.f32.mrb[122].mxu0  ;;  %v21422_v34 = vpop.f32.mrb[186].mxu1  ;;  %14034 = vmatprep.subr.bf16.mxu0 %v23803_v48  ;;  %v23812_v63 = vld [vmem:[#allocation7 + $0x16c] ss:$16 sps:$4 sm:$0xff]  }
 0x6a8   : > { %31663 = vst [vmem:[#allocation35_spill] sm:$0xff] %v29830_v23  ;;  %v29832_v40 = vpop.f32.mrb[123].mxu0  ;;  %v21423_v35 = vpop.f32.mrb[187].mxu1  ;;  %14617 = vmatpush1.bf16.msra.mxu1 %v23798_v32  ;;  %v23818_v48 = vld [vmem:[#allocation7 + $0x18c] ss:$16 sps:$4 sm:$0xff]  }
 0x6a9   : > { %31664 = vst [vmem:[#allocation36_spill] sm:$0xff] %v29832_v40  ;;  %v29835_v47 = vadd.f32 %v21421_v62, %v29705_v7  ;;  %v21424_v46 = vadd.f32 %v21423_v35, %v21422_v34  ;;  %14618 = vmatprep.subr.bf16.mxu1 %v23806_v25 }
 0x6aa   : > { %14035 = vmatpush1.bf16.msra.mxu0 %v23801_v21  ;;  %v23813_v21 = vld [vmem:[#allocation7 + $0x180] ss:$16 sps:$4 sm:$0xff]  }
 0x6ab   : > { %31665 = vst [vmem:[#allocation37_spill] sm:$0xff] %v29835_v47  ;;  %v29838_v61 = vadd.f32 %v21424_v46, %v29709_v51  ;;  %v23807_v51 = vld [vmem:[#allocation7 + $0x160] ss:$16 sps:$4 sm:$0xff]   ;;  %14036 = vmatprep.subr.bf16.mxu0 %v23809_v50  ;;  %v23815_v46 = vld [vmem:[#allocation7 + $0x184] ss:$16 sps:$4 sm:$0xff]  }
 0x6ac   : > { %14619 = vmatpush1.bf16.msra.mxu1 %v23804_v5  ;;  %v23821_v50 = vld [vmem:[#allocation7 + $0x1a4] ss:$16 sps:$4 sm:$0xff]  }
 0x6ad   : > { %31666 = vst [vmem:[#allocation38_spill] sm:$0xff] %v29838_v61  ;;  %v29840_v12 = vpop.f32.mrb[124].mxu0  ;;  %v21425_v58 = vpop.f32.mrb[188].mxu1  ;;  %14620 = vmatprep.subr.bf16.mxu1 %v23812_v63  ;;  %v23819_v63 = vld [vmem:[#allocation7 + $0x1a0] ss:$16 sps:$4 sm:$0xff]  }
 0x6ae   : > { %31667 = vst [vmem:[#allocation39_spill] sm:$0xff] %v29840_v12  ;;  %v29842_v59 = vpop.f32.mrb[125].mxu0  ;;  %v21426_v7 = vpop.f32.mrb[189].mxu1  ;;  %14037 = vmatpush1.bf16.msra.mxu0 %v23807_v51  ;;  %v23822_v51 = vld [vmem:[#allocation7 + $0x1a8] ss:$16 sps:$4 sm:$0xff]  }
 0x6af   : > { %31668 = vst [vmem:[#allocation40_spill] sm:$0xff] %v29842_v59  ;;  %v21427_v22 = vadd.f32 %v21426_v7, %v21425_v58  ;;  %v29844_v54 = vpop.f32.mrb[126].mxu0  ;;  %v21428_v41 = vpop.f32.mrb[190].mxu1  ;;  %14038 = vmatprep.subr.bf16.mxu0 %v23815_v46  ;;  %v23816_v58 = vld [vmem:[#allocation7 + $0x188] ss:$16 sps:$4 sm:$0xff]  }
 0x6b0   : > { %31669 = vst [vmem:[#allocation41_spill] sm:$0xff] %v29844_v54  ;;  %v29846_v62 = vpop.f32.mrb[127].mxu0  ;;  %v21429_v34 = vpop.f32.mrb[191].mxu1  ;;  %14621 = vmatpush1.bf16.msra.mxu1 %v23810_v10  ;;  %v23830_v10 = vld [vmem:[#allocation7 + $0x1cc] ss:$16 sps:$4 sm:$0xff]  }
 0x6b1   : > { %31670 = vst [vmem:[#allocation42_spill] sm:$0xff] %v29846_v62  ;;  %v29849_v35 = vadd.f32 %v21427_v22, %v29715_v19  ;;  %v21430_v32 = vadd.f32 %v21429_v34, %v21428_v41  ;;  %14622 = vmatprep.subr.bf16.mxu1 %v23818_v48  ;;  %v23824_v62 = vld [vmem:[#allocation7 + $0x1ac] ss:$16 sps:$4 sm:$0xff]   ;;  %v23827_v34 = vld [vmem:[#allocation7 + $0x1c4] ss:$16 sps:$4 sm:$0xff]  }
 0x6b2   : > { %14039 = vmatpush1.bf16.msra.mxu0 %v23813_v21  ;;  %v23828_v46 = vld [vmem:[#allocation7 + $0x1c8] ss:$16 sps:$4 sm:$0xff]  }
 0x6b3   : > { %31671 = vst [vmem:[#allocation43_spill] sm:$0xff] %v29849_v35  ;;  %v29852_v25 = vadd.f32 %v21430_v32, %v29719_v42  ;;  %14040 = vmatprep.subr.bf16.mxu0 %v23821_v50  ;;  %v23825_v32 = vld [vmem:[#allocation7 + $0x1c0] ss:$16 sps:$4 sm:$0xff]  }
 0x6b4   : > { %14623 = vmatpush1.bf16.msra.mxu1 %v23816_v58  ;;  %v23831_v50 = vld [vmem:[#allocation7 + $0x1e0] ss:$16 sps:$4 sm:$0xff]  }
 0x6b5   : > { %31672 = vst [vmem:[#allocation44_spill] sm:$0xff] %v29852_v25  ;;  %v21447_v7 = vpop.f32.mrb[192].mxu1  ;;  %14624 = vmatprep.subr.bf16.mxu1 %v23824_v62  ;;  %v23834_v62 = vld [vmem:[#allocation7 + $0x1e8] ss:$16 sps:$4 sm:$0xff]  }
 0x6b6   : > { %v21448_v5 = vpop.f32.mrb[193].mxu1  ;;  %14041 = vmatpush1.bf16.msra.mxu0 %v23819_v63 }
 0x6b7   : > { %v29854_v19 = vadd.f32 %v21448_v5, %v21447_v7  ;;  %v21450_v22 = vpop.f32.mrb[194].mxu1  ;;  %14042 = vmatprep.subr.bf16.mxu0 %v23827_v34  ;;  %v23833_v7 = vld [vmem:[#allocation7 + $0x1e4] ss:$16 sps:$4 sm:$0xff]   ;;  %v23836_v5 = vld [vmem:[#allocation7 + $0x1ec] ss:$16 sps:$4 sm:$0xff]  }
 0x6b8   : > { %v21451_v41 = vpop.f32.mrb[195].mxu1  ;;  %14625 = vmatpush1.bf16.msra.mxu1 %v23822_v51  ;;  %v23842_v51 = vld [vmem:[#allocation7 + $0x20c] ss:$16 sps:$4 sm:$0xff]  }
 0x6b9   : > { %v29856_v42 = vadd.f32 %v21451_v41, %v21450_v22  ;;  %14626 = vmatprep.subr.bf16.mxu1 %v23830_v10  ;;  %v23839_v41 = vld [vmem:[#allocation7 + $0x204] ss:$16 sps:$4 sm:$0xff]  }
 0x6ba   : > { %14043 = vmatpush1.bf16.msra.mxu0 %v23825_v32 }
 0x6bb   : > { %14044 = vmatprep.subr.bf16.mxu0 %v23833_v7 }
 0x6bc   : > { %14627 = vmatpush1.bf16.msra.mxu1 %v23828_v46 }
 0x6bd   : > { %v21453_v48 = vpop.f32.mrb[196].mxu1  ;;  %14628 = vmatprep.subr.bf16.mxu1 %v23836_v5 }
 0x6be   : > { %v21454_v21 = vpop.f32.mrb[197].mxu1  ;;  %14045 = vmatpush1.bf16.msra.mxu0 %v23831_v50 }
 0x6bf   : > { %v29858_v25 = vadd.f32 %v21454_v21, %v21453_v48  ;;  %v21456_v58 = vpop.f32.mrb[198].mxu1  ;;  %14087 = vmatprep.subr.bf16.mxu0 %v23839_v41 }
 0x6c0   : > { %v21457_v22 = vpop.f32.mrb[199].mxu1  ;;  %14629 = vmatpush1.bf16.msra.mxu1 %v23834_v62 }
 0x6c1   : > { %v21458_v63 = vadd.f32 %v21457_v22, %v21456_v58  ;;  %14671 = vmatprep.subr.bf16.mxu1 %v23842_v51 }
 0x6c5   : > { %v21459_v34 = vpop.f32.mrb[200].mxu1 }
 0x6c6   : > { %v21460_v10 = vpop.f32.mrb[201].mxu1 }
 0x6c7   : > { %v21461_v32 = vadd.f32 %v21460_v10, %v21459_v34  ;;  %v21462_v35 = vpop.f32.mrb[202].mxu1 }
 0x6c8   : > { %v21463_v48 = vpop.f32.mrb[203].mxu1 }
 0x6c9   : > { %v21464_v21 = vadd.f32 %v21463_v48, %v21462_v35 }
 0x6cd   : > { %v21465_v54 = vpop.f32.mrb[204].mxu1 }
 0x6ce   : > { %v21466_v59 = vpop.f32.mrb[205].mxu1 }
 0x6cf   : > { %v21467_v12 = vadd.f32 %v21466_v59, %v21465_v54  ;;  %v21468_v46 = vpop.f32.mrb[206].mxu1 }
 0x6d0   : > { %v21469_v7 = vpop.f32.mrb[207].mxu1 }
 0x6d1   : > { %v21470_v61 = vadd.f32 %v21469_v7, %v21468_v46 }
 0x6d5   : > { %v21471_v58 = vpop.f32.mrb[208].mxu1 }
 0x6d6   : > { %v21472_v5 = vpop.f32.mrb[209].mxu1 }
 0x6d7   : > { %v21473_v50 = vadd.f32 %v21472_v5, %v21471_v58  ;;  %v21474_v22 = vpop.f32.mrb[210].mxu1 }
 0x6d8   : > { %v21475_v47 = vpop.f32.mrb[211].mxu1 }
 0x6d9   : > { %v21476_v62 = vadd.f32 %v21475_v47, %v21474_v22 }
 0x6dd   : > { %v21477_v40 = vpop.f32.mrb[212].mxu1 }
 0x6de   : > { %v21478_v41 = vpop.f32.mrb[213].mxu1 }
 0x6df   : > { %v21479_v51 = vadd.f32 %v21478_v41, %v21477_v40  ;;  %v21480_v23 = vpop.f32.mrb[214].mxu1 }
 0x6e0   : > { %v21481_v34 = vpop.f32.mrb[215].mxu1 }
 0x6e1   : > { %v21482_v10 = vadd.f32 %v21481_v34, %v21480_v23 }
 0x6e5   : > { %v21483_v13 = vpop.f32.mrb[216].mxu1 }
 0x6e6   : > { %v21484_v35 = vpop.f32.mrb[217].mxu1 }
 0x6e7   : > { %v29860_v48 = vadd.f32 %v21484_v35, %v21483_v13  ;;  %v21486_v59 = vpop.f32.mrb[218].mxu1 }
 0x6e8   : > { %v21487_v54 = vpop.f32.mrb[219].mxu1 }
 0x6e9   : > { %v21488_v28 = vadd.f32 %v21487_v54, %v21486_v59 }
 0x6ed   : > { %v21489_v46 = vpop.f32.mrb[220].mxu1 }
 0x6ee   : > { %v21490_v7 = vpop.f32.mrb[221].mxu1 }
 0x6ef   : > { %v29862_v18 = vadd.f32 %v21490_v7, %v21489_v46  ;;  %v21492_v58 = vpop.f32.mrb[222].mxu1 }
 0x6f0   : > { %v21493_v5 = vpop.f32.mrb[223].mxu1 }
 0x6f1   : > { %v29864_v47 = vadd.f32 %v21493_v5, %v21492_v58 }
 0x6f5   : > { %v21511_v22 = vpop.f32.mrb[224].mxu1 }
 0x6f6   : > { %v21512_v40 = vpop.f32.mrb[225].mxu1 }
 0x6f7   : > { %v21513_v41 = vadd.f32 %v21512_v40, %v21511_v22  ;;  %v21514_v11 = vpop.f32.mrb[226].mxu1 }
 0x6f8   : > { %v21515_v23 = vpop.f32.mrb[227].mxu1 }
 0x6f9   : > { %v29867_v34 = vadd.f32 %v21513_v41, %v29854_v19  ;;  %v21516_v13 = vadd.f32 %v21515_v23, %v21514_v11 }
 0x6fb   : > { %v29870_v35 = vadd.f32 %v21516_v13, %v29856_v42 }
 0x6fd   : > { %v21517_v59 = vpop.f32.mrb[228].mxu1 }
 0x6fe   : > { %v21518_v54 = vpop.f32.mrb[229].mxu1 }
 0x6ff   : > { %v21519_v46 = vadd.f32 %v21518_v54, %v21517_v59  ;;  %v21520_v7 = vpop.f32.mrb[230].mxu1 }
 0x700   : > { %v21521_v55 = vpop.f32.mrb[231].mxu1 }
 0x701   : > { %v29873_v58 = vadd.f32 %v21519_v46, %v29858_v25  ;;  %v21522_v5 = vadd.f32 %v21521_v55, %v21520_v7 }
 0x703   : > { %v29875_v52 = vadd.f32 %v21522_v5, %v21458_v63 }
 0x705   : > { %v21523_v22 = vpop.f32.mrb[232].mxu1 }
 0x706   : > { %v21524_v40 = vpop.f32.mrb[233].mxu1 }
 0x707   : > { %v21525_v43 = vadd.f32 %v21524_v40, %v21523_v22  ;;  %v21526_v19 = vpop.f32.mrb[234].mxu1 }
 0x708   : > { %v21527_v41 = vpop.f32.mrb[235].mxu1 }
 0x709   : > { %v29877_v11 = vadd.f32 %v21525_v43, %v21461_v32  ;;  %v21528_v42 = vadd.f32 %v21527_v41, %v21526_v19 }
 0x70b   : > { %v29879_v23 = vadd.f32 %v21528_v42, %v21464_v21 }
 0x70d   : > { %v21529_v13 = vpop.f32.mrb[236].mxu1 }
 0x70e   : > { %v21530_v59 = vpop.f32.mrb[237].mxu1 }
 0x70f   : > { %v21531_v54 = vadd.f32 %v21530_v59, %v21529_v13  ;;  %v21532_v3 = vpop.f32.mrb[238].mxu1 }
 0x710   : > { %v21533_v1 = vpop.f32.mrb[239].mxu1 }
 0x711   : > { %v29881_v25 = vadd.f32 %v21531_v54, %v21467_v12  ;;  %v21534_v55 = vadd.f32 %v21533_v1, %v21532_v3 }
 0x713   : > { %v29883_v63 = vadd.f32 %v21534_v55, %v21470_v61 }
 0x715   : > { %v21535_v46 = vpop.f32.mrb[240].mxu1 }
 0x716   : > { %v21536_v7 = vpop.f32.mrb[241].mxu1 }
 0x717   : > { %v21537_v5 = vadd.f32 %v21536_v7, %v21535_v46  ;;  %v21538_v22 = vpop.f32.mrb[242].mxu1 }
 0x718   : > { %v21539_v40 = vpop.f32.mrb[243].mxu1 }
 0x719   : > { %v29885_v43 = vadd.f32 %v21537_v5, %v21473_v50  ;;  %v21540_v32 = vadd.f32 %v21539_v40, %v21538_v22 }
 0x71b   : > { %v29887_v21 = vadd.f32 %v21540_v32, %v21476_v62 }
 0x71d   : > { %v21541_v19 = vpop.f32.mrb[244].mxu1 }
 0x71e   : > { %v21542_v41 = vpop.f32.mrb[245].mxu1 }
 0x71f   : > { %v21543_v42 = vadd.f32 %v21542_v41, %v21541_v19  ;;  %v21544_v13 = vpop.f32.mrb[246].mxu1 }
 0x720   : > { %v21545_v59 = vpop.f32.mrb[247].mxu1 }
 0x721   : > { %v29889_v12 = vadd.f32 %v21543_v42, %v21479_v51  ;;  %v21546_v1 = vadd.f32 %v21545_v59, %v21544_v13 }
 0x723   : > { %v29891_v3 = vadd.f32 %v21546_v1, %v21482_v10 }
 0x725   : > { %v21547_v61 = vpop.f32.mrb[248].mxu1 }
 0x726   : > { %v21548_v54 = vpop.f32.mrb[249].mxu1 }
 0x727   : > { %v21549_v55 = vadd.f32 %v21548_v54, %v21547_v61  ;;  %v21550_v46 = vpop.f32.mrb[250].mxu1 }
 0x728   : > { %v21551_v7 = vpop.f32.mrb[251].mxu1 }
 0x729   : > { %v29894_v50 = vadd.f32 %v21549_v55, %v29860_v48  ;;  %v21552_v62 = vadd.f32 %v21551_v7, %v21550_v46 }
 0x72b   : > { %v29896_v5 = vadd.f32 %v21552_v62, %v21488_v28 }
 0x72d   : > { %v21553_v22 = vpop.f32.mrb[252].mxu1 }
 0x72e   : > { %v21554_v40 = vpop.f32.mrb[253].mxu1 }
 0x72f   : > { %v21555_v32 = vadd.f32 %v21554_v40, %v21553_v22  ;;  %v21556_v19 = vpop.f32.mrb[254].mxu1 }
 0x730   : > { %v21557_v51 = vpop.f32.mrb[255].mxu1 }
 0x731   : > { %v29899_v41 = vadd.f32 %v21555_v32, %v29862_v18  ;;  %v21558_v10 = vadd.f32 %v21557_v51, %v21556_v19 }
 0x733   : > { %v29902_v42 = vadd.f32 %v21558_v10, %v29864_v47 }
 0x735   : > { %v21575_v13 = vpop.f32.mrb[0].mxu1 }
 0x736   : > { %v9826_v59 = vpop.f32.mrb[128].mxu0  ;;  %v21576_v1 = vpop.f32.mrb[1].mxu1 }
 0x737   : > { %v10196_v48 = vmax.f32 %v29724_v4, %v9826_v59  ;;  %v9828_v61 = vpop.f32.mrb[129].mxu0  ;;  %v21577_v28 = vadd.f32 %v21576_v1, %v21575_v13  ;;  %v21578_v54 = vpop.f32.mrb[2].mxu1 }
 0x738   : > { %v10197_v55 = vmax.f32 %v29726_v44, %v9828_v61  ;;  %v9830_v46 = vpop.f32.mrb[130].mxu0  ;;  %v21579_v7 = vpop.f32.mrb[3].mxu1 }
 0x739   : > { %v10134_v62 = vadd.f32 %v21577_v28, %v29867_v34  ;;  %v10199_v18 = vmax.f32 %v29728_v9, %v9830_v46  ;;  %v9832_v22 = vpop.f32.mrb[131].mxu0  ;;  %v21580_v40 = vadd.f32 %v21579_v7, %v21578_v54 }
 0x73a   : > { %v29908_v47 = vpack.c.bf16 %v10197_v55, %v10196_v48  ;;  %v10200_v32 = vmax.f32 %v29730_v33, %v9832_v22  ;;  %v23837_v22 = vld [vmem:[#allocation7 + $0x200] ss:$16 sps:$4 sm:$0xff]  }
 0x73b   : > { %v29912_v19 = vmax.f32 %v29733_v31, %v10134_v62  ;;  %v10137_v4 = vadd.f32 %v21580_v40, %v29870_v35  ;;  %v23840_v40 = vld [vmem:[#allocation7 + $0x208] ss:$16 sps:$4 sm:$0xff]  }
 0x73c   : > { %31673 = vst [vmem:[#allocation45_spill] sm:$0xff] %v29908_v47  ;;  %v29915_v51 = vpack.c.bf16 %v10200_v32, %v10199_v18  ;;  %v31492_v54 = vshrl.u32 %v29908_v47, 16 }
 0x73d   : > { %v29918_v44 = vmax.f32 %v29737_v6, %v10137_v4  ;;  %v21581_v10 = vpop.f32.mrb[4].mxu1  ;;  %v23845_v4 = vld [vmem:[#allocation7 + $0x224] ss:$16 sps:$4 sm:$0xff]  }
 0x73e   : > { %31674 = vst [vmem:[#allocation46_spill] sm:$0xff] %v29915_v51  ;;  %v9836_v34 = vpop.f32.mrb[132].mxu0  ;;  %v21582_v13 = vpop.f32.mrb[5].mxu1 }
 0x73f   : > { %v10202_v9 = vmax.f32 %v29742_v8, %v9836_v34  ;;  %v9838_v59 = vpop.f32.mrb[133].mxu0  ;;  %v21584_v1 = vpop.f32.mrb[6].mxu1  ;;  %v21583_v33 = vadd.f32 %v21582_v13, %v21581_v10  ;;  %v23848_v10 = vld [vmem:[#allocation7 + $0x22c] ss:$16 sps:$4 sm:$0xff]   ;;  %v23846_v13 = vld [vmem:[#allocation7 + $0x228] ss:$16 sps:$4 sm:$0xff]  }
 0x740   : > { %v10203_v61 = vmax.f32 %v29744_v37, %v9838_v59  ;;  %v9840_v28 = vpop.f32.mrb[134].mxu0  ;;  %v21585_v31 = vpop.f32.mrb[7].mxu1  ;;  %v31491_v37 = vshll.u32 %v29908_v47, 16 }
 0x741   : > { %v21227_v35 = vpack.c.bf16 %v10202_v9, %v10196_v48  ;;  %v10205_v46 = vmax.f32 %v29746_v39, %v9840_v28  ;;  %v9842_v7 = vpop.f32.mrb[135].mxu0  ;;  %v10142_v18 = vadd.f32 %v21583_v33, %v29873_v58  ;;  %v21586_v32 = vadd.f32 %v21585_v31, %v21584_v1 }
 0x742   : > { %v29924_v6 = vpack.c.bf16 %v10203_v61, %v10202_v9  ;;  %v21228_v62 = vpack.c.bf16 %v10203_v61, %v10197_v55  ;;  %v10206_v8 = vmax.f32 %v29748_v45, %v9842_v7  ;;  %v23843_v55 = vld [vmem:[#allocation7 + $0x220] ss:$16 sps:$4 sm:$0xff]   ;;  %v23851_v61 = vld [vmem:[#allocation7 + $0x244] ss:$16 sps:$4 sm:$0xff]   ;;  %v10378_v33 = vrot.slane %v31492_v54, 4 }
 0x743   : > { %v29931_v48 = vmax.f32 %v29751_v38, %v10142_v18  ;;  %v10145_v58 = vadd.f32 %v21586_v32, %v29875_v52  ;;  %v23854_v7 = vld [vmem:[#allocation7 + $0x24c] ss:$16 sps:$4 sm:$0xff]   ;;  %v23903_v54 = vld [vmem:[#allocation7 + $0x360] ss:$16 sps:$4 sm:$0xff]  }
 0x744   : > { %v31485_v34 = vshrl.u32 %v29924_v6, 16  ;;  %v29933_v39 = vpack.c.bf16 %v10206_v8, %v10205_v46  ;;  %14046 = vmatprep.mubr.bf16.mxu0 %v21228_v62  ;;  %14630 = vmatprep.mubr.bf16.mxu1 %v21228_v62  ;;  %v31484_v9 = vshll.u32 %v29924_v6, 16  ;;  %v10381_v62 = vrot.slane %v31491_v37, 5  ;;  %v23908_v37 = vld [vmem:[#allocation7 + $0x36c] ss:$16 sps:$4 sm:$0xff]  }
 0x745   : > { %14047 = vmatmul.mubr.bf16.vlgmr.msra.gmra.mrb[160].mxu0 %v21227_v35  ;;  %14631 = vmatmul.mubr.bf16.vlgmr.msra.gmra.mrb[32].mxu1 %v21227_v35  ;;  %v21587_v45 = vpop.f32.mrb[8].mxu1  ;;  %v29939_v59 = vpack.c.bf16 %v29931_v48, %v29912_v19  ;;  %v29944_v52 = vmax.f32 %v29755_v53, %v10145_v58 }
 0x746   : > { %14088 = vmatpush1.bf16.msra.mxu0 %v23837_v22  ;;  %14672 = vmatpush1.bf16.msra.mxu1 %v23840_v40  ;;  %v9846_v38 = vpop.f32.mrb[136].mxu0  ;;  %v21588_v1 = vpop.f32.mrb[9].mxu1  ;;  %v10406_v40 = vrot.slane %v31485_v34, 4 }
 0x747   : > { %v10208_v28 = vmax.f32 %v29760_v27, %v9846_v38  ;;  %v9848_v31 = vpop.f32.mrb[137].mxu0  ;;  %v21589_v35 = vadd.f32 %v21588_v1, %v21587_v45  ;;  %v21590_v46 = vpop.f32.mrb[10].mxu1  ;;  %14089 = vmatprep.subr.bf16.mxu0 %v23845_v4  ;;  %14673 = vmatprep.subr.bf16.mxu1 %v23848_v10  ;;  %v31483_v4 = vshll.u32 %v29933_v39, 16  ;;  %v23852_v38 = vld [vmem:[#allocation7 + $0x248] ss:$16 sps:$4 sm:$0xff]   ;;  %v10409_v1 = vrot.slane %v31484_v9, 5 }
 0x748   : > { %v10209_v18 = vmax.f32 %v29762_v20, %v9848_v31  ;;  %v9850_v8 = vpop.f32.mrb[138].mxu0  ;;  %v21591_v22 = vpop.f32.mrb[11].mxu1  ;;  %v23849_v20 = vld [vmem:[#allocation7 + $0x240] ss:$16 sps:$4 sm:$0xff]   ;;  %v23864_v9 = vld [vmem:[#allocation7 + $0x288] ss:$16 sps:$4 sm:$0xff]  }
 0x749   : > { %v10150_v53 = vadd.f32 %v21589_v35, %v29877_v11  ;;  %v10211_v27 = vmax.f32 %v29764_v30, %v9850_v8  ;;  %v9852_v32 = vpop.f32.mrb[139].mxu0  ;;  %v21592_v58 = vadd.f32 %v21591_v22, %v21590_v46  ;;  %v23857_v11 = vld [vmem:[#allocation7 + $0x264] ss:$16 sps:$4 sm:$0xff]   ;;  %v23860_v35 = vld [vmem:[#allocation7 + $0x26c] ss:$16 sps:$4 sm:$0xff]   ;;  %v10382_v46 = vor.u32 %v10381_v62, %v10378_v33 }
 0x74a   : > { %v29955_v10 = vpack.c.bf16 %v10209_v18, %v10208_v28  ;;  %v10212_v45 = vmax.f32 %v29766_v16, %v9852_v32  ;;  %14090 = vmatpush1.bf16.msra.mxu0 %v23843_v55  ;;  %14674 = vmatpush1.bf16.msra.mxu1 %v23846_v13  ;;  %v31490_v16 = vshll.u32 %v29915_v51, 16  ;;  %v10410_v13 = vor.u32 %v10409_v1, %v10406_v40 }
 0x74b   : > { %v29961_v31 = vmax.f32 %v29769_v57, %v10150_v53  ;;  %v10153_v30 = vadd.f32 %v21592_v58, %v29879_v23  ;;  %14091 = vmatprep.subr.bf16.mxu0 %v23851_v61  ;;  %14675 = vmatprep.subr.bf16.mxu1 %v23854_v7  ;;  %v23855_v57 = vld [vmem:[#allocation7 + $0x260] ss:$16 sps:$4 sm:$0xff]   ;;  %v23858_v53 = vld [vmem:[#allocation7 + $0x268] ss:$16 sps:$4 sm:$0xff]   ;;  %v23863_v7 = vld [vmem:[#allocation7 + $0x284] ss:$16 sps:$4 sm:$0xff]  }
 0x74c   : > { %v29965_v55 = vpack.c.bf16 %v10212_v45, %v10211_v27  ;;  %v10411_v32 = vrot.slane %v10410_v13, 4  ;;  %v10415_v33 = vrot.slane %v31483_v4, 5 }
 0x74d   : > { %v29968_v8 = vmax.f32 %v29773_v17, %v10153_v30  ;;  %v21593_v22 = vpop.f32.mrb[12].mxu1  ;;  %v23866_v17 = vld [vmem:[#allocation7 + $0x28c] ss:$16 sps:$4 sm:$0xff]  }
 0x74e   : > { %14092 = vmatpush1.bf16.msra.mxu0 %v23849_v20  ;;  %14676 = vmatpush1.bf16.msra.mxu1 %v23852_v38  ;;  %v9856_v23 = vpop.f32.mrb[140].mxu0  ;;  %v21594_v61 = vpop.f32.mrb[13].mxu1  ;;  %v10383_v20 = vrot.slane %v10382_v46, 4  ;;  %v29984_v13 = vsel %vm29975_vm8, %v10411_v32, %v10415_v33  ;;  %v23870_v33 = vld [vmem:[#allocation7 + $0x2a8] ss:$16 sps:$4 sm:$0xff]  }
 0x74f   : > { %v10214_v62 = vmax.f32 %v29778_v24, %v9856_v23  ;;  %v9858_v27 = vpop.f32.mrb[141].mxu0  ;;  %v21595_v58 = vadd.f32 %v21594_v61, %v21593_v22  ;;  %v21596_v40 = vpop.f32.mrb[14].mxu1  ;;  %14093 = vmatprep.subr.bf16.mxu0 %v23857_v11  ;;  %14677 = vmatprep.subr.bf16.mxu1 %v23860_v35  ;;  %v10387_v24 = vrot.slane %v31490_v16, 5  ;;  %v23905_v16 = vld [vmem:[#allocation7 + $0x364] ss:$16 sps:$4 sm:$0xff]  }
 0x750   : > { %v10215_v38 = vmax.f32 %v29780_v60, %v9858_v27  ;;  %v9860_v1 = vpop.f32.mrb[142].mxu0  ;;  %v21597_v30 = vpop.f32.mrb[15].mxu1  ;;  %v23861_v27 = vld [vmem:[#allocation7 + $0x280] ss:$16 sps:$4 sm:$0xff]  }
 0x751   : > { %v21230_v11 = vpack.c.bf16 %v10214_v62, %v10208_v28  ;;  %v10158_v35 = vadd.f32 %v21595_v58, %v29881_v25  ;;  %v10217_v22 = vmax.f32 %v29782_v2, %v9860_v1  ;;  %v9862_v23 = vpop.f32.mrb[143].mxu0  ;;  %v21598_v61 = vadd.f32 %v21597_v30, %v21596_v40  ;;  %v23869_v25 = vld [vmem:[#allocation7 + $0x2a4] ss:$16 sps:$4 sm:$0xff]   ;;  %v23872_v2 = vld [vmem:[#allocation7 + $0x2ac] ss:$16 sps:$4 sm:$0xff]  }
 0x752   : > { %v29988_v4 = vpack.c.bf16 %v10215_v38, %v10214_v62  ;;  %v21231_v46 = vpack.c.bf16 %v10215_v38, %v10209_v18  ;;  %v10218_v60 = vmax.f32 %v29784_v36, %v9862_v23  ;;  %14094 = vmatpush1.bf16.msra.mxu0 %v23855_v57  ;;  %14678 = vmatpush1.bf16.msra.mxu1 %v23858_v53  ;;  %v23878_v38 = vld [vmem:[#allocation7 + $0x2cc] ss:$16 sps:$4 sm:$0xff]   ;;  %v23873_v23 = vld [vmem:[#allocation7 + $0x2c0] ss:$16 sps:$4 sm:$0xff]  }
 0x753   : > { %v29992_v34 = vmax.f32 %v29787_v26, %v10158_v35  ;;  %v10161_v28 = vadd.f32 %v21598_v61, %v29883_v63  ;;  %14095 = vmatprep.subr.bf16.mxu0 %v23863_v7  ;;  %14679 = vmatprep.subr.bf16.mxu1 %v23866_v17  ;;  %v29997_v32 = vsel %vm29975_vm8, %v10383_v20, %v10387_v24  ;;  %v23867_v7 = vld [vmem:[#allocation7 + $0x2a0] ss:$16 sps:$4 sm:$0xff]   ;;  %v23875_v20 = vld [vmem:[#allocation7 + $0x2c4] ss:$16 sps:$4 sm:$0xff]   ;;  %v23876_v61 = vld [vmem:[#allocation7 + $0x2c8] ss:$16 sps:$4 sm:$0xff]  }
 0x754   : > { %v29999_v18 = vpack.c.bf16 %v10218_v60, %v10217_v22  ;;  %14056 = vmatprep.mubr.bf16.mxu0 %v21231_v46  ;;  %14640 = vmatprep.mubr.bf16.mxu1 %v21231_v46  ;;  %v30003_v36 = vcombine.high %v29997_v32, %v29984_v13  ;;  %v23884_v60 = vld [vmem:[#allocation7 + $0x2ec] ss:$16 sps:$4 sm:$0xff]  }
 0x755   : > { %v30006_v26 = vmax.f32 %v29791_v15, %v10161_v28  ;;  %14057 = vmatmul.mubr.bf16.gmra.mrb[164].mxu0 %v21230_v11  ;;  %14641 = vmatmul.mubr.bf16.gmra.mrb[36].mxu1 %v21230_v11  ;;  %v21599_v63 = vpop.f32.mrb[16].mxu1  ;;  %v30017_v46 = vpack.c.bf16 %v29992_v34, %v29961_v31 }
 0x756   : > { %31677 = vst [vmem:[#allocation47_spill] sm:$0xff] %v30003_v36  ;;  %14096 = vmatpush1.bf16.msra.mxu0 %v23861_v27  ;;  %14680 = vmatpush1.bf16.msra.mxu1 %v23864_v9  ;;  %v9866_v57 = vpop.f32.mrb[144].mxu0  ;;  %v21600_v53 = vpop.f32.mrb[17].mxu1 }
 0x757   : > { %v10220_v62 = vmax.f32 %v29796_v29, %v9866_v57  ;;  %v9868_v58 = vpop.f32.mrb[145].mxu0  ;;  %v21601_v40 = vadd.f32 %v21600_v53, %v21599_v63  ;;  %v21602_v17 = vpop.f32.mrb[18].mxu1  ;;  %14097 = vmatprep.subr.bf16.mxu0 %v23869_v25  ;;  %14681 = vmatprep.subr.bf16.mxu1 %v23872_v2  ;;  %v23879_v57 = vld [vmem:[#allocation7 + $0x2e0] ss:$16 sps:$4 sm:$0xff]   ;;  %v23882_v53 = vld [vmem:[#allocation7 + $0x2e8] ss:$16 sps:$4 sm:$0xff]  }
 0x758   : > { %v10221_v15 = vmax.f32 %v29798_v56, %v9868_v58  ;;  %v9870_v1 = vpop.f32.mrb[146].mxu0  ;;  %v21603_v30 = vpop.f32.mrb[19].mxu1 }
 0x759   : > { %v10166_v24 = vadd.f32 %v21601_v40, %v29885_v43  ;;  %v10223_v9 = vmax.f32 %v29800_v14, %v9870_v1  ;;  %v9872_v11 = vpop.f32.mrb[147].mxu0  ;;  %v21604_v35 = vadd.f32 %v21603_v30, %v21602_v17  ;;  %v23881_v14 = vld [vmem:[#allocation7 + $0x2e4] ss:$16 sps:$4 sm:$0xff]   ;;  %v23890_v17 = vld [vmem:[#allocation7 + $0x30c] ss:$16 sps:$4 sm:$0xff]  }
 0x75a   : > { %v30012_v22 = vpack.c.bf16 %v10221_v15, %v10220_v62  ;;  %v10224_v29 = vmax.f32 %v29802_v0, %v9872_v11  ;;  %14098 = vmatpush1.bf16.msra.mxu0 %v23867_v7  ;;  %14682 = vmatpush1.bf16.msra.mxu1 %v23870_v33  ;;  %v31679_v0 = vld [vmem:[#allocation29_spill] sm:$0xff]  ;;  %v23887_v40 = vld [vmem:[#allocation7 + $0x304] ss:$16 sps:$4 sm:$0xff]  }
 0x75b   : > { %v30020_v56 = vmax.f32 %v29805_v49, %v10166_v24  ;;  %v10169_v43 = vadd.f32 %v21604_v35, %v29887_v21  ;;  %14099 = vmatprep.subr.bf16.mxu0 %v23875_v20  ;;  %14683 = vmatprep.subr.bf16.mxu1 %v23878_v38  ;;  %v31681_v49 = vld [vmem:[#allocation58_spill] sm:$0xff]  ;;  %v31487_v20 = vshrl.u32 %v29988_v4, 16  ;;  %v31683_v35 = vld [vmem:[#allocation60_spill] sm:$0xff] }
 0x75c   : > { %v30023_v27 = vpack.c.bf16 %v10224_v29, %v10223_v9  ;;  %v31682_v38 = vld [vmem:[#allocation30_spill] sm:$0xff] }
 0x75d   : > { %31678 = vst [vmem:[#allocation48_spill] sm:$0xff] %v30020_v56  ;;  %v30026_v28 = vmax.f32 %v31679_v0, %v10169_v43  ;;  %v21605_v25 = vpop.f32.mrb[20].mxu1  ;;  %v31486_v43 = vshll.u32 %v29988_v4, 16 }
 0x75e   : > { %14100 = vmatpush1.bf16.msra.mxu0 %v23873_v23  ;;  %14684 = vmatpush1.bf16.msra.mxu1 %v23876_v61  ;;  %v9876_v2 = vpop.f32.mrb[148].mxu0  ;;  %v21606_v63 = vpop.f32.mrb[21].mxu1 }
 0x75f   : > { %31680 = vst [vmem:[#allocation49_spill] sm:$0xff] %v30026_v28  ;;  %v10226_v7 = vmax.f32 %v31681_v49, %v9876_v2  ;;  %v9878_v33 = vpop.f32.mrb[149].mxu0  ;;  %v21607_v21 = vadd.f32 %v21606_v63, %v21605_v25  ;;  %v21608_v58 = vpop.f32.mrb[22].mxu1  ;;  %14101 = vmatprep.subr.bf16.mxu0 %v23881_v14  ;;  %14685 = vmatprep.subr.bf16.mxu1 %v23884_v60  ;;  %v31684_v60 = vld [vmem:[#allocation31_spill] sm:$0xff]  ;;  %v31685_v49 = vld [vmem:[#allocation61_spill] sm:$0xff] }
 0x760   : > { %v10227_v1 = vmax.f32 %v31682_v38, %v9878_v33  ;;  %v9880_v30 = vpop.f32.mrb[150].mxu0  ;;  %v21609_v24 = vpop.f32.mrb[23].mxu1  ;;  %v23885_v2 = vld [vmem:[#allocation7 + $0x300] ss:$16 sps:$4 sm:$0xff]   ;;  %v23888_v63 = vld [vmem:[#allocation7 + $0x308] ss:$16 sps:$4 sm:$0xff]  }
 0x761   : > { %v21233_v9 = vpack.c.bf16 %v10226_v7, %v10220_v62  ;;  %v10174_v11 = vadd.f32 %v21607_v21, %v29889_v12  ;;  %v10229_v29 = vmax.f32 %v31683_v35, %v9880_v30  ;;  %v9882_v23 = vpop.f32.mrb[151].mxu0  ;;  %v21610_v61 = vadd.f32 %v21609_v24, %v21608_v58  ;;  %v23893_v62 = vld [vmem:[#allocation7 + $0x324] ss:$16 sps:$4 sm:$0xff]   ;;  %v23896_v21 = vld [vmem:[#allocation7 + $0x32c] ss:$16 sps:$4 sm:$0xff]  }
 0x762   : > { %v30034_v0 = vpack.c.bf16 %v10227_v1, %v10226_v7  ;;  %v21234_v14 = vpack.c.bf16 %v10227_v1, %v10221_v15  ;;  %v10230_v25 = vmax.f32 %v31684_v60, %v9882_v23  ;;  %14102 = vmatpush1.bf16.msra.mxu0 %v23879_v57  ;;  %14686 = vmatpush1.bf16.msra.mxu1 %v23882_v53  ;;  %v31488_v58 = vshrl.u32 %v29955_v10, 16  ;;  %v31687_v57 = vld [vmem:[#allocation32_spill] sm:$0xff]  ;;  %v31689_v35 = vld [vmem:[#allocation33_spill] sm:$0xff] }
 0x763   : > { %v30038_v33 = vmax.f32 %v31685_v49, %v10174_v11  ;;  %v10177_v12 = vadd.f32 %v21610_v61, %v29891_v3  ;;  %14103 = vmatprep.subr.bf16.mxu0 %v23887_v40  ;;  %14687 = vmatprep.subr.bf16.mxu1 %v23890_v17  ;;  %v31489_v15 = vshll.u32 %v29955_v10, 16  ;;  %v23891_v1 = vld [vmem:[#allocation7 + $0x320] ss:$16 sps:$4 sm:$0xff]   ;;  %v23894_v30 = vld [vmem:[#allocation7 + $0x328] ss:$16 sps:$4 sm:$0xff]   ;;  %v10462_v24 = vrot.slane %v31487_v20, 4 }
 0x764   : > { %v30042_v7 = vpack.c.bf16 %v10230_v25, %v10229_v29  ;;  %14066 = vmatprep.mubr.bf16.mxu0 %v21234_v14  ;;  %14650 = vmatprep.mubr.bf16.mxu1 %v21234_v14  ;;  %v10465_v11 = vrot.slane %v31486_v43, 5  ;;  %v23899_v14 = vld [vmem:[#allocation7 + $0x344] ss:$16 sps:$4 sm:$0xff]   ;;  %v23902_v60 = vld [vmem:[#allocation7 + $0x34c] ss:$16 sps:$4 sm:$0xff]   ;;  %v31493_v25 = vshll.u32 %v29965_v55, 16 }
 0x765   : > { %31686 = vst [vmem:[#allocation50_spill] sm:$0xff] %v30038_v33  ;;  %v30046_v53 = vmax.f32 %v31687_v57, %v10177_v12  ;;  %14067 = vmatmul.mubr.bf16.gmra.mrb[168].mxu0 %v21233_v9  ;;  %14651 = vmatmul.mubr.bf16.gmra.mrb[40].mxu1 %v21233_v9  ;;  %v21611_v38 = vpop.f32.mrb[24].mxu1  ;;  %v30050_v3 = vpack.c.bf16 %v30038_v33, %v30020_v56  ;;  %v30065_v57 = vrot.slane %v31488_v58, 4  ;;  %v31495_v43 = vshll.u32 %v29999_v18, 16  ;;  %v23897_v58 = vld [vmem:[#allocation7 + $0x340] ss:$16 sps:$4 sm:$0xff]  }
 0x766   : > { %14104 = vmatpush1.bf16.msra.mxu0 %v23885_v2  ;;  %14688 = vmatpush1.bf16.msra.mxu1 %v23888_v63  ;;  %v9886_v40 = vpop.f32.mrb[152].mxu0  ;;  %v21612_v17 = vpop.f32.mrb[25].mxu1  ;;  %v31690_v2 = vld [vmem:[#allocation34_spill] sm:$0xff]  ;;  %v31703_v56 = vld [vmem:[#allocation43_spill] sm:$0xff] }
 0x767   : > { %31688 = vst [vmem:[#allocation51_spill] sm:$0xff] %v30046_v53  ;;  %v30057_v29 = vmax.f32 %v31689_v35, %v9886_v40  ;;  %v9888_v9 = vpop.f32.mrb[153].mxu0  ;;  %v21613_v23 = vadd.f32 %v21612_v17, %v21611_v38  ;;  %v21614_v61 = vpop.f32.mrb[26].mxu1  ;;  %14105 = vmatprep.subr.bf16.mxu0 %v23893_v62  ;;  %14689 = vmatprep.subr.bf16.mxu1 %v23896_v21  ;;  %v31691_v35 = vld [vmem:[#allocation35_spill] sm:$0xff]  ;;  %v30071_v21 = vrot.slane %v31489_v15, 5 }
 0x768   : > { %v30061_v63 = vmax.f32 %v31690_v2, %v9888_v9  ;;  %v9890_v49 = vpop.f32.mrb[154].mxu0  ;;  %v21615_v12 = vpop.f32.mrb[27].mxu1  ;;  %v31692_v2 = vld [vmem:[#allocation36_spill] sm:$0xff] }
 0x769   : > { %v10182_v40 = vadd.f32 %v21613_v23, %v29894_v50  ;;  %v10235_v38 = vmax.f32 %v31691_v35, %v9890_v49  ;;  %v9892_v17 = vpop.f32.mrb[155].mxu0  ;;  %v21616_v62 = vadd.f32 %v21615_v12, %v21614_v61  ;;  %v23900_v50 = vld [vmem:[#allocation7 + $0x348] ss:$16 sps:$4 sm:$0xff]   ;;  %v10466_v23 = vor.u32 %v10465_v11, %v10462_v24 }
 0x76a   : > { %v30076_v9 = vpack.c.bf16 %v30061_v63, %v30057_v29  ;;  %v10236_v20 = vmax.f32 %v31692_v2, %v9892_v17  ;;  %14106 = vmatpush1.bf16.msra.mxu0 %v23891_v1  ;;  %14690 = vmatpush1.bf16.msra.mxu1 %v23894_v30  ;;  %v31496_v49 = vshrl.u32 %v30034_v0, 16  ;;  %v31693_v12 = vld [vmem:[#allocation37_spill] sm:$0xff]  ;;  %v31694_v24 = vld [vmem:[#allocation38_spill] sm:$0xff] }
 0x76b   : > { %v30082_v35 = vmax.f32 %v31693_v12, %v10182_v40  ;;  %v10185_v15 = vadd.f32 %v21616_v62, %v29896_v5  ;;  %14107 = vmatprep.subr.bf16.mxu0 %v23899_v14  ;;  %14691 = vmatprep.subr.bf16.mxu1 %v23902_v60  ;;  %v23906_v61 = vld [vmem:[#allocation7 + $0x368] ss:$16 sps:$4 sm:$0xff]   ;;  %v30094_v40 = vrot.slane %v31493_v25, 5  ;;  %v23911_v60 = vld [vmem:[#allocation7 + $0x384] ss:$16 sps:$4 sm:$0xff]   ;;  %v20166_v62 = vcombine.low %v29997_v32, %v29984_v13 }
 0x76c   : > { %v30087_v30 = vpack.c.bf16 %v10236_v20, %v10235_v38  ;;  %v10438_v20 = vor.u32 %v30071_v21, %v30065_v57  ;;  %v10471_v38 = vrot.slane %v31495_v43, 5  ;;  %v31696_v12 = vld [vmem:[#allocation39_spill] sm:$0xff]  ;;  %v31697_v13 = vshll.u32 %v30034_v0, 16  ;;  %v31698_v21 = vld [vmem:[#allocation40_spill] sm:$0xff] }
 0x76d   : > { %v30090_v11 = vmax.f32 %v31694_v24, %v10185_v15  ;;  %v21617_v2 = vpop.f32.mrb[28].mxu1  ;;  %v10467_v15 = vrot.slane %v10466_v23, 4  ;;  %v31503_v57 = vshll.u32 %v30076_v9, 16 }
 0x76e   : > { %14108 = vmatpush1.bf16.msra.mxu0 %v23897_v58  ;;  %14692 = vmatpush1.bf16.msra.mxu1 %v23900_v50  ;;  %v9896_v5 = vpop.f32.mrb[156].mxu0  ;;  %v21618_v14 = vpop.f32.mrb[29].mxu1  ;;  %v23914_v58 = vld [vmem:[#allocation7 + $0x38c] ss:$16 sps:$4 sm:$0xff]   ;;  %v10518_v50 = vrot.slane %v31496_v49, 4  ;;  %v10521_v32 = vrot.slane %v31697_v13, 5 }
 0x76f   : > { %31695 = vst [vmem:[#allocation52_spill] sm:$0xff] %v30090_v11  ;;  %v10238_v24 = vmax.f32 %v31696_v12, %v9896_v5  ;;  %v9898_v1 = vpop.f32.mrb[157].mxu0  ;;  %v21619_v25 = vadd.f32 %v21618_v14, %v21617_v2  ;;  %v21620_v17 = vpop.f32.mrb[30].mxu1  ;;  %14109 = vmatprep.subr.bf16.mxu0 %v23905_v16  ;;  %14693 = vmatprep.subr.bf16.mxu1 %v23908_v37  ;;  %v31699_v5 = vshrl.u32 %v30012_v22, 16  ;;  %v31700_v2 = vshll.u32 %v30012_v22, 16  ;;  %v31701_v49 = vld [vmem:[#allocation41_spill] sm:$0xff] }
 0x770   : > { %v10239_v23 = vmax.f32 %v31698_v21, %v9898_v1  ;;  %v9900_v36 = vpop.f32.mrb[158].mxu0  ;;  %v21621_v43 = vpop.f32.mrb[31].mxu1  ;;  %v31702_v21 = vld [vmem:[#allocation42_spill] sm:$0xff] }
 0x771   : > { %v10490_v12 = vrot.slane %v31699_v5, 4  ;;  %v10493_v16 = vrot.slane %v31700_v2, 5  ;;  %v21236_v37 = vpack.c.bf16 %v10238_v24, %v30057_v29  ;;  %v10190_v14 = vadd.f32 %v21619_v25, %v29899_v41  ;;  %v9902_v53 = vpop.f32.mrb[159].mxu0  ;;  %v23909_v5 = vld [vmem:[#allocation7 + $0x380] ss:$16 sps:$4 sm:$0xff]  }
 0x772   : > { %v10241_v11 = vmax.f32 %v31701_v49, %v9900_v36  ;;  %v21622_v13 = vadd.f32 %v21621_v43, %v21620_v17  ;;  %v30117_v33 = vpack.c.bf16 %v10239_v23, %v10238_v24  ;;  %v21237_v1 = vpack.c.bf16 %v10239_v23, %v30061_v63  ;;  %14110 = vmatpush1.bf16.msra.mxu0 %v23903_v54  ;;  %v23912_v2 = vld [vmem:[#allocation7 + $0x388] ss:$16 sps:$4 sm:$0xff]   ;;  %v23917_v54 = vld [vmem:[#allocation7 + $0x3a4] ss:$16 sps:$4 sm:$0xff]  }
 0x773   : > { %v10242_v28 = vmax.f32 %v31702_v21, %v9902_v53  ;;  %14694 = vmatpush1.bf16.msra.mxu1 %v23906_v61  ;;  %v30122_v29 = vmax.f32 %v31703_v56, %v10190_v14  ;;  %14111 = vmatprep.subr.bf16.mxu0 %v23911_v60  ;;  %v10439_v36 = vrot.slane %v10438_v20, 4  ;;  %v10522_v43 = vor.u32 %v10521_v32, %v10518_v50  ;;  %v23920_v53 = vld [vmem:[#allocation7 + $0x3ac] ss:$16 sps:$4 sm:$0xff]   ;;  %v31704_v61 = vld [vmem:[#allocation44_spill] sm:$0xff] }
 0x774   : > { %v10193_v41 = vadd.f32 %v21622_v13, %v29902_v42  ;;  %14695 = vmatprep.subr.bf16.mxu1 %v23914_v58  ;;  %v31501_v25 = vshrl.u32 %v30117_v33, 16  ;;  %v31500_v49 = vshll.u32 %v30117_v33, 16  ;;  %14076 = vmatprep.mubr.bf16.mxu0 %v21237_v1  ;;  %v30131_v56 = vsel %vm29975_vm8, %v10467_v15, %v10471_v38  ;;  %v23915_v60 = vld [vmem:[#allocation7 + $0x3a0] ss:$16 sps:$4 sm:$0xff]   ;;  %v23923_v23 = vld [vmem:[#allocation7 + $0x3c4] ss:$16 sps:$4 sm:$0xff]  }
 0x775   : > { %v30127_v63 = vpack.c.bf16 %v10242_v28, %v10241_v11  ;;  %14660 = vmatprep.mubr.bf16.mxu1 %v21237_v1  ;;  %v31504_v42 = vshll.u32 %v30042_v7, 16  ;;  %14077 = vmatmul.mubr.bf16.gmra.mrb[172].mxu0 %v21236_v37  ;;  %v10494_v20 = vor.u32 %v10493_v16, %v10490_v12  ;;  %v30139_v28 = vpack.c.bf16 %v30122_v29, %v30082_v35  ;;  %v23918_v11 = vld [vmem:[#allocation7 + $0x3a8] ss:$16 sps:$4 sm:$0xff]   ;;  %v23926_v12 = vld [vmem:[#allocation7 + $0x3cc] ss:$16 sps:$4 sm:$0xff]  }
 0x776   : > { %v30135_v17 = vmax.f32 %v31704_v61, %v10193_v41  ;;  %14661 = vmatmul.mubr.bf16.gmra.mrb[44].mxu1 %v21236_v37  ;;  %14112 = vmatpush1.bf16.msra.mxu0 %v23909_v5  ;;  %v31705_v24 = vshrl.u32 %v30076_v9, 16  ;;  %v10549_v38 = vrot.slane %v31503_v57, 5  ;;  %v10574_v58 = vrot.slane %v31501_v25, 4  ;;  %v23953_v57 = vld [vmem:[#allocation7 + $0x464] ss:$16 sps:$4 sm:$0xff]  }
 0x777   : > { %14696 = vmatpush1.bf16.msra.mxu1 %v23912_v2  ;;  %v10577_v50 = vrot.slane %v31500_v49, 5  ;;  %v31505_v32 = vshll.u32 %v30023_v27, 16  ;;  %14119 = vmatprep.mubr.bf16.mxu0 %v20166_v62  ;;  %v10523_v16 = vrot.slane %v10522_v43, 4  ;;  %v10444_v37 = vsel %vm29975_vm8, %v10439_v36, %v30094_v40  ;;  %v23924_v2 = vld [vmem:[#allocation7 + $0x3c8] ss:$16 sps:$4 sm:$0xff]  }
 0x778   : > { %v10546_v15 = vrot.slane %v31705_v24, 4  ;;  %14703 = vmatprep.mubr.bf16.mxu1 %v20166_v62  ;;  %14113 = vmatprep.subr.bf16.mxu0 %v23917_v54  ;;  %v10495_v13 = vrot.slane %v10494_v20, 4  ;;  %v10527_v1 = vrot.slane %v31504_v42, 5  ;;  %v30156_v21 = vcombine.high %v10444_v37, %v30131_v56  ;;  %v23921_v62 = vld [vmem:[#allocation7 + $0x3c0] ss:$16 sps:$4 sm:$0xff]  }
 0x779   : > { %14697 = vmatprep.subr.bf16.mxu1 %v23920_v53  ;;  %v10578_v14 = vor.u32 %v10577_v50, %v10574_v58  ;;  %v31499_v5 = vshll.u32 %v30127_v63, 16  ;;  %v23929_v43 = vld [vmem:[#allocation7 + $0x3e4] ss:$16 sps:$4 sm:$0xff]   ;;  %v23932_v54 = vld [vmem:[#allocation7 + $0x3ec] ss:$16 sps:$4 sm:$0xff]   ;;  %v10499_v40 = vrot.slane %v31505_v32, 5  ;;  %v30172_v20 = vpack.c.bf16 %v29918_v44, %v29918_v44 }
 0x77a   : > { %14114 = vmatpush1.bf16.msra.mxu0 %v23915_v60  ;;  %v10550_v41 = vor.u32 %v10549_v38, %v10546_v15  ;;  %v30163_v36 = vsel %vm29975_vm8, %v10523_v16, %v10527_v1  ;;  %v31502_v53 = vshll.u32 %v30087_v30, 16  ;;  %v23930_v24 = vld [vmem:[#allocation7 + $0x3e8] ss:$16 sps:$4 sm:$0xff]   ;;  %v23935_v50 = vld [vmem:[#allocation7 + $0x404] ss:$16 sps:$4 sm:$0xff]   ;;  %v30182_v44 = vpack.c.bf16 %v29912_v19, %v29912_v19 }
 0x77b   : > { %14698 = vmatpush1.bf16.msra.mxu1 %v23918_v11  ;;  %14115 = vmatprep.subr.bf16.mxu0 %v23923_v23  ;;  %v10579_v61 = vrot.slane %v10578_v14, 4  ;;  %v30168_v60 = vsel %vm29975_vm8, %v10495_v13, %v10499_v40  ;;  %31706 = vst [vmem:[#allocation53_spill] sm:$0xff] %v30172_v20  ;;  %v23927_v11 = vld [vmem:[#allocation7 + $0x3e0] ss:$16 sps:$4 sm:$0xff]   ;;  %v10583_v38 = vrot.slane %v31499_v5, 5  ;;  %v30192_v14 = vpack.c.bf16 %v29944_v52, %v29944_v52 }
 0x77c   : > { %14699 = vmatprep.subr.bf16.mxu1 %v23926_v12  ;;  %v10551_v15 = vrot.slane %v10550_v41, 4  ;;  %v30178_v58 = vcombine.high %v30168_v60, %v30163_v36  ;;  %v23938_v23 = vld [vmem:[#allocation7 + $0x40c] ss:$16 sps:$4 sm:$0xff]   ;;  %31708 = vst [vmem:[#allocation59_spill] sm:$0xff] %v30182_v44  ;;  %v10555_v12 = vrot.slane %v31502_v53, 5  ;;  %v10608_v13 = vrot.slane %v30172_v20, 5 }
 0x77d   : > { %v30188_v16 = vsel %vm29975_vm8, %v10579_v61, %v10583_v38  ;;  %31709 = vst [vmem:[#allocation57_spill] sm:$0xff] %v30192_v14  ;;  %v23933_v1 = vld [vmem:[#allocation7 + $0x400] ss:$16 sps:$4 sm:$0xff]   ;;  %v20123_v41 = vrot.slane %v30182_v44, 9  ;;  %v23944_v40 = vld [vmem:[#allocation7 + $0x42c] ss:$16 sps:$4 sm:$0xff]  }
 0x77e   : > { %14116 = vmatpush1.bf16.msra.mxu0 %v23921_v62  ;;  %31707 = vst [vmem:[#allocation54_spill] sm:$0xff] %v30178_v58  ;;  %v30197_v19 = vsel %vm29975_vm8, %v10551_v15, %v10555_v12  ;;  %v30201_v62 = vpack.c.bf16 %v29931_v48, %v29931_v48  ;;  %v10616_v61 = vrot.slane %v30192_v14, 5  ;;  %v31712_v48 = vmov 0  ;;  %v23948_v5 = vld [vmem:[#allocation7 + $0x448] ss:$16 sps:$4 sm:$0xff]  }
 0x77f   : > { %14700 = vmatpush1.bf16.msra.mxu1 %v23924_v2  ;;  %14117 = vmatprep.subr.bf16.mxu0 %v23929_v43  ;;  %v23936_v2 = vld [vmem:[#allocation7 + $0x408] ss:$16 sps:$4 sm:$0xff]   ;;  %v30205_v52 = vcombine.high %v30197_v19, %v30188_v16  ;;  %v20169_v43 = vcombine.low %v10444_v37, %v30131_v56  ;;  %v31713_v48 = vsel %vm30212_vm11, 4294967295, %v31712_v48  ;;  %v30218_v15 = vsel %vm30212_vm11, %v20123_v41, %v10608_v13  ;;  %v23947_v37 = vld [vmem:[#allocation7 + $0x444] ss:$16 sps:$4 sm:$0xff]  }
 0x780   : > { %14701 = vmatprep.subr.bf16.mxu1 %v23932_v54  ;;  %31710 = vst [vmem:[#allocation63_spill] sm:$0xff] %v30201_v62  ;;  %v23941_v54 = vld [vmem:[#allocation7 + $0x424] ss:$16 sps:$4 sm:$0xff]   ;;  %31714 = vst [vmem:[#allocation65_spill] sm:$0xff] %v31713_v48  ;;  %v20125_v56 = vrot.slane %v30201_v62, 9  ;;  %v31507_v38 = vshrl.u32 %v30182_v44, 16 }
 0x781   : > { %31711 = vst [vmem:[#allocation62_spill] sm:$0xff] %v30205_v52  ;;  %v31510_v12 = vshll.u32 %v30201_v62, 16  ;;  %v10673_v13 = vshrl.u32 %v29915_v51, 16  ;;  %v23945_v41 = vld [vmem:[#allocation7 + $0x440] ss:$16 sps:$4 sm:$0xff]   ;;  %v10838_v49 = vrot.slane %v30172_v20, 6 }
 0x782   : > { %14118 = vmatpush1.bf16.msra.mxu0 %v23927_v11  ;;  %v23939_v11 = vld [vmem:[#allocation7 + $0x420] ss:$16 sps:$4 sm:$0xff]   ;;  %v20141_v25 = vrot.slane %v30201_v62, 10  ;;  %v10733_v53 = vshrl.u32 %v29999_v18, 16 }
 0x783   : > { %14702 = vmatpush1.bf16.msra.mxu1 %v23930_v24  ;;  %14160 = vmatprep.subr.bf16.mxu0 %v23935_v50  ;;  %v23942_v24 = vld [vmem:[#allocation7 + $0x428] ss:$16 sps:$4 sm:$0xff]   ;;  %v31508_v50 = vshll.u32 %v30182_v44, 16 }
 0x784   : > { %14744 = vmatprep.subr.bf16.mxu1 %v23938_v23  ;;  %v31509_v23 = vshrl.u32 %v30201_v62, 16  ;;  %v23959_v62 = vld [vmem:[#allocation7 + $0x484] ss:$16 sps:$4 sm:$0xff]  }
 0x785   : > { %14120 = vmatmul.mubr.bf16.vlgmr.msra.gmra.mrb[160].mxu0 %v29939_v59  ;;  %v30243_v42 = vrot.slane %v31508_v50, 5 }
 0x786   : > { %14704 = vmatmul.mubr.bf16.vlgmr.msra.gmra.mrb[32].mxu1 %v29939_v59  ;;  %14129 = vmatprep.mubr.bf16.mxu0 %v20169_v43  ;;  %v23950_v59 = vld [vmem:[#allocation7 + $0x44c] ss:$16 sps:$4 sm:$0xff]   ;;  %v10420_v32 = vrot.slane %v31509_v23, 4  ;;  %v31717_v23 = vmov 0 }
 0x787   : > { %14161 = vmatpush1.bf16.msra.mxu0 %v23933_v1  ;;  %14713 = vmatprep.mubr.bf16.mxu1 %v20169_v43  ;;  %v10693_v1 = vshrl.u32 %v29933_v39, 16  ;;  %v20139_v43 = vrot.slane %v30182_v44, 10  ;;  %v31718_v23 = vsel %vm30257_vm0, 4294967295, %v31717_v23 }
 0x788   : > { %14745 = vmatpush1.bf16.msra.mxu1 %v23936_v2  ;;  %14162 = vmatprep.subr.bf16.mxu0 %v23941_v54  ;;  %v10617_v2 = vsel %vm30212_vm11, %v20125_v56, %v10616_v61  ;;  %v10846_v54 = vrot.slane %v30192_v14, 6  ;;  %v30237_v61 = vrot.slane %v31507_v38, 4  ;;  %v20172_v56 = vcombine.low %v30168_v60, %v30163_v36  ;;  %31719 = vst [vmem:[#allocation64_spill] sm:$0xff] %v31718_v23 }
 0x789   : > { %14746 = vmatprep.subr.bf16.mxu1 %v23944_v40  ;;  %v10713_v40 = vshrl.u32 %v29965_v55, 16  ;;  %v10695_v52 = vrot.slane %v10693_v1, 5  ;;  %v31715_v36 = vshrl.u32 %v29908_v47, 16  ;;  %v31716_v38 = vshll.u32 %v29908_v47, 16 }
 0x78a   : > { %v31720_v1 = vshll.u32 %v29915_v51, 16 }
 0x78b   : > { %14163 = vmatpush1.bf16.msra.mxu0 %v23939_v11  ;;  %v23956_v11 = vld [vmem:[#allocation7 + $0x46c] ss:$16 sps:$4 sm:$0xff]   ;;  %v10669_v60 = vrot.slane %v31715_v36, 5  ;;  %v10670_v50 = vrot.slane %v31716_v38, 6  ;;  %v10847_v36 = vsel %vm30257_vm0, %v20141_v25, %v10846_v54  ;;  %v30268_v38 = vrot.slane %v10733_v53, 5 }
 0x78c   : > { %14747 = vmatpush1.bf16.msra.mxu1 %v23942_v24  ;;  %14164 = vmatprep.subr.bf16.mxu0 %v23947_v37  ;;  %v10423_v24 = vrot.slane %v31510_v12, 5  ;;  %v10675_v37 = vrot.slane %v10673_v13, 5  ;;  %v30261_v12 = vrot.slane %v10713_v40, 5  ;;  %v23954_v13 = vld [vmem:[#allocation7 + $0x468] ss:$16 sps:$4 sm:$0xff]   ;;  %v10676_v44 = vrot.slane %v31720_v1, 6 }
 0x78d   : > { %14748 = vmatprep.subr.bf16.mxu1 %v23950_v59  ;;  %14130 = vmatmul.mubr.bf16.gmra.mrb[164].mxu0 %v30017_v46  ;;  %v23951_v59 = vld [vmem:[#allocation7 + $0x460] ss:$16 sps:$4 sm:$0xff]   ;;  %v10671_v48 = vor.u32 %v10670_v50, %v10669_v60  ;;  %v31721_v40 = vshrl.u32 %v29924_v6, 16  ;;  %v10396_v1 = vor.u32 %v30243_v42, %v30237_v61  ;;  %v31723_v25 = vshll.u32 %v29933_v39, 16  ;;  %v24274_v42 = vld [vmem:[#allocation7 + $0xb0c] ss:$16 sps:$4 sm:$0xff]  }
 0x78e   : > { %14714 = vmatmul.mubr.bf16.gmra.mrb[36].mxu1 %v30017_v46  ;;  %14139 = vmatprep.mubr.bf16.mxu0 %v20172_v56  ;;  %v23962_v46 = vld [vmem:[#allocation7 + $0x48c] ss:$16 sps:$4 sm:$0xff]   ;;  %v10424_v51 = vor.u32 %v10423_v24, %v10420_v32  ;;  %v23957_v50 = vld [vmem:[#allocation7 + $0x480] ss:$16 sps:$4 sm:$0xff]   ;;  %v10677_v54 = vor.u32 %v10676_v44, %v10675_v37  ;;  %v30281_v60 = vcombine.low %v30218_v15, %v10617_v2  ;;  %v23965_v44 = vld [vmem:[#allocation7 + $0x4a4] ss:$16 sps:$4 sm:$0xff]  }
 0x78f   : > { %14165 = vmatpush1.bf16.msra.mxu0 %v23945_v41  ;;  %14723 = vmatprep.mubr.bf16.mxu1 %v20172_v56  ;;  %v10689_v47 = vrot.slane %v31721_v40, 5  ;;  %v31722_v41 = vshll.u32 %v29924_v6, 16  ;;  %v10696_v53 = vrot.slane %v31723_v25, 6  ;;  %v10672_v32 = vrot.slane %v10671_v48, 4 }
 0x790   : > { %14749 = vmatpush1.bf16.msra.mxu1 %v23948_v5  ;;  %14166 = vmatprep.subr.bf16.mxu0 %v23953_v57  ;;  %v10839_v5 = vsel %vm30257_vm0, %v20139_v43, %v10838_v49  ;;  %v23960_v57 = vld [vmem:[#allocation7 + $0x488] ss:$16 sps:$4 sm:$0xff]   ;;  %v31727_v49 = vshrl.u32 %v29955_v10, 16  ;;  %v31522_v15 = vshll.u32 %v30192_v14, 16  ;;  %v31730_v37 = vshll.u32 %v29988_v4, 16 }
 0x791   : > { %v10690_v58 = vrot.slane %v31722_v41, 6  ;;  %14750 = vmatprep.subr.bf16.mxu1 %v23956_v11  ;;  %v30283_v40 = vcombine.low %v10839_v5, %v10847_v36  ;;  %v10697_v61 = vor.u32 %v10696_v53, %v10695_v52  ;;  %v31729_v11 = vshrl.u32 %v29988_v4, 16 }
 0x792   : > { %v10709_v43 = vrot.slane %v31727_v49, 5  ;;  %v10753_v52 = vshrl.u32 %v30023_v27, 16  ;;  %v10773_v48 = vshrl.u32 %v30042_v7, 16  ;;  %v20175_v36 = vcombine.low %v30197_v19, %v30188_v16  ;;  %v23963_v16 = vld [vmem:[#allocation7 + $0x4a0] ss:$16 sps:$4 sm:$0xff]  }
 0x793   : > { %v10691_v56 = vor.u32 %v10690_v58, %v10689_v47  ;;  %31724 = vst [vmem:[#allocation67_spill] sm:$0xff] %v30283_v40  ;;  %14167 = vmatpush1.bf16.msra.mxu0 %v23951_v59  ;;  %v31728_v47 = vshll.u32 %v29955_v10, 16  ;;  %v10729_v24 = vrot.slane %v31729_v11, 5  ;;  %v10730_v59 = vrot.slane %v31730_v37, 6  ;;  %v23966_v19 = vld [vmem:[#allocation7 + $0x4a8] ss:$16 sps:$4 sm:$0xff]  }
 0x794   : > { %14751 = vmatpush1.bf16.msra.mxu1 %v23954_v13  ;;  %14168 = vmatprep.subr.bf16.mxu0 %v23959_v62  ;;  %v23968_v13 = vld [vmem:[#allocation7 + $0x4ac] ss:$16 sps:$4 sm:$0xff]   ;;  %v31731_v62 = vshll.u32 %v29999_v18, 16  ;;  %v10425_v25 = vrot.slane %v10424_v51, 4  ;;  %v30310_v53 = vsel %vm30287_vm1, %v10672_v32, %v10677_v54  ;;  %v31733_v51 = vshll.u32 %v29965_v55, 16 }
 0x795   : > { %v10710_v58 = vrot.slane %v31728_v47, 6  ;;  %v10692_v2 = vrot.slane %v10691_v56, 4  ;;  %14752 = vmatprep.subr.bf16.mxu1 %v23962_v46  ;;  %14140 = vmatmul.mubr.bf16.gmra.mrb[168].mxu0 %v30050_v3  ;;  %v10731_v46 = vor.u32 %v10730_v59, %v10729_v24  ;;  %v23971_v32 = vld [vmem:[#allocation7 + $0x4c4] ss:$16 sps:$4 sm:$0xff]   ;;  %v10429_v47 = vrot.slane %v31522_v15, 5 }
 0x796   : > { %v10736_v41 = vrot.slane %v31731_v62, 6  ;;  %14724 = vmatmul.mubr.bf16.gmra.mrb[40].mxu1 %v30050_v3  ;;  %14149 = vmatprep.mubr.bf16.mxu0 %v20175_v36  ;;  %v10716_v3 = vrot.slane %v31733_v51, 6  ;;  %v23974_v11 = vld [vmem:[#allocation7 + $0x4cc] ss:$16 sps:$4 sm:$0xff]   ;;  %v31734_v24 = vshll.u32 %v30172_v20, 16 }
 0x797   : > { %v30314_v5 = vsel %vm30287_vm1, %v10692_v2, %v10697_v61  ;;  %14169 = vmatpush1.bf16.msra.mxu0 %v23957_v50  ;;  %v10711_v49 = vor.u32 %v10710_v58, %v10709_v43  ;;  %14733 = vmatprep.mubr.bf16.mxu1 %v20175_v36  ;;  %v10397_v61 = vrot.slane %v10396_v1, 4  ;;  %v10732_v50 = vrot.slane %v10731_v46, 4 }
 0x798   : > { %v30318_v56 = vcombine.high %v30310_v53, %v30314_v5  ;;  %v10737_v54 = vor.u32 %v10736_v41, %v30268_v38  ;;  %14753 = vmatpush1.bf16.msra.mxu1 %v23960_v57  ;;  %v10755_v2 = vrot.slane %v10753_v52, 5  ;;  %14170 = vmatprep.subr.bf16.mxu0 %v23965_v44  ;;  %v10401_v43 = vrot.slane %v31734_v24, 5  ;;  %v23969_v52 = vld [vmem:[#allocation7 + $0x4c0] ss:$16 sps:$4 sm:$0xff]  }
 0x799   : > { %14754 = vmatprep.subr.bf16.mxu1 %v23968_v13  ;;  %v31735_v58 = vshrl.u32 %v30012_v22, 16  ;;  %v31736_v38 = vshll.u32 %v30012_v22, 16  ;;  %v10775_v57 = vrot.slane %v10773_v48, 5  ;;  %v10793_v1 = vshrl.u32 %v30087_v30, 16  ;;  %v23972_v48 = vld [vmem:[#allocation7 + $0x4c8] ss:$16 sps:$4 sm:$0xff]  }
 0x79a   : > { %31732 = vst [vmem:[#allocation66_spill] sm:$0xff] %v30318_v56  ;;  %v10430_v36 = vsel %vm29975_vm8, %v10425_v25, %v10429_v47  ;;  %v30336_v44 = vsel %vm30287_vm1, %v10732_v50, %v10737_v54  ;;  %v10712_v13 = vrot.slane %v10711_v49, 4  ;;  %v10717_v62 = vor.u32 %v10716_v3, %v30261_v12 }
 0x79b   : > { %v10749_v37 = vrot.slane %v31735_v58, 5  ;;  %v10750_v59 = vrot.slane %v31736_v38, 6  ;;  %14171 = vmatpush1.bf16.msra.mxu0 %v23963_v16  ;;  %v31737_v46 = vshll.u32 %v30023_v27, 16  ;;  %v10402_v24 = vsel %vm29975_vm8, %v10397_v61, %v10401_v43  ;;  %v23977_v58 = vld [vmem:[#allocation7 + $0x4e4] ss:$16 sps:$4 sm:$0xff]  }
 0x79c   : > { %14755 = vmatpush1.bf16.msra.mxu1 %v23966_v19  ;;  %14172 = vmatprep.subr.bf16.mxu0 %v23971_v32  ;;  %v31738_v25 = vshrl.u32 %v30034_v0, 16  ;;  %v31739_v54 = vshll.u32 %v30034_v0, 16  ;;  %v31740_v49 = vshll.u32 %v30042_v7, 16  ;;  %v10813_v12 = vshrl.u32 %v30127_v63, 16  ;;  %v23980_v19 = vld [vmem:[#allocation7 + $0x4ec] ss:$16 sps:$4 sm:$0xff]  }
 0x79d   : > { %v10751_v41 = vor.u32 %v10750_v59, %v10749_v37  ;;  %v10756_v51 = vrot.slane %v31737_v46, 6  ;;  %14756 = vmatprep.subr.bf16.mxu1 %v23974_v11  ;;  %v20168_v3 = vcombine.low %v10402_v24, %v10430_v36  ;;  %v10795_v38 = vrot.slane %v10793_v1, 5  ;;  %14150 = vmatmul.mubr.bf16.gmra.mrb[172].mxu0 %v30139_v28  ;;  %v23975_v59 = vld [vmem:[#allocation7 + $0x4e0] ss:$16 sps:$4 sm:$0xff]  }
 0x79e   : > { %v10769_v47 = vrot.slane %v31738_v25, 5  ;;  %v10770_v16 = vrot.slane %v31739_v54, 6  ;;  %v10776_v50 = vrot.slane %v31740_v49, 6  ;;  %14734 = vmatmul.mubr.bf16.gmra.mrb[44].mxu1 %v30139_v28  ;;  %v30354_v46 = vsel %vm30287_vm1, %v10712_v13, %v10717_v62 }
 0x79f   : > { %v10752_v32 = vrot.slane %v10751_v41, 4  ;;  %v10757_v37 = vor.u32 %v10756_v51, %v10755_v2  ;;  %14173 = vmatpush1.bf16.msra.mxu0 %v23969_v52  ;;  %14192 = vmatprep.mubr.bf16.mxu0 %v20168_v3  ;;  %v31741_v36 = vshrl.u32 %v30076_v9, 16  ;;  %v31742_v1 = vshll.u32 %v30076_v9, 16  ;;  %v23983_v52 = vld [vmem:[#allocation7 + $0x504] ss:$16 sps:$4 sm:$0xff]  }
 0x7a0   : > { %v10771_v61 = vor.u32 %v10770_v16, %v10769_v47  ;;  %v10777_v43 = vor.u32 %v10776_v50, %v10775_v57  ;;  %v30364_v28 = vpack.c.bf16 %v29961_v31, %v29961_v31  ;;  %14757 = vmatpush1.bf16.msra.mxu1 %v23972_v48  ;;  %14776 = vmatprep.mubr.bf16.mxu1 %v20168_v3  ;;  %v23978_v57 = vld [vmem:[#allocation7 + $0x4e8] ss:$16 sps:$4 sm:$0xff]   ;;  %v31744_v13 = vshll.u32 %v30087_v30, 16  ;;  %v23986_v47 = vld [vmem:[#allocation7 + $0x50c] ss:$16 sps:$4 sm:$0xff]  }
 0x7a1   : > { %v10758_v11 = vsel %vm30287_vm1, %v10752_v32, %v10757_v37  ;;  %v10789_v2 = vrot.slane %v31741_v36, 5  ;;  %v10790_v41 = vrot.slane %v31742_v1, 6  ;;  %v30370_v24 = vcombine.high %v30354_v46, %v30336_v44  ;;  %14174 = vmatprep.subr.bf16.mxu0 %v23977_v58  ;;  %14758 = vmatprep.subr.bf16.mxu1 %v23980_v19  ;;  %v23981_v32 = vld [vmem:[#allocation7 + $0x500] ss:$16 sps:$4 sm:$0xff]  }
 0x7a2   : > { %31743 = vst [vmem:[#allocation68_spill] sm:$0xff] %v30364_v28  ;;  %v10772_v51 = vrot.slane %v10771_v61, 4  ;;  %v10796_v62 = vrot.slane %v31744_v13, 6  ;;  %v10815_v25 = vrot.slane %v10813_v12, 5  ;;  %v31746_v31 = vshrl.u32 %v30117_v33, 16 }
 0x7a3   : > { %31745 = vst [vmem:[#allocation72_spill] sm:$0xff] %v30370_v24  ;;  %v10791_v54 = vor.u32 %v10790_v41, %v10789_v2  ;;  %v31747_v48 = vshll.u32 %v30117_v33, 16  ;;  %14175 = vmatpush1.bf16.msra.mxu0 %v23975_v59  ;;  %v31749_v58 = vshll.u32 %v30127_v63, 16  ;;  %v30384_v36 = vpack.c.bf16 %v29968_v8, %v29968_v8  ;;  %v23992_v59 = vld [vmem:[#allocation7 + $0x52c] ss:$16 sps:$4 sm:$0xff]  }
 0x7a4   : > { %v10809_v16 = vrot.slane %v31746_v31, 5  ;;  %v10778_v50 = vsel %vm30287_vm1, %v10772_v51, %v10777_v43  ;;  %v10797_v3 = vor.u32 %v10796_v62, %v10795_v38  ;;  %v30388_v2 = vpack.c.bf16 %v29992_v34, %v29992_v34  ;;  %14759 = vmatpush1.bf16.msra.mxu1 %v23978_v57  ;;  %14176 = vmatprep.subr.bf16.mxu0 %v23983_v52  ;;  %v23984_v38 = vld [vmem:[#allocation7 + $0x508] ss:$16 sps:$4 sm:$0xff]   ;;  %v23989_v43 = vld [vmem:[#allocation7 + $0x524] ss:$16 sps:$4 sm:$0xff]  }
 0x7a5   : > { %v10810_v49 = vrot.slane %v31747_v48, 6  ;;  %v30378_v37 = vcombine.low %v10758_v11, %v10778_v50  ;;  %v10792_v61 = vrot.slane %v10791_v54, 4  ;;  %v10816_v19 = vrot.slane %v31749_v58, 6  ;;  %14760 = vmatprep.subr.bf16.mxu1 %v23986_v47  ;;  %v31751_v57 = vld [vmem:[#allocation48_spill] sm:$0xff]  ;;  %v31752_v31 = vld [vmem:[#allocation49_spill] sm:$0xff] }
 0x7a6   : > { %v10446_v1 = vshrl.u32 %v30364_v28, 16  ;;  %v10449_v8 = vshll.u32 %v30364_v28, 16  ;;  %v30394_v62 = vcombine.high %v10758_v11, %v10778_v50  ;;  %v30398_v34 = vpack.c.bf16 %v30006_v26, %v30006_v26  ;;  %v23987_v47 = vld [vmem:[#allocation7 + $0x520] ss:$16 sps:$4 sm:$0xff]   ;;  %v23990_v26 = vld [vmem:[#allocation7 + $0x528] ss:$16 sps:$4 sm:$0xff]  }
 0x7a7   : > { %31748 = vst [vmem:[#allocation71_spill] sm:$0xff] %v30378_v37  ;;  %v10811_v12 = vor.u32 %v10810_v49, %v10809_v16  ;;  %v10798_v41 = vsel %vm30287_vm1, %v10792_v61, %v10797_v3  ;;  %v10817_v13 = vor.u32 %v10816_v19, %v10815_v25  ;;  %v30402_v52 = vpack.c.bf16 %v31751_v57, %v31751_v57  ;;  %v31753_v16 = vld [vmem:[#allocation50_spill] sm:$0xff]  ;;  %v31755_v3 = vld [vmem:[#allocation51_spill] sm:$0xff] }
 0x7a8   : > { %31750 = vst [vmem:[#allocation29_spill] sm:$0xff] %v30394_v62  ;;  %14177 = vmatpush1.bf16.msra.mxu0 %v23981_v32  ;;  %v30408_v25 = vpack.c.bf16 %v31752_v31, %v31752_v31  ;;  %v30412_v11 = vpack.c.bf16 %v31753_v16, %v31753_v16  ;;  %14761 = vmatpush1.bf16.msra.mxu1 %v23984_v38  ;;  %v23995_v48 = vld [vmem:[#allocation7 + $0x544] ss:$16 sps:$4 sm:$0xff]   ;;  %v10474_v49 = vshrl.u32 %v30388_v2, 16  ;;  %v23998_v61 = vld [vmem:[#allocation7 + $0x54c] ss:$16 sps:$4 sm:$0xff]  }
 0x7a9   : > { %v10812_v51 = vrot.slane %v10811_v12, 4  ;;  %14178 = vmatprep.subr.bf16.mxu0 %v23989_v43  ;;  %v30419_v32 = vpack.c.bf16 %v31755_v3, %v31755_v3  ;;  %14762 = vmatprep.subr.bf16.mxu1 %v23992_v59  ;;  %v30421_v12 = vrot.slane %v10446_v1, 4  ;;  %v30427_v38 = vpack.c.bf16 %v30082_v35, %v30082_v35  ;;  %v31756_v43 = vld [vmem:[#allocation52_spill] sm:$0xff]  ;;  %v24004_v58 = vld [vmem:[#allocation7 + $0x56c] ss:$16 sps:$4 sm:$0xff]  }
 0x7aa   : > { %v30439_v59 = vpack.c.bf16 %v30122_v29, %v30122_v29  ;;  %v30443_v31 = vpack.c.bf16 %v30135_v17, %v30135_v17  ;;  %v23993_v16 = vld [vmem:[#allocation7 + $0x540] ss:$16 sps:$4 sm:$0xff]   ;;  %v23996_v35 = vld [vmem:[#allocation7 + $0x548] ss:$16 sps:$4 sm:$0xff]   ;;  %v10719_v15 = vrot.slane %v10446_v1, 5  ;;  %v30446_v19 = vrot.slane %v10474_v49, 4 }
 0x7ab   : > { %v10818_v54 = vsel %vm30287_vm1, %v10812_v51, %v10817_v13  ;;  %v30431_v51 = vpack.c.bf16 %v31756_v43, %v31756_v43  ;;  %v30433_v13 = vrot.slane %v10449_v8, 5  ;;  %v24001_v43 = vld [vmem:[#allocation7 + $0x564] ss:$16 sps:$4 sm:$0xff]   ;;  %v10723_v29 = vshrl.u32 %v30384_v36, 16 }
 0x7ac   : > { %v30415_v50 = vcombine.low %v10798_v41, %v10818_v54  ;;  %v30435_v57 = vcombine.high %v10798_v41, %v10818_v54  ;;  %14179 = vmatpush1.bf16.msra.mxu0 %v23987_v47  ;;  %14763 = vmatpush1.bf16.msra.mxu1 %v23990_v26  ;;  %v10720_v54 = vrot.slane %v10449_v8, 6  ;;  %v31758_v47 = vshll.u32 %v30384_v36, 16 }
 0x7ad   : > { %14180 = vmatprep.subr.bf16.mxu0 %v23995_v48  ;;  %14764 = vmatprep.subr.bf16.mxu1 %v23998_v61  ;;  %v31759_v1 = vshll.u32 %v30388_v2, 16  ;;  %v23999_v48 = vld [vmem:[#allocation7 + $0x560] ss:$16 sps:$4 sm:$0xff]   ;;  %v24002_v61 = vld [vmem:[#allocation7 + $0x568] ss:$16 sps:$4 sm:$0xff]   ;;  %v10725_v17 = vrot.slane %v10723_v29, 5 }
 0x7ae   : > { %31754 = vst [vmem:[#allocation58_spill] sm:$0xff] %v30415_v50  ;;  %31757 = vst [vmem:[#allocation30_spill] sm:$0xff] %v30435_v57  ;;  %v10726_v40 = vrot.slane %v31758_v47, 6  ;;  %v10739_v57 = vrot.slane %v10474_v49, 5  ;;  %v10721_v41 = vor.u32 %v10720_v54, %v10719_v15  ;;  %v10743_v47 = vshrl.u32 %v30398_v34, 16 }
 0x7af   : > { %v10740_v26 = vrot.slane %v31759_v1, 6  ;;  %v24007_v49 = vld [vmem:[#allocation7 + $0x584] ss:$16 sps:$4 sm:$0xff]   ;;  %v31760_v3 = vshll.u32 %v30398_v34, 16  ;;  %v31761_v8 = vshrl.u32 %v30402_v52, 16 }
 0x7b0   : > { %14181 = vmatpush1.bf16.msra.mxu0 %v23993_v16  ;;  %14765 = vmatpush1.bf16.msra.mxu1 %v23996_v35  ;;  %v10722_v56 = vrot.slane %v10721_v41, 4  ;;  %v24010_v16 = vld [vmem:[#allocation7 + $0x58c] ss:$16 sps:$4 sm:$0xff]   ;;  %v10727_v54 = vor.u32 %v10726_v40, %v10725_v17  ;;  %v10745_v29 = vrot.slane %v10743_v47, 5  ;;  %v24008_v50 = vld [vmem:[#allocation7 + $0x588] ss:$16 sps:$4 sm:$0xff]  }
 0x7b1   : > { %v10741_v24 = vor.u32 %v10740_v26, %v10739_v57  ;;  %14182 = vmatprep.subr.bf16.mxu0 %v24001_v43  ;;  %v10746_v23 = vrot.slane %v31760_v3, 6  ;;  %v10759_v15 = vrot.slane %v31761_v8, 5  ;;  %14766 = vmatprep.subr.bf16.mxu1 %v24004_v58  ;;  %v31762_v57 = vshll.u32 %v30402_v52, 16  ;;  %v24005_v3 = vld [vmem:[#allocation7 + $0x580] ss:$16 sps:$4 sm:$0xff]  }
 0x7b2   : > { %v10728_v58 = vsel %vm30287_vm1, %v10722_v56, %v10727_v54  ;;  %v10763_v17 = vshrl.u32 %v30408_v25, 16  ;;  %v24013_v8 = vld [vmem:[#allocation7 + $0x5a4] ss:$16 sps:$4 sm:$0xff]   ;;  %v31763_v47 = vshll.u32 %v30408_v25, 16  ;;  %v31764_v41 = vshrl.u32 %v30412_v11, 16 }
 0x7b3   : > { %v10742_v62 = vrot.slane %v10741_v24, 4  ;;  %v10760_v26 = vrot.slane %v31762_v57, 6  ;;  %v10747_v40 = vor.u32 %v10746_v23, %v10745_v29  ;;  %v10783_v35 = vshrl.u32 %v30419_v32, 16  ;;  %v24016_v56 = vld [vmem:[#allocation7 + $0x5ac] ss:$16 sps:$4 sm:$0xff]  }
 0x7b4   : > { %14183 = vmatpush1.bf16.msra.mxu0 %v23999_v48  ;;  %14767 = vmatpush1.bf16.msra.mxu1 %v24002_v61  ;;  %v10766_v57 = vrot.slane %v31763_v47, 6  ;;  %v10779_v43 = vrot.slane %v31764_v41, 5  ;;  %v31765_v48 = vshll.u32 %v30412_v11, 16  ;;  %v10765_v61 = vrot.slane %v10763_v17, 5  ;;  %v24011_v29 = vld [vmem:[#allocation7 + $0x5a0] ss:$16 sps:$4 sm:$0xff]  }
 0x7b5   : > { %v10761_v24 = vor.u32 %v10760_v26, %v10759_v15  ;;  %14184 = vmatprep.subr.bf16.mxu0 %v24007_v49  ;;  %14768 = vmatprep.subr.bf16.mxu1 %v24010_v16  ;;  %v10748_v23 = vsel %vm30287_vm1, %v10742_v62, %v10747_v40  ;;  %v31766_v49 = vshll.u32 %v30419_v32, 16  ;;  %v31767_v26 = vshll.u32 %v30388_v2, 16  ;;  %v24014_v16 = vld [vmem:[#allocation7 + $0x5a8] ss:$16 sps:$4 sm:$0xff]  }
 0x7b6   : > { %v10780_v1 = vrot.slane %v31765_v48, 6  ;;  %v30488_v20 = vcombine.low %v10728_v58, %v10748_v23  ;;  %v10767_v37 = vor.u32 %v10766_v57, %v10765_v61  ;;  %v10785_v14 = vrot.slane %v10783_v35, 5  ;;  %v24022_v35 = vld [vmem:[#allocation7 + $0x5cc] ss:$16 sps:$4 sm:$0xff]  }
 0x7b7   : > { %v10762_v15 = vrot.slane %v10761_v24, 4  ;;  %v10786_v54 = vrot.slane %v31766_v49, 6  ;;  %v10479_v47 = vrot.slane %v31767_v26, 5  ;;  %v31769_v62 = vshrl.u32 %v30427_v38, 16  ;;  %v24019_v49 = vld [vmem:[#allocation7 + $0x5c4] ss:$16 sps:$4 sm:$0xff]  }
 0x7b8   : > { %31768 = vst [vmem:[#allocation60_spill] sm:$0xff] %v30488_v20  ;;  %v10781_v48 = vor.u32 %v10780_v1, %v10779_v43  ;;  %14185 = vmatpush1.bf16.msra.mxu0 %v24005_v3  ;;  %v31770_v24 = vshll.u32 %v30427_v38, 16  ;;  %14769 = vmatpush1.bf16.msra.mxu1 %v24008_v50  ;;  %v10803_v26 = vshrl.u32 %v30431_v51, 16  ;;  %v31771_v58 = vshll.u32 %v30431_v51, 16  ;;  %v24025_v20 = vld [vmem:[#allocation7 + $0x5e4] ss:$16 sps:$4 sm:$0xff]  }
 0x7b9   : > { %v10799_v40 = vrot.slane %v31769_v62, 5  ;;  %14186 = vmatprep.subr.bf16.mxu0 %v24013_v8  ;;  %v31772_v1 = vshrl.u32 %v30439_v59, 16  ;;  %14770 = vmatprep.subr.bf16.mxu1 %v24016_v56  ;;  %v10768_v3 = vsel %vm30287_vm1, %v10762_v15, %v10767_v37  ;;  %v10787_v57 = vor.u32 %v10786_v54, %v10785_v14  ;;  %v24017_v62 = vld [vmem:[#allocation7 + $0x5c0] ss:$16 sps:$4 sm:$0xff]   ;;  %v24020_v56 = vld [vmem:[#allocation7 + $0x5c8] ss:$16 sps:$4 sm:$0xff]  }
 0x7ba   : > { %v10800_v17 = vrot.slane %v31770_v24, 6  ;;  %v10782_v28 = vrot.slane %v10781_v48, 4  ;;  %v10806_v23 = vrot.slane %v31771_v58, 6  ;;  %v31773_v50 = vshll.u32 %v30439_v59, 16 }
 0x7bb   : > { %v10819_v43 = vrot.slane %v31772_v1, 5  ;;  %v10480_v48 = vor.u32 %v10479_v47, %v30446_v19  ;;  %v10805_v41 = vrot.slane %v10803_v26, 5  ;;  %v10452_v14 = vor.u32 %v30433_v13, %v30421_v12  ;;  %v24028_v19 = vld [vmem:[#allocation7 + $0x5ec] ss:$16 sps:$4 sm:$0xff]   ;;  %v24023_v26 = vld [vmem:[#allocation7 + $0x5e0] ss:$16 sps:$4 sm:$0xff]  }
 0x7bc   : > { %v10801_v61 = vor.u32 %v10800_v17, %v10799_v40  ;;  %v10820_v8 = vrot.slane %v31773_v50, 6  ;;  %14187 = vmatpush1.bf16.msra.mxu0 %v24011_v29  ;;  %v10788_v24 = vsel %vm30287_vm1, %v10782_v28, %v10787_v57  ;;  %14771 = vmatpush1.bf16.msra.mxu1 %v24014_v16  ;;  %v10823_v15 = vshrl.u32 %v30443_v31, 16  ;;  %v24026_v12 = vld [vmem:[#allocation7 + $0x5e8] ss:$16 sps:$4 sm:$0xff]  }
 0x7bd   : > { %14188 = vmatprep.subr.bf16.mxu0 %v24019_v49  ;;  %v30508_v37 = vcombine.low %v10768_v3, %v10788_v24  ;;  %14772 = vmatprep.subr.bf16.mxu1 %v24022_v35  ;;  %v10807_v54 = vor.u32 %v10806_v23, %v10805_v41  ;;  %v31774_v29 = vshll.u32 %v30443_v31, 16  ;;  %v10481_v47 = vrot.slane %v10480_v48, 4  ;;  %v24031_v41 = vld [vmem:[#allocation7 + $0x604] ss:$16 sps:$4 sm:$0xff]  }
 0x7be   : > { %v10802_v58 = vrot.slane %v10801_v61, 4  ;;  %v10821_v1 = vor.u32 %v10820_v8, %v10819_v43  ;;  %v31775_v40 = vshrl.u32 %v30412_v11, 16  ;;  %v31776_v17 = vshll.u32 %v30412_v11, 16 }
 0x7bf   : > { %v10826_v28 = vrot.slane %v31774_v29, 6  ;;  %v10825_v35 = vrot.slane %v10823_v15, 5  ;;  %v10453_v23 = vrot.slane %v10452_v14, 4  ;;  %v31777_v3 = vshll.u32 %v30398_v34, 16  ;;  %v24029_v15 = vld [vmem:[#allocation7 + $0x600] ss:$16 sps:$4 sm:$0xff]  }
 0x7c0   : > { %v10532_v16 = vrot.slane %v31775_v40, 4  ;;  %v10535_v49 = vrot.slane %v31776_v17, 5  ;;  %14189 = vmatpush1.bf16.msra.mxu0 %v24017_v62  ;;  %v10808_v13 = vsel %vm30287_vm1, %v10802_v58, %v10807_v54  ;;  %v10822_v43 = vrot.slane %v10821_v1, 4  ;;  %14773 = vmatpush1.bf16.msra.mxu1 %v24020_v56  ;;  %v24034_v62 = vld [vmem:[#allocation7 + $0x60c] ss:$16 sps:$4 sm:$0xff]  }
 0x7c1   : > { %14190 = vmatprep.subr.bf16.mxu0 %v24025_v20  ;;  %v10485_v57 = vrot.slane %v31777_v3, 5  ;;  %v31778_v61 = vshrl.u32 %v30402_v52, 16  ;;  %v31779_v8 = vshll.u32 %v30402_v52, 16  ;;  %14774 = vmatprep.subr.bf16.mxu1 %v24028_v19  ;;  %v10827_v24 = vor.u32 %v10826_v28, %v10825_v35  ;;  %v24032_v28 = vld [vmem:[#allocation7 + $0x608] ss:$16 sps:$4 sm:$0xff]  }
 0x7c2   : > { %v31780_v58 = vshll.u32 %v30384_v36, 16  ;;  %v10536_v56 = vor.u32 %v10535_v49, %v10532_v16  ;;  %v24037_v17 = vld [vmem:[#allocation7 + $0x624] ss:$16 sps:$4 sm:$0xff]   ;;  %v31781_v35 = vld [vmem:[#allocation47_spill] sm:$0xff]  ;;  %v31782_v49 = vshrl.u32 %v30439_v59, 16 }
 0x7c3   : > { %v10504_v50 = vrot.slane %v31778_v61, 4  ;;  %v10507_v48 = vrot.slane %v31779_v8, 5  ;;  %v10486_v20 = vsel %vm29975_vm8, %v10481_v47, %v10485_v57  ;;  %v10828_v14 = vsel %vm30287_vm1, %v10822_v43, %v10827_v24  ;;  %v24040_v47 = vld [vmem:[#allocation7 + $0x62c] ss:$16 sps:$4 sm:$0xff]  }
 0x7c4   : > { %v10457_v1 = vrot.slane %v31780_v58, 5  ;;  %14191 = vmatpush1.bf16.msra.mxu0 %v24023_v26  ;;  %14775 = vmatpush1.bf16.msra.mxu1 %v24026_v12  ;;  %v30533_v29 = vcombine.low %v10808_v13, %v10828_v14  ;;  %v10537_v16 = vrot.slane %v10536_v56, 4  ;;  %v10588_v26 = vrot.slane %v31782_v49, 4  ;;  %v24035_v13 = vld [vmem:[#allocation7 + $0x620] ss:$16 sps:$4 sm:$0xff]  }
 0x7c5   : > { %14233 = vmatprep.subr.bf16.mxu0 %v24031_v41  ;;  %v10508_v19 = vor.u32 %v10507_v48, %v10504_v50  ;;  %14817 = vmatprep.subr.bf16.mxu1 %v24034_v62  ;;  %v31783_v12 = vshll.u32 %v30439_v59, 16  ;;  %v31785_v57 = vshrl.u32 %v30427_v38, 16  ;;  %v31786_v50 = vshll.u32 %v30427_v38, 16  ;;  %v24038_v48 = vld [vmem:[#allocation7 + $0x628] ss:$16 sps:$4 sm:$0xff]  }
 0x7c6   : > { %v10458_v54 = vsel %vm29975_vm8, %v10453_v23, %v10457_v1  ;;  %v31784_v23 = vshll.u32 %v30419_v32, 16  ;;  %v24043_v62 = vld [vmem:[#allocation7 + $0x644] ss:$16 sps:$4 sm:$0xff]   ;;  %v24046_v24 = vld [vmem:[#allocation7 + $0x64c] ss:$16 sps:$4 sm:$0xff]   ;;  %v31787_v58 = vshll.u32 %v30408_v25, 16 }
 0x7c7   : > { %v20171_v40 = vcombine.low %v10458_v54, %v10486_v20  ;;  %14193 = vmatmul.mubr.bf16.vlgmr.msra.gmra.mrb[160].mxu0 %v31781_v35  ;;  %v10591_v43 = vrot.slane %v31783_v12, 5  ;;  %14777 = vmatmul.mubr.bf16.vlgmr.msra.gmra.mrb[32].mxu1 %v31781_v35  ;;  %v10509_v41 = vrot.slane %v10508_v19, 4  ;;  %v10560_v61 = vrot.slane %v31785_v57, 4  ;;  %v24041_v14 = vld [vmem:[#allocation7 + $0x640] ss:$16 sps:$4 sm:$0xff]  }
 0x7c8   : > { %14234 = vmatpush1.bf16.msra.mxu0 %v24029_v15  ;;  %v10541_v3 = vrot.slane %v31784_v23, 5  ;;  %v10563_v8 = vrot.slane %v31786_v50, 5  ;;  %14818 = vmatpush1.bf16.msra.mxu1 %v24032_v28  ;;  %v10513_v1 = vrot.slane %v31787_v58, 5  ;;  %v24044_v19 = vld [vmem:[#allocation7 + $0x648] ss:$16 sps:$4 sm:$0xff]   ;;  %v31788_v49 = vshll.u32 %v30443_v31, 16 }
 0x7c9   : > { %14202 = vmatprep.mubr.bf16.mxu0 %v20171_v40  ;;  %14786 = vmatprep.mubr.bf16.mxu1 %v20171_v40  ;;  %v10592_v56 = vor.u32 %v10591_v43, %v10588_v26  ;;  %v24049_v40 = vld [vmem:[#allocation7 + $0x664] ss:$16 sps:$4 sm:$0xff]   ;;  %v24050_v12 = vld [vmem:[#allocation7 + $0x668] ss:$16 sps:$4 sm:$0xff]   ;;  %v24059_v58 = vld [vmem:[#allocation7 + $0x6a0] ss:$16 sps:$4 sm:$0xff]  }
 0x7ca   : > { %14235 = vmatprep.subr.bf16.mxu0 %v24037_v17  ;;  %14819 = vmatprep.subr.bf16.mxu1 %v24040_v47  ;;  %v10542_v20 = vsel %vm29975_vm8, %v10537_v16, %v10541_v3  ;;  %v10514_v15 = vsel %vm29975_vm8, %v10509_v41, %v10513_v1  ;;  %v10564_v54 = vor.u32 %v10563_v8, %v10560_v61  ;;  %v24052_v17 = vld [vmem:[#allocation7 + $0x66c] ss:$16 sps:$4 sm:$0xff]   ;;  %v24047_v47 = vld [vmem:[#allocation7 + $0x660] ss:$16 sps:$4 sm:$0xff]   ;;  %v10597_v26 = vrot.slane %v31788_v49, 5 }
 0x7cb   : > { %v20174_v28 = vcombine.low %v10514_v15, %v10542_v20  ;;  %v10593_v35 = vrot.slane %v10592_v56, 4  ;;  %v24055_v43 = vld [vmem:[#allocation7 + $0x684] ss:$16 sps:$4 sm:$0xff]   ;;  %v31789_v41 = vshll.u32 %v30431_v51, 16  ;;  %v24053_v3 = vld [vmem:[#allocation7 + $0x680] ss:$16 sps:$4 sm:$0xff]  }
 0x7cc   : > { %14236 = vmatpush1.bf16.msra.mxu0 %v24035_v13  ;;  %14820 = vmatpush1.bf16.msra.mxu1 %v24038_v48  ;;  %v10565_v16 = vrot.slane %v10564_v54, 4  ;;  %v24058_v13 = vld [vmem:[#allocation7 + $0x68c] ss:$16 sps:$4 sm:$0xff]   ;;  %v24056_v61 = vld [vmem:[#allocation7 + $0x688] ss:$16 sps:$4 sm:$0xff]   ;;  %v20124_v20 = vrot.slane %v29924_v6, 9 }
 0x7cd   : > { %14237 = vmatprep.subr.bf16.mxu0 %v24043_v62  ;;  %14821 = vmatprep.subr.bf16.mxu1 %v24046_v24  ;;  %v10569_v23 = vrot.slane %v31789_v41, 5  ;;  %v24061_v8 = vld [vmem:[#allocation7 + $0x6a4] ss:$16 sps:$4 sm:$0xff]   ;;  %v24064_v62 = vld [vmem:[#allocation7 + $0x6ac] ss:$16 sps:$4 sm:$0xff]   ;;  %v10612_v24 = vrot.slane %v29933_v39, 5 }
 0x7ce   : > { %v31790_v48 = vld [vmem:[#allocation54_spill] sm:$0xff]  ;;  %v24070_v15 = vld [vmem:[#allocation7 + $0x6cc] ss:$16 sps:$4 sm:$0xff]  }
 0x7cf   : > { %14203 = vmatmul.mubr.bf16.gmra.mrb[164].mxu0 %v30156_v21  ;;  %14787 = vmatmul.mubr.bf16.gmra.mrb[36].mxu1 %v30156_v21  ;;  %v10598_v21 = vsel %vm29975_vm8, %v10593_v35, %v10597_v26  ;;  %v10570_v57 = vsel %vm29975_vm8, %v10565_v16, %v10569_v23  ;;  %v31791_v1 = vld [vmem:[#allocation46_spill] sm:$0xff]  ;;  %v31792_v54 = vld [vmem:[#allocation45_spill] sm:$0xff] }
 0x7d0   : > { %14212 = vmatprep.mubr.bf16.mxu0 %v20174_v28  ;;  %14238 = vmatpush1.bf16.msra.mxu0 %v24041_v14  ;;  %v20177_v50 = vcombine.low %v10570_v57, %v10598_v21  ;;  %v10604_v45 = vrot.slane %v31791_v1, 5  ;;  %v24062_v56 = vld [vmem:[#allocation7 + $0x6a8] ss:$16 sps:$4 sm:$0xff]   ;;  %v24067_v14 = vld [vmem:[#allocation7 + $0x6c4] ss:$16 sps:$4 sm:$0xff]  }
 0x7d1   : > { %14796 = vmatprep.mubr.bf16.mxu1 %v20174_v28  ;;  %14822 = vmatpush1.bf16.msra.mxu1 %v24044_v19  ;;  %v20122_v19 = vrot.slane %v31792_v54, 9  ;;  %v24073_v49 = vld [vmem:[#allocation7 + $0x6e4] ss:$16 sps:$4 sm:$0xff]   ;;  %v24082_v23 = vld [vmem:[#allocation7 + $0x70c] ss:$16 sps:$4 sm:$0xff]  }
 0x7d2   : > { %14239 = vmatprep.subr.bf16.mxu0 %v24049_v40  ;;  %14823 = vmatprep.subr.bf16.mxu1 %v24052_v17  ;;  %v30571_v40 = vsel %vm30212_vm11, %v20124_v20, %v10612_v24  ;;  %v24065_v17 = vld [vmem:[#allocation7 + $0x6c0] ss:$16 sps:$4 sm:$0xff]   ;;  %v24079_v41 = vld [vmem:[#allocation7 + $0x704] ss:$16 sps:$4 sm:$0xff]   ;;  %v24100_v20 = vld [vmem:[#allocation7 + $0x76c] ss:$16 sps:$4 sm:$0xff]  }
 0x7d3   : > { %v30575_v35 = vsel %vm30212_vm11, %v20122_v19, %v10604_v45  ;;  %v31794_v26 = vld [vmem:[#allocation62_spill] sm:$0xff]  ;;  %v24106_v19 = vld [vmem:[#allocation7 + $0x78c] ss:$16 sps:$4 sm:$0xff]  }
 0x7d4   : > { %14240 = vmatpush1.bf16.msra.mxu0 %v24047_v47  ;;  %v24068_v47 = vld [vmem:[#allocation7 + $0x6c8] ss:$16 sps:$4 sm:$0xff]   ;;  %v20179_v16 = vcombine.high %v30575_v35, %v30571_v40  ;;  %v24077_v21 = vld [vmem:[#allocation7 + $0x700] ss:$16 sps:$4 sm:$0xff]   ;;  %v24085_v57 = vld [vmem:[#allocation7 + $0x724] ss:$16 sps:$4 sm:$0xff]  }
 0x7d5   : > { %14824 = vmatpush1.bf16.msra.mxu1 %v24050_v12  ;;  %14241 = vmatprep.subr.bf16.mxu0 %v24055_v43  ;;  %v24076_v12 = vld [vmem:[#allocation7 + $0x6ec] ss:$16 sps:$4 sm:$0xff]   ;;  %v24071_v43 = vld [vmem:[#allocation7 + $0x6e0] ss:$16 sps:$4 sm:$0xff]   ;;  %v24097_v45 = vld [vmem:[#allocation7 + $0x764] ss:$16 sps:$4 sm:$0xff]  }
 0x7d6   : > { %14825 = vmatprep.subr.bf16.mxu1 %v24058_v13  ;;  %v24074_v13 = vld [vmem:[#allocation7 + $0x6e8] ss:$16 sps:$4 sm:$0xff]   ;;  %v24089_v24 = vld [vmem:[#allocation7 + $0x740] ss:$16 sps:$4 sm:$0xff]  }
 0x7d7   : > { %14213 = vmatmul.mubr.bf16.gmra.mrb[168].mxu0 %v31790_v48  ;;  %14797 = vmatmul.mubr.bf16.gmra.mrb[40].mxu1 %v31790_v48  ;;  %v24091_v48 = vld [vmem:[#allocation7 + $0x744] ss:$16 sps:$4 sm:$0xff]   ;;  %v24263_v28 = vld [vmem:[#allocation7 + $0xae0] ss:$16 sps:$4 sm:$0xff]  }
 0x7d8   : > { %14222 = vmatprep.mubr.bf16.mxu0 %v20177_v50  ;;  %14242 = vmatpush1.bf16.msra.mxu0 %v24053_v3  ;;  %v24080_v3 = vld [vmem:[#allocation7 + $0x708] ss:$16 sps:$4 sm:$0xff]  }
 0x7d9   : > { %14806 = vmatprep.mubr.bf16.mxu1 %v20177_v50  ;;  %14826 = vmatpush1.bf16.msra.mxu1 %v24056_v61  ;;  %v24088_v61 = vld [vmem:[#allocation7 + $0x72c] ss:$16 sps:$4 sm:$0xff]   ;;  %v24083_v50 = vld [vmem:[#allocation7 + $0x720] ss:$16 sps:$4 sm:$0xff]  }
 0x7da   : > { %14243 = vmatprep.subr.bf16.mxu0 %v24061_v8  ;;  %14827 = vmatprep.subr.bf16.mxu1 %v24064_v62  ;;  %v24086_v8 = vld [vmem:[#allocation7 + $0x728] ss:$16 sps:$4 sm:$0xff]   ;;  %v24094_v62 = vld [vmem:[#allocation7 + $0x74c] ss:$16 sps:$4 sm:$0xff]  }
 0x7dc   : > { %14244 = vmatpush1.bf16.msra.mxu0 %v24059_v58  ;;  %v24092_v58 = vld [vmem:[#allocation7 + $0x748] ss:$16 sps:$4 sm:$0xff]  }
 0x7dd   : > { %14828 = vmatpush1.bf16.msra.mxu1 %v24062_v56  ;;  %14245 = vmatprep.subr.bf16.mxu0 %v24067_v14  ;;  %v24095_v56 = vld [vmem:[#allocation7 + $0x760] ss:$16 sps:$4 sm:$0xff]   ;;  %v24098_v14 = vld [vmem:[#allocation7 + $0x768] ss:$16 sps:$4 sm:$0xff]  }
 0x7de   : > { %14829 = vmatprep.subr.bf16.mxu1 %v24070_v15  ;;  %v24103_v15 = vld [vmem:[#allocation7 + $0x784] ss:$16 sps:$4 sm:$0xff]  }
 0x7df   : > { %14223 = vmatmul.mubr.bf16.gmra.mrb[172].mxu0 %v31794_v26  ;;  %14807 = vmatmul.mubr.bf16.gmra.mrb[44].mxu1 %v31794_v26  ;;  %v24107_v26 = vld [vmem:[#allocation7 + $0x7a0] ss:$16 sps:$4 sm:$0xff]  }
 0x7e0   : > { %14265 = vmatprep.mubr.bf16.mxu0 %v20179_v16  ;;  %14246 = vmatpush1.bf16.msra.mxu0 %v24065_v17  ;;  %v24101_v17 = vld [vmem:[#allocation7 + $0x780] ss:$16 sps:$4 sm:$0xff]  }
 0x7e1   : > { %14849 = vmatprep.mubr.bf16.mxu1 %v20179_v16  ;;  %14830 = vmatpush1.bf16.msra.mxu1 %v24068_v47  ;;  %v24104_v47 = vld [vmem:[#allocation7 + $0x788] ss:$16 sps:$4 sm:$0xff]   ;;  %v24109_v16 = vld [vmem:[#allocation7 + $0x7a4] ss:$16 sps:$4 sm:$0xff]  }
 0x7e2   : > { %14247 = vmatprep.subr.bf16.mxu0 %v24073_v49  ;;  %14831 = vmatprep.subr.bf16.mxu1 %v24076_v12  ;;  %v24112_v49 = vld [vmem:[#allocation7 + $0x7ac] ss:$16 sps:$4 sm:$0xff]   ;;  %v24110_v12 = vld [vmem:[#allocation7 + $0x7a8] ss:$16 sps:$4 sm:$0xff]  }
 0x7e4   : > { %14248 = vmatpush1.bf16.msra.mxu0 %v24071_v43  ;;  %v24115_v43 = vld [vmem:[#allocation7 + $0x7c4] ss:$16 sps:$4 sm:$0xff]  }
 0x7e5   : > { %14832 = vmatpush1.bf16.msra.mxu1 %v24074_v13  ;;  %14249 = vmatprep.subr.bf16.mxu0 %v24079_v41  ;;  %v24118_v13 = vld [vmem:[#allocation7 + $0x7cc] ss:$16 sps:$4 sm:$0xff]   ;;  %v24113_v41 = vld [vmem:[#allocation7 + $0x7c0] ss:$16 sps:$4 sm:$0xff]  }
 0x7e6   : > { %14833 = vmatprep.subr.bf16.mxu1 %v24082_v23  ;;  %v24116_v23 = vld [vmem:[#allocation7 + $0x7c8] ss:$16 sps:$4 sm:$0xff]  }
 0x7e8   : > { %14250 = vmatpush1.bf16.msra.mxu0 %v24077_v21  ;;  %v24121_v21 = vld [vmem:[#allocation7 + $0x7e4] ss:$16 sps:$4 sm:$0xff]  }
 0x7e9   : > { %14834 = vmatpush1.bf16.msra.mxu1 %v24080_v3  ;;  %14251 = vmatprep.subr.bf16.mxu0 %v24085_v57  ;;  %v24124_v3 = vld [vmem:[#allocation7 + $0x7ec] ss:$16 sps:$4 sm:$0xff]   ;;  %v10628_v57 = vrot.slane %v29999_v18, 5 }
 0x7ea   : > { %14835 = vmatprep.subr.bf16.mxu1 %v24088_v61  ;;  %v24119_v61 = vld [vmem:[#allocation7 + $0x7e0] ss:$16 sps:$4 sm:$0xff]  }
 0x7ec   : > { %14252 = vmatpush1.bf16.msra.mxu0 %v24083_v50  ;;  %v24122_v50 = vld [vmem:[#allocation7 + $0x7e8] ss:$16 sps:$4 sm:$0xff]  }
 0x7ed   : > { %14836 = vmatpush1.bf16.msra.mxu1 %v24086_v8  ;;  %14253 = vmatprep.subr.bf16.mxu0 %v24091_v48  ;;  %v24127_v8 = vld [vmem:[#allocation7 + $0x804] ss:$16 sps:$4 sm:$0xff]   ;;  %v10620_v48 = vrot.slane %v29965_v55, 5 }
 0x7ee   : > { %14837 = vmatprep.subr.bf16.mxu1 %v24094_v62  ;;  %v20128_v62 = vrot.slane %v29988_v4, 9 }
 0x7f0   : > { %14254 = vmatpush1.bf16.msra.mxu0 %v24089_v24  ;;  %v24130_v24 = vld [vmem:[#allocation7 + $0x80c] ss:$16 sps:$4 sm:$0xff]  }
 0x7f1   : > { %14838 = vmatpush1.bf16.msra.mxu1 %v24092_v58  ;;  %14255 = vmatprep.subr.bf16.mxu0 %v24097_v45  ;;  %v20126_v58 = vrot.slane %v29955_v10, 9  ;;  %v10629_v45 = vsel %vm30212_vm11, %v20128_v62, %v10628_v57  ;;  %v24140_v57 = vld [vmem:[#allocation7 + $0x848] ss:$16 sps:$4 sm:$0xff]   ;;  %v24143_v62 = vld [vmem:[#allocation7 + $0x860] ss:$16 sps:$4 sm:$0xff]  }
 0x7f2   : > { %14839 = vmatprep.subr.bf16.mxu1 %v24100_v20  ;;  %v20178_v20 = vcombine.low %v30575_v35, %v30571_v40  ;;  %v10636_v40 = vrot.slane %v30023_v27, 5  ;;  %v20132_v35 = vrot.slane %v30034_v0, 9 }
 0x7f4   : > { %14256 = vmatpush1.bf16.msra.mxu0 %v24095_v56  ;;  %v24125_v56 = vld [vmem:[#allocation7 + $0x800] ss:$16 sps:$4 sm:$0xff]  }
 0x7f5   : > { %14840 = vmatpush1.bf16.msra.mxu1 %v24098_v14  ;;  %14257 = vmatprep.subr.bf16.mxu0 %v24103_v15  ;;  %v10621_v14 = vsel %vm30212_vm11, %v20126_v58, %v10620_v48  ;;  %v24128_v15 = vld [vmem:[#allocation7 + $0x808] ss:$16 sps:$4 sm:$0xff]   ;;  %v10660_v48 = vrot.slane %v30127_v63, 5  ;;  %v20136_v58 = vrot.slane %v30117_v33, 9 }
 0x7f6   : > { %14841 = vmatprep.subr.bf16.mxu1 %v24106_v19  ;;  %v20182_v19 = vcombine.high %v10621_v14, %v10629_v45 }
 0x7f8   : > { %14258 = vmatpush1.bf16.msra.mxu0 %v24101_v17  ;;  %v24133_v17 = vld [vmem:[#allocation7 + $0x824] ss:$16 sps:$4 sm:$0xff]  }
 0x7f9   : > { %14842 = vmatpush1.bf16.msra.mxu1 %v24104_v47  ;;  %14259 = vmatprep.subr.bf16.mxu0 %v24109_v16  ;;  %v24136_v47 = vld [vmem:[#allocation7 + $0x82c] ss:$16 sps:$4 sm:$0xff]   ;;  %v10644_v16 = vrot.slane %v30042_v7, 5 }
 0x7fa   : > { %14843 = vmatprep.subr.bf16.mxu1 %v24112_v49  ;;  %v24131_v49 = vld [vmem:[#allocation7 + $0x820] ss:$16 sps:$4 sm:$0xff]  }
 0x7fc   : > { %14260 = vmatpush1.bf16.msra.mxu0 %v24107_v26  ;;  %v24134_v26 = vld [vmem:[#allocation7 + $0x828] ss:$16 sps:$4 sm:$0xff]  }
 0x7fd   : > { %14844 = vmatpush1.bf16.msra.mxu1 %v24110_v12  ;;  %14261 = vmatprep.subr.bf16.mxu0 %v24115_v43  ;;  %v24139_v12 = vld [vmem:[#allocation7 + $0x844] ss:$16 sps:$4 sm:$0xff]   ;;  %v24142_v43 = vld [vmem:[#allocation7 + $0x84c] ss:$16 sps:$4 sm:$0xff]  }
 0x7fe   : > { %14845 = vmatprep.subr.bf16.mxu1 %v24118_v13  ;;  %v20130_v13 = vrot.slane %v30012_v22, 9 }
 0x800   : > { %14262 = vmatpush1.bf16.msra.mxu0 %v24113_v41  ;;  %v10645_v41 = vsel %vm30212_vm11, %v20132_v35, %v10644_v16  ;;  %v24152_v16 = vld [vmem:[#allocation7 + $0x888] ss:$16 sps:$4 sm:$0xff]   ;;  %v24160_v35 = vld [vmem:[#allocation7 + $0x8ac] ss:$16 sps:$4 sm:$0xff]  }
 0x801   : > { %14846 = vmatpush1.bf16.msra.mxu1 %v24116_v23  ;;  %14263 = vmatprep.subr.bf16.mxu0 %v24121_v21  ;;  %v20181_v23 = vcombine.low %v10621_v14, %v10629_v45  ;;  %v24137_v21 = vld [vmem:[#allocation7 + $0x840] ss:$16 sps:$4 sm:$0xff]   ;;  %v24146_v45 = vld [vmem:[#allocation7 + $0x868] ss:$16 sps:$4 sm:$0xff]   ;;  %v20134_v14 = vrot.slane %v30076_v9, 9 }
 0x802   : > { %14847 = vmatprep.subr.bf16.mxu1 %v24124_v3  ;;  %v10637_v3 = vsel %vm30212_vm11, %v20130_v13, %v10636_v40  ;;  %v24157_v40 = vld [vmem:[#allocation7 + $0x8a4] ss:$16 sps:$4 sm:$0xff]   ;;  %v24166_v13 = vld [vmem:[#allocation7 + $0x8cc] ss:$16 sps:$4 sm:$0xff]  }
 0x804   : > { %14264 = vmatpush1.bf16.msra.mxu0 %v24119_v61  ;;  %v20185_v61 = vcombine.high %v10637_v3, %v10645_v41 }
 0x805   : > { %14848 = vmatpush1.bf16.msra.mxu1 %v24122_v50  ;;  %14306 = vmatprep.subr.bf16.mxu0 %v24127_v8  ;;  %v24145_v50 = vld [vmem:[#allocation7 + $0x864] ss:$16 sps:$4 sm:$0xff]   ;;  %v24148_v8 = vld [vmem:[#allocation7 + $0x86c] ss:$16 sps:$4 sm:$0xff]  }
 0x806   : > { %14890 = vmatprep.subr.bf16.mxu1 %v24130_v24  ;;  %v10652_v24 = vrot.slane %v30087_v30, 5 }
 0x807   : > { %14266 = vmatmul.mubr.bf16.vlgmr.msra.gmra.mrb[160].mxu0 %v20178_v20 }
 0x808   : > { %14850 = vmatmul.mubr.bf16.vlgmr.msra.gmra.mrb[32].mxu1 %v20178_v20  ;;  %14275 = vmatprep.mubr.bf16.mxu0 %v20182_v19  ;;  %v24151_v20 = vld [vmem:[#allocation7 + $0x884] ss:$16 sps:$4 sm:$0xff]  }
 0x809   : > { %14307 = vmatpush1.bf16.msra.mxu0 %v24125_v56  ;;  %14859 = vmatprep.mubr.bf16.mxu1 %v20182_v19  ;;  %v24154_v56 = vld [vmem:[#allocation7 + $0x88c] ss:$16 sps:$4 sm:$0xff]   ;;  %v20184_v19 = vcombine.low %v10637_v3, %v10645_v41  ;;  %v20190_v3 = vcombine.low %v30310_v53, %v30314_v5  ;;  %v24176_v53 = vld [vmem:[#allocation7 + $0x908] ss:$16 sps:$4 sm:$0xff]   ;;  %v24181_v5 = vld [vmem:[#allocation7 + $0x924] ss:$16 sps:$4 sm:$0xff]  }
 0x80a   : > { %14891 = vmatpush1.bf16.msra.mxu1 %v24128_v15  ;;  %14308 = vmatprep.subr.bf16.mxu0 %v24133_v17  ;;  %v10661_v15 = vsel %vm30212_vm11, %v20136_v58, %v10660_v48  ;;  %v24149_v17 = vld [vmem:[#allocation7 + $0x880] ss:$16 sps:$4 sm:$0xff]   ;;  %v24175_v48 = vld [vmem:[#allocation7 + $0x904] ss:$16 sps:$4 sm:$0xff]   ;;  %v24184_v58 = vld [vmem:[#allocation7 + $0x92c] ss:$16 sps:$4 sm:$0xff]  }
 0x80b   : > { %14892 = vmatprep.subr.bf16.mxu1 %v24136_v47  ;;  %v10653_v47 = vsel %vm30212_vm11, %v20134_v14, %v10652_v24  ;;  %v24173_v24 = vld [vmem:[#allocation7 + $0x900] ss:$16 sps:$4 sm:$0xff]   ;;  %v24190_v14 = vld [vmem:[#allocation7 + $0x94c] ss:$16 sps:$4 sm:$0xff]  }
 0x80c   : > { %v20187_v41 = vcombine.low %v10653_v47, %v10661_v15 }
 0x80d   : > { %14309 = vmatpush1.bf16.msra.mxu0 %v24131_v49  ;;  %v20188_v49 = vcombine.high %v10653_v47, %v10661_v15  ;;  %v24185_v15 = vld [vmem:[#allocation7 + $0x940] ss:$16 sps:$4 sm:$0xff]   ;;  %v24196_v47 = vld [vmem:[#allocation7 + $0x96c] ss:$16 sps:$4 sm:$0xff]  }
 0x80e   : > { %14893 = vmatpush1.bf16.msra.mxu1 %v24134_v26  ;;  %14310 = vmatprep.subr.bf16.mxu0 %v24139_v12  ;;  %v24155_v26 = vld [vmem:[#allocation7 + $0x8a0] ss:$16 sps:$4 sm:$0xff]   ;;  %v24158_v12 = vld [vmem:[#allocation7 + $0x8a8] ss:$16 sps:$4 sm:$0xff]  }
 0x80f   : > { %14276 = vmatmul.mubr.bf16.gmra.mrb[164].mxu0 %v20181_v23  ;;  %14894 = vmatprep.subr.bf16.mxu1 %v24142_v43  ;;  %v24163_v43 = vld [vmem:[#allocation7 + $0x8c4] ss:$16 sps:$4 sm:$0xff]  }
 0x810   : > { %14860 = vmatmul.mubr.bf16.gmra.mrb[36].mxu1 %v20181_v23  ;;  %14285 = vmatprep.mubr.bf16.mxu0 %v20185_v61  ;;  %v24161_v23 = vld [vmem:[#allocation7 + $0x8c0] ss:$16 sps:$4 sm:$0xff]  }
 0x811   : > { %14311 = vmatpush1.bf16.msra.mxu0 %v24137_v21  ;;  %14869 = vmatprep.mubr.bf16.mxu1 %v20185_v61  ;;  %v24164_v21 = vld [vmem:[#allocation7 + $0x8c8] ss:$16 sps:$4 sm:$0xff]   ;;  %v24172_v61 = vld [vmem:[#allocation7 + $0x8ec] ss:$16 sps:$4 sm:$0xff]  }
 0x812   : > { %14895 = vmatpush1.bf16.msra.mxu1 %v24140_v57  ;;  %14312 = vmatprep.subr.bf16.mxu0 %v24145_v50  ;;  %v24169_v57 = vld [vmem:[#allocation7 + $0x8e4] ss:$16 sps:$4 sm:$0xff]   ;;  %v24167_v50 = vld [vmem:[#allocation7 + $0x8e0] ss:$16 sps:$4 sm:$0xff]  }
 0x813   : > { %14896 = vmatprep.subr.bf16.mxu1 %v24148_v8  ;;  %v24170_v8 = vld [vmem:[#allocation7 + $0x8e8] ss:$16 sps:$4 sm:$0xff]  }
 0x815   : > { %14313 = vmatpush1.bf16.msra.mxu0 %v24143_v62  ;;  %v24178_v62 = vld [vmem:[#allocation7 + $0x90c] ss:$16 sps:$4 sm:$0xff]  }
 0x816   : > { %14897 = vmatpush1.bf16.msra.mxu1 %v24146_v45  ;;  %14314 = vmatprep.subr.bf16.mxu0 %v24151_v20  ;;  %v24179_v45 = vld [vmem:[#allocation7 + $0x920] ss:$16 sps:$4 sm:$0xff]   ;;  %v24182_v20 = vld [vmem:[#allocation7 + $0x928] ss:$16 sps:$4 sm:$0xff]  }
 0x817   : > { %14286 = vmatmul.mubr.bf16.gmra.mrb[168].mxu0 %v20184_v19  ;;  %14898 = vmatprep.subr.bf16.mxu1 %v24154_v56  ;;  %v24187_v56 = vld [vmem:[#allocation7 + $0x944] ss:$16 sps:$4 sm:$0xff]  }
 0x818   : > { %14870 = vmatmul.mubr.bf16.gmra.mrb[40].mxu1 %v20184_v19  ;;  %14295 = vmatprep.mubr.bf16.mxu0 %v20188_v49  ;;  %v24188_v19 = vld [vmem:[#allocation7 + $0x948] ss:$16 sps:$4 sm:$0xff]  }
 0x819   : > { %14315 = vmatpush1.bf16.msra.mxu0 %v24149_v17  ;;  %14879 = vmatprep.mubr.bf16.mxu1 %v20188_v49  ;;  %v24193_v17 = vld [vmem:[#allocation7 + $0x964] ss:$16 sps:$4 sm:$0xff]   ;;  %v24194_v49 = vld [vmem:[#allocation7 + $0x968] ss:$16 sps:$4 sm:$0xff]  }
 0x81a   : > { %14899 = vmatpush1.bf16.msra.mxu1 %v24152_v16  ;;  %14316 = vmatprep.subr.bf16.mxu0 %v24157_v40  ;;  %v24191_v16 = vld [vmem:[#allocation7 + $0x960] ss:$16 sps:$4 sm:$0xff]   ;;  %v24199_v40 = vld [vmem:[#allocation7 + $0x984] ss:$16 sps:$4 sm:$0xff]  }
 0x81b   : > { %14900 = vmatprep.subr.bf16.mxu1 %v24160_v35  ;;  %v24202_v35 = vld [vmem:[#allocation7 + $0x98c] ss:$16 sps:$4 sm:$0xff]  }
 0x81d   : > { %14317 = vmatpush1.bf16.msra.mxu0 %v24155_v26  ;;  %v24197_v26 = vld [vmem:[#allocation7 + $0x980] ss:$16 sps:$4 sm:$0xff]  }
 0x81e   : > { %14901 = vmatpush1.bf16.msra.mxu1 %v24158_v12  ;;  %14318 = vmatprep.subr.bf16.mxu0 %v24163_v43  ;;  %v24200_v12 = vld [vmem:[#allocation7 + $0x988] ss:$16 sps:$4 sm:$0xff]   ;;  %v24205_v43 = vld [vmem:[#allocation7 + $0x9a4] ss:$16 sps:$4 sm:$0xff]  }
 0x81f   : > { %14296 = vmatmul.mubr.bf16.gmra.mrb[172].mxu0 %v20187_v41  ;;  %14902 = vmatprep.subr.bf16.mxu1 %v24166_v13  ;;  %v24208_v13 = vld [vmem:[#allocation7 + $0x9ac] ss:$16 sps:$4 sm:$0xff]  }
 0x820   : > { %14880 = vmatmul.mubr.bf16.gmra.mrb[44].mxu1 %v20187_v41  ;;  %14338 = vmatprep.mubr.bf16.mxu0 %v20190_v3  ;;  %v24203_v41 = vld [vmem:[#allocation7 + $0x9a0] ss:$16 sps:$4 sm:$0xff]  }
 0x821   : > { %14319 = vmatpush1.bf16.msra.mxu0 %v24161_v23  ;;  %14922 = vmatprep.mubr.bf16.mxu1 %v20190_v3  ;;  %v24206_v23 = vld [vmem:[#allocation7 + $0x9a8] ss:$16 sps:$4 sm:$0xff]   ;;  %v24214_v3 = vld [vmem:[#allocation7 + $0x9cc] ss:$16 sps:$4 sm:$0xff]  }
 0x822   : > { %14903 = vmatpush1.bf16.msra.mxu1 %v24164_v21  ;;  %14320 = vmatprep.subr.bf16.mxu0 %v24169_v57  ;;  %v24211_v21 = vld [vmem:[#allocation7 + $0x9c4] ss:$16 sps:$4 sm:$0xff]   ;;  %v24209_v57 = vld [vmem:[#allocation7 + $0x9c0] ss:$16 sps:$4 sm:$0xff]  }
 0x823   : > { %14904 = vmatprep.subr.bf16.mxu1 %v24172_v61  ;;  %v24212_v61 = vld [vmem:[#allocation7 + $0x9c8] ss:$16 sps:$4 sm:$0xff]  }
 0x825   : > { %14321 = vmatpush1.bf16.msra.mxu0 %v24167_v50  ;;  %v24217_v50 = vld [vmem:[#allocation7 + $0x9e4] ss:$16 sps:$4 sm:$0xff]  }
 0x826   : > { %14905 = vmatpush1.bf16.msra.mxu1 %v24170_v8  ;;  %14322 = vmatprep.subr.bf16.mxu0 %v24175_v48  ;;  %v24220_v8 = vld [vmem:[#allocation7 + $0x9ec] ss:$16 sps:$4 sm:$0xff]   ;;  %v24215_v48 = vld [vmem:[#allocation7 + $0x9e0] ss:$16 sps:$4 sm:$0xff]  }
 0x827   : > { %14906 = vmatprep.subr.bf16.mxu1 %v24178_v62  ;;  %v24218_v62 = vld [vmem:[#allocation7 + $0x9e8] ss:$16 sps:$4 sm:$0xff]  }
 0x829   : > { %14323 = vmatpush1.bf16.msra.mxu0 %v24173_v24  ;;  %v24223_v24 = vld [vmem:[#allocation7 + $0xa04] ss:$16 sps:$4 sm:$0xff]  }
 0x82a   : > { %14907 = vmatpush1.bf16.msra.mxu1 %v24176_v53  ;;  %14324 = vmatprep.subr.bf16.mxu0 %v24181_v5  ;;  %v24226_v53 = vld [vmem:[#allocation7 + $0xa0c] ss:$16 sps:$4 sm:$0xff]   ;;  %v24221_v5 = vld [vmem:[#allocation7 + $0xa00] ss:$16 sps:$4 sm:$0xff]  }
 0x82b   : > { %14908 = vmatprep.subr.bf16.mxu1 %v24184_v58  ;;  %v24224_v58 = vld [vmem:[#allocation7 + $0xa08] ss:$16 sps:$4 sm:$0xff]  }
 0x82d   : > { %14325 = vmatpush1.bf16.msra.mxu0 %v24179_v45  ;;  %v20193_v45 = vcombine.low %v30354_v46, %v30336_v44  ;;  %v31795_v44 = vld [vmem:[#allocation68_spill] sm:$0xff] }
 0x82e   : > { %14909 = vmatpush1.bf16.msra.mxu1 %v24182_v20  ;;  %14326 = vmatprep.subr.bf16.mxu0 %v24187_v56  ;;  %v24229_v20 = vld [vmem:[#allocation7 + $0xa24] ss:$16 sps:$4 sm:$0xff]   ;;  %v10632_v56 = vrot.slane %v30398_v34, 5  ;;  %v20127_v46 = vrot.slane %v31795_v44, 9 }
 0x82f   : > { %14910 = vmatprep.subr.bf16.mxu1 %v24190_v14  ;;  %v24232_v14 = vld [vmem:[#allocation7 + $0xa2c] ss:$16 sps:$4 sm:$0xff]  }
 0x831   : > { %14327 = vmatpush1.bf16.msra.mxu0 %v24185_v15  ;;  %v10624_v15 = vrot.slane %v30384_v36, 5 }
 0x832   : > { %14911 = vmatpush1.bf16.msra.mxu1 %v24188_v19  ;;  %14328 = vmatprep.subr.bf16.mxu0 %v24193_v17  ;;  %v20129_v19 = vrot.slane %v30388_v2, 9  ;;  %v24227_v17 = vld [vmem:[#allocation7 + $0xa20] ss:$16 sps:$4 sm:$0xff]  }
 0x833   : > { %14912 = vmatprep.subr.bf16.mxu1 %v24196_v47  ;;  %v24230_v47 = vld [vmem:[#allocation7 + $0xa28] ss:$16 sps:$4 sm:$0xff]  }
 0x835   : > { %14329 = vmatpush1.bf16.msra.mxu0 %v24191_v16  ;;  %v10633_v16 = vsel %vm30212_vm11, %v20129_v19, %v10632_v56  ;;  %v24242_v19 = vld [vmem:[#allocation7 + $0xa68] ss:$16 sps:$4 sm:$0xff]  }
 0x836   : > { %14913 = vmatpush1.bf16.msra.mxu1 %v24194_v49  ;;  %14330 = vmatprep.subr.bf16.mxu0 %v24199_v40  ;;  %v24235_v49 = vld [vmem:[#allocation7 + $0xa44] ss:$16 sps:$4 sm:$0xff]   ;;  %v24238_v40 = vld [vmem:[#allocation7 + $0xa4c] ss:$16 sps:$4 sm:$0xff]  }
 0x837   : > { %14914 = vmatprep.subr.bf16.mxu1 %v24202_v35 }
 0x839   : > { %14331 = vmatpush1.bf16.msra.mxu0 %v24197_v26  ;;  %v24233_v26 = vld [vmem:[#allocation7 + $0xa40] ss:$16 sps:$4 sm:$0xff]  }
 0x83a   : > { %14915 = vmatpush1.bf16.msra.mxu1 %v24200_v12  ;;  %14332 = vmatprep.subr.bf16.mxu0 %v24205_v43  ;;  %v24236_v12 = vld [vmem:[#allocation7 + $0xa48] ss:$16 sps:$4 sm:$0xff]   ;;  %v24241_v43 = vld [vmem:[#allocation7 + $0xa64] ss:$16 sps:$4 sm:$0xff]  }
 0x83b   : > { %14916 = vmatprep.subr.bf16.mxu1 %v24208_v13  ;;  %v10648_v13 = vrot.slane %v30419_v32, 5 }
 0x83d   : > { %14333 = vmatpush1.bf16.msra.mxu0 %v24203_v41  ;;  %v24244_v41 = vld [vmem:[#allocation7 + $0xa6c] ss:$16 sps:$4 sm:$0xff]  }
 0x83e   : > { %14917 = vmatpush1.bf16.msra.mxu1 %v24206_v23  ;;  %14334 = vmatprep.subr.bf16.mxu0 %v24211_v21  ;;  %v31796_v23 = vld [vmem:[#allocation63_spill] sm:$0xff] }
 0x83f   : > { %14918 = vmatprep.subr.bf16.mxu1 %v24214_v3  ;;  %v31797_v21 = vshrl.u32 %v31796_v23, 16 }
 0x841   : > { %14335 = vmatpush1.bf16.msra.mxu0 %v24209_v57  ;;  %v10699_v3 = vrot.slane %v31797_v21, 5  ;;  %v31798_v57 = vshll.u32 %v31796_v23, 16 }
 0x842   : > { %14919 = vmatpush1.bf16.msra.mxu1 %v24212_v61  ;;  %14336 = vmatprep.subr.bf16.mxu0 %v24217_v50  ;;  %v31799_v50 = vld [vmem:[#allocation57_spill] sm:$0xff] }
 0x843   : > { %14920 = vmatprep.subr.bf16.mxu1 %v24220_v8  ;;  %v10700_v61 = vrot.slane %v31798_v57, 6  ;;  %v10703_v8 = vshrl.u32 %v31799_v50, 16 }
 0x845   : > { %14337 = vmatpush1.bf16.msra.mxu0 %v24215_v48  ;;  %v31800_v48 = vld [vmem:[#allocation71_spill] sm:$0xff] }
 0x846   : > { %14921 = vmatpush1.bf16.msra.mxu1 %v24218_v62  ;;  %14379 = vmatprep.subr.bf16.mxu0 %v24223_v24  ;;  %v10640_v62 = vrot.slane %v30408_v25, 5  ;;  %v20133_v24 = vrot.slane %v30412_v11, 9 }
 0x847   : > { %14963 = vmatprep.subr.bf16.mxu1 %v24226_v53  ;;  %v24239_v53 = vld [vmem:[#allocation7 + $0xa60] ss:$16 sps:$4 sm:$0xff]  }
 0x848   : > { %14339 = vmatmul.mubr.bf16.vlgmr.msra.gmra.mrb[160].mxu0 %v30281_v60 }
 0x849   : > { %14923 = vmatmul.mubr.bf16.vlgmr.msra.gmra.mrb[32].mxu1 %v30281_v60  ;;  %14348 = vmatprep.mubr.bf16.mxu0 %v20193_v45  ;;  %v10625_v60 = vsel %vm30212_vm11, %v20127_v46, %v10624_v15  ;;  %v24247_v46 = vld [vmem:[#allocation7 + $0xa84] ss:$16 sps:$4 sm:$0xff]  }
 0x84a   : > { %14380 = vmatpush1.bf16.msra.mxu0 %v24221_v5  ;;  %14932 = vmatprep.mubr.bf16.mxu1 %v20193_v45  ;;  %v20183_v35 = vcombine.low %v10625_v60, %v10633_v16  ;;  %v31801_v5 = vld [vmem:[#allocation59_spill] sm:$0xff]  ;;  %v31805_v60 = vshll.u32 %v31799_v50, 16 }
 0x84b   : > { %14964 = vmatpush1.bf16.msra.mxu1 %v24224_v58  ;;  %14381 = vmatprep.subr.bf16.mxu0 %v24229_v20  ;;  %v31802_v58 = vshrl.u32 %v31801_v5, 16  ;;  %v31803_v20 = vshll.u32 %v31801_v5, 16  ;;  %v24250_v16 = vld [vmem:[#allocation7 + $0xa8c] ss:$16 sps:$4 sm:$0xff]   ;;  %v24251_v5 = vld [vmem:[#allocation7 + $0xaa0] ss:$16 sps:$4 sm:$0xff]  }
 0x84c   : > { %14965 = vmatprep.subr.bf16.mxu1 %v24232_v14  ;;  %v31804_v14 = vld [vmem:[#allocation53_spill] sm:$0xff] }
 0x84d   : > { %v10679_v45 = vrot.slane %v31802_v58, 5  ;;  %v10680_v56 = vrot.slane %v31803_v20, 6  ;;  %v10683_v15 = vshrl.u32 %v31804_v14, 16  ;;  %v31806_v57 = vshll.u32 %v31804_v14, 16  ;;  %v24254_v20 = vld [vmem:[#allocation7 + $0xaa8] ss:$16 sps:$4 sm:$0xff]  }
 0x84e   : > { %14382 = vmatpush1.bf16.msra.mxu0 %v24227_v17  ;;  %v20131_v17 = vrot.slane %v30402_v52, 9 }
 0x84f   : > { %14966 = vmatpush1.bf16.msra.mxu1 %v24230_v47  ;;  %14383 = vmatprep.subr.bf16.mxu0 %v24235_v49  ;;  %v10649_v47 = vsel %vm30212_vm11, %v20133_v24, %v10648_v13  ;;  %v10701_v49 = vor.u32 %v10700_v61, %v10699_v3  ;;  %v10681_v23 = vor.u32 %v10680_v56, %v10679_v45  ;;  %v10685_v21 = vrot.slane %v10683_v15, 5  ;;  %v24248_v13 = vld [vmem:[#allocation7 + $0xa88] ss:$16 sps:$4 sm:$0xff]   ;;  %v24256_v61 = vld [vmem:[#allocation7 + $0xaac] ss:$16 sps:$4 sm:$0xff]  }
 0x850   : > { %14349 = vmatmul.mubr.bf16.gmra.mrb[164].mxu0 %v20183_v35  ;;  %14967 = vmatprep.subr.bf16.mxu1 %v24238_v40  ;;  %v10705_v40 = vrot.slane %v10703_v8, 5  ;;  %v10664_v3 = vrot.slane %v30443_v31, 5  ;;  %v10656_v24 = vrot.slane %v30431_v51, 5  ;;  %v20135_v56 = vrot.slane %v30427_v38, 9  ;;  %v24259_v15 = vld [vmem:[#allocation7 + $0xac4] ss:$16 sps:$4 sm:$0xff]  }
 0x851   : > { %14933 = vmatmul.mubr.bf16.gmra.mrb[36].mxu1 %v20183_v35  ;;  %14358 = vmatprep.mubr.bf16.mxu0 %v31800_v48  ;;  %v10706_v35 = vrot.slane %v31805_v60, 6  ;;  %v10702_v50 = vrot.slane %v10701_v49, 4  ;;  %v10682_v58 = vrot.slane %v10681_v23, 4  ;;  %v24269_v23 = vld [vmem:[#allocation7 + $0xb00] ss:$16 sps:$4 sm:$0xff]  }
 0x852   : > { %14384 = vmatpush1.bf16.msra.mxu0 %v24233_v26  ;;  %14942 = vmatprep.mubr.bf16.mxu1 %v31800_v48  ;;  %v10641_v26 = vsel %vm30212_vm11, %v20131_v17, %v10640_v62  ;;  %v10686_v48 = vrot.slane %v31806_v57, 6  ;;  %v31807_v62 = vld [vmem:[#allocation58_spill] sm:$0xff] }
 0x853   : > { %14968 = vmatpush1.bf16.msra.mxu1 %v24236_v12  ;;  %14385 = vmatprep.subr.bf16.mxu0 %v24241_v43  ;;  %v20186_v12 = vcombine.low %v10641_v26, %v10649_v47  ;;  %v24245_v43 = vld [vmem:[#allocation7 + $0xa80] ss:$16 sps:$4 sm:$0xff]   ;;  %v10707_v8 = vor.u32 %v10706_v35, %v10705_v40  ;;  %v10657_v47 = vsel %vm30212_vm11, %v20135_v56, %v10656_v24  ;;  %v24260_v40 = vld [vmem:[#allocation7 + $0xac8] ss:$16 sps:$4 sm:$0xff]   ;;  %v24265_v35 = vld [vmem:[#allocation7 + $0xae4] ss:$16 sps:$4 sm:$0xff]  }
 0x854   : > { %14969 = vmatprep.subr.bf16.mxu1 %v24244_v41  ;;  %v24253_v41 = vld [vmem:[#allocation7 + $0xaa4] ss:$16 sps:$4 sm:$0xff]   ;;  %v10687_v45 = vor.u32 %v10686_v48, %v10685_v21  ;;  %v24268_v26 = vld [vmem:[#allocation7 + $0xaec] ss:$16 sps:$4 sm:$0xff]   ;;  %v24272_v21 = vld [vmem:[#allocation7 + $0xb08] ss:$16 sps:$4 sm:$0xff]  }
 0x855   : > { %v10708_v17 = vsel %vm30287_vm1, %v10702_v50, %v10707_v8  ;;  %v24277_v57 = vld [vmem:[#allocation7 + $0xb24] ss:$16 sps:$4 sm:$0xff]   ;;  %v24280_v48 = vld [vmem:[#allocation7 + $0xb2c] ss:$16 sps:$4 sm:$0xff]   ;;  %v24281_v50 = vld [vmem:[#allocation7 + $0xb40] ss:$16 sps:$4 sm:$0xff]  }
 0x856   : > { %14386 = vmatpush1.bf16.msra.mxu0 %v24239_v53  ;;  %v20137_v53 = vrot.slane %v30439_v59, 9  ;;  %v10688_v49 = vsel %vm30287_vm1, %v10682_v58, %v10687_v45  ;;  %v24284_v8 = vld [vmem:[#allocation7 + $0xb48] ss:$16 sps:$4 sm:$0xff]   ;;  %v24292_v24 = vld [vmem:[#allocation7 + $0xb6c] ss:$16 sps:$4 sm:$0xff]  }
 0x857   : > { %14970 = vmatpush1.bf16.msra.mxu1 %v24242_v19  ;;  %14387 = vmatprep.subr.bf16.mxu0 %v24247_v46  ;;  %v24262_v19 = vld [vmem:[#allocation7 + $0xacc] ss:$16 sps:$4 sm:$0xff]   ;;  %v20192_v60 = vcombine.low %v10688_v49, %v10708_v17  ;;  %v24295_v58 = vld [vmem:[#allocation7 + $0xb84] ss:$16 sps:$4 sm:$0xff]   ;;  %v24296_v56 = vld [vmem:[#allocation7 + $0xb88] ss:$16 sps:$4 sm:$0xff]  }
 0x858   : > { %14359 = vmatmul.mubr.bf16.gmra.mrb[168].mxu0 %v20186_v12  ;;  %14971 = vmatprep.subr.bf16.mxu1 %v24250_v16  ;;  %v10665_v14 = vsel %vm30212_vm11, %v20137_v53, %v10664_v3  ;;  %v24257_v16 = vld [vmem:[#allocation7 + $0xac0] ss:$16 sps:$4 sm:$0xff]   ;;  %v24283_v3 = vld [vmem:[#allocation7 + $0xb44] ss:$16 sps:$4 sm:$0xff]   ;;  %v24298_v45 = vld [vmem:[#allocation7 + $0xb8c] ss:$16 sps:$4 sm:$0xff]  }
 0x859   : > { %14943 = vmatmul.mubr.bf16.gmra.mrb[40].mxu1 %v20186_v12  ;;  %14368 = vmatprep.mubr.bf16.mxu0 %v31807_v62  ;;  %v20189_v46 = vcombine.low %v10657_v47, %v10665_v14  ;;  %v24266_v12 = vld [vmem:[#allocation7 + $0xae8] ss:$16 sps:$4 sm:$0xff]   ;;  %v24287_v53 = vld [vmem:[#allocation7 + $0xb60] ss:$16 sps:$4 sm:$0xff]   ;;  %v24301_v14 = vld [vmem:[#allocation7 + $0xba4] ss:$16 sps:$4 sm:$0xff]  }
 0x85a   : > { %14388 = vmatpush1.bf16.msra.mxu0 %v24245_v43  ;;  %14952 = vmatprep.mubr.bf16.mxu1 %v31807_v62  ;;  %v24271_v43 = vld [vmem:[#allocation7 + $0xb04] ss:$16 sps:$4 sm:$0xff]   ;;  %v24302_v17 = vld [vmem:[#allocation7 + $0xba8] ss:$16 sps:$4 sm:$0xff]  }
 0x85b   : > { %14972 = vmatpush1.bf16.msra.mxu1 %v24248_v13  ;;  %14389 = vmatprep.subr.bf16.mxu0 %v24253_v41  ;;  %v24275_v13 = vld [vmem:[#allocation7 + $0xb20] ss:$16 sps:$4 sm:$0xff]   ;;  %v24278_v41 = vld [vmem:[#allocation7 + $0xb28] ss:$16 sps:$4 sm:$0xff]   ;;  %v24289_v62 = vld [vmem:[#allocation7 + $0xb64] ss:$16 sps:$4 sm:$0xff]  }
 0x85c   : > { %14973 = vmatprep.subr.bf16.mxu1 %v24256_v61  ;;  %v24286_v61 = vld [vmem:[#allocation7 + $0xb4c] ss:$16 sps:$4 sm:$0xff]   ;;  %v24307_v47 = vld [vmem:[#allocation7 + $0xbc4] ss:$16 sps:$4 sm:$0xff]   ;;  %v24308_v49 = vld [vmem:[#allocation7 + $0xbc8] ss:$16 sps:$4 sm:$0xff]  }
 0x85e   : > { %14390 = vmatpush1.bf16.msra.mxu0 %v24251_v5  ;;  %v24290_v5 = vld [vmem:[#allocation7 + $0xb68] ss:$16 sps:$4 sm:$0xff]  }
 0x85f   : > { %14974 = vmatpush1.bf16.msra.mxu1 %v24254_v20  ;;  %14391 = vmatprep.subr.bf16.mxu0 %v24259_v15  ;;  %v24293_v20 = vld [vmem:[#allocation7 + $0xb80] ss:$16 sps:$4 sm:$0xff]   ;;  %v24304_v15 = vld [vmem:[#allocation7 + $0xbac] ss:$16 sps:$4 sm:$0xff]  }
 0x860   : > { %14369 = vmatmul.mubr.bf16.gmra.mrb[172].mxu0 %v20189_v46  ;;  %14975 = vmatprep.subr.bf16.mxu1 %v24262_v19  ;;  %v24299_v19 = vld [vmem:[#allocation7 + $0xba0] ss:$16 sps:$4 sm:$0xff]  }
 0x861   : > { %14953 = vmatmul.mubr.bf16.gmra.mrb[44].mxu1 %v20189_v46  ;;  %14411 = vmatprep.mubr.bf16.mxu0 %v20192_v60  ;;  %v24310_v46 = vld [vmem:[#allocation7 + $0xbcc] ss:$16 sps:$4 sm:$0xff]  }
 0x862   : > { %14392 = vmatpush1.bf16.msra.mxu0 %v24257_v16  ;;  %14995 = vmatprep.mubr.bf16.mxu1 %v20192_v60  ;;  %v24305_v16 = vld [vmem:[#allocation7 + $0xbc0] ss:$16 sps:$4 sm:$0xff]   ;;  %v24316_v60 = vld [vmem:[#allocation7 + $0xbec] ss:$16 sps:$4 sm:$0xff]  }
 0x863   : > { %14976 = vmatpush1.bf16.msra.mxu1 %v24260_v40  ;;  %14393 = vmatprep.subr.bf16.mxu0 %v24265_v35  ;;  %v24313_v40 = vld [vmem:[#allocation7 + $0xbe4] ss:$16 sps:$4 sm:$0xff]   ;;  %v24311_v35 = vld [vmem:[#allocation7 + $0xbe0] ss:$16 sps:$4 sm:$0xff]  }
 0x864   : > { %14977 = vmatprep.subr.bf16.mxu1 %v24268_v26  ;;  %v24314_v26 = vld [vmem:[#allocation7 + $0xbe8] ss:$16 sps:$4 sm:$0xff]  }
 0x866   : > { %14394 = vmatpush1.bf16.msra.mxu0 %v24263_v28  ;;  %v24319_v28 = vld [vmem:[#allocation7 + $0xc04] ss:$16 sps:$4 sm:$0xff]  }
 0x867   : > { %14978 = vmatpush1.bf16.msra.mxu1 %v24266_v12  ;;  %14395 = vmatprep.subr.bf16.mxu0 %v24271_v43  ;;  %v24322_v12 = vld [vmem:[#allocation7 + $0xc0c] ss:$16 sps:$4 sm:$0xff]   ;;  %v24317_v43 = vld [vmem:[#allocation7 + $0xc00] ss:$16 sps:$4 sm:$0xff]  }
 0x868   : > { %14979 = vmatprep.subr.bf16.mxu1 %v24274_v42  ;;  %v24320_v42 = vld [vmem:[#allocation7 + $0xc08] ss:$16 sps:$4 sm:$0xff]  }
 0x86a   : > { %14396 = vmatpush1.bf16.msra.mxu0 %v24269_v23  ;;  %v24325_v23 = vld [vmem:[#allocation7 + $0xc24] ss:$16 sps:$4 sm:$0xff]  }
 0x86b   : > { %14980 = vmatpush1.bf16.msra.mxu1 %v24272_v21  ;;  %14397 = vmatprep.subr.bf16.mxu0 %v24277_v57  ;;  %v31808_v21 = vld [vmem:[#allocation66_spill] sm:$0xff]  ;;  %v24328_v57 = vld [vmem:[#allocation7 + $0xc2c] ss:$16 sps:$4 sm:$0xff]  }
 0x86c   : > { %14981 = vmatprep.subr.bf16.mxu1 %v24280_v48  ;;  %v31809_v48 = vld [vmem:[#allocation60_spill] sm:$0xff] }
 0x86e   : > { %14398 = vmatpush1.bf16.msra.mxu0 %v24275_v13  ;;  %v24323_v13 = vld [vmem:[#allocation7 + $0xc20] ss:$16 sps:$4 sm:$0xff]  }
 0x86f   : > { %14982 = vmatpush1.bf16.msra.mxu1 %v24278_v41  ;;  %14399 = vmatprep.subr.bf16.mxu0 %v24283_v3  ;;  %v24326_v41 = vld [vmem:[#allocation7 + $0xc28] ss:$16 sps:$4 sm:$0xff]   ;;  %v24331_v3 = vld [vmem:[#allocation7 + $0xc44] ss:$16 sps:$4 sm:$0xff]  }
 0x870   : > { %14983 = vmatprep.subr.bf16.mxu1 %v24286_v61  ;;  %v24334_v61 = vld [vmem:[#allocation7 + $0xc4c] ss:$16 sps:$4 sm:$0xff]  }
 0x872   : > { %14400 = vmatpush1.bf16.msra.mxu0 %v24281_v50  ;;  %v24329_v50 = vld [vmem:[#allocation7 + $0xc40] ss:$16 sps:$4 sm:$0xff]  }
 0x873   : > { %14984 = vmatpush1.bf16.msra.mxu1 %v24284_v8  ;;  %14401 = vmatprep.subr.bf16.mxu0 %v24289_v62  ;;  %v24332_v8 = vld [vmem:[#allocation7 + $0xc48] ss:$16 sps:$4 sm:$0xff]   ;;  %v24337_v62 = vld [vmem:[#allocation7 + $0xc64] ss:$16 sps:$4 sm:$0xff]  }
 0x874   : > { %14985 = vmatprep.subr.bf16.mxu1 %v24292_v24  ;;  %v31810_v24 = vld [vmem:[#allocation72_spill] sm:$0xff] }
 0x876   : > { %14402 = vmatpush1.bf16.msra.mxu0 %v24287_v53  ;;  %v24340_v53 = vld [vmem:[#allocation7 + $0xc6c] ss:$16 sps:$4 sm:$0xff]  }
 0x877   : > { %14986 = vmatpush1.bf16.msra.mxu1 %v24290_v5  ;;  %14403 = vmatprep.subr.bf16.mxu0 %v24295_v58  ;;  %v24335_v5 = vld [vmem:[#allocation7 + $0xc60] ss:$16 sps:$4 sm:$0xff]   ;;  %v24338_v58 = vld [vmem:[#allocation7 + $0xc68] ss:$16 sps:$4 sm:$0xff]  }
 0x878   : > { %14987 = vmatprep.subr.bf16.mxu1 %v24298_v45  ;;  %v24343_v45 = vld [vmem:[#allocation7 + $0xc84] ss:$16 sps:$4 sm:$0xff]  }
 0x87a   : > { %14404 = vmatpush1.bf16.msra.mxu0 %v24293_v20  ;;  %v24346_v20 = vld [vmem:[#allocation7 + $0xc8c] ss:$16 sps:$4 sm:$0xff]  }
 0x87b   : > { %14988 = vmatpush1.bf16.msra.mxu1 %v24296_v56  ;;  %14405 = vmatprep.subr.bf16.mxu0 %v24301_v14  ;;  %v24341_v56 = vld [vmem:[#allocation7 + $0xc80] ss:$16 sps:$4 sm:$0xff]   ;;  %v24344_v14 = vld [vmem:[#allocation7 + $0xc88] ss:$16 sps:$4 sm:$0xff]  }
 0x87c   : > { %14989 = vmatprep.subr.bf16.mxu1 %v24304_v15  ;;  %v24349_v15 = vld [vmem:[#allocation7 + $0xca4] ss:$16 sps:$4 sm:$0xff]  }
 0x87e   : > { %14406 = vmatpush1.bf16.msra.mxu0 %v24299_v19  ;;  %v31811_v19 = vld [vmem:[#allocation29_spill] sm:$0xff] }
 0x87f   : > { %14990 = vmatpush1.bf16.msra.mxu1 %v24302_v17  ;;  %14407 = vmatprep.subr.bf16.mxu0 %v24307_v47  ;;  %v24352_v17 = vld [vmem:[#allocation7 + $0xcac] ss:$16 sps:$4 sm:$0xff]   ;;  %v10842_v47 = vrot.slane %v29933_v39, 6  ;;  %v20138_v39 = vrot.slane %v31792_v54, 10 }
 0x880   : > { %14991 = vmatprep.subr.bf16.mxu1 %v24310_v46  ;;  %v10834_v46 = vrot.slane %v31791_v1, 6  ;;  %v24364_v54 = vld [vmem:[#allocation7 + $0xcec] ss:$16 sps:$4 sm:$0xff]  }
 0x882   : > { %14408 = vmatpush1.bf16.msra.mxu0 %v24305_v16  ;;  %v20140_v16 = vrot.slane %v29924_v6, 10  ;;  %v24356_v6 = vld [vmem:[#allocation7 + $0xcc8] ss:$16 sps:$4 sm:$0xff]  }
 0x883   : > { %14992 = vmatpush1.bf16.msra.mxu1 %v24308_v49  ;;  %14409 = vmatprep.subr.bf16.mxu0 %v24313_v40  ;;  %v24350_v49 = vld [vmem:[#allocation7 + $0xca8] ss:$16 sps:$4 sm:$0xff]   ;;  %v24355_v40 = vld [vmem:[#allocation7 + $0xcc4] ss:$16 sps:$4 sm:$0xff]  }
 0x884   : > { %14993 = vmatprep.subr.bf16.mxu1 %v24316_v60  ;;  %v24358_v60 = vld [vmem:[#allocation7 + $0xccc] ss:$16 sps:$4 sm:$0xff]  }
 0x886   : > { %14410 = vmatpush1.bf16.msra.mxu0 %v24311_v35 }
 0x887   : > { %14994 = vmatpush1.bf16.msra.mxu1 %v24314_v26  ;;  %14452 = vmatprep.subr.bf16.mxu0 %v24319_v28  ;;  %v30677_v26 = vsel %vm30257_vm0, %v20140_v16, %v10842_v47  ;;  %v24353_v28 = vld [vmem:[#allocation7 + $0xcc0] ss:$16 sps:$4 sm:$0xff]   ;;  %v24400_v47 = vld [vmem:[#allocation7 + $0xdac] ss:$16 sps:$4 sm:$0xff]   ;;  %v24403_v16 = vld [vmem:[#allocation7 + $0xdc4] ss:$16 sps:$4 sm:$0xff]  }
 0x888   : > { %15036 = vmatprep.subr.bf16.mxu1 %v24322_v12  ;;  %v24361_v12 = vld [vmem:[#allocation7 + $0xce4] ss:$16 sps:$4 sm:$0xff]  }
 0x889   : > { %14412 = vmatmul.mubr.bf16.vlgmr.msra.gmra.mrb[160].mxu0 %v31808_v21 }
 0x88a   : > { %14996 = vmatmul.mubr.bf16.vlgmr.msra.gmra.mrb[32].mxu1 %v31808_v21  ;;  %14421 = vmatprep.mubr.bf16.mxu0 %v31809_v48  ;;  %v24367_v21 = vld [vmem:[#allocation7 + $0xd04] ss:$16 sps:$4 sm:$0xff]  }
 0x88b   : > { %14453 = vmatpush1.bf16.msra.mxu0 %v24317_v43  ;;  %15005 = vmatprep.mubr.bf16.mxu1 %v31809_v48  ;;  %v31813_v43 = vld [vmem:[#allocation30_spill] sm:$0xff] }
 0x88c   : > { %15037 = vmatpush1.bf16.msra.mxu1 %v24320_v42  ;;  %14454 = vmatprep.subr.bf16.mxu0 %v24325_v23  ;;  %v24359_v42 = vld [vmem:[#allocation7 + $0xce0] ss:$16 sps:$4 sm:$0xff]   ;;  %v24362_v23 = vld [vmem:[#allocation7 + $0xce8] ss:$16 sps:$4 sm:$0xff]  }
 0x88d   : > { %15038 = vmatprep.subr.bf16.mxu1 %v24328_v57  ;;  %v24370_v57 = vld [vmem:[#allocation7 + $0xd0c] ss:$16 sps:$4 sm:$0xff]   ;;  %v24365_v48 = vld [vmem:[#allocation7 + $0xd00] ss:$16 sps:$4 sm:$0xff]  }
 0x88f   : > { %14455 = vmatpush1.bf16.msra.mxu0 %v24323_v13  ;;  %v24368_v13 = vld [vmem:[#allocation7 + $0xd08] ss:$16 sps:$4 sm:$0xff]  }
 0x890   : > { %15039 = vmatpush1.bf16.msra.mxu1 %v24326_v41  ;;  %14456 = vmatprep.subr.bf16.mxu0 %v24331_v3  ;;  %v24373_v41 = vld [vmem:[#allocation7 + $0xd24] ss:$16 sps:$4 sm:$0xff]   ;;  %v24376_v3 = vld [vmem:[#allocation7 + $0xd2c] ss:$16 sps:$4 sm:$0xff]  }
 0x891   : > { %14422 = vmatmul.mubr.bf16.gmra.mrb[164].mxu0 %v31810_v24  ;;  %15040 = vmatprep.subr.bf16.mxu1 %v24334_v61  ;;  %v24371_v61 = vld [vmem:[#allocation7 + $0xd20] ss:$16 sps:$4 sm:$0xff]  }
 0x892   : > { %15006 = vmatmul.mubr.bf16.gmra.mrb[36].mxu1 %v31810_v24  ;;  %14431 = vmatprep.mubr.bf16.mxu0 %v30508_v37  ;;  %v24377_v24 = vld [vmem:[#allocation7 + $0xd40] ss:$16 sps:$4 sm:$0xff]  }
 0x893   : > { %14457 = vmatpush1.bf16.msra.mxu0 %v24329_v50  ;;  %15015 = vmatprep.mubr.bf16.mxu1 %v30508_v37  ;;  %v24347_v37 = vld [vmem:[#allocation7 + $0xca0] ss:$16 sps:$4 sm:$0xff]   ;;  %v24374_v50 = vld [vmem:[#allocation7 + $0xd28] ss:$16 sps:$4 sm:$0xff]  }
 0x894   : > { %15041 = vmatpush1.bf16.msra.mxu1 %v24332_v8  ;;  %14458 = vmatprep.subr.bf16.mxu0 %v24337_v62  ;;  %v24379_v8 = vld [vmem:[#allocation7 + $0xd44] ss:$16 sps:$4 sm:$0xff]   ;;  %v24382_v62 = vld [vmem:[#allocation7 + $0xd4c] ss:$16 sps:$4 sm:$0xff]  }
 0x895   : > { %15042 = vmatprep.subr.bf16.mxu1 %v24340_v53  ;;  %v24380_v53 = vld [vmem:[#allocation7 + $0xd48] ss:$16 sps:$4 sm:$0xff]  }
 0x897   : > { %14459 = vmatpush1.bf16.msra.mxu0 %v24335_v5  ;;  %v24385_v5 = vld [vmem:[#allocation7 + $0xd64] ss:$16 sps:$4 sm:$0xff]  }
 0x898   : > { %15043 = vmatpush1.bf16.msra.mxu1 %v24338_v58  ;;  %14460 = vmatprep.subr.bf16.mxu0 %v24343_v45  ;;  %v24388_v58 = vld [vmem:[#allocation7 + $0xd6c] ss:$16 sps:$4 sm:$0xff]   ;;  %v24383_v45 = vld [vmem:[#allocation7 + $0xd60] ss:$16 sps:$4 sm:$0xff]  }
 0x899   : > { %14432 = vmatmul.mubr.bf16.gmra.mrb[168].mxu0 %v31811_v19  ;;  %15044 = vmatprep.subr.bf16.mxu1 %v24346_v20  ;;  %v24386_v20 = vld [vmem:[#allocation7 + $0xd68] ss:$16 sps:$4 sm:$0xff]  }
 0x89a   : > { %15016 = vmatmul.mubr.bf16.gmra.mrb[40].mxu1 %v31811_v19  ;;  %14441 = vmatprep.mubr.bf16.mxu0 %v30533_v29  ;;  %v24392_v19 = vld [vmem:[#allocation7 + $0xd88] ss:$16 sps:$4 sm:$0xff]  }
 0x89b   : > { %14461 = vmatpush1.bf16.msra.mxu0 %v24341_v56  ;;  %15025 = vmatprep.mubr.bf16.mxu1 %v30533_v29  ;;  %v30681_v29 = vsel %vm30257_vm0, %v20138_v39, %v10834_v46  ;;  %v24391_v56 = vld [vmem:[#allocation7 + $0xd84] ss:$16 sps:$4 sm:$0xff]   ;;  %v24398_v46 = vld [vmem:[#allocation7 + $0xda8] ss:$16 sps:$4 sm:$0xff]  }
 0x89c   : > { %15045 = vmatpush1.bf16.msra.mxu1 %v24344_v14  ;;  %14462 = vmatprep.subr.bf16.mxu0 %v24349_v15  ;;  %v20203_v1 = vcombine.high %v30681_v29, %v30677_v26  ;;  %v24394_v14 = vld [vmem:[#allocation7 + $0xd8c] ss:$16 sps:$4 sm:$0xff]   ;;  %v24389_v15 = vld [vmem:[#allocation7 + $0xd80] ss:$16 sps:$4 sm:$0xff]   ;;  %v24409_v39 = vld [vmem:[#allocation7 + $0xde4] ss:$16 sps:$4 sm:$0xff]  }
 0x89d   : > { %15046 = vmatprep.subr.bf16.mxu1 %v24352_v17  ;;  %v24397_v17 = vld [vmem:[#allocation7 + $0xda4] ss:$16 sps:$4 sm:$0xff]  }
 0x89f   : > { %14463 = vmatpush1.bf16.msra.mxu0 %v24347_v37  ;;  %v24395_v37 = vld [vmem:[#allocation7 + $0xda0] ss:$16 sps:$4 sm:$0xff]  }
 0x8a0   : > { %15047 = vmatpush1.bf16.msra.mxu1 %v24350_v49  ;;  %14464 = vmatprep.subr.bf16.mxu0 %v24355_v40  ;;  %v24406_v49 = vld [vmem:[#allocation7 + $0xdcc] ss:$16 sps:$4 sm:$0xff]   ;;  %v24401_v40 = vld [vmem:[#allocation7 + $0xdc0] ss:$16 sps:$4 sm:$0xff]  }
 0x8a1   : > { %14442 = vmatmul.mubr.bf16.gmra.mrb[172].mxu0 %v31813_v43  ;;  %15048 = vmatprep.subr.bf16.mxu1 %v24358_v60  ;;  %v24404_v60 = vld [vmem:[#allocation7 + $0xdc8] ss:$16 sps:$4 sm:$0xff]  }
 0x8a2   : > { %15026 = vmatmul.mubr.bf16.gmra.mrb[44].mxu1 %v31813_v43  ;;  %14484 = vmatprep.mubr.bf16.mxu0 %v20203_v1  ;;  %v24415_v43 = vld [vmem:[#allocation7 + $0xe04] ss:$16 sps:$4 sm:$0xff]  }
 0x8a3   : > { %14465 = vmatpush1.bf16.msra.mxu0 %v24353_v28  ;;  %15068 = vmatprep.mubr.bf16.mxu1 %v20203_v1  ;;  %v24412_v28 = vld [vmem:[#allocation7 + $0xdec] ss:$16 sps:$4 sm:$0xff]   ;;  %v24407_v1 = vld [vmem:[#allocation7 + $0xde0] ss:$16 sps:$4 sm:$0xff]  }
 0x8a4   : > { %15049 = vmatpush1.bf16.msra.mxu1 %v24356_v6  ;;  %14466 = vmatprep.subr.bf16.mxu0 %v24361_v12  ;;  %v10858_v6 = vrot.slane %v29999_v18, 6  ;;  %v24410_v12 = vld [vmem:[#allocation7 + $0xde8] ss:$16 sps:$4 sm:$0xff]   ;;  %v20202_v18 = vcombine.low %v30681_v29, %v30677_v26  ;;  %v10866_v26 = vrot.slane %v30023_v27, 6  ;;  %v20148_v29 = vrot.slane %v30034_v0, 10 }
 0x8a5   : > { %15050 = vmatprep.subr.bf16.mxu1 %v24364_v54  ;;  %v10850_v54 = vrot.slane %v29965_v55, 6  ;;  %v24416_v55 = vld [vmem:[#allocation7 + $0xe08] ss:$16 sps:$4 sm:$0xff]  }
 0x8a6   : > { %v24428_v27 = vld [vmem:[#allocation7 + $0xe48] ss:$16 sps:$4 sm:$0xff]  }
 0x8a7   : > { %14467 = vmatpush1.bf16.msra.mxu0 %v24359_v42  ;;  %v20144_v42 = vrot.slane %v29988_v4, 10 }
 0x8a8   : > { %15051 = vmatpush1.bf16.msra.mxu1 %v24362_v23  ;;  %14468 = vmatprep.subr.bf16.mxu0 %v24367_v21  ;;  %v24418_v23 = vld [vmem:[#allocation7 + $0xe0c] ss:$16 sps:$4 sm:$0xff]   ;;  %v20142_v21 = vrot.slane %v29955_v10, 10  ;;  %v10874_v10 = vrot.slane %v30042_v7, 6 }
 0x8a9   : > { %15052 = vmatprep.subr.bf16.mxu1 %v24370_v57  ;;  %v10859_v57 = vsel %vm30257_vm0, %v20144_v42, %v10858_v6  ;;  %v24454_v6 = vld [vmem:[#allocation7 + $0xecc] ss:$16 sps:$4 sm:$0xff]  }
 0x8aa   : > { %v10875_v7 = vsel %vm30257_vm0, %v20148_v29, %v10874_v10  ;;  %v24460_v42 = vld [vmem:[#allocation7 + $0xeec] ss:$16 sps:$4 sm:$0xff]  }
 0x8ab   : > { %14469 = vmatpush1.bf16.msra.mxu0 %v24365_v48  ;;  %v24413_v48 = vld [vmem:[#allocation7 + $0xe00] ss:$16 sps:$4 sm:$0xff]  }
 0x8ac   : > { %15053 = vmatpush1.bf16.msra.mxu1 %v24368_v13  ;;  %14470 = vmatprep.subr.bf16.mxu0 %v24373_v41  ;;  %v10851_v13 = vsel %vm30257_vm0, %v20142_v21, %v10850_v54  ;;  %v24421_v41 = vld [vmem:[#allocation7 + $0xe24] ss:$16 sps:$4 sm:$0xff]   ;;  %v24455_v21 = vld [vmem:[#allocation7 + $0xee0] ss:$16 sps:$4 sm:$0xff]  }
 0x8ad   : > { %15054 = vmatprep.subr.bf16.mxu1 %v24376_v3  ;;  %v20206_v4 = vcombine.high %v10851_v13, %v10859_v57  ;;  %v24424_v3 = vld [vmem:[#allocation7 + $0xe2c] ss:$16 sps:$4 sm:$0xff]   ;;  %v24457_v54 = vld [vmem:[#allocation7 + $0xee4] ss:$16 sps:$4 sm:$0xff]  }
 0x8af   : > { %14471 = vmatpush1.bf16.msra.mxu0 %v24371_v61  ;;  %v24419_v61 = vld [vmem:[#allocation7 + $0xe20] ss:$16 sps:$4 sm:$0xff]  }
 0x8b0   : > { %15055 = vmatpush1.bf16.msra.mxu1 %v24374_v50  ;;  %14472 = vmatprep.subr.bf16.mxu0 %v24379_v8  ;;  %v24422_v50 = vld [vmem:[#allocation7 + $0xe28] ss:$16 sps:$4 sm:$0xff]   ;;  %v24427_v8 = vld [vmem:[#allocation7 + $0xe44] ss:$16 sps:$4 sm:$0xff]  }
 0x8b1   : > { %15056 = vmatprep.subr.bf16.mxu1 %v24382_v62  ;;  %v24430_v62 = vld [vmem:[#allocation7 + $0xe4c] ss:$16 sps:$4 sm:$0xff]  }
 0x8b3   : > { %14473 = vmatpush1.bf16.msra.mxu0 %v24377_v24  ;;  %v20146_v24 = vrot.slane %v30012_v22, 10  ;;  %v24431_v22 = vld [vmem:[#allocation7 + $0xe60] ss:$16 sps:$4 sm:$0xff]  }
 0x8b4   : > { %15057 = vmatpush1.bf16.msra.mxu1 %v24380_v53  ;;  %14474 = vmatprep.subr.bf16.mxu0 %v24385_v5  ;;  %v20205_v53 = vcombine.low %v10851_v13, %v10859_v57  ;;  %v24425_v5 = vld [vmem:[#allocation7 + $0xe40] ss:$16 sps:$4 sm:$0xff]   ;;  %v24458_v57 = vld [vmem:[#allocation7 + $0xee8] ss:$16 sps:$4 sm:$0xff]   ;;  %v10854_v13 = vrot.slane %v30384_v36, 6  ;;  %v20149_v36 = vrot.slane %v30412_v11, 10 }
 0x8b5   : > { %15058 = vmatprep.subr.bf16.mxu1 %v24388_v58  ;;  %v10867_v58 = vsel %vm30257_vm0, %v20146_v24, %v10866_v26  ;;  %v20151_v11 = vrot.slane %v30427_v38, 10  ;;  %v11592_v24 = vld [vmem:[#allocation8] sm:$0xf]  ;;  %v31818_v38 = vld [vmem:[#allocation56_spill] sm:$0xff] }
 0x8b6   : > { %v20209_v0 = vcombine.high %v10867_v58, %v10875_v7 }
 0x8b7   : > { %14475 = vmatpush1.bf16.msra.mxu0 %v24383_v45  ;;  %v24433_v45 = vld [vmem:[#allocation7 + $0xe64] ss:$16 sps:$4 sm:$0xff]  }
 0x8b8   : > { %15059 = vmatpush1.bf16.msra.mxu1 %v24386_v20  ;;  %14476 = vmatprep.subr.bf16.mxu0 %v24391_v56  ;;  %v24436_v20 = vld [vmem:[#allocation7 + $0xe6c] ss:$16 sps:$4 sm:$0xff]   ;;  %v10890_v56 = vrot.slane %v30127_v63, 6 }
 0x8b9   : > { %15060 = vmatprep.subr.bf16.mxu1 %v24394_v14  ;;  %v10882_v14 = vrot.slane %v30087_v30, 6 }
 0x8bb   : > { %14477 = vmatpush1.bf16.msra.mxu0 %v24389_v15  ;;  %v20152_v15 = vrot.slane %v30117_v33, 10  ;;  %v24440_v33 = vld [vmem:[#allocation7 + $0xe88] ss:$16 sps:$4 sm:$0xff]  }
 0x8bc   : > { %15061 = vmatpush1.bf16.msra.mxu1 %v24392_v19  ;;  %14478 = vmatprep.subr.bf16.mxu0 %v24397_v17  ;;  %v24434_v19 = vld [vmem:[#allocation7 + $0xe68] ss:$16 sps:$4 sm:$0xff]   ;;  %v24439_v17 = vld [vmem:[#allocation7 + $0xe84] ss:$16 sps:$4 sm:$0xff]  }
 0x8bd   : > { %15062 = vmatprep.subr.bf16.mxu1 %v24400_v47  ;;  %v24442_v47 = vld [vmem:[#allocation7 + $0xe8c] ss:$16 sps:$4 sm:$0xff]   ;;  %v10891_v63 = vsel %vm30257_vm0, %v20152_v15, %v10890_v56 }
 0x8bf   : > { %14479 = vmatpush1.bf16.msra.mxu0 %v24395_v37  ;;  %v20150_v37 = vrot.slane %v30076_v9, 10  ;;  %v24443_v9 = vld [vmem:[#allocation7 + $0xea0] ss:$16 sps:$4 sm:$0xff]  }
 0x8c0   : > { %15063 = vmatpush1.bf16.msra.mxu1 %v24398_v46  ;;  %14480 = vmatprep.subr.bf16.mxu0 %v24403_v16  ;;  %v20208_v46 = vcombine.low %v10867_v58, %v10875_v7  ;;  %v24437_v16 = vld [vmem:[#allocation7 + $0xe80] ss:$16 sps:$4 sm:$0xff]  }
 0x8c1   : > { %15064 = vmatprep.subr.bf16.mxu1 %v24406_v49  ;;  %v10883_v49 = vsel %vm30257_vm0, %v20150_v37, %v10882_v14  ;;  %v31819_v58 = vld [vmem:[#allocation70_spill] sm:$0xff] }
 0x8c2   : > { %v20212_v30 = vcombine.high %v10883_v49, %v10891_v63  ;;  %v30751_v35 = vrot.slane %v11592_v24, %v31819_v58 }
 0x8c3   : > { %14481 = vmatpush1.bf16.msra.mxu0 %v24401_v40  ;;  %v24445_v40 = vld [vmem:[#allocation7 + $0xea4] ss:$16 sps:$4 sm:$0xff]  }
 0x8c4   : > { %15065 = vmatpush1.bf16.msra.mxu1 %v24404_v60  ;;  %14482 = vmatprep.subr.bf16.mxu0 %v24409_v39  ;;  %v24448_v60 = vld [vmem:[#allocation7 + $0xeac] ss:$16 sps:$4 sm:$0xff]   ;;  %v24446_v39 = vld [vmem:[#allocation7 + $0xea8] ss:$16 sps:$4 sm:$0xff]  }
 0x8c5   : > { %15066 = vmatprep.subr.bf16.mxu1 %v24412_v28  ;;  %v24451_v28 = vld [vmem:[#allocation7 + $0xec4] ss:$16 sps:$4 sm:$0xff]  }
 0x8c7   : > { %14483 = vmatpush1.bf16.msra.mxu0 %v24407_v1  ;;  %v20211_v1 = vcombine.low %v10883_v49, %v10891_v63 }
 0x8c8   : > { %15067 = vmatpush1.bf16.msra.mxu1 %v24410_v12  ;;  %14525 = vmatprep.subr.bf16.mxu0 %v24415_v43  ;;  %v24449_v12 = vld [vmem:[#allocation7 + $0xec0] ss:$16 sps:$4 sm:$0xff]   ;;  %v24452_v43 = vld [vmem:[#allocation7 + $0xec8] ss:$16 sps:$4 sm:$0xff]  }
 0x8c9   : > { %15109 = vmatprep.subr.bf16.mxu1 %v24418_v23  ;;  %v25493_v23 = vmov 0  }
 0x8ca   : > { %14485 = vmatmul.mubr.bf16.vlgmr.msra.gmra.mrb[160].mxu0 %v20202_v18 }
 0x8cb   : > { %15069 = vmatmul.mubr.bf16.vlgmr.msra.gmra.mrb[32].mxu1 %v20202_v18  ;;  %14494 = vmatprep.mubr.bf16.mxu0 %v20206_v4  ;;  %v10862_v18 = vrot.slane %v30398_v34, 6  ;;  %v10878_v34 = vrot.slane %v30419_v32, 6  ;;  %v10886_v32 = vrot.slane %v30431_v51, 6  ;;  %v31816_v51 = vld [vmem:[#allocation55_spill] sm:$0xff] }
 0x8cc   : > { %14526 = vmatpush1.bf16.msra.mxu0 %v24413_v48  ;;  %15078 = vmatprep.mubr.bf16.mxu1 %v20206_v4  ;;  %v31814_v48 = vld [vmem:[#allocation67_spill] sm:$0xff]  ;;  %v20143_v4 = vrot.slane %v31795_v44, 10  ;;  %v30742_v7 = vrot.slane %v11592_v24, %v31816_v51 }
 0x8cd   : > { %15110 = vmatpush1.bf16.msra.mxu1 %v24416_v55  ;;  %14527 = vmatprep.subr.bf16.mxu0 %v24421_v41  ;;  %v20145_v55 = vrot.slane %v30388_v2, 10  ;;  %v20147_v2 = vrot.slane %v30402_v52, 10  ;;  %v10879_v44 = vsel %vm30257_vm0, %v20149_v36, %v10878_v34 }
 0x8ce   : > { %15111 = vmatprep.subr.bf16.mxu1 %v24424_v3  ;;  %v10855_v3 = vsel %vm30257_vm0, %v20143_v4, %v10854_v13 }
 0x8cf   : > { %v10863_v41 = vsel %vm30257_vm0, %v20145_v55, %v10862_v18 }
 0x8d0   : > { %14528 = vmatpush1.bf16.msra.mxu0 %v24419_v61  ;;  %v20207_v10 = vcombine.low %v10855_v3, %v10863_v41  ;;  %v10870_v61 = vrot.slane %v30408_v25, 6  ;;  %v20153_v25 = vrot.slane %v30439_v59, 10  ;;  %v31817_v59 = vld [vmem:[#allocation69_spill] sm:$0xff] }
 0x8d1   : > { %15112 = vmatpush1.bf16.msra.mxu1 %v24422_v50  ;;  %14529 = vmatprep.subr.bf16.mxu0 %v24427_v8  ;;  %v10894_v50 = vrot.slane %v30443_v31, 6  ;;  %v10887_v8 = vsel %vm30257_vm0, %v20151_v11, %v10886_v32  ;;  %v31815_v31 = vmov 0.0  }
 0x8d2   : > { %14495 = vmatmul.mubr.bf16.gmra.mrb[164].mxu0 %v20205_v53  ;;  %15113 = vmatprep.subr.bf16.mxu1 %v24430_v62  ;;  %v10871_v26 = vsel %vm30257_vm0, %v20147_v2, %v10870_v61 }
 0x8d3   : > { %15079 = vmatmul.mubr.bf16.gmra.mrb[36].mxu1 %v20205_v53  ;;  %14504 = vmatprep.mubr.bf16.mxu0 %v20209_v0  ;;  %v20210_v29 = vcombine.low %v10871_v26, %v10879_v44  ;;  %v10895_v52 = vsel %vm30257_vm0, %v20153_v25, %v10894_v50  ;;  %v30745_v53 = vrot.slane %v11592_v24, %v31817_v59 }
 0x8d4   : > { %14530 = vmatpush1.bf16.msra.mxu0 %v24425_v5  ;;  %15088 = vmatprep.mubr.bf16.mxu1 %v20209_v0  ;;  %v20213_v62 = vcombine.low %v10887_v8, %v10895_v52  ;;  %v30748_v5 = vrot.slane %v11592_v24, %v31818_v38 }
 0x8d5   : > { %15114 = vmatpush1.bf16.msra.mxu1 %v24428_v27  ;;  %14531 = vmatprep.subr.bf16.mxu0 %v24433_v45 }
 0x8d6   : > { %15115 = vmatprep.subr.bf16.mxu1 %v24436_v20 }
 0x8d8   : > { %14532 = vmatpush1.bf16.msra.mxu0 %v24431_v22 }
 0x8d9   : > { %15116 = vmatpush1.bf16.msra.mxu1 %v24434_v19  ;;  %14533 = vmatprep.subr.bf16.mxu0 %v24439_v17 }
 0x8da   : > { %14505 = vmatmul.mubr.bf16.gmra.mrb[168].mxu0 %v20208_v46  ;;  %15117 = vmatprep.subr.bf16.mxu1 %v24442_v47 }
 0x8db   : > { %15089 = vmatmul.mubr.bf16.gmra.mrb[40].mxu1 %v20208_v46  ;;  %14514 = vmatprep.mubr.bf16.mxu0 %v20212_v30 }
 0x8dc   : > { %14534 = vmatpush1.bf16.msra.mxu0 %v24437_v16  ;;  %15098 = vmatprep.mubr.bf16.mxu1 %v20212_v30 }
 0x8dd   : > { %15118 = vmatpush1.bf16.msra.mxu1 %v24440_v33  ;;  %14535 = vmatprep.subr.bf16.mxu0 %v24445_v40 }
 0x8de   : > { %15119 = vmatprep.subr.bf16.mxu1 %v24448_v60 }
 0x8e0   : > { %14536 = vmatpush1.bf16.msra.mxu0 %v24443_v9 }
 0x8e1   : > { %15120 = vmatpush1.bf16.msra.mxu1 %v24446_v39  ;;  %14537 = vmatprep.subr.bf16.mxu0 %v24451_v28 }
 0x8e2   : > { %14515 = vmatmul.mubr.bf16.gmra.mrb[172].mxu0 %v20211_v1  ;;  %15121 = vmatprep.subr.bf16.mxu1 %v24454_v6 }
 0x8e3   : > { %15099 = vmatmul.mubr.bf16.gmra.mrb[44].mxu1 %v20211_v1  ;;  %14557 = vmatprep.mubr.bf16.mxu0 %v25493_v23 }
 0x8e4   : > { %14538 = vmatpush1.bf16.msra.mxu0 %v24449_v12  ;;  %15141 = vmatprep.mubr.bf16.mxu1 %v25493_v23 }
 0x8e5   : > { %15122 = vmatpush1.bf16.msra.mxu1 %v24452_v43  ;;  %14539 = vmatprep.subr.bf16.mxu0 %v24457_v54 }
 0x8e6   : > { %15123 = vmatprep.subr.bf16.mxu1 %v24460_v42 }
 0x8e8   : > { %14540 = vmatpush1.bf16.msra.mxu0 %v24455_v21 }
 0x8e9   : > { %15124 = vmatpush1.bf16.msra.mxu1 %v24458_v57 }
 0x8eb   : > { %14558 = vmatmul.mubr.bf16.vlgmr.msra.gmra.mrb[160].mxu0 %v31814_v48 }
 0x8ec   : > { %15142 = vmatmul.mubr.bf16.vlgmr.msra.gmra.mrb[32].mxu1 %v31814_v48  ;;  %14567 = vmatprep.mubr.bf16.mxu0 %v25493_v23 }
 0x8ed   : > { %15151 = vmatprep.mubr.bf16.mxu1 %v25493_v23 }
 0x8f3   : > { %14568 = vmatmul.mubr.bf16.gmra.mrb[164].mxu0 %v20207_v10 }
 0x8f4   : > { %15152 = vmatmul.mubr.bf16.gmra.mrb[36].mxu1 %v20207_v10  ;;  %14577 = vmatprep.mubr.bf16.mxu0 %v25493_v23 }
 0x8f5   : > { %15161 = vmatprep.mubr.bf16.mxu1 %v25493_v23 }
 0x8fb   : > { %14578 = vmatmul.mubr.bf16.gmra.mrb[168].mxu0 %v20210_v29 }
 0x8fc   : > { %15162 = vmatmul.mubr.bf16.gmra.mrb[40].mxu1 %v20210_v29  ;;  %14587 = vmatprep.mubr.bf16.mxu0 %v25493_v23 }
 0x8fd   : > { %15171 = vmatprep.mubr.bf16.mxu1 %v25493_v23 }
 0x903   : > { %14588 = vmatmul.mubr.bf16.gmra.mrb[172].mxu0 %v20213_v62 }
 0x904   : > { %15172 = vmatmul.mubr.bf16.gmra.mrb[44].mxu1 %v20213_v62  ;;  %15295 = vmatprep.mubr.f32.mxu0 %v31815_v31 }
 0x905   : > { %15384 = vmatprep.mubr.f32.mxu1 %v31815_v31 }
 0x9be   : > { %v14559_v27 = vpop.f32.mrb[160].mxu0 }
 0x9bf   : > { %v22031_v0 = vadd.f32 %v14559_v27, %v30742_v7  ;;  %v15143_v45 = vpop.f32.mrb[32].mxu1  ;;  %v14561_v20 = vpop.f32.mrb[161].mxu0 }
 0x9c0   : > { %v22047_v56 = vadd.f32 %v15143_v45, %v30745_v53  ;;  %v22032_v22 = vadd.f32 %v14561_v20, %v30748_v5  ;;  %v15145_v14 = vpop.f32.mrb[33].mxu1  ;;  %v14563_v15 = vpop.f32.mrb[162].mxu0 }
 0x9c1   : > { %v22048_v19 = vadd.f32 %v15145_v14, %v30751_v35  ;;  %v22033_v17 = vadd.f32 %v14563_v15, %v30742_v7  ;;  %v15147_v47 = vpop.f32.mrb[34].mxu1  ;;  %v14565_v37 = vpop.f32.mrb[163].mxu0  ;;  %v15182_v49 = vmax.f32 %v22031_v0, 0.0 }
 0x9c2   : > { %v22049_v63 = vadd.f32 %v15147_v47, %v30745_v53  ;;  %v22034_v46 = vadd.f32 %v14565_v37, %v30748_v5  ;;  %v15149_v16 = vpop.f32.mrb[35].mxu1  ;;  %v15184_v40 = vmax.f32 %v22047_v56, 0.0  ;;  %v15183_v60 = vmax.f32 %v22032_v22, 0.0 }
 0x9c3   : > { %v15186_v33 = vmax.f32 %v22033_v17, 0.0  ;;  %v22050_v30 = vadd.f32 %v15149_v16, %v30751_v35  ;;  %v15185_v28 = vmax.f32 %v22048_v19, 0.0 }
 0x9c4   : > { %v15188_v9 = vmax.f32 %v22049_v63, 0.0  ;;  %v15187_v39 = vmax.f32 %v22034_v46, 0.0 }
 0x9c5   : > { %v30761_v6 = vpack.c.bf16 %v15186_v33, %v15182_v49  ;;  %v15189_v1 = vmax.f32 %v22050_v30, 0.0 }
 0x9c6   : > { %v30763_v12 = vpack.c.bf16 %v15188_v9, %v15184_v40  ;;  %v30765_v43 = vpack.c.bf16 %v15187_v39, %v15183_v60  ;;  %v14569_v54 = vpop.f32.mrb[164].mxu0 }
 0x9c7   : > { %v30767_v42 = vpack.c.bf16 %v15189_v1, %v15185_v28  ;;  %v22035_v23 = vadd.f32 %v14569_v54, %v30742_v7  ;;  %v15153_v21 = vpop.f32.mrb[36].mxu1  ;;  %v14571_v57 = vpop.f32.mrb[165].mxu0 }
 0x9c8   : > { %v22051_v18 = vadd.f32 %v15153_v21, %v30745_v53  ;;  %v22036_v48 = vadd.f32 %v14571_v57, %v30748_v5  ;;  %v15155_v13 = vpop.f32.mrb[37].mxu1  ;;  %v14573_v55 = vpop.f32.mrb[166].mxu0  ;;  %21968 = vmatprep.subr.bf16.mxu0 %v30765_v43 }
 0x9c9   : > { %v22052_v4 = vadd.f32 %v15155_v13, %v30751_v35  ;;  %v22037_v41 = vadd.f32 %v14573_v55, %v30742_v7  ;;  %v15157_v3 = vpop.f32.mrb[38].mxu1  ;;  %21984 = vmatprep.subr.bf16.mxu1 %v30767_v42  ;;  %v14575_v10 = vpop.f32.mrb[167].mxu0  ;;  %21970 = vmatpush1.bf16.msra.mxu0 %v30761_v6  ;;  %v15190_v2 = vmax.f32 %v22035_v23, 0.0 }
 0x9ca   : > { %v22053_v34 = vadd.f32 %v15157_v3, %v30745_v53  ;;  %v22038_v61 = vadd.f32 %v14575_v10, %v30748_v5  ;;  %v15159_v36 = vpop.f32.mrb[39].mxu1  ;;  %21986 = vmatpush1.bf16.msra.mxu1 %v30763_v12  ;;  %v15192_v29 = vmax.f32 %v22051_v18, 0.0  ;;  %v15191_v50 = vmax.f32 %v22036_v48, 0.0 }
 0x9cb   : > { %v15194_v44 = vmax.f32 %v22037_v41, 0.0  ;;  %v22054_v26 = vadd.f32 %v15159_v36, %v30751_v35  ;;  %v15193_v11 = vmax.f32 %v22052_v4, 0.0 }
 0x9cc   : > { %v15196_v32 = vmax.f32 %v22053_v34, 0.0  ;;  %v15195_v25 = vmax.f32 %v22038_v61, 0.0 }
 0x9cd   : > { %v30781_v52 = vpack.c.bf16 %v15194_v44, %v15190_v2  ;;  %v15197_v8 = vmax.f32 %v22054_v26, 0.0 }
 0x9ce   : > { %v30783_v62 = vpack.c.bf16 %v15196_v32, %v15192_v29  ;;  %v30785_v24 = vpack.c.bf16 %v15195_v25, %v15191_v50  ;;  %v14579_v27 = vpop.f32.mrb[168].mxu0 }
 0x9cf   : > { %v30787_v0 = vpack.c.bf16 %v15197_v8, %v15193_v11  ;;  %v22039_v45 = vadd.f32 %v14579_v27, %v30742_v7  ;;  %v15163_v20 = vpop.f32.mrb[40].mxu1  ;;  %v14581_v56 = vpop.f32.mrb[169].mxu0 }
 0x9d0   : > { %v22055_v22 = vadd.f32 %v15163_v20, %v30745_v53  ;;  %v22040_v14 = vadd.f32 %v14581_v56, %v30748_v5  ;;  %v15165_v15 = vpop.f32.mrb[41].mxu1  ;;  %v14583_v19 = vpop.f32.mrb[170].mxu0  ;;  %21972 = vmatprep.subr.bf16.mxu0 %v30785_v24 }
 0x9d1   : > { %v22056_v17 = vadd.f32 %v15165_v15, %v30751_v35  ;;  %v22041_v47 = vadd.f32 %v14583_v19, %v30742_v7  ;;  %v15167_v37 = vpop.f32.mrb[42].mxu1  ;;  %21988 = vmatprep.subr.bf16.mxu1 %v30787_v0  ;;  %v14585_v63 = vpop.f32.mrb[171].mxu0  ;;  %21974 = vmatpush1.bf16.msra.mxu0 %v30781_v52  ;;  %v15198_v33 = vmax.f32 %v22039_v45, 0.0 }
 0x9d2   : > { %v22057_v46 = vadd.f32 %v15167_v37, %v30745_v53  ;;  %v22042_v16 = vadd.f32 %v14585_v63, %v30748_v5  ;;  %v15169_v49 = vpop.f32.mrb[43].mxu1  ;;  %21990 = vmatpush1.bf16.msra.mxu1 %v30783_v62  ;;  %v15200_v60 = vmax.f32 %v22055_v22, 0.0  ;;  %v15199_v9 = vmax.f32 %v22040_v14, 0.0  ;;  %v24475_v37 = vld [vmem:[%s31433_s8 + $0x24] ss:$8 sps:$4 sm:$0xff]   ;;  %v15412_v63 = vld [vmem:[#allocation10 + $0x30] sm:$0xff] }
 0x9d3   : > { %v15202_v30 = vmax.f32 %v22041_v47, 0.0  ;;  %v22058_v40 = vadd.f32 %v15169_v49, %v30751_v35  ;;  %v15201_v1 = vmax.f32 %v22056_v17, 0.0  ;;  %v24467_v17 = vld [vmem:[%s31433_s8 + $0x10] ss:$8 sps:$4 sm:$0xff]   ;;  %v24472_v47 = vld [vmem:[%s31433_s8 + $0x214] ss:$8 sps:$4 sm:$0xff]  }
 0x9d4   : > { %v15204_v39 = vmax.f32 %v22057_v46, 0.0  ;;  %v15203_v28 = vmax.f32 %v22042_v16, 0.0  ;;  %v24470_v46 = vld [vmem:[%s31433_s8 + $0x210] ss:$8 sps:$4 sm:$0xff]   ;;  %v24473_v16 = vld [vmem:[%s31433_s8 + $0x20] ss:$8 sps:$4 sm:$0xff]  }
 0x9d5   : > { %v30801_v54 = vpack.c.bf16 %v15202_v30, %v15198_v33  ;;  %v15205_v23 = vmax.f32 %v22058_v40, 0.0  ;;  %v24478_v49 = vld [vmem:[%s31433_s8 + $0x224] ss:$8 sps:$4 sm:$0xff]   ;;  %v24481_v33 = vld [vmem:[%s31433_s8 + $0x34] ss:$8 sps:$4 sm:$0xff]  }
 0x9d6   : > { %v30803_v21 = vpack.c.bf16 %v15204_v39, %v15200_v60  ;;  %v21975_v57 = vpack.c.bf16 %v15203_v28, %v15199_v9  ;;  %v14589_v18 = vpop.f32.mrb[172].mxu0  ;;  %v15413_v30 = vld [vmem:[#allocation10 + $0x38] sm:$0xff]  ;;  %v24479_v60 = vld [vmem:[%s31433_s8 + $0x30] ss:$8 sps:$4 sm:$0xff]   ;;  %v24484_v9 = vld [vmem:[%s31433_s8 + $0x234] ss:$8 sps:$4 sm:$0xff]  }
 0x9d7   : > { %v21991_v48 = vpack.c.bf16 %v15205_v23, %v15201_v1  ;;  %v22043_v13 = vadd.f32 %v14589_v18, %v30742_v7  ;;  %v15173_v55 = vpop.f32.mrb[44].mxu1  ;;  %v14591_v4 = vpop.f32.mrb[173].mxu0  ;;  %v24476_v40 = vld [vmem:[%s31433_s8 + $0x220] ss:$8 sps:$4 sm:$0xff]   ;;  %v24487_v39 = vld [vmem:[%s31433_s8 + $0x44] ss:$8 sps:$4 sm:$0xff]  }
 0x9d8   : > { %v22059_v41 = vadd.f32 %v15173_v55, %v30745_v53  ;;  %v22044_v3 = vadd.f32 %v14591_v4, %v30748_v5  ;;  %v15175_v10 = vpop.f32.mrb[45].mxu1  ;;  %v14593_v34 = vpop.f32.mrb[174].mxu0  ;;  %21976 = vmatprep.subr.bf16.mxu0 %v21975_v57  ;;  %v24482_v28 = vld [vmem:[%s31433_s8 + $0x230] ss:$8 sps:$4 sm:$0xff]   ;;  %v24485_v1 = vld [vmem:[%s31433_s8 + $0x40] ss:$8 sps:$4 sm:$0xff]  }
 0x9d9   : > { %v22060_v61 = vadd.f32 %v15175_v10, %v30751_v35  ;;  %v22045_v36 = vadd.f32 %v14593_v34, %v30742_v7  ;;  %v15177_v2 = vpop.f32.mrb[46].mxu1  ;;  %21992 = vmatprep.subr.bf16.mxu1 %v21991_v48  ;;  %v14595_v44 = vpop.f32.mrb[175].mxu0  ;;  %21978 = vmatpush1.bf16.msra.mxu0 %v30801_v54  ;;  %v15206_v32 = vmax.f32 %v22043_v13, 0.0  ;;  %v24488_v23 = vld [vmem:[%s31433_s8 + $0x240] ss:$8 sps:$4 sm:$0xff]  }
 0x9da   : > { %v22061_v26 = vadd.f32 %v15177_v2, %v30745_v53  ;;  %v22046_v29 = vadd.f32 %v14595_v44, %v30748_v5  ;;  %v15179_v50 = vpop.f32.mrb[47].mxu1  ;;  %21994 = vmatpush1.bf16.msra.mxu1 %v30803_v21  ;;  %v15208_v8 = vmax.f32 %v22059_v41, 0.0  ;;  %v15207_v27 = vmax.f32 %v22044_v3, 0.0  ;;  %v15214_v53 = vld [vmem:[#allocation10] sm:$0xff]  ;;  %v15215_v5 = vld [vmem:[#allocation10 + $0x8] sm:$0xff] }
 0x9db   : > { %v15210_v25 = vmax.f32 %v22045_v36, 0.0  ;;  %v22062_v11 = vadd.f32 %v15179_v50, %v30751_v35  ;;  %v15209_v20 = vmax.f32 %v22060_v61, 0.0  ;;  %v15216_v35 = vld [vmem:[#allocation10 + $0x10] sm:$0xff]  ;;  %v24499_v18 = vld [vmem:[%s31433_s8 + $0x64] ss:$8 sps:$4 sm:$0xff]  }
 0x9dc   : > { %v15212_v45 = vmax.f32 %v22061_v26, 0.0  ;;  %v15211_v7 = vmax.f32 %v22046_v29, 0.0  ;;  %v24497_v13 = vld [vmem:[%s31433_s8 + $0x60] ss:$8 sps:$4 sm:$0xff]   ;;  %v24502_v55 = vld [vmem:[%s31433_s8 + $0x264] ss:$8 sps:$4 sm:$0xff]  }
 0x9dd   : > { %v21981_v56 = vpack.c.bf16 %v15210_v25, %v15206_v32  ;;  %v15213_v22 = vmax.f32 %v22062_v11, 0.0  ;;  %v24505_v4 = vld [vmem:[%s31433_s8 + $0x74] ss:$8 sps:$4 sm:$0xff]   ;;  %v24500_v41 = vld [vmem:[%s31433_s8 + $0x260] ss:$8 sps:$4 sm:$0xff]  }
 0x9de   : > { %v21997_v14 = vpack.c.bf16 %v15212_v45, %v15208_v8  ;;  %v21979_v15 = vpack.c.bf16 %v15211_v7, %v15207_v27  ;;  %v24503_v3 = vld [vmem:[%s31433_s8 + $0x70] ss:$8 sps:$4 sm:$0xff]   ;;  %v24508_v10 = vld [vmem:[%s31433_s8 + $0x274] ss:$8 sps:$4 sm:$0xff]   ;;  %v24511_v34 = vld [vmem:[%s31433_s8 + $0x84] ss:$8 sps:$4 sm:$0xff]  }
 0x9df   : > { %v21995_v19 = vpack.c.bf16 %v15213_v22, %v15209_v20  ;;  %v24506_v61 = vld [vmem:[%s31433_s8 + $0x270] ss:$8 sps:$4 sm:$0xff]   ;;  %v24509_v36 = vld [vmem:[%s31433_s8 + $0x80] ss:$8 sps:$4 sm:$0xff]   ;;  %v24514_v2 = vld [vmem:[%s31433_s8 + $0x284] ss:$8 sps:$4 sm:$0xff]  }
 0x9e0   : > { %21980 = vmatprep.subr.bf16.mxu0 %v21979_v15  ;;  %v24517_v44 = vld [vmem:[%s31433_s8 + $0x94] ss:$8 sps:$4 sm:$0xff]   ;;  %v24512_v26 = vld [vmem:[%s31433_s8 + $0x280] ss:$8 sps:$4 sm:$0xff]   ;;  %v24515_v29 = vld [vmem:[%s31433_s8 + $0x90] ss:$8 sps:$4 sm:$0xff]  }
 0x9e1   : > { %21996 = vmatprep.subr.bf16.mxu1 %v21995_v19  ;;  %21982 = vmatpush1.bf16.msra.mxu0 %v21981_v56  ;;  %v24520_v50 = vld [vmem:[%s31433_s8 + $0x294] ss:$8 sps:$4 sm:$0xff]   ;;  %v24523_v32 = vld [vmem:[%s31433_s8 + $0xa4] ss:$8 sps:$4 sm:$0xff]   ;;  %v24518_v25 = vld [vmem:[%s31433_s8 + $0x290] ss:$8 sps:$4 sm:$0xff]  }
 0x9e2   : > { %21998 = vmatpush1.bf16.msra.mxu1 %v21997_v14  ;;  %22000 = vmatprep.subr.bf16.mxu0 %v30765_v43  ;;  %v24466_v43 = vld [vmem:[%s31433_s8 + $0x204] ss:$8 sps:$4 sm:$0xff]   ;;  %v24521_v11 = vld [vmem:[%s31433_s8 + $0xa0] ss:$8 sps:$4 sm:$0xff]   ;;  %v24527_v45 = vld [vmem:[%s31433_s8 + $0xb0] ss:$8 sps:$4 sm:$0xff]  }
 0x9e3   : > { %22016 = vmatprep.subr.bf16.mxu1 %v30767_v42  ;;  %v15410_v42 = vld [vmem:[#allocation10 + $0x20] sm:$0xff]  ;;  %v24529_v7 = vld [vmem:[%s31433_s8 + $0xb4] ss:$8 sps:$4 sm:$0xff]  }
 0x9e4   : > { %20694 = vmatmul.mubr.msk.f32.vlgmr.msra.gmra.mrb[176].mxu0 %vm15218_vm2, %v15214_v53  ;;  %v24526_v8 = vld [vmem:[%s31433_s8 + $0x2a4] ss:$8 sps:$4 sm:$0xff]   ;;  %v24524_v27 = vld [vmem:[%s31433_s8 + $0x2a0] ss:$8 sps:$4 sm:$0xff]   ;;  %v24530_v20 = vld [vmem:[%s31433_s8 + $0x2b0] ss:$8 sps:$4 sm:$0xff]  }
 0x9e5   : > { %20698 = vmatmul.mubr.msk.f32.vlgmr.msra.gmra.mrb[48].mxu1 %vm15218_vm2, %v15214_v53  ;;  %22002 = vmatpush1.bf16.msra.mxu0 %v30761_v6  ;;  %v15217_v6 = vld [vmem:[#allocation10 + $0x18] sm:$0xff]  ;;  %v24539_v53 = vld [vmem:[%s31433_s8 + $0xd0] ss:$8 sps:$4 sm:$0xff]  }
 0x9e6   : > { %22018 = vmatpush1.bf16.msra.mxu1 %v30763_v12  ;;  %22004 = vmatprep.subr.bf16.mxu0 %v30785_v24  ;;  %v24463_v12 = vld [vmem:[%s31433_s8 + $0x4] ss:$8 sps:$4 sm:$0xff]   ;;  %v15411_v24 = vld [vmem:[#allocation10 + $0x28] sm:$0xff]  ;;  %v24533_v22 = vld [vmem:[%s31433_s8 + $0xc0] ss:$8 sps:$4 sm:$0xff]  }
 0x9e7   : > { %22020 = vmatprep.subr.bf16.mxu1 %v30787_v0  ;;  %15301 = vmatprep.mubr.f32.mxu0 %v31815_v31  ;;  %v24464_v0 = vld [vmem:[%s31433_s8 + $0x200] ss:$8 sps:$4 sm:$0xff]  }
 0x9e8   : > { %20695 = vmatmul.mubr.msk.f32.gmra.mrb[178].mxu0 %vm15218_vm2, %v15215_v5  ;;  %15390 = vmatprep.mubr.f32.mxu1 %v31815_v31 }
 0x9e9   : > { %22006 = vmatpush1.bf16.msra.mxu0 %v30781_v52  ;;  %15307 = vmatprep.mubr.f32.mxu0 %v31815_v31  ;;  %v24461_v52 = vld [vmem:[%s31433_s8] ss:$8 sps:$4 sm:$0xff]  }
 0x9ea   : > { %22022 = vmatpush1.bf16.msra.mxu1 %v30783_v62  ;;  %22008 = vmatprep.subr.bf16.mxu0 %v21975_v57  ;;  %v24469_v62 = vld [vmem:[%s31433_s8 + $0x14] ss:$8 sps:$4 sm:$0xff]  }
 0x9eb   : > { %22024 = vmatprep.subr.bf16.mxu1 %v21991_v48  ;;  %20699 = vmatmul.mubr.msk.f32.gmra.mrb[50].mxu1 %vm15218_vm2, %v15215_v5  ;;  %v24496_v57 = vld [vmem:[%s31433_s8 + $0x254] ss:$8 sps:$4 sm:$0xff]   ;;  %v24494_v48 = vld [vmem:[%s31433_s8 + $0x250] ss:$8 sps:$4 sm:$0xff]  }
 0x9ec   : > { %20696 = vmatmul.mubr.msk.f32.gmra.mrb[180].mxu0 %vm15218_vm2, %v15216_v35  ;;  %15396 = vmatprep.mubr.f32.mxu1 %v31815_v31  ;;  %v24541_v5 = vld [vmem:[%s31433_s8 + $0xd4] ss:$8 sps:$4 sm:$0xff]  }
 0x9ed   : > { %22010 = vmatpush1.bf16.msra.mxu0 %v30801_v54  ;;  %15313 = vmatprep.mubr.f32.mxu0 %v31815_v31  ;;  %v24490_v54 = vld [vmem:[%s31433_s8 + $0x244] ss:$8 sps:$4 sm:$0xff]  }
 0x9ee   : > { %22026 = vmatpush1.bf16.msra.mxu1 %v30803_v21  ;;  %22012 = vmatprep.subr.bf16.mxu0 %v21979_v15  ;;  %v24491_v21 = vld [vmem:[%s31433_s8 + $0x50] ss:$8 sps:$4 sm:$0xff]   ;;  %v24536_v15 = vld [vmem:[%s31433_s8 + $0x2c0] ss:$8 sps:$4 sm:$0xff]  }
 0x9ef   : > { %22028 = vmatprep.subr.bf16.mxu1 %v21995_v19  ;;  %20700 = vmatmul.mubr.msk.f32.gmra.mrb[52].mxu1 %vm15218_vm2, %v15216_v35  ;;  %v24538_v19 = vld [vmem:[%s31433_s8 + $0x2c4] ss:$8 sps:$4 sm:$0xff]   ;;  %v24542_v35 = vld [vmem:[%s31433_s8 + $0x2d0] ss:$8 sps:$4 sm:$0xff]  }
 0x9f0   : > { %20697 = vmatmul.mubr.msk.f32.gmra.mrb[182].mxu0 %vm15218_vm2, %v15217_v6  ;;  %15402 = vmatprep.mubr.f32.mxu1 %v31815_v31 }
 0x9f1   : > { %22014 = vmatpush1.bf16.msra.mxu0 %v21981_v56  ;;  %15490 = vmatprep.mubr.f32.mxu0 %v31815_v31  ;;  %v24532_v56 = vld [vmem:[%s31433_s8 + $0x2b4] ss:$8 sps:$4 sm:$0xff]  }
 0x9f2   : > { %22030 = vmatpush1.bf16.msra.mxu1 %v21997_v14  ;;  %16012 = vmatprep.subr.bf16.mxu0 %v24463_v12  ;;  %v24535_v14 = vld [vmem:[%s31433_s8 + $0xc4] ss:$8 sps:$4 sm:$0xff]   ;;  %v24545_v12 = vld [vmem:[%s31433_s8 + $0xe0] ss:$8 sps:$4 sm:$0xff]  }
 0x9f3   : > { %20701 = vmatmul.mubr.msk.f32.gmra.mrb[54].mxu1 %vm15218_vm2, %v15217_v6  ;;  %16503 = vmatprep.subr.bf16.mxu1 %v24466_v43  ;;  %v24544_v6 = vld [vmem:[%s31433_s8 + $0x2d4] ss:$8 sps:$4 sm:$0xff]   ;;  %v24547_v43 = vld [vmem:[%s31433_s8 + $0xe4] ss:$8 sps:$4 sm:$0xff]  }
 0x9f4   : > { %20702 = vmatmul.mubr.msk.f32.vlgmr.msra.gmra.mrb[184].mxu0 %vm15218_vm2, %v15410_v42  ;;  %15579 = vmatprep.mubr.f32.mxu1 %v31815_v31 }
 0x9f5   : > { %15496 = vmatprep.mubr.f32.mxu0 %v31815_v31  ;;  %16013 = vmatpush1.bf16.msra.mxu0 %v24461_v52  ;;  %v24550_v52 = vld [vmem:[%s31433_s8 + $0x2e4] ss:$8 sps:$4 sm:$0xff]  }
 0x9f6   : > { %16014 = vmatprep.subr.bf16.mxu0 %v24469_v62  ;;  %v24551_v62 = vld [vmem:[%s31433_s8 + $0xf0] ss:$8 sps:$4 sm:$0xff]  }
 0x9f7   : > { %20706 = vmatmul.mubr.msk.f32.vlgmr.msra.gmra.mrb[56].mxu1 %vm15218_vm2, %v15410_v42  ;;  %v24548_v42 = vld [vmem:[%s31433_s8 + $0x2e0] ss:$8 sps:$4 sm:$0xff]  }
 0x9f8   : > { %20703 = vmatmul.mubr.msk.f32.gmra.mrb[186].mxu0 %vm15218_vm2, %v15411_v24  ;;  %15585 = vmatprep.mubr.f32.mxu1 %v31815_v31 }
 0x9f9   : > { %15502 = vmatprep.mubr.f32.mxu0 %v31815_v31  ;;  %16504 = vmatpush1.bf16.msra.mxu1 %v24464_v0  ;;  %v24554_v0 = vld [vmem:[%s31433_s8 + $0x2f0] ss:$8 sps:$4 sm:$0xff]  }
 0x9fa   : > { %16505 = vmatprep.subr.bf16.mxu1 %v24472_v47  ;;  %16015 = vmatpush1.bf16.msra.mxu0 %v24467_v17  ;;  %v24556_v17 = vld [vmem:[%s31433_s8 + $0x2f4] ss:$8 sps:$4 sm:$0xff]   ;;  %v24559_v47 = vld [vmem:[%s31433_s8 + $0x104] ss:$8 sps:$4 sm:$0xff]  }
 0x9fb   : > { %20707 = vmatmul.mubr.msk.f32.gmra.mrb[58].mxu1 %vm15218_vm2, %v15411_v24  ;;  %16016 = vmatprep.subr.bf16.mxu0 %v24475_v37  ;;  %v24553_v24 = vld [vmem:[%s31433_s8 + $0xf4] ss:$8 sps:$4 sm:$0xff]   ;;  %v24562_v37 = vld [vmem:[%s31433_s8 + $0x304] ss:$8 sps:$4 sm:$0xff]  }
 0x9fc   : > { %20704 = vmatmul.mubr.msk.f32.gmra.mrb[188].mxu0 %vm15218_vm2, %v15412_v63  ;;  %15591 = vmatprep.mubr.f32.mxu1 %v31815_v31 }
 0x9fd   : > { %15508 = vmatprep.mubr.f32.mxu0 %v31815_v31  ;;  %16506 = vmatpush1.bf16.msra.mxu1 %v24470_v46 }
 0x9fe   : > { %16507 = vmatprep.subr.bf16.mxu1 %v24478_v49  ;;  %16017 = vmatpush1.bf16.msra.mxu0 %v24473_v16 }
 0x9ff   : > { %20708 = vmatmul.mubr.msk.f32.gmra.mrb[60].mxu1 %vm15218_vm2, %v15412_v63  ;;  %16018 = vmatprep.subr.bf16.mxu0 %v24481_v33 }
 0xa00   : > { %20705 = vmatmul.mubr.msk.f32.gmra.mrb[190].mxu0 %vm15218_vm2, %v15413_v30  ;;  %15597 = vmatprep.mubr.f32.mxu1 %v31815_v31  ;;  %v24493_v31 = vld [vmem:[%s31433_s8 + $0x54] ss:$8 sps:$4 sm:$0xff]  }
 0xa01   : > { %16508 = vmatpush1.bf16.msra.mxu1 %v24476_v40 }
 0xa02   : > { %16509 = vmatprep.subr.bf16.mxu1 %v24484_v9  ;;  %16019 = vmatpush1.bf16.msra.mxu0 %v24479_v60 }
 0xa03   : > { %20709 = vmatmul.mubr.msk.f32.gmra.mrb[62].mxu1 %vm15218_vm2, %v15413_v30  ;;  %16020 = vmatprep.subr.bf16.mxu0 %v24487_v39 }
 0xa05   : > { %16510 = vmatpush1.bf16.msra.mxu1 %v24482_v28 }
 0xa06   : > { %16511 = vmatprep.subr.bf16.mxu1 %v24490_v54  ;;  %16021 = vmatpush1.bf16.msra.mxu0 %v24485_v1 }
 0xa07   : > { %16022 = vmatprep.subr.bf16.mxu0 %v24493_v31 }
 0xa09   : > { %16512 = vmatpush1.bf16.msra.mxu1 %v24488_v23 }
 0xa0a   : > { %16513 = vmatprep.subr.bf16.mxu1 %v24496_v57  ;;  %16023 = vmatpush1.bf16.msra.mxu0 %v24491_v21 }
 0xa0b   : > { %16024 = vmatprep.subr.bf16.mxu0 %v24499_v18 }
 0xa0d   : > { %16514 = vmatpush1.bf16.msra.mxu1 %v24494_v48 }
 0xa0e   : > { %16515 = vmatprep.subr.bf16.mxu1 %v24502_v55  ;;  %16025 = vmatpush1.bf16.msra.mxu0 %v24497_v13 }
 0xa0f   : > { %16026 = vmatprep.subr.bf16.mxu0 %v24505_v4 }
 0xa11   : > { %16516 = vmatpush1.bf16.msra.mxu1 %v24500_v41 }
 0xa12   : > { %16517 = vmatprep.subr.bf16.mxu1 %v24508_v10  ;;  %16027 = vmatpush1.bf16.msra.mxu0 %v24503_v3 }
 0xa13   : > { %16028 = vmatprep.subr.bf16.mxu0 %v24511_v34 }
 0xa15   : > { %16518 = vmatpush1.bf16.msra.mxu1 %v24506_v61 }
 0xa16   : > { %16519 = vmatprep.subr.bf16.mxu1 %v24514_v2  ;;  %16029 = vmatpush1.bf16.msra.mxu0 %v24509_v36 }
 0xa17   : > { %16030 = vmatprep.subr.bf16.mxu0 %v24517_v44 }
 0xa19   : > { %16520 = vmatpush1.bf16.msra.mxu1 %v24512_v26 }
 0xa1a   : > { %16521 = vmatprep.subr.bf16.mxu1 %v24520_v50  ;;  %16031 = vmatpush1.bf16.msra.mxu0 %v24515_v29  ;;  %v24557_v50 = vld [vmem:[%s31433_s8 + $0x100] ss:$8 sps:$4 sm:$0xff]  }
 0xa1b   : > { %16032 = vmatprep.subr.bf16.mxu0 %v24523_v32  ;;  %v24560_v32 = vld [vmem:[%s31433_s8 + $0x300] ss:$8 sps:$4 sm:$0xff]  }
 0xa1d   : > { %16522 = vmatpush1.bf16.msra.mxu1 %v24518_v25 }
 0xa1e   : > { %16523 = vmatprep.subr.bf16.mxu1 %v24526_v8  ;;  %16033 = vmatpush1.bf16.msra.mxu0 %v24521_v11 }
 0xa1f   : > { %16034 = vmatprep.subr.bf16.mxu0 %v24529_v7  ;;  %v24568_v7 = vld [vmem:[%s31433_s8 + $0x314] ss:$8 sps:$4 sm:$0xff]  }
 0xa21   : > { %16524 = vmatpush1.bf16.msra.mxu1 %v24524_v27 }
 0xa22   : > { %16525 = vmatprep.subr.bf16.mxu1 %v24532_v56  ;;  %16035 = vmatpush1.bf16.msra.mxu0 %v24527_v45  ;;  %v24565_v45 = vld [vmem:[%s31433_s8 + $0x114] ss:$8 sps:$4 sm:$0xff]  }
 0xa23   : > { %16036 = vmatprep.subr.bf16.mxu0 %v24535_v14 }
 0xa25   : > { %16526 = vmatpush1.bf16.msra.mxu1 %v24530_v20 }
 0xa26   : > { %16527 = vmatprep.subr.bf16.mxu1 %v24538_v19  ;;  %16037 = vmatpush1.bf16.msra.mxu0 %v24533_v22 }
 0xa27   : > { %16038 = vmatprep.subr.bf16.mxu0 %v24541_v5  ;;  %v24566_v5 = vld [vmem:[%s31433_s8 + $0x310] ss:$8 sps:$4 sm:$0xff]  }
 0xa29   : > { %16528 = vmatpush1.bf16.msra.mxu1 %v24536_v15 }
 0xa2a   : > { %16529 = vmatprep.subr.bf16.mxu1 %v24544_v6  ;;  %16039 = vmatpush1.bf16.msra.mxu0 %v24539_v53  ;;  %v24563_v53 = vld [vmem:[%s31433_s8 + $0x110] ss:$8 sps:$4 sm:$0xff]  }
 0xa2b   : > { %16040 = vmatprep.subr.bf16.mxu0 %v24547_v43 }
 0xa2d   : > { %16530 = vmatpush1.bf16.msra.mxu1 %v24542_v35 }
 0xa2e   : > { %16531 = vmatprep.subr.bf16.mxu1 %v24550_v52  ;;  %16041 = vmatpush1.bf16.msra.mxu0 %v24545_v12  ;;  %v24574_v52 = vld [vmem:[%s31433_s8 + $0x324] ss:$8 sps:$4 sm:$0xff]  }
 0xa2f   : > { %16042 = vmatprep.subr.bf16.mxu0 %v24553_v24 }
 0xa31   : > { %16532 = vmatpush1.bf16.msra.mxu1 %v24548_v42  ;;  %v24571_v42 = vld [vmem:[%s31433_s8 + $0x124] ss:$8 sps:$4 sm:$0xff]  }
 0xa32   : > { %16533 = vmatprep.subr.bf16.mxu1 %v24556_v17  ;;  %16043 = vmatpush1.bf16.msra.mxu0 %v24551_v62 }
 0xa33   : > { %16065 = vmatprep.subr.bf16.mxu0 %v24559_v47 }
 0xa35   : > { %16534 = vmatpush1.bf16.msra.mxu1 %v24554_v0 }
 0xa36   : > { %16556 = vmatprep.subr.bf16.mxu1 %v24562_v37  ;;  %v24569_v37 = vld [vmem:[%s31433_s8 + $0x120] ss:$8 sps:$4 sm:$0xff]  }
 0xab7   : > { %v15297_v63 = vpop.f32.mrb[176].mxu0 }
 0xab8   : > { %v15299_v46 = vpop.f32.mrb[177].mxu0  ;;  %v15386_v16 = vpop.f32.mrb[48].mxu1 }
 0xab9   : > { %v15388_v49 = vpop.f32.mrb[49].mxu1 }
 0xabb   : > { %v15303_v33 = vpop.f32.mrb[178].mxu0 }
 0xabc   : > { %v15305_v30 = vpop.f32.mrb[179].mxu0 }
 0xabe   : > { %v15392_v40 = vpop.f32.mrb[50].mxu1 }
 0xabf   : > { %v15309_v60 = vpop.f32.mrb[180].mxu0  ;;  %v15394_v9 = vpop.f32.mrb[51].mxu1 }
 0xac0   : > { %v15311_v39 = vpop.f32.mrb[181].mxu0 }
 0xac2   : > { %v31053_v28 = vpop.f32.mrb[52].mxu1 }
 0xac3   : > { %v15315_v1 = vpop.f32.mrb[182].mxu0  ;;  %v31055_v54 = vpop.f32.mrb[53].mxu1 }
 0xac4   : > { %v15317_v31 = vpop.f32.mrb[183].mxu0 }
 0xac6   : > { %v31057_v23 = vpop.f32.mrb[54].mxu1 }
 0xac7   : > { %v15492_v21 = vpop.f32.mrb[184].mxu0  ;;  %v31059_v57 = vpop.f32.mrb[55].mxu1 }
 0xac8   : > { %v15604_v18 = vmax.f32 %v15297_v63, %v15492_v21  ;;  %v15494_v48 = vpop.f32.mrb[185].mxu0  ;;  %v24572_v63 = vld [vmem:[%s31433_s8 + $0x320] ss:$8 sps:$4 sm:$0xff]   ;;  %v24592_v21 = vld [vmem:[%s31433_s8 + $0x354] ss:$8 sps:$4 sm:$0xff]  }
 0xac9   : > { %v15605_v13 = vmax.f32 %v15299_v46, %v15494_v48  ;;  %v24595_v48 = vld [vmem:[%s31433_s8 + $0x164] ss:$8 sps:$4 sm:$0xff]  }
 0xaca   : > { %v15581_v55 = vpop.f32.mrb[56].mxu1 }
 0xacb   : > { %v15498_v4 = vpop.f32.mrb[186].mxu0  ;;  %v15606_v41 = vmax.f32 %v15386_v16, %v15581_v55  ;;  %v15583_v3 = vpop.f32.mrb[57].mxu1  ;;  %v24593_v55 = vld [vmem:[%s31433_s8 + $0x160] ss:$8 sps:$4 sm:$0xff]  }
 0xacc   : > { %v15608_v10 = vmax.f32 %v15303_v33, %v15498_v4  ;;  %v15500_v34 = vpop.f32.mrb[187].mxu0  ;;  %v15607_v61 = vmax.f32 %v15388_v49, %v15583_v3  ;;  %v24577_v49 = vld [vmem:[%s31433_s8 + $0x134] ss:$8 sps:$4 sm:$0xff]   ;;  %v24596_v4 = vld [vmem:[%s31433_s8 + $0x360] ss:$8 sps:$4 sm:$0xff]  }
 0xacd   : > { %v15609_v36 = vmax.f32 %v15305_v30, %v15500_v34  ;;  %v24580_v33 = vld [vmem:[%s31433_s8 + $0x334] ss:$8 sps:$4 sm:$0xff]   ;;  %v24602_v34 = vld [vmem:[%s31433_s8 + $0x370] ss:$8 sps:$4 sm:$0xff]  }
 0xace   : > { %v15620_v2 = vpack.c.bf16 %v15608_v10, %v15604_v18  ;;  %v15587_v44 = vpop.f32.mrb[58].mxu1  ;;  %v24590_v18 = vld [vmem:[%s31433_s8 + $0x350] ss:$8 sps:$4 sm:$0xff]   ;;  %v24604_v3 = vld [vmem:[%s31433_s8 + $0x374] ss:$8 sps:$4 sm:$0xff]  }
 0xacf   : > { %v15621_v26 = vpack.c.bf16 %v15609_v36, %v15605_v13  ;;  %v15504_v29 = vpop.f32.mrb[188].mxu0  ;;  %v15610_v25 = vmax.f32 %v15392_v40, %v15587_v44  ;;  %v15589_v11 = vpop.f32.mrb[59].mxu1  ;;  %v24598_v13 = vld [vmem:[%s31433_s8 + $0x364] ss:$8 sps:$4 sm:$0xff]   ;;  %v24599_v10 = vld [vmem:[%s31433_s8 + $0x170] ss:$8 sps:$4 sm:$0xff]  }
 0xad0   : > { %v15612_v8 = vmax.f32 %v15309_v60, %v15504_v29  ;;  %v15506_v27 = vpop.f32.mrb[189].mxu0  ;;  %v15611_v20 = vmax.f32 %v15394_v9, %v15589_v11  ;;  %v24575_v9 = vld [vmem:[%s31433_s8 + $0x130] ss:$8 sps:$4 sm:$0xff]   ;;  %v24610_v36 = vld [vmem:[%s31433_s8 + $0x384] ss:$8 sps:$4 sm:$0xff]  }
 0xad1   : > { %v15613_v56 = vmax.f32 %v15311_v39, %v15506_v27  ;;  %16044 = vmatprep.mubr.bf16.mxu0 %v15621_v26  ;;  %16535 = vmatprep.mubr.bf16.mxu1 %v15621_v26  ;;  %v31073_v22 = vpack.c.bf16 %v15610_v25, %v15606_v41  ;;  %v24578_v39 = vld [vmem:[%s31433_s8 + $0x330] ss:$8 sps:$4 sm:$0xff]   ;;  %v24601_v41 = vld [vmem:[%s31433_s8 + $0x174] ss:$8 sps:$4 sm:$0xff]   ;;  %v24608_v44 = vld [vmem:[%s31433_s8 + $0x380] ss:$8 sps:$4 sm:$0xff]  }
 0xad2   : > { %16045 = vmatmul.mubr.bf16.vlgmr.msra.gmra.mrb[192].mxu0 %v15620_v2  ;;  %16536 = vmatmul.mubr.bf16.vlgmr.msra.gmra.mrb[64].mxu1 %v15620_v2  ;;  %v15623_v14 = vpack.c.bf16 %v15611_v20, %v15607_v61  ;;  %v15593_v15 = vpop.f32.mrb[60].mxu1  ;;  %v24607_v61 = vld [vmem:[%s31433_s8 + $0x184] ss:$8 sps:$4 sm:$0xff]   ;;  %v24605_v2 = vld [vmem:[%s31433_s8 + $0x180] ss:$8 sps:$4 sm:$0xff]  }
 0xad3   : > { %16066 = vmatpush1.bf16.msra.mxu0 %v24557_v50  ;;  %16557 = vmatpush1.bf16.msra.mxu1 %v24560_v32  ;;  %v15510_v19 = vpop.f32.mrb[190].mxu0  ;;  %v15614_v35 = vmax.f32 %v31053_v28, %v15593_v15  ;;  %v15595_v6 = vpop.f32.mrb[61].mxu1  ;;  %v24583_v28 = vld [vmem:[%s31433_s8 + $0x144] ss:$8 sps:$4 sm:$0xff]   ;;  %v24613_v26 = vld [vmem:[%s31433_s8 + $0x194] ss:$8 sps:$4 sm:$0xff]  }
 0xad4   : > { %v15616_v12 = vmax.f32 %v15315_v1, %v15510_v19  ;;  %v15512_v43 = vpop.f32.mrb[191].mxu0  ;;  %16067 = vmatprep.subr.bf16.mxu0 %v24565_v45  ;;  %16558 = vmatprep.subr.bf16.mxu1 %v24568_v7  ;;  %v15615_v62 = vmax.f32 %v31055_v54, %v15595_v6  ;;  %v24586_v1 = vld [vmem:[%s31433_s8 + $0x344] ss:$8 sps:$4 sm:$0xff]   ;;  %v24581_v54 = vld [vmem:[%s31433_s8 + $0x140] ss:$8 sps:$4 sm:$0xff]  }
 0xad5   : > { %v15617_v24 = vmax.f32 %v15317_v31, %v15512_v43  ;;  %v24584_v31 = vld [vmem:[%s31433_s8 + $0x340] ss:$8 sps:$4 sm:$0xff]   ;;  %v24616_v29 = vld [vmem:[%s31433_s8 + $0x394] ss:$8 sps:$4 sm:$0xff]   ;;  %v24611_v50 = vld [vmem:[%s31433_s8 + $0x190] ss:$8 sps:$4 sm:$0xff]  }
 0xad6   : > { %v15624_v0 = vpack.c.bf16 %v15616_v12, %v15612_v8  ;;  %v15599_v17 = vpop.f32.mrb[62].mxu1  ;;  %v24614_v32 = vld [vmem:[%s31433_s8 + $0x390] ss:$8 sps:$4 sm:$0xff]   ;;  %v24619_v25 = vld [vmem:[%s31433_s8 + $0x1a4] ss:$8 sps:$4 sm:$0xff]  }
 0xad7   : > { %v15625_v47 = vpack.c.bf16 %v15617_v24, %v15613_v56  ;;  %16068 = vmatpush1.bf16.msra.mxu0 %v24563_v53  ;;  %16559 = vmatpush1.bf16.msra.mxu1 %v24566_v5  ;;  %v15618_v46 = vmax.f32 %v31057_v23, %v15599_v17  ;;  %v15601_v16 = vpop.f32.mrb[63].mxu1  ;;  %v24589_v23 = vld [vmem:[%s31433_s8 + $0x154] ss:$8 sps:$4 sm:$0xff]   ;;  %v24622_v11 = vld [vmem:[%s31433_s8 + $0x3a4] ss:$8 sps:$4 sm:$0xff]  }
 0xad8   : > { %16069 = vmatprep.subr.bf16.mxu0 %v24571_v42  ;;  %16560 = vmatprep.subr.bf16.mxu1 %v24574_v52  ;;  %v15619_v30 = vmax.f32 %v31059_v57, %v15601_v16  ;;  %v24587_v57 = vld [vmem:[%s31433_s8 + $0x150] ss:$8 sps:$4 sm:$0xff]   ;;  %v24617_v8 = vld [vmem:[%s31433_s8 + $0x1a0] ss:$8 sps:$4 sm:$0xff]   ;;  %v24625_v45 = vld [vmem:[%s31433_s8 + $0x1b4] ss:$8 sps:$4 sm:$0xff]  }
 0xad9   : > { %16054 = vmatprep.mubr.bf16.mxu0 %v15625_v47  ;;  %16545 = vmatprep.mubr.bf16.mxu1 %v15625_v47  ;;  %v31103_v40 = vpack.c.bf16 %v15618_v46, %v15614_v35  ;;  %v24620_v27 = vld [vmem:[%s31433_s8 + $0x3a0] ss:$8 sps:$4 sm:$0xff]   ;;  %v24628_v7 = vld [vmem:[%s31433_s8 + $0x3b4] ss:$8 sps:$4 sm:$0xff]   ;;  %v24623_v20 = vld [vmem:[%s31433_s8 + $0x1b0] ss:$8 sps:$4 sm:$0xff]  }
 0xada   : > { %16055 = vmatmul.mubr.bf16.gmra.mrb[196].mxu0 %v15624_v0  ;;  %16546 = vmatmul.mubr.bf16.gmra.mrb[68].mxu1 %v15624_v0  ;;  %v31105_v60 = vpack.c.bf16 %v15619_v30, %v15615_v62  ;;  %v24626_v56 = vld [vmem:[%s31433_s8 + $0x3b0] ss:$8 sps:$4 sm:$0xff]   ;;  %v24634_v15 = vld [vmem:[%s31433_s8 + $0x3c4] ss:$8 sps:$4 sm:$0xff]   ;;  %v24629_v19 = vld [vmem:[%s31433_s8 + $0x1c0] ss:$8 sps:$4 sm:$0xff]  }
 0xadb   : > { %16070 = vmatpush1.bf16.msra.mxu0 %v24569_v37  ;;  %16561 = vmatpush1.bf16.msra.mxu1 %v24572_v63  ;;  %v24632_v53 = vld [vmem:[%s31433_s8 + $0x3c0] ss:$8 sps:$4 sm:$0xff]   ;;  %v24637_v5 = vld [vmem:[%s31433_s8 + $0x1d4] ss:$8 sps:$4 sm:$0xff]   ;;  %v24635_v6 = vld [vmem:[%s31433_s8 + $0x1d0] ss:$8 sps:$4 sm:$0xff]  }
 0xadc   : > { %16071 = vmatprep.subr.bf16.mxu0 %v24577_v49  ;;  %16562 = vmatprep.subr.bf16.mxu1 %v24580_v33  ;;  %v24640_v35 = vld [vmem:[%s31433_s8 + $0x3d4] ss:$8 sps:$4 sm:$0xff]   ;;  %v24638_v12 = vld [vmem:[%s31433_s8 + $0x3d0] ss:$8 sps:$4 sm:$0xff]   ;;  %v24643_v43 = vld [vmem:[%s31433_s8 + $0x1e4] ss:$8 sps:$4 sm:$0xff]  }
 0xadd   : > { %16097 = vmatprep.mubr.bf16.mxu0 %v15623_v14  ;;  %16588 = vmatprep.mubr.bf16.mxu1 %v15623_v14  ;;  %v24631_v14 = vld [vmem:[%s31433_s8 + $0x1c4] ss:$8 sps:$4 sm:$0xff]   ;;  %v24641_v52 = vld [vmem:[%s31433_s8 + $0x1e0] ss:$8 sps:$4 sm:$0xff]   ;;  %v24649_v24 = vld [vmem:[%s31433_s8 + $0x1f4] ss:$8 sps:$4 sm:$0xff]  }
 0xade   : > { %v24646_v42 = vld [vmem:[%s31433_s8 + $0x3e4] ss:$8 sps:$4 sm:$0xff]   ;;  %v24644_v62 = vld [vmem:[%s31433_s8 + $0x3e0] ss:$8 sps:$4 sm:$0xff]   ;;  %v24652_v0 = vld [vmem:[%s31433_s8 + $0x3f4] ss:$8 sps:$4 sm:$0xff]  }
 0xadf   : > { %16072 = vmatpush1.bf16.msra.mxu0 %v24575_v9  ;;  %16563 = vmatpush1.bf16.msra.mxu1 %v24578_v39  ;;  %v24647_v17 = vld [vmem:[%s31433_s8 + $0x1f0] ss:$8 sps:$4 sm:$0xff]  }
 0xae0   : > { %16073 = vmatprep.subr.bf16.mxu0 %v24583_v28  ;;  %16564 = vmatprep.subr.bf16.mxu1 %v24586_v1  ;;  %v24650_v47 = vld [vmem:[%s31433_s8 + $0x3f0] ss:$8 sps:$4 sm:$0xff]  }
 0xae1   : > { %v24655_v37 = vld [vmem:[#allocation11 + $0x4] ss:$16 sps:$4 sm:$0xff]   ;;  %v24658_v63 = vld [vmem:[#allocation11 + $0xc] ss:$16 sps:$4 sm:$0xff]   ;;  %v24653_v46 = vld [vmem:[#allocation11] ss:$16 sps:$4 sm:$0xff]  }
 0xae2   : > { %v24656_v16 = vld [vmem:[#allocation11 + $0x8] ss:$16 sps:$4 sm:$0xff]   ;;  %v24661_v49 = vld [vmem:[#allocation11 + $0x24] ss:$16 sps:$4 sm:$0xff]   ;;  %v24664_v33 = vld [vmem:[#allocation11 + $0x2c] ss:$16 sps:$4 sm:$0xff]  }
 0xae3   : > { %16074 = vmatpush1.bf16.msra.mxu0 %v24581_v54  ;;  %16565 = vmatpush1.bf16.msra.mxu1 %v24584_v31  ;;  %v24659_v30 = vld [vmem:[#allocation11 + $0x20] ss:$16 sps:$4 sm:$0xff]   ;;  %v24662_v9 = vld [vmem:[#allocation11 + $0x28] ss:$16 sps:$4 sm:$0xff]   ;;  %v24667_v39 = vld [vmem:[#allocation11 + $0x44] ss:$16 sps:$4 sm:$0xff]  }
 0xae4   : > { %16075 = vmatprep.subr.bf16.mxu0 %v24589_v23  ;;  %16566 = vmatprep.subr.bf16.mxu1 %v24592_v21  ;;  %v24670_v28 = vld [vmem:[#allocation11 + $0x4c] ss:$16 sps:$4 sm:$0xff]   ;;  %v24665_v1 = vld [vmem:[#allocation11 + $0x40] ss:$16 sps:$4 sm:$0xff]   ;;  %v24668_v54 = vld [vmem:[#allocation11 + $0x48] ss:$16 sps:$4 sm:$0xff]  }
 0xae5   : > { %v24673_v31 = vld [vmem:[#allocation11 + $0x64] ss:$16 sps:$4 sm:$0xff]   ;;  %v24674_v23 = vld [vmem:[#allocation11 + $0x68] ss:$16 sps:$4 sm:$0xff]  }
 0xae6   : > { %v24679_v21 = vld [vmem:[#allocation11 + $0x84] ss:$16 sps:$4 sm:$0xff]  }
 0xae7   : > { %16076 = vmatpush1.bf16.msra.mxu0 %v24587_v57  ;;  %16567 = vmatpush1.bf16.msra.mxu1 %v24590_v18  ;;  %v24682_v57 = vld [vmem:[#allocation11 + $0x8c] ss:$16 sps:$4 sm:$0xff]   ;;  %v24677_v18 = vld [vmem:[#allocation11 + $0x80] ss:$16 sps:$4 sm:$0xff]  }
 0xae8   : > { %16077 = vmatprep.subr.bf16.mxu0 %v24595_v48  ;;  %16568 = vmatprep.subr.bf16.mxu1 %v24598_v13  ;;  %v24680_v48 = vld [vmem:[#allocation11 + $0x88] ss:$16 sps:$4 sm:$0xff]   ;;  %v24685_v13 = vld [vmem:[#allocation11 + $0xa4] ss:$16 sps:$4 sm:$0xff]  }
 0xaeb   : > { %16078 = vmatpush1.bf16.msra.mxu0 %v24593_v55  ;;  %16569 = vmatpush1.bf16.msra.mxu1 %v24596_v4  ;;  %v24688_v55 = vld [vmem:[#allocation11 + $0xac] ss:$16 sps:$4 sm:$0xff]   ;;  %v24683_v4 = vld [vmem:[#allocation11 + $0xa0] ss:$16 sps:$4 sm:$0xff]  }
 0xaec   : > { %16079 = vmatprep.subr.bf16.mxu0 %v24601_v41  ;;  %16570 = vmatprep.subr.bf16.mxu1 %v24604_v3  ;;  %v24691_v41 = vld [vmem:[#allocation11 + $0xc4] ss:$16 sps:$4 sm:$0xff]   ;;  %v24694_v3 = vld [vmem:[#allocation11 + $0xcc] ss:$16 sps:$4 sm:$0xff]  }
 0xaef   : > { %16080 = vmatpush1.bf16.msra.mxu0 %v24599_v10  ;;  %16571 = vmatpush1.bf16.msra.mxu1 %v24602_v34  ;;  %v24689_v10 = vld [vmem:[#allocation11 + $0xc0] ss:$16 sps:$4 sm:$0xff]   ;;  %v24692_v34 = vld [vmem:[#allocation11 + $0xc8] ss:$16 sps:$4 sm:$0xff]  }
 0xaf0   : > { %16081 = vmatprep.subr.bf16.mxu0 %v24607_v61  ;;  %16572 = vmatprep.subr.bf16.mxu1 %v24610_v36  ;;  %v24697_v61 = vld [vmem:[#allocation11 + $0xe4] ss:$16 sps:$4 sm:$0xff]   ;;  %v24700_v36 = vld [vmem:[#allocation11 + $0xec] ss:$16 sps:$4 sm:$0xff]  }
 0xaf3   : > { %16082 = vmatpush1.bf16.msra.mxu0 %v24605_v2  ;;  %16573 = vmatpush1.bf16.msra.mxu1 %v24608_v44  ;;  %v24695_v2 = vld [vmem:[#allocation11 + $0xe0] ss:$16 sps:$4 sm:$0xff]   ;;  %v24698_v44 = vld [vmem:[#allocation11 + $0xe8] ss:$16 sps:$4 sm:$0xff]  }
 0xaf4   : > { %16083 = vmatprep.subr.bf16.mxu0 %v24613_v26  ;;  %16574 = vmatprep.subr.bf16.mxu1 %v24616_v29  ;;  %v24703_v26 = vld [vmem:[#allocation11 + $0x104] ss:$16 sps:$4 sm:$0xff]   ;;  %v24706_v29 = vld [vmem:[#allocation11 + $0x10c] ss:$16 sps:$4 sm:$0xff]  }
 0xaf7   : > { %16084 = vmatpush1.bf16.msra.mxu0 %v24611_v50  ;;  %16575 = vmatpush1.bf16.msra.mxu1 %v24614_v32  ;;  %v24701_v50 = vld [vmem:[#allocation11 + $0x100] ss:$16 sps:$4 sm:$0xff]   ;;  %v24704_v32 = vld [vmem:[#allocation11 + $0x108] ss:$16 sps:$4 sm:$0xff]  }
 0xaf8   : > { %16085 = vmatprep.subr.bf16.mxu0 %v24619_v25  ;;  %16576 = vmatprep.subr.bf16.mxu1 %v24622_v11  ;;  %v24709_v25 = vld [vmem:[#allocation11 + $0x124] ss:$16 sps:$4 sm:$0xff]   ;;  %v24712_v11 = vld [vmem:[#allocation11 + $0x12c] ss:$16 sps:$4 sm:$0xff]  }
 0xafb   : > { %16086 = vmatpush1.bf16.msra.mxu0 %v24617_v8  ;;  %16577 = vmatpush1.bf16.msra.mxu1 %v24620_v27  ;;  %v24707_v8 = vld [vmem:[#allocation11 + $0x120] ss:$16 sps:$4 sm:$0xff]   ;;  %v24710_v27 = vld [vmem:[#allocation11 + $0x128] ss:$16 sps:$4 sm:$0xff]  }
 0xafc   : > { %16087 = vmatprep.subr.bf16.mxu0 %v24625_v45  ;;  %16578 = vmatprep.subr.bf16.mxu1 %v24628_v7  ;;  %v24715_v45 = vld [vmem:[#allocation11 + $0x144] ss:$16 sps:$4 sm:$0xff]   ;;  %v24718_v7 = vld [vmem:[#allocation11 + $0x14c] ss:$16 sps:$4 sm:$0xff]  }
 0xaff   : > { %16088 = vmatpush1.bf16.msra.mxu0 %v24623_v20  ;;  %16579 = vmatpush1.bf16.msra.mxu1 %v24626_v56  ;;  %v24713_v20 = vld [vmem:[#allocation11 + $0x140] ss:$16 sps:$4 sm:$0xff]   ;;  %v24716_v56 = vld [vmem:[#allocation11 + $0x148] ss:$16 sps:$4 sm:$0xff]  }
 0xb00   : > { %16089 = vmatprep.subr.bf16.mxu0 %v24631_v14  ;;  %16580 = vmatprep.subr.bf16.mxu1 %v24634_v15  ;;  %v24721_v14 = vld [vmem:[#allocation11 + $0x164] ss:$16 sps:$4 sm:$0xff]   ;;  %v24724_v15 = vld [vmem:[#allocation11 + $0x16c] ss:$16 sps:$4 sm:$0xff]  }
 0xb03   : > { %16090 = vmatpush1.bf16.msra.mxu0 %v24629_v19  ;;  %16581 = vmatpush1.bf16.msra.mxu1 %v24632_v53  ;;  %v24719_v19 = vld [vmem:[#allocation11 + $0x160] ss:$16 sps:$4 sm:$0xff]   ;;  %v24722_v53 = vld [vmem:[#allocation11 + $0x168] ss:$16 sps:$4 sm:$0xff]  }
 0xb04   : > { %16091 = vmatprep.subr.bf16.mxu0 %v24637_v5  ;;  %16582 = vmatprep.subr.bf16.mxu1 %v24640_v35  ;;  %v24727_v5 = vld [vmem:[#allocation11 + $0x184] ss:$16 sps:$4 sm:$0xff]   ;;  %v24730_v35 = vld [vmem:[#allocation11 + $0x18c] ss:$16 sps:$4 sm:$0xff]  }
 0xb07   : > { %16092 = vmatpush1.bf16.msra.mxu0 %v24635_v6  ;;  %16583 = vmatpush1.bf16.msra.mxu1 %v24638_v12  ;;  %v24725_v6 = vld [vmem:[#allocation11 + $0x180] ss:$16 sps:$4 sm:$0xff]   ;;  %v24728_v12 = vld [vmem:[#allocation11 + $0x188] ss:$16 sps:$4 sm:$0xff]  }
 0xb08   : > { %16093 = vmatprep.subr.bf16.mxu0 %v24643_v43  ;;  %16584 = vmatprep.subr.bf16.mxu1 %v24646_v42  ;;  %v24733_v43 = vld [vmem:[#allocation11 + $0x1a4] ss:$16 sps:$4 sm:$0xff]   ;;  %v24736_v42 = vld [vmem:[#allocation11 + $0x1ac] ss:$16 sps:$4 sm:$0xff]  }
 0xb0b   : > { %16094 = vmatpush1.bf16.msra.mxu0 %v24641_v52  ;;  %16585 = vmatpush1.bf16.msra.mxu1 %v24644_v62  ;;  %v24731_v52 = vld [vmem:[#allocation11 + $0x1a0] ss:$16 sps:$4 sm:$0xff]   ;;  %v24734_v62 = vld [vmem:[#allocation11 + $0x1a8] ss:$16 sps:$4 sm:$0xff]  }
 0xb0c   : > { %16095 = vmatprep.subr.bf16.mxu0 %v24649_v24  ;;  %16586 = vmatprep.subr.bf16.mxu1 %v24652_v0  ;;  %v24737_v24 = vld [vmem:[#allocation11 + $0x1c0] ss:$16 sps:$4 sm:$0xff]   ;;  %v24739_v0 = vld [vmem:[#allocation11 + $0x1c4] ss:$16 sps:$4 sm:$0xff]  }
 0xb0f   : > { %16096 = vmatpush1.bf16.msra.mxu0 %v24647_v17  ;;  %16587 = vmatpush1.bf16.msra.mxu1 %v24650_v47  ;;  %v24740_v17 = vld [vmem:[#allocation11 + $0x1c8] ss:$16 sps:$4 sm:$0xff]   ;;  %v24742_v47 = vld [vmem:[#allocation11 + $0x1cc] ss:$16 sps:$4 sm:$0xff]  }
 0xb10   : > { %18191 = vmatprep.subr.bf16.mxu0 %v24655_v37  ;;  %18355 = vmatprep.subr.bf16.mxu1 %v24658_v63  ;;  %v24743_v37 = vld [vmem:[#allocation11 + $0x1e0] ss:$16 sps:$4 sm:$0xff]   ;;  %v24745_v63 = vld [vmem:[#allocation11 + $0x1e4] ss:$16 sps:$4 sm:$0xff]  }
 0xb12   : > { %16098 = vmatmul.mubr.bf16.vlgmr.msra.gmra.mrb[192].mxu0 %v31073_v22  ;;  %16589 = vmatmul.mubr.bf16.vlgmr.msra.gmra.mrb[64].mxu1 %v31073_v22  ;;  %v24676_v22 = vld [vmem:[#allocation11 + $0x6c] ss:$16 sps:$4 sm:$0xff]  }
 0xb13   : > { %16107 = vmatprep.mubr.bf16.mxu0 %v31105_v60  ;;  %16598 = vmatprep.mubr.bf16.mxu1 %v31105_v60  ;;  %v24671_v60 = vld [vmem:[#allocation11 + $0x60] ss:$16 sps:$4 sm:$0xff]  }
 0xb14   : > { %18192 = vmatpush1.bf16.msra.mxu0 %v24653_v46  ;;  %18356 = vmatpush1.bf16.msra.mxu1 %v24656_v16  ;;  %v24746_v46 = vld [vmem:[#allocation11 + $0x1e8] ss:$16 sps:$4 sm:$0xff]   ;;  %v24748_v16 = vld [vmem:[#allocation11 + $0x1ec] ss:$16 sps:$4 sm:$0xff]  }
 0xb15   : > { %18193 = vmatprep.subr.bf16.mxu0 %v24661_v49  ;;  %18357 = vmatprep.subr.bf16.mxu1 %v24664_v33  ;;  %v24751_v49 = vld [vmem:[#allocation11 + $0x204] ss:$16 sps:$4 sm:$0xff]   ;;  %v24754_v33 = vld [vmem:[#allocation11 + $0x20c] ss:$16 sps:$4 sm:$0xff]  }
 0xb18   : > { %18194 = vmatpush1.bf16.msra.mxu0 %v24659_v30  ;;  %18358 = vmatpush1.bf16.msra.mxu1 %v24662_v9 }
 0xb19   : > { %18195 = vmatprep.subr.bf16.mxu0 %v24667_v39  ;;  %18359 = vmatprep.subr.bf16.mxu1 %v24670_v28 }
 0xb1a   : > { %16108 = vmatmul.mubr.bf16.gmra.mrb[196].mxu0 %v31103_v40  ;;  %16599 = vmatmul.mubr.bf16.gmra.mrb[68].mxu1 %v31103_v40  ;;  %v24686_v40 = vld [vmem:[#allocation11 + $0xa8] ss:$16 sps:$4 sm:$0xff]  }
 0xb1c   : > { %18196 = vmatpush1.bf16.msra.mxu0 %v24665_v1  ;;  %18360 = vmatpush1.bf16.msra.mxu1 %v24668_v54 }
 0xb1d   : > { %18197 = vmatprep.subr.bf16.mxu0 %v24673_v31  ;;  %18361 = vmatprep.subr.bf16.mxu1 %v24676_v22 }
 0xb20   : > { %18198 = vmatpush1.bf16.msra.mxu0 %v24671_v60  ;;  %18362 = vmatpush1.bf16.msra.mxu1 %v24674_v23 }
 0xb21   : > { %18199 = vmatprep.subr.bf16.mxu0 %v24679_v21  ;;  %18363 = vmatprep.subr.bf16.mxu1 %v24682_v57 }
 0xb24   : > { %18200 = vmatpush1.bf16.msra.mxu0 %v24677_v18  ;;  %18364 = vmatpush1.bf16.msra.mxu1 %v24680_v48 }
 0xb25   : > { %18201 = vmatprep.subr.bf16.mxu0 %v24685_v13  ;;  %18365 = vmatprep.subr.bf16.mxu1 %v24688_v55  ;;  %v24749_v13 = vld [vmem:[#allocation11 + $0x200] ss:$16 sps:$4 sm:$0xff]   ;;  %v24752_v55 = vld [vmem:[#allocation11 + $0x208] ss:$16 sps:$4 sm:$0xff]  }
 0xb28   : > { %18202 = vmatpush1.bf16.msra.mxu0 %v24683_v4  ;;  %18366 = vmatpush1.bf16.msra.mxu1 %v24686_v40  ;;  %v24757_v4 = vld [vmem:[#allocation11 + $0x224] ss:$16 sps:$4 sm:$0xff]  }
 0xb29   : > { %18203 = vmatprep.subr.bf16.mxu0 %v24691_v41  ;;  %18367 = vmatprep.subr.bf16.mxu1 %v24694_v3 }
 0xb2c   : > { %18204 = vmatpush1.bf16.msra.mxu0 %v24689_v10  ;;  %18368 = vmatpush1.bf16.msra.mxu1 %v24692_v34  ;;  %v24760_v10 = vld [vmem:[#allocation11 + $0x22c] ss:$16 sps:$4 sm:$0xff]  }
 0xb2d   : > { %18205 = vmatprep.subr.bf16.mxu0 %v24697_v61  ;;  %18369 = vmatprep.subr.bf16.mxu1 %v24700_v36 }
 0xb30   : > { %18206 = vmatpush1.bf16.msra.mxu0 %v24695_v2  ;;  %18370 = vmatpush1.bf16.msra.mxu1 %v24698_v44 }
 0xb31   : > { %18207 = vmatprep.subr.bf16.mxu0 %v24703_v26  ;;  %18371 = vmatprep.subr.bf16.mxu1 %v24706_v29  ;;  %v24755_v29 = vld [vmem:[#allocation11 + $0x220] ss:$16 sps:$4 sm:$0xff]  }
 0xb34   : > { %18208 = vmatpush1.bf16.msra.mxu0 %v24701_v50  ;;  %18372 = vmatpush1.bf16.msra.mxu1 %v24704_v32  ;;  %v24758_v50 = vld [vmem:[#allocation11 + $0x228] ss:$16 sps:$4 sm:$0xff]  }
 0xb35   : > { %18209 = vmatprep.subr.bf16.mxu0 %v24709_v25  ;;  %18373 = vmatprep.subr.bf16.mxu1 %v24712_v11 }
 0xb38   : > { %18210 = vmatpush1.bf16.msra.mxu0 %v24707_v8  ;;  %18374 = vmatpush1.bf16.msra.mxu1 %v24710_v27  ;;  %v24763_v8 = vld [vmem:[#allocation11 + $0x244] ss:$16 sps:$4 sm:$0xff]   ;;  %v24766_v27 = vld [vmem:[#allocation11 + $0x24c] ss:$16 sps:$4 sm:$0xff]  }
 0xb39   : > { %18211 = vmatprep.subr.bf16.mxu0 %v24715_v45  ;;  %18375 = vmatprep.subr.bf16.mxu1 %v24718_v7 }
 0xb3c   : > { %18212 = vmatpush1.bf16.msra.mxu0 %v24713_v20  ;;  %18376 = vmatpush1.bf16.msra.mxu1 %v24716_v56  ;;  %v24761_v56 = vld [vmem:[#allocation11 + $0x240] ss:$16 sps:$4 sm:$0xff]  }
 0xb3d   : > { %18213 = vmatprep.subr.bf16.mxu0 %v24721_v14  ;;  %18377 = vmatprep.subr.bf16.mxu1 %v24724_v15  ;;  %v24764_v14 = vld [vmem:[#allocation11 + $0x248] ss:$16 sps:$4 sm:$0xff]   ;;  %v24769_v15 = vld [vmem:[#allocation11 + $0x264] ss:$16 sps:$4 sm:$0xff]  }
 0xb40   : > { %18214 = vmatpush1.bf16.msra.mxu0 %v24719_v19  ;;  %18378 = vmatpush1.bf16.msra.mxu1 %v24722_v53  ;;  %v24772_v19 = vld [vmem:[#allocation11 + $0x26c] ss:$16 sps:$4 sm:$0xff]   ;;  %v24767_v53 = vld [vmem:[#allocation11 + $0x260] ss:$16 sps:$4 sm:$0xff]  }
 0xb41   : > { %18215 = vmatprep.subr.bf16.mxu0 %v24727_v5  ;;  %18379 = vmatprep.subr.bf16.mxu1 %v24730_v35  ;;  %v24770_v5 = vld [vmem:[#allocation11 + $0x268] ss:$16 sps:$4 sm:$0xff]   ;;  %v24775_v35 = vld [vmem:[#allocation11 + $0x284] ss:$16 sps:$4 sm:$0xff]  }
 0xb44   : > { %18216 = vmatpush1.bf16.msra.mxu0 %v24725_v6  ;;  %18380 = vmatpush1.bf16.msra.mxu1 %v24728_v12  ;;  %v24778_v6 = vld [vmem:[#allocation11 + $0x28c] ss:$16 sps:$4 sm:$0xff]   ;;  %v24773_v12 = vld [vmem:[#allocation11 + $0x280] ss:$16 sps:$4 sm:$0xff]  }
 0xb45   : > { %18217 = vmatprep.subr.bf16.mxu0 %v24733_v43  ;;  %18381 = vmatprep.subr.bf16.mxu1 %v24736_v42  ;;  %v24776_v43 = vld [vmem:[#allocation11 + $0x288] ss:$16 sps:$4 sm:$0xff]   ;;  %v24781_v42 = vld [vmem:[#allocation11 + $0x2a4] ss:$16 sps:$4 sm:$0xff]  }
 0xb48   : > { %18218 = vmatpush1.bf16.msra.mxu0 %v24731_v52  ;;  %18382 = vmatpush1.bf16.msra.mxu1 %v24734_v62  ;;  %v24784_v52 = vld [vmem:[#allocation11 + $0x2ac] ss:$16 sps:$4 sm:$0xff]   ;;  %v24779_v62 = vld [vmem:[#allocation11 + $0x2a0] ss:$16 sps:$4 sm:$0xff]  }
 0xb49   : > { %18219 = vmatprep.subr.bf16.mxu0 %v24739_v0  ;;  %18383 = vmatprep.subr.bf16.mxu1 %v24742_v47  ;;  %v24787_v0 = vld [vmem:[#allocation11 + $0x2c4] ss:$16 sps:$4 sm:$0xff]   ;;  %v24785_v47 = vld [vmem:[#allocation11 + $0x2c0] ss:$16 sps:$4 sm:$0xff]  }
 0xb4c   : > { %18220 = vmatpush1.bf16.msra.mxu0 %v24737_v24  ;;  %18384 = vmatpush1.bf16.msra.mxu1 %v24740_v17  ;;  %v24782_v24 = vld [vmem:[#allocation11 + $0x2a8] ss:$16 sps:$4 sm:$0xff]   ;;  %v24790_v17 = vld [vmem:[#allocation11 + $0x2cc] ss:$16 sps:$4 sm:$0xff]  }
 0xb4d   : > { %18221 = vmatprep.subr.bf16.mxu0 %v24745_v63  ;;  %18385 = vmatprep.subr.bf16.mxu1 %v24748_v16  ;;  %v24793_v63 = vld [vmem:[#allocation11 + $0x2e4] ss:$16 sps:$4 sm:$0xff]   ;;  %v24791_v16 = vld [vmem:[#allocation11 + $0x2e0] ss:$16 sps:$4 sm:$0xff]  }
 0xb50   : > { %18222 = vmatpush1.bf16.msra.mxu0 %v24743_v37  ;;  %18386 = vmatpush1.bf16.msra.mxu1 %v24746_v46  ;;  %v24788_v37 = vld [vmem:[#allocation11 + $0x2c8] ss:$16 sps:$4 sm:$0xff]   ;;  %v24796_v46 = vld [vmem:[#allocation11 + $0x2ec] ss:$16 sps:$4 sm:$0xff]  }
 0xb51   : > { %18232 = vmatprep.subr.bf16.mxu0 %v24751_v49  ;;  %18396 = vmatprep.subr.bf16.mxu1 %v24754_v33  ;;  %v24794_v49 = vld [vmem:[#allocation11 + $0x2e8] ss:$16 sps:$4 sm:$0xff]   ;;  %v24799_v33 = vld [vmem:[#allocation11 + $0x304] ss:$16 sps:$4 sm:$0xff]  }
 0xbe5   : > { %v16099_v30 = vpop.f32.mrb[192].mxu0  ;;  %v16590_v9 = vpop.f32.mrb[64].mxu1 }
 0xbe6   : > { %v16609_v39 = vmax.f32 %v16099_v30, %v16590_v9  ;;  %v16101_v28 = vpop.f32.mrb[193].mxu0  ;;  %v16592_v1 = vpop.f32.mrb[65].mxu1  ;;  %v24802_v30 = vld [vmem:[#allocation11 + $0x30c] ss:$16 sps:$4 sm:$0xff]   ;;  %v24797_v9 = vld [vmem:[#allocation11 + $0x300] ss:$16 sps:$4 sm:$0xff]  }
 0xbe7   : > { %v16610_v54 = vmax.f32 %v16101_v28, %v16592_v1  ;;  %v16103_v31 = vpop.f32.mrb[194].mxu0  ;;  %v16594_v22 = vpop.f32.mrb[66].mxu1  ;;  %v24805_v28 = vld [vmem:[#allocation11 + $0x324] ss:$16 sps:$4 sm:$0xff]   ;;  %v24808_v1 = vld [vmem:[#allocation11 + $0x32c] ss:$16 sps:$4 sm:$0xff]  }
 0xbe8   : > { %v16611_v60 = vmax.f32 %v16103_v31, %v16594_v22  ;;  %v16105_v23 = vpop.f32.mrb[195].mxu0  ;;  %v16596_v21 = vpop.f32.mrb[67].mxu1  ;;  %v24806_v31 = vld [vmem:[#allocation11 + $0x328] ss:$16 sps:$4 sm:$0xff]   ;;  %v24811_v22 = vld [vmem:[#allocation11 + $0x344] ss:$16 sps:$4 sm:$0xff]  }
 0xbe9   : > { %v16612_v57 = vmax.f32 %v16105_v23, %v16596_v21  ;;  %v24809_v23 = vld [vmem:[#allocation11 + $0x340] ss:$16 sps:$4 sm:$0xff]   ;;  %v24812_v21 = vld [vmem:[#allocation11 + $0x348] ss:$16 sps:$4 sm:$0xff]  }
 0xbea   : > { %v31263_v18 = vpack.c.bf16 %v16611_v60, %v16609_v39  ;;  %v24800_v39 = vld [vmem:[#allocation11 + $0x308] ss:$16 sps:$4 sm:$0xff]   ;;  %v24814_v60 = vld [vmem:[#allocation11 + $0x34c] ss:$16 sps:$4 sm:$0xff]  }
 0xbeb   : > { %v16618_v48 = vpack.c.bf16 %v16612_v57, %v16610_v54  ;;  %v24803_v54 = vld [vmem:[#allocation11 + $0x320] ss:$16 sps:$4 sm:$0xff]   ;;  %v24817_v57 = vld [vmem:[#allocation11 + $0x364] ss:$16 sps:$4 sm:$0xff]  }
 0xbed   : > { %v16109_v40 = vpop.f32.mrb[196].mxu0  ;;  %v16600_v41 = vpop.f32.mrb[68].mxu1  ;;  %18223 = vmatprep.mubr.bf16.mxu0 %v16618_v48  ;;  %18387 = vmatprep.mubr.bf16.mxu1 %v16618_v48  ;;  %v16624_v3 = vrot.slane %v16618_v48, 4  ;;  %v24820_v48 = vld [vmem:[#allocation11 + $0x36c] ss:$16 sps:$4 sm:$0xff]  }
 0xbee   : > { %v16613_v34 = vmax.f32 %v16109_v40, %v16600_v41  ;;  %v16111_v61 = vpop.f32.mrb[197].mxu0  ;;  %v16602_v36 = vpop.f32.mrb[69].mxu1  ;;  %18224 = vmatmul.mubr.bf16.vlgmr.msra.gmra.mrb[200].mxu0 %v31263_v18  ;;  %18388 = vmatmul.mubr.bf16.vlgmr.msra.gmra.mrb[72].mxu1 %v31263_v18  ;;  %v24826_v40 = vld [vmem:[#allocation11 + $0x38c] ss:$16 sps:$4 sm:$0xff]   ;;  %v24821_v41 = vld [vmem:[#allocation11 + $0x380] ss:$16 sps:$4 sm:$0xff]  }
 0xbef   : > { %v16614_v2 = vmax.f32 %v16111_v61, %v16602_v36  ;;  %18233 = vmatpush1.bf16.msra.mxu0 %v24749_v13  ;;  %18397 = vmatpush1.bf16.msra.mxu1 %v24752_v55  ;;  %v16113_v44 = vpop.f32.mrb[198].mxu0  ;;  %v16604_v26 = vpop.f32.mrb[70].mxu1  ;;  %v24815_v13 = vld [vmem:[#allocation11 + $0x360] ss:$16 sps:$4 sm:$0xff]   ;;  %v24818_v55 = vld [vmem:[#allocation11 + $0x368] ss:$16 sps:$4 sm:$0xff]  }
 0xbf0   : > { %v16615_v32 = vmax.f32 %v16113_v44, %v16604_v26  ;;  %18264 = vmatprep.mubr.bf16.mxu0 %v16624_v3  ;;  %18428 = vmatprep.mubr.bf16.mxu1 %v16624_v3  ;;  %v16115_v25 = vpop.f32.mrb[199].mxu0  ;;  %v16606_v11 = vpop.f32.mrb[71].mxu1  ;;  %v24824_v3 = vld [vmem:[#allocation11 + $0x388] ss:$16 sps:$4 sm:$0xff]   ;;  %v24827_v61 = vld [vmem:[#allocation11 + $0x3a0] ss:$16 sps:$4 sm:$0xff]  }
 0xbf1   : > { %v16616_v45 = vmax.f32 %v16115_v25, %v16606_v11  ;;  %18234 = vmatprep.subr.bf16.mxu0 %v24757_v4  ;;  %18398 = vmatprep.subr.bf16.mxu1 %v24760_v10  ;;  %v24823_v4 = vld [vmem:[#allocation11 + $0x384] ss:$16 sps:$4 sm:$0xff]   ;;  %v24830_v36 = vld [vmem:[#allocation11 + $0x3a8] ss:$16 sps:$4 sm:$0xff]   ;;  %v24838_v44 = vld [vmem:[#allocation11 + $0x3cc] ss:$16 sps:$4 sm:$0xff]  }
 0xbf2   : > { %v31267_v7 = vpack.c.bf16 %v16615_v32, %v16613_v34  ;;  %v24829_v10 = vld [vmem:[#allocation11 + $0x3a4] ss:$16 sps:$4 sm:$0xff]   ;;  %v24832_v34 = vld [vmem:[#allocation11 + $0x3ac] ss:$16 sps:$4 sm:$0xff]   ;;  %v24833_v26 = vld [vmem:[#allocation11 + $0x3c0] ss:$16 sps:$4 sm:$0xff]  }
 0xbf3   : > { %v31269_v20 = vpack.c.bf16 %v16616_v45, %v16614_v2  ;;  %18235 = vmatpush1.bf16.msra.mxu0 %v24755_v29  ;;  %18399 = vmatpush1.bf16.msra.mxu1 %v24758_v50  ;;  %v24835_v2 = vld [vmem:[#allocation11 + $0x3c4] ss:$16 sps:$4 sm:$0xff]   ;;  %v24836_v29 = vld [vmem:[#allocation11 + $0x3c8] ss:$16 sps:$4 sm:$0xff]   ;;  %v24844_v32 = vld [vmem:[#allocation11 + $0x3ec] ss:$16 sps:$4 sm:$0xff]  }
 0xbf4   : > { %18236 = vmatprep.subr.bf16.mxu0 %v24763_v8  ;;  %18400 = vmatprep.subr.bf16.mxu1 %v24766_v27  ;;  %v24841_v50 = vld [vmem:[#allocation11 + $0x3e4] ss:$16 sps:$4 sm:$0xff]   ;;  %v24839_v25 = vld [vmem:[#allocation11 + $0x3e0] ss:$16 sps:$4 sm:$0xff]   ;;  %v24842_v11 = vld [vmem:[#allocation11 + $0x3e8] ss:$16 sps:$4 sm:$0xff]  }
 0xbf5   : > { %v24847_v8 = vld [vmem:[#allocation11 + $0x404] ss:$16 sps:$4 sm:$0xff]   ;;  %v24850_v27 = vld [vmem:[#allocation11 + $0x40c] ss:$16 sps:$4 sm:$0xff]   ;;  %v24845_v45 = vld [vmem:[#allocation11 + $0x400] ss:$16 sps:$4 sm:$0xff]  }
 0xbf7   : > { %18237 = vmatpush1.bf16.msra.mxu0 %v24761_v56  ;;  %18401 = vmatpush1.bf16.msra.mxu1 %v24764_v14  ;;  %v16623_v56 = vrot.slane %v31263_v18, 4  ;;  %v24848_v14 = vld [vmem:[#allocation11 + $0x408] ss:$16 sps:$4 sm:$0xff]   ;;  %v24857_v18 = vld [vmem:[#allocation11 + $0x440] ss:$16 sps:$4 sm:$0xff]  }
 0xbf8   : > { %18238 = vmatprep.subr.bf16.mxu0 %v24769_v15  ;;  %18402 = vmatprep.subr.bf16.mxu1 %v24772_v19  ;;  %v24853_v15 = vld [vmem:[#allocation11 + $0x424] ss:$16 sps:$4 sm:$0xff]   ;;  %v24856_v19 = vld [vmem:[#allocation11 + $0x42c] ss:$16 sps:$4 sm:$0xff]  }
 0xbfb   : > { %18239 = vmatpush1.bf16.msra.mxu0 %v24767_v53  ;;  %18403 = vmatpush1.bf16.msra.mxu1 %v24770_v5  ;;  %v24851_v53 = vld [vmem:[#allocation11 + $0x420] ss:$16 sps:$4 sm:$0xff]   ;;  %v24854_v5 = vld [vmem:[#allocation11 + $0x428] ss:$16 sps:$4 sm:$0xff]  }
 0xbfc   : > { %18240 = vmatprep.subr.bf16.mxu0 %v24775_v35  ;;  %18404 = vmatprep.subr.bf16.mxu1 %v24778_v6  ;;  %v24859_v35 = vld [vmem:[#allocation11 + $0x444] ss:$16 sps:$4 sm:$0xff]   ;;  %v24862_v6 = vld [vmem:[#allocation11 + $0x44c] ss:$16 sps:$4 sm:$0xff]  }
 0xbff   : > { %18241 = vmatpush1.bf16.msra.mxu0 %v24773_v12  ;;  %18405 = vmatpush1.bf16.msra.mxu1 %v24776_v43  ;;  %v24860_v12 = vld [vmem:[#allocation11 + $0x448] ss:$16 sps:$4 sm:$0xff]   ;;  %v24865_v43 = vld [vmem:[#allocation11 + $0x464] ss:$16 sps:$4 sm:$0xff]  }
 0xc00   : > { %18242 = vmatprep.subr.bf16.mxu0 %v24781_v42  ;;  %18406 = vmatprep.subr.bf16.mxu1 %v24784_v52  ;;  %v24868_v42 = vld [vmem:[#allocation11 + $0x46c] ss:$16 sps:$4 sm:$0xff]   ;;  %v24863_v52 = vld [vmem:[#allocation11 + $0x460] ss:$16 sps:$4 sm:$0xff]  }
 0xc03   : > { %18243 = vmatpush1.bf16.msra.mxu0 %v24779_v62  ;;  %18407 = vmatpush1.bf16.msra.mxu1 %v24782_v24  ;;  %v24866_v62 = vld [vmem:[#allocation11 + $0x468] ss:$16 sps:$4 sm:$0xff]   ;;  %v24871_v24 = vld [vmem:[#allocation11 + $0x484] ss:$16 sps:$4 sm:$0xff]  }
 0xc04   : > { %18244 = vmatprep.subr.bf16.mxu0 %v24787_v0  ;;  %18408 = vmatprep.subr.bf16.mxu1 %v24790_v17  ;;  %v24874_v0 = vld [vmem:[#allocation11 + $0x48c] ss:$16 sps:$4 sm:$0xff]   ;;  %v24869_v17 = vld [vmem:[#allocation11 + $0x480] ss:$16 sps:$4 sm:$0xff]  }
 0xc07   : > { %18245 = vmatpush1.bf16.msra.mxu0 %v24785_v47  ;;  %18409 = vmatpush1.bf16.msra.mxu1 %v24788_v37  ;;  %v24872_v47 = vld [vmem:[#allocation11 + $0x488] ss:$16 sps:$4 sm:$0xff]   ;;  %v24877_v37 = vld [vmem:[#allocation11 + $0x4a4] ss:$16 sps:$4 sm:$0xff]  }
 0xc08   : > { %18246 = vmatprep.subr.bf16.mxu0 %v24793_v63  ;;  %18410 = vmatprep.subr.bf16.mxu1 %v24796_v46  ;;  %v24880_v63 = vld [vmem:[#allocation11 + $0x4ac] ss:$16 sps:$4 sm:$0xff]   ;;  %v24875_v46 = vld [vmem:[#allocation11 + $0x4a0] ss:$16 sps:$4 sm:$0xff]  }
 0xc0b   : > { %18247 = vmatpush1.bf16.msra.mxu0 %v24791_v16  ;;  %18411 = vmatpush1.bf16.msra.mxu1 %v24794_v49  ;;  %v24878_v16 = vld [vmem:[#allocation11 + $0x4a8] ss:$16 sps:$4 sm:$0xff]   ;;  %v24883_v49 = vld [vmem:[#allocation11 + $0x4c4] ss:$16 sps:$4 sm:$0xff]  }
 0xc0c   : > { %18248 = vmatprep.subr.bf16.mxu0 %v24799_v33  ;;  %18412 = vmatprep.subr.bf16.mxu1 %v24802_v30  ;;  %v24886_v33 = vld [vmem:[#allocation11 + $0x4cc] ss:$16 sps:$4 sm:$0xff]   ;;  %v24881_v30 = vld [vmem:[#allocation11 + $0x4c0] ss:$16 sps:$4 sm:$0xff]  }
 0xc0f   : > { %18249 = vmatpush1.bf16.msra.mxu0 %v24797_v9  ;;  %18413 = vmatpush1.bf16.msra.mxu1 %v24800_v39  ;;  %v24884_v9 = vld [vmem:[#allocation11 + $0x4c8] ss:$16 sps:$4 sm:$0xff]   ;;  %v24889_v39 = vld [vmem:[#allocation11 + $0x4e4] ss:$16 sps:$4 sm:$0xff]  }
 0xc10   : > { %18250 = vmatprep.subr.bf16.mxu0 %v24805_v28  ;;  %18414 = vmatprep.subr.bf16.mxu1 %v24808_v1  ;;  %v24892_v28 = vld [vmem:[#allocation11 + $0x4ec] ss:$16 sps:$4 sm:$0xff]   ;;  %v24887_v1 = vld [vmem:[#allocation11 + $0x4e0] ss:$16 sps:$4 sm:$0xff]  }
 0xc13   : > { %18251 = vmatpush1.bf16.msra.mxu0 %v24803_v54  ;;  %18415 = vmatpush1.bf16.msra.mxu1 %v24806_v31  ;;  %v24890_v54 = vld [vmem:[#allocation11 + $0x4e8] ss:$16 sps:$4 sm:$0xff]   ;;  %v24895_v31 = vld [vmem:[#allocation11 + $0x504] ss:$16 sps:$4 sm:$0xff]  }
 0xc14   : > { %18252 = vmatprep.subr.bf16.mxu0 %v24811_v22  ;;  %18416 = vmatprep.subr.bf16.mxu1 %v24814_v60  ;;  %v24898_v22 = vld [vmem:[#allocation11 + $0x50c] ss:$16 sps:$4 sm:$0xff]   ;;  %v24893_v60 = vld [vmem:[#allocation11 + $0x500] ss:$16 sps:$4 sm:$0xff]  }
 0xc17   : > { %18253 = vmatpush1.bf16.msra.mxu0 %v24809_v23  ;;  %18417 = vmatpush1.bf16.msra.mxu1 %v24812_v21  ;;  %v24896_v23 = vld [vmem:[#allocation11 + $0x508] ss:$16 sps:$4 sm:$0xff]   ;;  %v24901_v21 = vld [vmem:[#allocation11 + $0x524] ss:$16 sps:$4 sm:$0xff]  }
 0xc18   : > { %18254 = vmatprep.subr.bf16.mxu0 %v24817_v57  ;;  %18418 = vmatprep.subr.bf16.mxu1 %v24820_v48  ;;  %v24904_v57 = vld [vmem:[#allocation11 + $0x52c] ss:$16 sps:$4 sm:$0xff]   ;;  %v24899_v48 = vld [vmem:[#allocation11 + $0x520] ss:$16 sps:$4 sm:$0xff]  }
 0xc1b   : > { %18255 = vmatpush1.bf16.msra.mxu0 %v24815_v13  ;;  %18419 = vmatpush1.bf16.msra.mxu1 %v24818_v55  ;;  %v24902_v13 = vld [vmem:[#allocation11 + $0x528] ss:$16 sps:$4 sm:$0xff]   ;;  %v24907_v55 = vld [vmem:[#allocation11 + $0x544] ss:$16 sps:$4 sm:$0xff]  }
 0xc1c   : > { %18256 = vmatprep.subr.bf16.mxu0 %v24823_v4  ;;  %18420 = vmatprep.subr.bf16.mxu1 %v24826_v40  ;;  %v24910_v4 = vld [vmem:[#allocation11 + $0x54c] ss:$16 sps:$4 sm:$0xff]   ;;  %v24905_v40 = vld [vmem:[#allocation11 + $0x540] ss:$16 sps:$4 sm:$0xff]  }
 0xc1f   : > { %18257 = vmatpush1.bf16.msra.mxu0 %v24821_v41  ;;  %18421 = vmatpush1.bf16.msra.mxu1 %v24824_v3  ;;  %v24908_v41 = vld [vmem:[#allocation11 + $0x548] ss:$16 sps:$4 sm:$0xff]   ;;  %v24913_v3 = vld [vmem:[#allocation11 + $0x564] ss:$16 sps:$4 sm:$0xff]  }
 0xc20   : > { %18258 = vmatprep.subr.bf16.mxu0 %v24829_v10  ;;  %18422 = vmatprep.subr.bf16.mxu1 %v24832_v34  ;;  %v24916_v10 = vld [vmem:[#allocation11 + $0x56c] ss:$16 sps:$4 sm:$0xff]   ;;  %v24911_v34 = vld [vmem:[#allocation11 + $0x560] ss:$16 sps:$4 sm:$0xff]  }
 0xc23   : > { %18259 = vmatpush1.bf16.msra.mxu0 %v24827_v61  ;;  %18423 = vmatpush1.bf16.msra.mxu1 %v24830_v36  ;;  %v24914_v61 = vld [vmem:[#allocation11 + $0x568] ss:$16 sps:$4 sm:$0xff]   ;;  %v24919_v36 = vld [vmem:[#allocation11 + $0x584] ss:$16 sps:$4 sm:$0xff]  }
 0xc24   : > { %18260 = vmatprep.subr.bf16.mxu0 %v24835_v2  ;;  %18424 = vmatprep.subr.bf16.mxu1 %v24838_v44  ;;  %v24922_v2 = vld [vmem:[#allocation11 + $0x58c] ss:$16 sps:$4 sm:$0xff]   ;;  %v24917_v44 = vld [vmem:[#allocation11 + $0x580] ss:$16 sps:$4 sm:$0xff]  }
 0xc27   : > { %18261 = vmatpush1.bf16.msra.mxu0 %v24833_v26  ;;  %18425 = vmatpush1.bf16.msra.mxu1 %v24836_v29  ;;  %v24920_v26 = vld [vmem:[#allocation11 + $0x588] ss:$16 sps:$4 sm:$0xff]   ;;  %v24925_v29 = vld [vmem:[#allocation11 + $0x5a4] ss:$16 sps:$4 sm:$0xff]  }
 0xc28   : > { %18262 = vmatprep.subr.bf16.mxu0 %v24841_v50  ;;  %18426 = vmatprep.subr.bf16.mxu1 %v24844_v32  ;;  %v24928_v50 = vld [vmem:[#allocation11 + $0x5ac] ss:$16 sps:$4 sm:$0xff]   ;;  %v24923_v32 = vld [vmem:[#allocation11 + $0x5a0] ss:$16 sps:$4 sm:$0xff]  }
 0xc2b   : > { %18263 = vmatpush1.bf16.msra.mxu0 %v24839_v25  ;;  %18427 = vmatpush1.bf16.msra.mxu1 %v24842_v11  ;;  %v24926_v25 = vld [vmem:[#allocation11 + $0x5a8] ss:$16 sps:$4 sm:$0xff]   ;;  %v24931_v11 = vld [vmem:[#allocation11 + $0x5c4] ss:$16 sps:$4 sm:$0xff]  }
 0xc2c   : > { %18273 = vmatprep.subr.bf16.mxu0 %v24847_v8  ;;  %18437 = vmatprep.subr.bf16.mxu1 %v24850_v27  ;;  %v24934_v8 = vld [vmem:[#allocation11 + $0x5cc] ss:$16 sps:$4 sm:$0xff]   ;;  %v24929_v27 = vld [vmem:[#allocation11 + $0x5c0] ss:$16 sps:$4 sm:$0xff]  }
 0xc2e   : > { %18265 = vmatmul.mubr.bf16.vlgmr.msra.gmra.mrb[200].mxu0 %v16623_v56  ;;  %18429 = vmatmul.mubr.bf16.vlgmr.msra.gmra.mrb[72].mxu1 %v16623_v56  ;;  %v24937_v56 = vld [vmem:[#allocation11 + $0x5e4] ss:$16 sps:$4 sm:$0xff]  }
 0xc2f   : > { %18274 = vmatpush1.bf16.msra.mxu0 %v24845_v45  ;;  %18305 = vmatprep.mubr.bf16.mxu0 %v31269_v20  ;;  %v24932_v45 = vld [vmem:[#allocation11 + $0x5c8] ss:$16 sps:$4 sm:$0xff]  }
 0xc30   : > { %18438 = vmatpush1.bf16.msra.mxu1 %v24848_v14  ;;  %18469 = vmatprep.mubr.bf16.mxu1 %v31269_v20  ;;  %v24940_v14 = vld [vmem:[#allocation11 + $0x5ec] ss:$16 sps:$4 sm:$0xff]  }
 0xc31   : > { %18275 = vmatprep.subr.bf16.mxu0 %v24853_v15  ;;  %18439 = vmatprep.subr.bf16.mxu1 %v24856_v19  ;;  %v24935_v15 = vld [vmem:[#allocation11 + $0x5e0] ss:$16 sps:$4 sm:$0xff]   ;;  %v24938_v19 = vld [vmem:[#allocation11 + $0x5e8] ss:$16 sps:$4 sm:$0xff]  }
 0xc33   : > { %18276 = vmatpush1.bf16.msra.mxu0 %v24851_v53  ;;  %v24943_v53 = vld [vmem:[#allocation11 + $0x604] ss:$16 sps:$4 sm:$0xff]  }
 0xc34   : > { %18440 = vmatpush1.bf16.msra.mxu1 %v24854_v5  ;;  %18277 = vmatprep.subr.bf16.mxu0 %v24859_v35  ;;  %v24946_v5 = vld [vmem:[#allocation11 + $0x60c] ss:$16 sps:$4 sm:$0xff]   ;;  %v24941_v35 = vld [vmem:[#allocation11 + $0x600] ss:$16 sps:$4 sm:$0xff]  }
 0xc35   : > { %18441 = vmatprep.subr.bf16.mxu1 %v24862_v6  ;;  %v24944_v6 = vld [vmem:[#allocation11 + $0x608] ss:$16 sps:$4 sm:$0xff]  }
 0xc37   : > { %18278 = vmatpush1.bf16.msra.mxu0 %v24857_v18  ;;  %v24949_v18 = vld [vmem:[#allocation11 + $0x624] ss:$16 sps:$4 sm:$0xff]  }
 0xc38   : > { %18442 = vmatpush1.bf16.msra.mxu1 %v24860_v12  ;;  %18279 = vmatprep.subr.bf16.mxu0 %v24865_v43  ;;  %v16630_v12 = vrot.slane %v31269_v20, 4  ;;  %v24952_v43 = vld [vmem:[#allocation11 + $0x62c] ss:$16 sps:$4 sm:$0xff]  }
 0xc39   : > { %18443 = vmatprep.subr.bf16.mxu1 %v24868_v42  ;;  %v24947_v42 = vld [vmem:[#allocation11 + $0x620] ss:$16 sps:$4 sm:$0xff]   ;;  %v24964_v20 = vld [vmem:[#allocation11 + $0x66c] ss:$16 sps:$4 sm:$0xff]  }
 0xc3b   : > { %18280 = vmatpush1.bf16.msra.mxu0 %v24863_v52  ;;  %v24950_v52 = vld [vmem:[#allocation11 + $0x628] ss:$16 sps:$4 sm:$0xff]  }
 0xc3c   : > { %18444 = vmatpush1.bf16.msra.mxu1 %v24866_v62  ;;  %18281 = vmatprep.subr.bf16.mxu0 %v24871_v24  ;;  %v24955_v62 = vld [vmem:[#allocation11 + $0x644] ss:$16 sps:$4 sm:$0xff]   ;;  %v24958_v24 = vld [vmem:[#allocation11 + $0x64c] ss:$16 sps:$4 sm:$0xff]  }
 0xc3d   : > { %18445 = vmatprep.subr.bf16.mxu1 %v24874_v0  ;;  %v24953_v0 = vld [vmem:[#allocation11 + $0x640] ss:$16 sps:$4 sm:$0xff]  }
 0xc3f   : > { %18282 = vmatpush1.bf16.msra.mxu0 %v24869_v17  ;;  %v24956_v17 = vld [vmem:[#allocation11 + $0x648] ss:$16 sps:$4 sm:$0xff]  }
 0xc40   : > { %18446 = vmatpush1.bf16.msra.mxu1 %v24872_v47  ;;  %18283 = vmatprep.subr.bf16.mxu0 %v24877_v37  ;;  %v24961_v47 = vld [vmem:[#allocation11 + $0x664] ss:$16 sps:$4 sm:$0xff]   ;;  %v24959_v37 = vld [vmem:[#allocation11 + $0x660] ss:$16 sps:$4 sm:$0xff]  }
 0xc41   : > { %18447 = vmatprep.subr.bf16.mxu1 %v24880_v63  ;;  %v24962_v63 = vld [vmem:[#allocation11 + $0x668] ss:$16 sps:$4 sm:$0xff]  }
 0xc43   : > { %18284 = vmatpush1.bf16.msra.mxu0 %v24875_v46  ;;  %v24967_v46 = vld [vmem:[#allocation11 + $0x684] ss:$16 sps:$4 sm:$0xff]  }
 0xc44   : > { %18448 = vmatpush1.bf16.msra.mxu1 %v24878_v16  ;;  %18285 = vmatprep.subr.bf16.mxu0 %v24883_v49  ;;  %v24970_v16 = vld [vmem:[#allocation11 + $0x68c] ss:$16 sps:$4 sm:$0xff]   ;;  %v24965_v49 = vld [vmem:[#allocation11 + $0x680] ss:$16 sps:$4 sm:$0xff]  }
 0xc45   : > { %18449 = vmatprep.subr.bf16.mxu1 %v24886_v33  ;;  %v24968_v33 = vld [vmem:[#allocation11 + $0x688] ss:$16 sps:$4 sm:$0xff]  }
 0xc47   : > { %18286 = vmatpush1.bf16.msra.mxu0 %v24881_v30  ;;  %v24973_v30 = vld [vmem:[#allocation11 + $0x6a4] ss:$16 sps:$4 sm:$0xff]  }
 0xc48   : > { %18450 = vmatpush1.bf16.msra.mxu1 %v24884_v9  ;;  %18287 = vmatprep.subr.bf16.mxu0 %v24889_v39  ;;  %v24976_v9 = vld [vmem:[#allocation11 + $0x6ac] ss:$16 sps:$4 sm:$0xff]   ;;  %v24971_v39 = vld [vmem:[#allocation11 + $0x6a0] ss:$16 sps:$4 sm:$0xff]  }
 0xc49   : > { %18451 = vmatprep.subr.bf16.mxu1 %v24892_v28  ;;  %v24974_v28 = vld [vmem:[#allocation11 + $0x6a8] ss:$16 sps:$4 sm:$0xff]  }
 0xc4b   : > { %18288 = vmatpush1.bf16.msra.mxu0 %v24887_v1  ;;  %v24979_v1 = vld [vmem:[#allocation11 + $0x6c4] ss:$16 sps:$4 sm:$0xff]  }
 0xc4c   : > { %18452 = vmatpush1.bf16.msra.mxu1 %v24890_v54  ;;  %18289 = vmatprep.subr.bf16.mxu0 %v24895_v31  ;;  %v24982_v54 = vld [vmem:[#allocation11 + $0x6cc] ss:$16 sps:$4 sm:$0xff]   ;;  %v24977_v31 = vld [vmem:[#allocation11 + $0x6c0] ss:$16 sps:$4 sm:$0xff]  }
 0xc4d   : > { %18453 = vmatprep.subr.bf16.mxu1 %v24898_v22  ;;  %v24980_v22 = vld [vmem:[#allocation11 + $0x6c8] ss:$16 sps:$4 sm:$0xff]  }
 0xc4f   : > { %18290 = vmatpush1.bf16.msra.mxu0 %v24893_v60  ;;  %v24985_v60 = vld [vmem:[#allocation11 + $0x6e4] ss:$16 sps:$4 sm:$0xff]  }
 0xc50   : > { %18454 = vmatpush1.bf16.msra.mxu1 %v24896_v23  ;;  %18291 = vmatprep.subr.bf16.mxu0 %v24901_v21  ;;  %v24988_v23 = vld [vmem:[#allocation11 + $0x6ec] ss:$16 sps:$4 sm:$0xff]   ;;  %v24983_v21 = vld [vmem:[#allocation11 + $0x6e0] ss:$16 sps:$4 sm:$0xff]  }
 0xc51   : > { %18455 = vmatprep.subr.bf16.mxu1 %v24904_v57  ;;  %v24986_v57 = vld [vmem:[#allocation11 + $0x6e8] ss:$16 sps:$4 sm:$0xff]  }
 0xc53   : > { %18292 = vmatpush1.bf16.msra.mxu0 %v24899_v48  ;;  %v24991_v48 = vld [vmem:[#allocation11 + $0x704] ss:$16 sps:$4 sm:$0xff]  }
 0xc54   : > { %18456 = vmatpush1.bf16.msra.mxu1 %v24902_v13  ;;  %18293 = vmatprep.subr.bf16.mxu0 %v24907_v55  ;;  %v24994_v13 = vld [vmem:[#allocation11 + $0x70c] ss:$16 sps:$4 sm:$0xff]   ;;  %v24989_v55 = vld [vmem:[#allocation11 + $0x700] ss:$16 sps:$4 sm:$0xff]  }
 0xc55   : > { %18457 = vmatprep.subr.bf16.mxu1 %v24910_v4  ;;  %v24992_v4 = vld [vmem:[#allocation11 + $0x708] ss:$16 sps:$4 sm:$0xff]  }
 0xc57   : > { %18294 = vmatpush1.bf16.msra.mxu0 %v24905_v40  ;;  %v24997_v40 = vld [vmem:[#allocation11 + $0x724] ss:$16 sps:$4 sm:$0xff]  }
 0xc58   : > { %18458 = vmatpush1.bf16.msra.mxu1 %v24908_v41  ;;  %18295 = vmatprep.subr.bf16.mxu0 %v24913_v3  ;;  %v25000_v41 = vld [vmem:[#allocation11 + $0x72c] ss:$16 sps:$4 sm:$0xff]   ;;  %v24995_v3 = vld [vmem:[#allocation11 + $0x720] ss:$16 sps:$4 sm:$0xff]  }
 0xc59   : > { %18459 = vmatprep.subr.bf16.mxu1 %v24916_v10  ;;  %v24998_v10 = vld [vmem:[#allocation11 + $0x728] ss:$16 sps:$4 sm:$0xff]  }
 0xc5b   : > { %18296 = vmatpush1.bf16.msra.mxu0 %v24911_v34  ;;  %v25003_v34 = vld [vmem:[#allocation11 + $0x744] ss:$16 sps:$4 sm:$0xff]  }
 0xc5c   : > { %18460 = vmatpush1.bf16.msra.mxu1 %v24914_v61  ;;  %18297 = vmatprep.subr.bf16.mxu0 %v24919_v36  ;;  %v25006_v61 = vld [vmem:[#allocation11 + $0x74c] ss:$16 sps:$4 sm:$0xff]   ;;  %v25001_v36 = vld [vmem:[#allocation11 + $0x740] ss:$16 sps:$4 sm:$0xff]  }
 0xc5d   : > { %18461 = vmatprep.subr.bf16.mxu1 %v24922_v2  ;;  %v25004_v2 = vld [vmem:[#allocation11 + $0x748] ss:$16 sps:$4 sm:$0xff]  }
 0xc5f   : > { %18298 = vmatpush1.bf16.msra.mxu0 %v24917_v44  ;;  %v25009_v44 = vld [vmem:[#allocation11 + $0x764] ss:$16 sps:$4 sm:$0xff]  }
 0xc60   : > { %18462 = vmatpush1.bf16.msra.mxu1 %v24920_v26  ;;  %18299 = vmatprep.subr.bf16.mxu0 %v24925_v29  ;;  %v25012_v26 = vld [vmem:[#allocation11 + $0x76c] ss:$16 sps:$4 sm:$0xff]   ;;  %v25007_v29 = vld [vmem:[#allocation11 + $0x760] ss:$16 sps:$4 sm:$0xff]  }
 0xc61   : > { %18463 = vmatprep.subr.bf16.mxu1 %v24928_v50  ;;  %v25010_v50 = vld [vmem:[#allocation11 + $0x768] ss:$16 sps:$4 sm:$0xff]  }
 0xc63   : > { %18300 = vmatpush1.bf16.msra.mxu0 %v24923_v32  ;;  %v25015_v32 = vld [vmem:[#allocation11 + $0x784] ss:$16 sps:$4 sm:$0xff]  }
 0xc64   : > { %18464 = vmatpush1.bf16.msra.mxu1 %v24926_v25  ;;  %18301 = vmatprep.subr.bf16.mxu0 %v24931_v11  ;;  %v25018_v25 = vld [vmem:[#allocation11 + $0x78c] ss:$16 sps:$4 sm:$0xff]   ;;  %v25013_v11 = vld [vmem:[#allocation11 + $0x780] ss:$16 sps:$4 sm:$0xff]  }
 0xc65   : > { %18465 = vmatprep.subr.bf16.mxu1 %v24934_v8  ;;  %v25016_v8 = vld [vmem:[#allocation11 + $0x788] ss:$16 sps:$4 sm:$0xff]  }
 0xc67   : > { %18302 = vmatpush1.bf16.msra.mxu0 %v24929_v27  ;;  %v25021_v27 = vld [vmem:[#allocation11 + $0x7a4] ss:$16 sps:$4 sm:$0xff]  }
 0xc68   : > { %18466 = vmatpush1.bf16.msra.mxu1 %v24932_v45  ;;  %18303 = vmatprep.subr.bf16.mxu0 %v24937_v56  ;;  %v25024_v45 = vld [vmem:[#allocation11 + $0x7ac] ss:$16 sps:$4 sm:$0xff]   ;;  %v25019_v56 = vld [vmem:[#allocation11 + $0x7a0] ss:$16 sps:$4 sm:$0xff]  }
 0xc69   : > { %18467 = vmatprep.subr.bf16.mxu1 %v24940_v14  ;;  %v25022_v14 = vld [vmem:[#allocation11 + $0x7a8] ss:$16 sps:$4 sm:$0xff]  }
 0xc6b   : > { %18304 = vmatpush1.bf16.msra.mxu0 %v24935_v15  ;;  %v25027_v15 = vld [vmem:[#allocation11 + $0x7c4] ss:$16 sps:$4 sm:$0xff]  }
 0xc6c   : > { %18468 = vmatpush1.bf16.msra.mxu1 %v24938_v19  ;;  %18314 = vmatprep.subr.bf16.mxu0 %v24943_v53  ;;  %v25030_v19 = vld [vmem:[#allocation11 + $0x7cc] ss:$16 sps:$4 sm:$0xff]   ;;  %v25025_v53 = vld [vmem:[#allocation11 + $0x7c0] ss:$16 sps:$4 sm:$0xff]  }
 0xc6d   : > { %18478 = vmatprep.subr.bf16.mxu1 %v24946_v5  ;;  %v25028_v5 = vld [vmem:[#allocation11 + $0x7c8] ss:$16 sps:$4 sm:$0xff]  }
 0xc6e   : > { %18306 = vmatmul.mubr.bf16.vlgmr.msra.gmra.mrb[200].mxu0 %v31267_v7 }
 0xc6f   : > { %18470 = vmatmul.mubr.bf16.vlgmr.msra.gmra.mrb[72].mxu1 %v31267_v7  ;;  %18315 = vmatpush1.bf16.msra.mxu0 %v24941_v35  ;;  %v25033_v35 = vld [vmem:[#allocation11 + $0x7e4] ss:$16 sps:$4 sm:$0xff]  }
 0xc70   : > { %18346 = vmatprep.mubr.bf16.mxu0 %v16630_v12  ;;  %18479 = vmatpush1.bf16.msra.mxu1 %v24944_v6  ;;  %v25036_v6 = vld [vmem:[#allocation11 + $0x7ec] ss:$16 sps:$4 sm:$0xff]  }
 0xc71   : > { %18510 = vmatprep.mubr.bf16.mxu1 %v16630_v12  ;;  %18316 = vmatprep.subr.bf16.mxu0 %v24949_v18  ;;  %v25031_v18 = vld [vmem:[#allocation11 + $0x7e0] ss:$16 sps:$4 sm:$0xff]   ;;  %v25034_v12 = vld [vmem:[#allocation11 + $0x7e8] ss:$16 sps:$4 sm:$0xff]  }
 0xc72   : > { %18480 = vmatprep.subr.bf16.mxu1 %v24952_v43  ;;  %v25037_v43 = vld [vmem:[%s31436_s11 + $0x40] sm:$0xff]  }
 0xc73   : > { %18317 = vmatpush1.bf16.msra.mxu0 %v24947_v42  ;;  %v25038_v42 = vld [vmem:[%s31436_s11 + $0xc0] sm:$0xff]  }
 0xc74   : > { %18481 = vmatpush1.bf16.msra.mxu1 %v24950_v52  ;;  %18318 = vmatprep.subr.bf16.mxu0 %v24955_v62  ;;  %v25039_v52 = vld [vmem:[%s31436_s11] sm:$0xff]   ;;  %v16629_v62 = vrot.slane %v31267_v7, 4  ;;  %v25043_v7 = vld [vmem:[%s31436_s11 + $0x8] sm:$0xff]  }
 0xc75   : > { %18482 = vmatprep.subr.bf16.mxu1 %v24958_v24  ;;  %v25040_v24 = vld [vmem:[%s31436_s11 + $0x80] sm:$0xff]  }
 0xc77   : > { %18319 = vmatpush1.bf16.msra.mxu0 %v24953_v0  ;;  %v25041_v0 = vld [vmem:[%s31436_s11 + $0x48] sm:$0xff]  }
 0xc78   : > { %18483 = vmatpush1.bf16.msra.mxu1 %v24956_v17  ;;  %18320 = vmatprep.subr.bf16.mxu0 %v24961_v47  ;;  %v25042_v17 = vld [vmem:[%s31436_s11 + $0xc8] sm:$0xff]  }
 0xc79   : > { %18484 = vmatprep.subr.bf16.mxu1 %v24964_v20  ;;  %v25044_v47 = vld [vmem:[%s31436_s11 + $0x88] sm:$0xff]   ;;  %v25045_v20 = vld [vmem:[%s31436_s11 + $0x50] sm:$0xff]  }
 0xc7b   : > { %18321 = vmatpush1.bf16.msra.mxu0 %v24959_v37  ;;  %v25046_v37 = vld [vmem:[%s31436_s11 + $0xd0] sm:$0xff]  }
 0xc7c   : > { %18485 = vmatpush1.bf16.msra.mxu1 %v24962_v63  ;;  %18322 = vmatprep.subr.bf16.mxu0 %v24967_v46  ;;  %v25047_v63 = vld [vmem:[%s31436_s11 + $0x10] sm:$0xff]  }
 0xc7d   : > { %18486 = vmatprep.subr.bf16.mxu1 %v24970_v16  ;;  %v25048_v46 = vld [vmem:[%s31436_s11 + $0x90] sm:$0xff]   ;;  %v25049_v16 = vld [vmem:[%s31436_s11 + $0x58] sm:$0xff]  }
 0xc7f   : > { %18323 = vmatpush1.bf16.msra.mxu0 %v24965_v49  ;;  %v25050_v49 = vld [vmem:[%s31436_s11 + $0xd8] sm:$0xff]  }
 0xc80   : > { %18487 = vmatpush1.bf16.msra.mxu1 %v24968_v33  ;;  %18324 = vmatprep.subr.bf16.mxu0 %v24973_v30  ;;  %v25051_v33 = vld [vmem:[%s31436_s11 + $0x18] sm:$0xff]  }
 0xc81   : > { %18488 = vmatprep.subr.bf16.mxu1 %v24976_v9  ;;  %v25052_v30 = vld [vmem:[%s31436_s11 + $0x98] sm:$0xff]   ;;  %v25053_v9 = vld [vmem:[%s31436_s11 + $0x60] sm:$0xff]  }
 0xc83   : > { %18325 = vmatpush1.bf16.msra.mxu0 %v24971_v39  ;;  %v25054_v39 = vld [vmem:[%s31436_s11 + $0xe0] sm:$0xff]  }
 0xc84   : > { %18489 = vmatpush1.bf16.msra.mxu1 %v24974_v28  ;;  %18326 = vmatprep.subr.bf16.mxu0 %v24979_v1  ;;  %v25055_v28 = vld [vmem:[%s31436_s11 + $0x20] sm:$0xff]  }
 0xc85   : > { %18490 = vmatprep.subr.bf16.mxu1 %v24982_v54  ;;  %v25056_v1 = vld [vmem:[%s31436_s11 + $0xa0] sm:$0xff]   ;;  %v25057_v54 = vld [vmem:[%s31436_s11 + $0x68] sm:$0xff]  }
 0xc87   : > { %18327 = vmatpush1.bf16.msra.mxu0 %v24977_v31  ;;  %v25058_v31 = vld [vmem:[%s31436_s11 + $0xe8] sm:$0xff]  }
 0xc88   : > { %18491 = vmatpush1.bf16.msra.mxu1 %v24980_v22  ;;  %18328 = vmatprep.subr.bf16.mxu0 %v24985_v60  ;;  %v25059_v22 = vld [vmem:[%s31436_s11 + $0x28] sm:$0xff]  }
 0xc89   : > { %18492 = vmatprep.subr.bf16.mxu1 %v24988_v23  ;;  %v25060_v60 = vld [vmem:[%s31436_s11 + $0xa8] sm:$0xff]   ;;  %v25061_v23 = vld [vmem:[%s31436_s11 + $0x70] sm:$0xff]  }
 0xc8b   : > { %18329 = vmatpush1.bf16.msra.mxu0 %v24983_v21  ;;  %v25062_v21 = vld [vmem:[%s31436_s11 + $0xf0] sm:$0xff]  }
 0xc8c   : > { %18493 = vmatpush1.bf16.msra.mxu1 %v24986_v57  ;;  %18330 = vmatprep.subr.bf16.mxu0 %v24991_v48  ;;  %v25063_v57 = vld [vmem:[%s31436_s11 + $0x30] sm:$0xff]  }
 0xc8d   : > { %18494 = vmatprep.subr.bf16.mxu1 %v24994_v13  ;;  %v25064_v48 = vld [vmem:[%s31436_s11 + $0xb0] sm:$0xff]   ;;  %v25065_v13 = vld [vmem:[%s31436_s11 + $0x78] sm:$0xff]  }
 0xc8f   : > { %18331 = vmatpush1.bf16.msra.mxu0 %v24989_v55  ;;  %v25066_v55 = vld [vmem:[%s31436_s11 + $0xf8] sm:$0xff]  }
 0xc90   : > { %18495 = vmatpush1.bf16.msra.mxu1 %v24992_v4  ;;  %18332 = vmatprep.subr.bf16.mxu0 %v24997_v40  ;;  %v25067_v4 = vld [vmem:[%s31436_s11 + $0x38] sm:$0xff]  }
 0xc91   : > { %18496 = vmatprep.subr.bf16.mxu1 %v25000_v41  ;;  %v25068_v40 = vld [vmem:[%s31436_s11 + $0xb8] sm:$0xff]   ;;  %v16889_v41 = vld [vmem:[#allocation13] sm:$0xf] }
 0xc93   : > { %18333 = vmatpush1.bf16.msra.mxu0 %v24995_v3  ;;  %v16894_v3 = vrot.slane %v16889_v41, %v31816_v51 }
 0xc94   : > { %18497 = vmatpush1.bf16.msra.mxu1 %v24998_v10  ;;  %18334 = vmatprep.subr.bf16.mxu0 %v25003_v34  ;;  %v16902_v10 = vrot.slane %v16889_v41, %v31817_v59  ;;  %v16898_v34 = vrot.slane %v16889_v41, %v31818_v38 }
 0xc95   : > { %18498 = vmatprep.subr.bf16.mxu1 %v25006_v61  ;;  %v16906_v61 = vrot.slane %v16889_v41, %v31819_v58 }
 0xc97   : > { %18335 = vmatpush1.bf16.msra.mxu0 %v25001_v36 }
 0xc98   : > { %18499 = vmatpush1.bf16.msra.mxu1 %v25004_v2  ;;  %18336 = vmatprep.subr.bf16.mxu0 %v25009_v44 }
 0xc99   : > { %18500 = vmatprep.subr.bf16.mxu1 %v25012_v26 }
 0xc9b   : > { %18337 = vmatpush1.bf16.msra.mxu0 %v25007_v29 }
 0xc9c   : > { %18501 = vmatpush1.bf16.msra.mxu1 %v25010_v50  ;;  %18338 = vmatprep.subr.bf16.mxu0 %v25015_v32 }
 0xc9d   : > { %18502 = vmatprep.subr.bf16.mxu1 %v25018_v25 }
 0xc9f   : > { %18339 = vmatpush1.bf16.msra.mxu0 %v25013_v11 }
 0xca0   : > { %18503 = vmatpush1.bf16.msra.mxu1 %v25016_v8  ;;  %18340 = vmatprep.subr.bf16.mxu0 %v25021_v27 }
 0xca1   : > { %18504 = vmatprep.subr.bf16.mxu1 %v25024_v45 }
 0xca3   : > { %18341 = vmatpush1.bf16.msra.mxu0 %v25019_v56 }
 0xca4   : > { %18505 = vmatpush1.bf16.msra.mxu1 %v25022_v14  ;;  %18342 = vmatprep.subr.bf16.mxu0 %v25027_v15 }
 0xca5   : > { %18506 = vmatprep.subr.bf16.mxu1 %v25030_v19 }
 0xca7   : > { %18343 = vmatpush1.bf16.msra.mxu0 %v25025_v53 }
 0xca8   : > { %18507 = vmatpush1.bf16.msra.mxu1 %v25028_v5  ;;  %18344 = vmatprep.subr.bf16.mxu0 %v25033_v35  ;;  %v21158_v35 = vld [vmem:[#allocation14] ss:$0 sm:$0xff] }
 0xca9   : > { %18508 = vmatprep.subr.bf16.mxu1 %v25036_v6 }
 0xcab   : > { %18345 = vmatpush1.bf16.msra.mxu0 %v25031_v18 }
 0xcac   : > { %18509 = vmatpush1.bf16.msra.mxu1 %v25034_v12  ;;  %21623 = vmatprep.subr.bf16.mxu0 %v25037_v43 }
 0xcad   : > { %21645 = vmatprep.subr.bf16.mxu1 %v25038_v42 }
 0xcae   : > { %18347 = vmatmul.mubr.bf16.vlgmr.msra.gmra.mrb[200].mxu0 %v16629_v62 }
 0xcaf   : > { %18511 = vmatmul.mubr.bf16.vlgmr.msra.gmra.mrb[72].mxu1 %v16629_v62  ;;  %21624 = vmatpush3.bf16.msra.mxu0 %v25039_v52 }
 0xcb0   : > { %21646 = vmatpush3.bf16.msra.mxu1 %v25040_v24  ;;  %21625 = vmatprep.subr.bf16.mxu0 %v25041_v0 }
 0xcb1   : > { %21647 = vmatprep.subr.bf16.mxu1 %v25042_v17 }
 0xcb3   : > { %21626 = vmatpush3.bf16.msra.mxu0 %v25043_v7 }
 0xcb4   : > { %21648 = vmatpush3.bf16.msra.mxu1 %v25044_v47  ;;  %21627 = vmatprep.subr.bf16.mxu0 %v25045_v20 }
 0xcb5   : > { %21649 = vmatprep.subr.bf16.mxu1 %v25046_v37 }
 0xcb7   : > { %21628 = vmatpush3.bf16.msra.mxu0 %v25047_v63 }
 0xcb8   : > { %21650 = vmatpush3.bf16.msra.mxu1 %v25048_v46  ;;  %21629 = vmatprep.subr.bf16.mxu0 %v25049_v16 }
 0xcb9   : > { %21651 = vmatprep.subr.bf16.mxu1 %v25050_v49 }
 0xcbb   : > { %21630 = vmatpush3.bf16.msra.mxu0 %v25051_v33 }
 0xcbc   : > { %21652 = vmatpush3.bf16.msra.mxu1 %v25052_v30  ;;  %21631 = vmatprep.subr.bf16.mxu0 %v25053_v9 }
 0xcbd   : > { %21653 = vmatprep.subr.bf16.mxu1 %v25054_v39 }
 0xcbf   : > { %21632 = vmatpush3.bf16.msra.mxu0 %v25055_v28 }
 0xcc0   : > { %21654 = vmatpush3.bf16.msra.mxu1 %v25056_v1  ;;  %21633 = vmatprep.subr.bf16.mxu0 %v25057_v54 }
 0xcc1   : > { %21655 = vmatprep.subr.bf16.mxu1 %v25058_v31 }
 0xcc3   : > { %21634 = vmatpush3.bf16.msra.mxu0 %v25059_v22 }
 0xcc4   : > { %21656 = vmatpush3.bf16.msra.mxu1 %v25060_v60  ;;  %21635 = vmatprep.subr.bf16.mxu0 %v25061_v23 }
 0xcc5   : > { %21657 = vmatprep.subr.bf16.mxu1 %v25062_v21 }
 0xcc7   : > { %21636 = vmatpush3.bf16.msra.mxu0 %v25063_v57 }
 0xcc8   : > { %21658 = vmatpush3.bf16.msra.mxu1 %v25064_v48  ;;  %21637 = vmatprep.subr.bf16.mxu0 %v25065_v13 }
 0xcc9   : > { %21659 = vmatprep.subr.bf16.mxu1 %v25066_v55 }
 0xccb   : > { %21638 = vmatpush3.bf16.msra.mxu0 %v25067_v4 }
 0xccc   : > { %21660 = vmatpush3.bf16.msra.mxu1 %v25068_v40 }
 0xd81   : > { %v18348_v36 = vpop.f32.mrb[200].mxu0 }
 0xd82   : > { %v22063_v2 = vadd.f32 %v18348_v36, %v16894_v3  ;;  %v18512_v44 = vpop.f32.mrb[72].mxu1  ;;  %v18350_v26 = vpop.f32.mrb[201].mxu0 }
 0xd83   : > { %v22065_v29 = vadd.f32 %v18512_v44, %v16902_v10  ;;  %v22064_v50 = vadd.f32 %v18350_v26, %v16898_v34  ;;  %v18514_v32 = vpop.f32.mrb[73].mxu1  ;;  %v18352_v25 = vpop.f32.mrb[202].mxu0 }
 0xd84   : > { %v18519_v11 = vmax.f32 %v22063_v2, 0.0  ;;  %v22066_v8 = vadd.f32 %v18514_v32, %v16906_v61  ;;  %v18516_v27 = vpop.f32.mrb[74].mxu1  ;;  %v18353_v45 = vpop.f32.mrb[203].mxu0 }
 0xd85   : > { %v18521_v56 = vmax.f32 %v22065_v29, 0.0  ;;  %v18520_v51 = vmax.f32 %v22064_v50, 0.0  ;;  %v18517_v14 = vpop.f32.mrb[75].mxu1 }
 0xd86   : > { %v18522_v59 = vmax.f32 %v22066_v8, 0.0  ;;  %v18523_v38 = vpack.c.bf16 %v18519_v11, %v18519_v11 }
 0xd87   : > { %v18524_v15 = vpack.c.bf16 %v18520_v51, %v18520_v51  ;;  %v18525_v58 = vpack.c.bf16 %v18521_v56, %v18521_v56 }
 0xd88   : > { %v18526_v19 = vpack.c.bf16 %v18522_v59, %v18522_v59 }
 0xd89   : > { %18822 = vmatprep.mubr.bf16.mxu0 %v18524_v15 }
 0xd8a   : > { %18862 = vmatprep.mubr.bf16.mxu1 %v18526_v19  ;;  %18823 = vmatmul.mubr.bf16.vlgmr.msra.gmra.mrb[204].mxu0 %v18523_v38 }
 0xd8b   : > { %18863 = vmatmul.mubr.bf16.vlgmr.msra.gmra.mrb[76].mxu1 %v18525_v58 }
 0xe5d   : > { %v21639_v53 = vpop.f32.mrb[204].mxu0 }
 0xe5e   : > { %v21661_v5 = vpop.f32.mrb[76].mxu1  ;;  %v21640_v6 = vpop.f32.mrb[205].mxu0 }
 0xe5f   : > { %v21641_v18 = vadd.f32 %v21640_v6, %v21639_v53  ;;  %v21662_v12 = vpop.f32.mrb[77].mxu1  ;;  %v21642_v43 = vpop.f32.mrb[206].mxu0 }
 0xe60   : > { %v21663_v42 = vadd.f32 %v21662_v12, %v21661_v5  ;;  %v21664_v52 = vpop.f32.mrb[78].mxu1  ;;  %v21643_v62 = vpop.f32.mrb[207].mxu0 }
 0xe61   : > { %v18825_v24 = vadd.f32 %v21641_v18, %v21158_v35  ;;  %v21665_v0 = vpop.f32.mrb[79].mxu1 }
 0xe63   : > { %v18865_v17 = vadd.f32 %v21663_v42, %v18825_v24 }
 0xe65   : > { %18870 = vmax.xlane.f32.xlu0 %v18865_v17 }
 0xef2   : > { %v18871_v7 = vpop.xlane.xlu0 %18870 }
 0xef3   : > { %v18872_v47 = vsub.f32 %v18865_v17, %v18871_v7 }
 0xef5   : > { %v18873_v20 = vmul.f32 1.442695, %v18872_v47 }
 0xef7   : > { %25069 = vpow2.f32 %v18873_v20 }
 0xf01   : > { %v25070_v37 = vpop.eup %25069 }
 0xf02   : > { %18875 = vadd.xlane.f32.xlu0 %v25070_v37 }
 0xf8f   : > { %v18876_v63 = vpop.xlane.xlu0 %18875 }
 0xf90   : > { %25071 = vlog2.f32 %v18876_v63 }
 0xf9a   : > { %v25072_v46 = vpop.eup %25071 }
 0xf9b   : > { %v18878_v16 = vmul.f32 0.6931472, %v25072_v46 }
 0xf9d   : > { %v18879_v49 = vsub.f32 %v18872_v47, %v18878_v16 }
 0xf9f   : > { %18880 = vst [vmem:[%s563_s6] sm:$0xff] %v18879_v49 }
 0xfa0   : > { %25406 = shalt.err (!%p25403_p9)
}
 0xfa1   : > { %s25407_s28 = scalar_lea.hbm %s31383_s25, 128  ;;  %s25411_s23 = scalar_lea.hbm %s31820_s3, 256 }
 0xfa2   : > { %p25408_p12 = scmp.ne.s32.totalorder %s31383_s25, %s25407_s28  ;;  %p25412_p3 = scmp.lt.u32.totalorder %s31383_s25, %s31820_s3 }
 0xfa3   : > { %p25413_p4 = scmp.lt.u32.totalorder %s25411_s23, %s25407_s28  ;;  %p25415_p8 = scmp.lt.u32.totalorder %s25407_s28, %s31383_s25 }
 0xfa4   : > { %p25409_p10 = pnand %p25408_p12, %p31821_p11 }
 0xfa5   : > { %p25414_p7 = por %p25413_p4, %p25412_p3 }
 0xfa6   : > { %p25410_p2 = pneg %p25409_p10 }
 0xfa7   : > { %p25416_p13 = por %p25415_p8, %p25414_p7 }
 0xfa9   : > { %p25417_p0 = pnand %p25416_p13, %p25410_p2 }
 0xfab   : > { %25420 = shalt.err (!%p25417_p0)
}
 0xfac   : > { %23260 = dma.vmem_to_hbm [thread:$0]  (%p31821_p11), %s31385_s21, 128, %s31383_s25, %s18882_s19  }
 0xfad PF: > { %s31822_s14 = sld [smem:[#allocation25_spill]]  ;;  %s31823_s6 = sld [smem:[#allocation23_spill]] }
 0xfae   : > { %s31824_s22 = sld [smem:[#allocation28_spill]] }
 0xfb3   : > { %p23307_p1 = scmp.ge.s32.totalorder %s31822_s14, 2  ;;  %s18907_s16 = sand.u32 1, %s31823_s6  }
 0xfb4   : > { %p31825_p6 = scmp.ne.s32.totalorder %s31824_s22, 0  ;;  %s18908_s17 = scalar_lea.sflag [#allocation4], %s18907_s16 }
 0xfb6   : > { %p23288_p5 = pnand %p23307_p1, %p31825_p6 }
 0xfb8   : > { %25458 = dma.done.wait (!%p23288_p5), %s18908_s17, 128  }
 0xfb9   : > { %25460 = vsyncadd (!%p23288_p5), %s18908_s17, 4294967168  ;;  %s31826_s28 = sld [smem:[#allocation26_spill]]  ;;  %s31827_s29 = sld [smem:[#allocation24_spill]] }
 0xfba   : > { %s31828_s27 = sld [smem:[#allocation27_spill]]  ;;  %s31829_s25 = smov %s25467_s26 }
 0xfbf   : > { %p28_p9 = scmp.ge.s32.totalorder %s31826_s28, 4   ;;  %s31830_s26 = smov %s31827_s29 }
 0xfc1   :  { %30 = sbr.rel (!%p28_p9) target bundleno = 12 (0xc), region = 146 }
 0xfc8   :  { %18913 = vsyncpa [#allocation3], 1 }
 0xfc9   :  { %18915 = vsyncpa [#allocation3 + $0x1], 1 }
 0xfca   :  { %18916 = vsyncpa [#allocation6], 1 }
 0xfcb   :  { %18917 = vsyncpa [#allocation9], 1 }
 0xfcc   :  { %18918 = vsyncpa [#allocation12], 1 }
 0xfcd   :  { %18919 = vsyncpa [#allocation15], 1 }
 0xfce   :  { %18920 = vsyncpa [#allocation4], 1 }
 0xfcf   :  { %18922 = vsyncpa [#allocation4 + $0x1], 1 }

</bundles_post_ra>
